<compile_context>
chip_gen: v5e
topology: v5e:2x2
jax: 0.10.0
libtpu: 0.0.40
codegen_flags: <defaults>
</compile_context>

<pallas_src>
import functools

import jax
import jax.numpy as jnp
import numpy as np
from jax import lax
from jax.experimental import pallas as pl
from jax.experimental.pallas import tpu as pltpu

# ----------------------- model configuration (scaled down) -------------------
IN_C = (64, 64, 32, 32, 16, 8)
OUT_C = (32, 16, 16, 8, 4, 4)
GROUP_C = (8, 4, 4, 2, 2, 2)
OUT_CHANNEL = 3
GN_EPS = 1e-5


# ------------------------------- Pallas kernels ------------------------------
def _stage_kernel(x_ref, band_ref, b_ref, g_ref, be_ref, m_ref, o_ref, *,
                  H, n_per_group, eps):
    """Fused 3x3 conv (zero pad 1) + GroupNorm + ReLU for one batch element.

    x_ref:    (H+2, (W+2)*Cin)   zero-padded NHWC activation rows (f32)
    band_ref: (3, (W+2)*Cin, W*Cout)  banded conv weights, one per kernel row (bf16)
    b_ref:    (1, W*Cout)        conv bias tiled along lanes (b[l % Cout])
    g_ref:    (1, W*Cout)        GN gamma tiled along lanes
    be_ref:   (1, W*Cout)        GN beta tiled along lanes
    m_ref:    (G, W*Cout)        0/1 group membership of each lane
    o_ref:    (H, W*Cout)        output rows, NHWC flattened over (W, Cout)
    """
    acc = jnp.zeros(o_ref.shape, jnp.float32)
    for kh in range(3):
        slab = x_ref[kh:kh + H, :].astype(jnp.bfloat16)      # bf16 MXU operands
        acc = acc + jnp.dot(slab, band_ref[kh],
                            preferred_element_type=jnp.float32)
    y = acc + b_ref[...]

    # GroupNorm statistics on the VPU/XLU (no tiny MXU matmuls), f32 throughout.
    m = m_ref[...]                                           # (G, W*Cout)
    s1 = jnp.sum(y, axis=0, keepdims=True)                   # (1, W*Cout)
    s2 = jnp.sum(y * y, axis=0, keepdims=True)
    gs1 = jnp.sum(m * s1, axis=1, keepdims=True)             # (G, 1)
    gs2 = jnp.sum(m * s2, axis=1, keepdims=True)
    mean_g = gs1 / n_per_group
    var_g = gs2 / n_per_group - mean_g * mean_g              # biased (PyTorch GN)
    inv_g = lax.rsqrt(var_g + eps)
    mean_l = jnp.sum(m * mean_g, axis=0, keepdims=True)      # (1, W*Cout)
    inv_l = jnp.sum(m * inv_g, axis=0, keepdims=True)

    yn = (y - mean_l) * inv_l * g_ref[...] + be_ref[...]
    o_ref[...] = jnp.maximum(yn, 0.0)


def _final_kernel(x_ref, band_ref, b_ref, o_ref, *, H):
    """ReplicationPad2d(1) + 3x3 conv for one batch element (f32 operands).

    x_ref:    (H+2, (W+2)*Cin)  edge-padded NHWC activation rows
    band_ref: (3, (W+2)*Cin, W*Cout)
    b_ref:    (1, W*Cout)
    o_ref:    (H, W*Cout)
    """
    acc = jnp.zeros(o_ref.shape, jnp.float32)
    for kh in range(3):
        acc = acc + jnp.dot(x_ref[kh:kh + H, :], band_ref[kh],
                            preferred_element_type=jnp.float32)
    o_ref[...] = acc + b_ref[...]


# ---------------------- one-time weight repacking (no jit) -------------------
def _band_weights(w, width, dtype):
    """(Cout, Cin, 3, 3) -> (3, (W+2)*Cin, W*Cout) banded matmul weights.

    band[kh, q*Cin + c, j*Cout + o] = w[o, c, kh, q - j] if 0 <= q - j <= 2
    so that (padded NHWC rows) @ band[kh] applies kernel-row kh of the conv.
    """
    cout, cin = int(w.shape[0]), int(w.shape[1])
    diff = np.arange(width + 2)[:, None] - np.arange(width)[None, :]  # (W+2, W)
    wk = jnp.transpose(w, (2, 3, 1, 0))                      # [kh, kw, Cin, Cout]
    bands = []
    for kh in range(3):
        acc = jnp.zeros((width + 2, cin, width, cout), jnp.float32)
        for kw in range(3):
            sel = jnp.asarray((diff == kw).astype(np.float32))
            acc = acc + sel[:, None, :, None] * wk[kh, kw][None, :, None, :]
        bands.append(acc.reshape((width + 2) * cin, width * cout))
    return jnp.stack(bands, axis=0).astype(dtype)


def _tile_lanes(v, width):
    return jnp.tile(v.astype(jnp.float32), width).reshape(1, width * v.shape[0])


def prepare_params(params, x6_hw):
    """Repack PyTorch-style weights for the kernels (call once, outside jit)."""
    _, w0 = x6_hw
    prep = {}
    for i in range(6):
        p = params[f"dconv{i + 1}"]
        cout = int(p["w"].shape[0])
        g = GROUP_C[i]
        cg = cout // g
        width = w0 * (2 ** i)
        ch_of_lane = np.arange(width * cout) % cout
        gmask = (ch_of_lane[None, :] // cg == np.arange(g)[:, None])
        prep[f"dconv{i + 1}"] = {
            "band": _band_weights(p["w"], width, jnp.bfloat16),
            "bias": _tile_lanes(p["b"], width),
            "gamma": _tile_lanes(p["gamma"], width),
            "beta": _tile_lanes(p["beta"], width),
            "gmask": jnp.asarray(gmask.astype(np.float32)),
        }
    pf = params["final"]
    width = w0 * (2 ** 5)
    prep["final"] = {
        "band": _band_weights(pf["w"], width, jnp.float32),
        "bias": _tile_lanes(pf["b"], width),
    }
    return prep


# ------------------------------ pallas_call wrappers --------------------------
def _stage_call(x_nhwc, sp, num_groups):
    """conv3x3(pad=1) + GroupNorm + ReLU.  (B, H, W, Cin) -> (B, H, W, Cout)."""
    B, H, W, Cin = x_nhwc.shape
    band = sp["band"]
    WC = band.shape[2]
    Cout = WC // W
    Cg = Cout // num_groups
    xpad = jnp.pad(x_nhwc, ((0, 0), (1, 1), (1, 1), (0, 0)))
    x2d = xpad.reshape(B, H + 2, (W + 2) * Cin)
    kernel = functools.partial(_stage_kernel, H=H,
                               n_per_group=float(H * W * Cg), eps=GN_EPS)
    out = pl.pallas_call(
        kernel,
        out_shape=jax.ShapeDtypeStruct((B, H, WC), jnp.float32),
        grid=(B,),
        in_specs=[
            pl.BlockSpec((None, H + 2, (W + 2) * Cin), lambda b: (b, 0, 0)),
            pl.BlockSpec(band.shape, lambda b: (0, 0, 0)),
            pl.BlockSpec((1, WC), lambda b: (0, 0)),
            pl.BlockSpec((1, WC), lambda b: (0, 0)),
            pl.BlockSpec((1, WC), lambda b: (0, 0)),
            pl.BlockSpec((num_groups, WC), lambda b: (0, 0)),
        ],
        out_specs=pl.BlockSpec((None, H, WC), lambda b: (b, 0, 0)),
        compiler_params=pltpu.CompilerParams(
            dimension_semantics=("parallel",)),
    )(x2d, band, sp["bias"], sp["gamma"], sp["beta"], sp["gmask"])
    return out.reshape(B, H, W, Cout)


def _final_call(x_nhwc, fp):
    """ReplicationPad2d(1) + conv3x3.  (B, H, W, Cin) -> (B, H, W, Cout)."""
    B, H, W, Cin = x_nhwc.shape
    band = fp["band"]
    WC = band.shape[2]
    Cout = WC // W
    xpad = jnp.pad(x_nhwc, ((0, 0), (1, 1), (1, 1), (0, 0)), mode="edge")
    x2d = xpad.reshape(B, H + 2, (W + 2) * Cin)
    out = pl.pallas_call(
        functools.partial(_final_kernel, H=H),
        out_shape=jax.ShapeDtypeStruct((B, H, WC), jnp.float32),
        grid=(B,),
        in_specs=[
            pl.BlockSpec((None, H + 2, (W + 2) * Cin), lambda b: (b, 0, 0)),
            pl.BlockSpec(band.shape, lambda b: (0, 0, 0)),
            pl.BlockSpec((1, WC), lambda b: (0, 0)),
        ],
        out_specs=pl.BlockSpec((None, H, WC), lambda b: (b, 0, 0)),
        compiler_params=pltpu.CompilerParams(
            dimension_semantics=("parallel",)),
    )(x2d, band, fp["bias"])
    return out.reshape(B, H, W, Cout)


# --------------------------------- XLA glue -----------------------------------
def upsample2x_bilinear_nhwc(x):
    """F.interpolate(scale_factor=2, mode='bilinear', align_corners=False), NHWC.

    Gather-free 0.75/0.25 stencil (edge-clamped)."""
    B, H, W, C = x.shape
    up = 0.75 * x + 0.25 * jnp.concatenate([x[:, :1], x[:, :-1]], axis=1)
    dn = 0.75 * x + 0.25 * jnp.concatenate([x[:, 1:], x[:, -1:]], axis=1)
    x = jnp.stack([up, dn], axis=2).reshape(B, 2 * H, W, C)
    lf = 0.75 * x + 0.25 * jnp.concatenate([x[:, :, :1], x[:, :, :-1]], axis=2)
    rt = 0.75 * x + 0.25 * jnp.concatenate([x[:, :, 1:], x[:, :, -1:]], axis=2)
    return jnp.stack([lf, rt], axis=3).reshape(B, 2 * H, 2 * W, C)


def decoder_forward_pallas(prep, im, x1, x2, x3, x4, x5, x6):
    """decoder0_guide forward (no guide / no PPM / mode=-1) using Pallas kernels."""
    del im  # only used for an optional resize that never triggers at these shapes
    nhwc = lambda t: jnp.transpose(t, (0, 2, 3, 1))
    skips = (nhwc(x5), nhwc(x4), nhwc(x3), nhwc(x2), nhwc(x1))
    cur = nhwc(x6)
    for i in range(5):
        d = _stage_call(cur, prep[f"dconv{i + 1}"], GROUP_C[i])
        # TODO(synk): interpolate_x_to_y resize of d to the skip size -- spatial
        # sizes always match in this configuration.
        cur = upsample2x_bilinear_nhwc(jnp.concatenate([d, skips[i]], axis=-1))
    d6 = _stage_call(cur, prep["dconv6"], GROUP_C[5])
    out = _final_call(d6, prep["final"])
    # mode == -1 (default): identity output.
    return jnp.transpose(out, (0, 3, 1, 2))


# --------------------------- pure-JAX reference path --------------------------
def _ref_conv3x3(x, w, b, pad_mode="zero", operand_dtype=jnp.float32):
    if pad_mode == "edge":
        x = jnp.pad(x, ((0, 0), (0, 0), (1, 1), (1, 1)), mode="edge")
        pad = "VALID"
    else:
        pad = ((1, 1), (1, 1))
    y = lax.conv_general_dilated(
        x.astype(operand_dtype), w.astype(operand_dtype), (1, 1), pad,
        dimension_numbers=("NCHW", "OIHW", "NCHW"),
        preferred_element_type=jnp.float32)
    return y + b[None, :, None, None]


def _ref_gn_relu(x, gamma, beta, groups, eps=GN_EPS):
    B, C, H, W = x.shape
    xg = x.reshape(B, groups, C // groups, H, W)
    mean = xg.mean(axis=(2, 3, 4), keepdims=True)
    var = xg.var(axis=(2, 3, 4), keepdims=True)
    xn = ((xg - mean) / jnp.sqrt(var + eps)).reshape(B, C, H, W)
    return jax.nn.relu(xn * gamma[None, :, None, None] + beta[None, :, None, None])


def bilinear_resize(x, oh, ow):
    """Matches F.interpolate(..., mode='bilinear', align_corners=False)."""
    B, C, H, W = x.shape
    if (oh, ow) == (H, W):
        return x

    def coords(o, n):
        src = (jnp.arange(o, dtype=jnp.float32) + 0.5) * (n / o) - 0.5
        src = jnp.maximum(src, 0.0)
        i0 = jnp.minimum(jnp.floor(src).astype(jnp.int32), n - 1)
        i1 = jnp.minimum(i0 + 1, n - 1)
        return i0, i1, src - i0.astype(jnp.float32)

    y0, y1, fy = coords(oh, H)
    c0, c1, fx = coords(ow, W)
    fy_ = fy[None, None, :, None]
    rows = x[:, :, y0, :] * (1.0 - fy_) + x[:, :, y1, :] * fy_
    fx_ = fx[None, None, None, :]
    return rows[:, :, :, c0] * (1.0 - fx_) + rows[:, :, :, c1] * fx_


def decoder_forward_ref(params, im, x1, x2, x3, x4, x5, x6,
                        conv_dtype=jnp.float32):
    def stage(x, name, g):
        p = params[name]
        return _ref_gn_relu(_ref_conv3x3(x, p["w"], p["b"],
                                         operand_dtype=conv_dtype),
                            p["gamma"], p["beta"], g)

    def maybe_resize(x, ref_t):
        return bilinear_resize(x, ref_t.shape[2], ref_t.shape[3])

    def up2(x):
        return bilinear_resize(x, 2 * x.shape[2], 2 * x.shape[3])

    dx1 = stage(x6, "dconv1", GROUP_C[0])
    xin1 = up2(jnp.concatenate([dx1, x5], axis=1))
    dx2 = maybe_resize(stage(xin1, "dconv2", GROUP_C[1]), x4)
    xin2 = up2(jnp.concatenate([dx2, x4], axis=1))
    dx3 = maybe_resize(stage(xin2, "dconv3", GROUP_C[2]), x3)
    xin3 = up2(jnp.concatenate([dx3, x3], axis=1))
    dx4 = maybe_resize(stage(xin3, "dconv4", GROUP_C[3]), x2)
    xin4 = up2(jnp.concatenate([dx4, x2], axis=1))
    dx5 = maybe_resize(stage(xin4, "dconv5", GROUP_C[4]), x1)
    xin5 = up2(jnp.concatenate([dx5, x1], axis=1))
    dx6 = maybe_resize(stage(xin5, "dconv6", GROUP_C[5]), im)
    pf = params["final"]
    return _ref_conv3x3(dx6, pf["w"], pf["b"], pad_mode="edge")


# ------------------------------- params / inputs ------------------------------
def init_params(key):
    params = {}
    keys = jax.random.split(key, 7)
    for i in range(6):
        kk = jax.random.split(keys[i], 4)
        cin, cout = IN_C[i], OUT_C[i]
        params[f"dconv{i + 1}"] = {
            "w": 0.05 * jax.random.normal(kk[0], (cout, cin, 3, 3), jnp.float32),
            "b": 0.05 * jax.random.normal(kk[1], (cout,), jnp.float32),
            "gamma": 1.0 + 0.05 * jax.random.normal(kk[2], (cout,), jnp.float32),
            "beta": 0.05 * jax.random.normal(kk[3], (cout,), jnp.float32),
        }
    kk = jax.random.split(keys[6], 2)
    params["final"] = {
        "w": 0.05 * jax.random.normal(kk[0], (OUT_CHANNEL, OUT_C[5], 3, 3),
                                      jnp.float32),
        "b": 0.05 * jax.random.normal(kk[1], (OUT_CHANNEL,), jnp.float32),
    }
    return params


if __name__ == "__main__":
    key = jax.random.PRNGKey(0)
    kp, *ki = jax.random.split(key, 8)
    params = init_params(kp)

    B = 2
    # Skip channel counts derived from IN_C / OUT_C concat constraints.
    x6 = jax.random.normal(ki[0], (B, IN_C[0], 2, 2), jnp.float32)             # 64ch
    x5 = jax.random.normal(ki[1], (B, IN_C[1] - OUT_C[0], 2, 2), jnp.float32)   # 32ch
    x4 = jax.random.normal(ki[2], (B, IN_C[2] - OUT_C[1], 4, 4), jnp.float32)   # 16ch
    x3 = jax.random.normal(ki[3], (B, IN_C[3] - OUT_C[2], 8, 8), jnp.float32)   # 16ch
    x2 = jax.random.normal(ki[4], (B, IN_C[4] - OUT_C[3], 16, 16), jnp.float32)  # 8ch
    x1 = jax.random.normal(ki[5], (B, IN_C[5] - OUT_C[4], 32, 32), jnp.float32)  # 4ch
    im = jax.random.normal(ki[6], (B, 3, 64, 64), jnp.float32)

    prep = prepare_params(params, (x6.shape[2], x6.shape[3]))
    fwd = jax.jit(decoder_forward_pallas)
    out = jax.block_until_ready(fwd(prep, im, x1, x2, x3, x4, x5, x6))
    assert out.shape == (B, OUT_CHANNEL, 64, 64), out.shape

    # Structural check vs. a reference with matched bf16 conv-operand rounding.
    ref_bf16 = decoder_forward_ref(params, im, x1, x2, x3, x4, x5, x6,
                                   conv_dtype=jnp.bfloat16)
    err_bf16 = float(jnp.max(jnp.abs(out - ref_bf16)))
    # Numerics check vs. the full-f32 (PyTorch-equivalent) reference.
    ref_f32 = decoder_forward_ref(params, im, x1, x2, x3, x4, x5, x6,
                                  conv_dtype=jnp.float32)
    err_f32 = float(jnp.max(jnp.abs(out - ref_f32)))
    assert err_bf16 < 1e-2, f"mismatch vs bf16-matched reference: {err_bf16}"
    assert err_f32 < 1e-1, f"mismatch vs f32 reference: {err_f32}"

    print("KERNEL_OK")
</pallas_src>

<mosaic_0001>
module attributes {stable_mosaic.version = 11 : i64} {
  func.func @_stage_kernel(%arg0: i32, %arg1: memref<1x4x256xf32, #tpu.memory_space<vmem>>, %arg2: memref<3x256x64xbf16, #tpu.memory_space<vmem>>, %arg3: memref<1x64xf32, #tpu.memory_space<vmem>>, %arg4: memref<1x64xf32, #tpu.memory_space<vmem>>, %arg5: memref<1x64xf32, #tpu.memory_space<vmem>>, %arg6: memref<8x64xf32, #tpu.memory_space<vmem>>, %arg7: memref<1x2x64xf32, #tpu.memory_space<vmem>>) attributes {dimension_semantics = [#tpu.dimension_semantics<parallel>], iteration_bounds = array<i64: 2>, scalar_prefetch = 0 : i64, scratch_operands = 0 : i64, tpu.core_type = #tpu.core_type<tc>, window_params = [{transform_indices = @transform_0, window_bounds = array<i64: 1, 4, 256>}, {pipeline_mode = #tpu.pipeline_mode<synchronous>, transform_indices = @transform_1, window_bounds = array<i64: 3, 256, 64>}, {pipeline_mode = #tpu.pipeline_mode<synchronous>, transform_indices = @transform_2, window_bounds = array<i64: 1, 64>}, {pipeline_mode = #tpu.pipeline_mode<synchronous>, transform_indices = @transform_3, window_bounds = array<i64: 1, 64>}, {pipeline_mode = #tpu.pipeline_mode<synchronous>, transform_indices = @transform_4, window_bounds = array<i64: 1, 64>}, {pipeline_mode = #tpu.pipeline_mode<synchronous>, transform_indices = @transform_5, window_bounds = array<i64: 8, 64>}, {transform_indices = @transform_6, window_bounds = array<i64: 1, 2, 64>}]} {
    %cst = arith.constant 0.000000e+00 : f32
    %0 = vector.broadcast %cst : f32 to vector<2x64xf32>
    %c0 = arith.constant 0 : index
    %c0_0 = arith.constant 0 : index
    %c0_1 = arith.constant 0 : index
    %1 = vector.load %arg1[%c0, %c0_0, %c0_1] : memref<1x4x256xf32, #tpu.memory_space<vmem>>, vector<1x2x256xf32>
    %2 = vector.shape_cast %1 : vector<1x2x256xf32> to vector<2x256xf32>
    %3 = arith.truncf %2 : vector<2x256xf32> to vector<2x256xbf16>
    %c0_2 = arith.constant 0 : index
    %c0_3 = arith.constant 0 : index
    %c0_4 = arith.constant 0 : index
    %4 = vector.load %arg2[%c0_2, %c0_3, %c0_4] : memref<3x256x64xbf16, #tpu.memory_space<vmem>>, vector<1x256x64xbf16>
    %5 = vector.shape_cast %4 : vector<1x256x64xbf16> to vector<256x64xbf16>
    %cst_5 = arith.constant dense<0.000000e+00> : vector<2x64xf32>
    %6 = tpu.matmul %3, %5, %cst_5 {dimension_numbers = #tpu.dot_dimension_numbers<[1], [0], [0], [1], [0, 0, 1, 1], [], []>} : vector<2x256xbf16>, vector<256x64xbf16>, vector<2x64xf32> -> vector<2x64xf32>
    %7 = arith.addf %0, %6 : vector<2x64xf32>
    %c0_6 = arith.constant 0 : index
    %c1 = arith.constant 1 : index
    %c0_7 = arith.constant 0 : index
    %8 = vector.load %arg1[%c0_6, %c1, %c0_7] : memref<1x4x256xf32, #tpu.memory_space<vmem>>, vector<1x2x256xf32>
    %9 = vector.shape_cast %8 : vector<1x2x256xf32> to vector<2x256xf32>
    %10 = arith.truncf %9 : vector<2x256xf32> to vector<2x256xbf16>
    %c1_8 = arith.constant 1 : index
    %c0_9 = arith.constant 0 : index
    %c0_10 = arith.constant 0 : index
    %11 = vector.load %arg2[%c1_8, %c0_9, %c0_10] : memref<3x256x64xbf16, #tpu.memory_space<vmem>>, vector<1x256x64xbf16>
    %12 = vector.shape_cast %11 : vector<1x256x64xbf16> to vector<256x64xbf16>
    %cst_11 = arith.constant dense<0.000000e+00> : vector<2x64xf32>
    %13 = tpu.matmul %10, %12, %cst_11 {dimension_numbers = #tpu.dot_dimension_numbers<[1], [0], [0], [1], [0, 0, 1, 1], [], []>} : vector<2x256xbf16>, vector<256x64xbf16>, vector<2x64xf32> -> vector<2x64xf32>
    %14 = arith.addf %7, %13 : vector<2x64xf32>
    %c0_12 = arith.constant 0 : index
    %c2 = arith.constant 2 : index
    %c0_13 = arith.constant 0 : index
    %15 = vector.load %arg1[%c0_12, %c2, %c0_13] : memref<1x4x256xf32, #tpu.memory_space<vmem>>, vector<1x2x256xf32>
    %16 = vector.shape_cast %15 : vector<1x2x256xf32> to vector<2x256xf32>
    %17 = arith.truncf %16 : vector<2x256xf32> to vector<2x256xbf16>
    %c2_14 = arith.constant 2 : index
    %c0_15 = arith.constant 0 : index
    %c0_16 = arith.constant 0 : index
    %18 = vector.load %arg2[%c2_14, %c0_15, %c0_16] : memref<3x256x64xbf16, #tpu.memory_space<vmem>>, vector<1x256x64xbf16>
    %19 = vector.shape_cast %18 : vector<1x256x64xbf16> to vector<256x64xbf16>
    %cst_17 = arith.constant dense<0.000000e+00> : vector<2x64xf32>
    %20 = tpu.matmul %17, %19, %cst_17 {dimension_numbers = #tpu.dot_dimension_numbers<[1], [0], [0], [1], [0, 0, 1, 1], [], []>} : vector<2x256xbf16>, vector<256x64xbf16>, vector<2x64xf32> -> vector<2x64xf32>
    %21 = arith.addf %14, %20 : vector<2x64xf32>
    %c0_18 = arith.constant 0 : index
    %c0_19 = arith.constant 0 : index
    %22 = vector.load %arg3[%c0_18, %c0_19] : memref<1x64xf32, #tpu.memory_space<vmem>>, vector<1x64xf32>
    %23 = vector.broadcast %22 : vector<1x64xf32> to vector<2x64xf32>
    %24 = arith.addf %21, %23 : vector<2x64xf32>
    %c0_20 = arith.constant 0 : index
    %c0_21 = arith.constant 0 : index
    %25 = vector.load %arg6[%c0_20, %c0_21] : memref<8x64xf32, #tpu.memory_space<vmem>>, vector<8x64xf32>
    %cst_22 = arith.constant dense<0.000000e+00> : vector<64xf32>
    %26 = vector.multi_reduction <add>, %24, %cst_22 [0] : vector<2x64xf32> to vector<64xf32>
    %27 = vector.shape_cast %26 : vector<64xf32> to vector<1x64xf32>
    %28 = arith.mulf %24, %24 : vector<2x64xf32>
    %cst_23 = arith.constant dense<0.000000e+00> : vector<64xf32>
    %29 = vector.multi_reduction <add>, %28, %cst_23 [0] : vector<2x64xf32> to vector<64xf32>
    %30 = vector.shape_cast %29 : vector<64xf32> to vector<1x64xf32>
    %31 = vector.broadcast %27 : vector<1x64xf32> to vector<8x64xf32>
    %32 = arith.mulf %25, %31 : vector<8x64xf32>
    %cst_24 = arith.constant dense<0.000000e+00> : vector<8xf32>
    %33 = vector.multi_reduction <add>, %32, %cst_24 [1] : vector<8x64xf32> to vector<8xf32>
    %34 = vector.shape_cast %33 : vector<8xf32> to vector<8x1xf32>
    %35 = vector.broadcast %30 : vector<1x64xf32> to vector<8x64xf32>
    %36 = arith.mulf %25, %35 : vector<8x64xf32>
    %cst_25 = arith.constant dense<0.000000e+00> : vector<8xf32>
    %37 = vector.multi_reduction <add>, %36, %cst_25 [1] : vector<8x64xf32> to vector<8xf32>
    %38 = vector.shape_cast %37 : vector<8xf32> to vector<8x1xf32>
    %cst_26 = arith.constant 1.600000e+01 : f32
    %39 = vector.broadcast %cst_26 : f32 to vector<8x1xf32>
    %40 = arith.divf %34, %39 : vector<8x1xf32>
    %cst_27 = arith.constant 1.600000e+01 : f32
    %41 = vector.broadcast %cst_27 : f32 to vector<8x1xf32>
    %42 = arith.divf %38, %41 : vector<8x1xf32>
    %43 = arith.mulf %40, %40 : vector<8x1xf32>
    %44 = arith.subf %42, %43 : vector<8x1xf32>
    %cst_28 = arith.constant 9.99999974E-6 : f32
    %45 = vector.broadcast %cst_28 : f32 to vector<8x1xf32>
    %46 = arith.addf %44, %45 : vector<8x1xf32>
    %47 = math.rsqrt %46 : vector<8x1xf32>
    %48 = vector.broadcast %40 : vector<8x1xf32> to vector<8x64xf32>
    %49 = arith.mulf %25, %48 : vector<8x64xf32>
    %cst_29 = arith.constant dense<0.000000e+00> : vector<64xf32>
    %50 = vector.multi_reduction <add>, %49, %cst_29 [0] : vector<8x64xf32> to vector<64xf32>
    %51 = vector.shape_cast %50 : vector<64xf32> to vector<1x64xf32>
    %52 = vector.broadcast %47 : vector<8x1xf32> to vector<8x64xf32>
    %53 = arith.mulf %25, %52 : vector<8x64xf32>
    %cst_30 = arith.constant dense<0.000000e+00> : vector<64xf32>
    %54 = vector.multi_reduction <add>, %53, %cst_30 [0] : vector<8x64xf32> to vector<64xf32>
    %55 = vector.shape_cast %54 : vector<64xf32> to vector<1x64xf32>
    %56 = vector.broadcast %51 : vector<1x64xf32> to vector<2x64xf32>
    %57 = arith.subf %24, %56 : vector<2x64xf32>
    %58 = vector.broadcast %55 : vector<1x64xf32> to vector<2x64xf32>
    %59 = arith.mulf %57, %58 : vector<2x64xf32>
    %c0_31 = arith.constant 0 : index
    %c0_32 = arith.constant 0 : index
    %60 = vector.load %arg4[%c0_31, %c0_32] : memref<1x64xf32, #tpu.memory_space<vmem>>, vector<1x64xf32>
    %61 = vector.broadcast %60 : vector<1x64xf32> to vector<2x64xf32>
    %62 = arith.mulf %59, %61 : vector<2x64xf32>
    %c0_33 = arith.constant 0 : index
    %c0_34 = arith.constant 0 : index
    %63 = vector.load %arg5[%c0_33, %c0_34] : memref<1x64xf32, #tpu.memory_space<vmem>>, vector<1x64xf32>
    %64 = vector.broadcast %63 : vector<1x64xf32> to vector<2x64xf32>
    %65 = arith.addf %62, %64 : vector<2x64xf32>
    %cst_35 = arith.constant 0.000000e+00 : f32
    %66 = vector.broadcast %cst_35 : f32 to vector<2x64xf32>
    %67 = arith.maximumf %65, %66 : vector<2x64xf32>
    %c0_36 = arith.constant 0 : index
    %c0_37 = arith.constant 0 : index
    %c0_38 = arith.constant 0 : index
    %68 = vector.load %arg7[%c0_36, %c0_37, %c0_38] : memref<1x2x64xf32, #tpu.memory_space<vmem>>, vector<1x2x64xf32>
    %69 = vector.shape_cast %68 : vector<1x2x64xf32> to vector<2x64xf32>
    %70 = vector.shape_cast %67 : vector<2x64xf32> to vector<1x2x64xf32>
    tpu.vector_store %arg7[%c0_36, %c0_37, %c0_38], %70 {strides = array<i32>} : memref<1x2x64xf32, #tpu.memory_space<vmem>>, vector<1x2x64xf32>,
    return
  }
  func.func @transform_0(%arg0: i32) -> (i32, i32, i32) {
    %c0_i32 = arith.constant 0 : i32
    %c0_i32_0 = arith.constant 0 : i32
    %c0_i32_1 = arith.constant 0 : i32
    return %arg0, %c0_i32, %c0_i32_0 : i32, i32, i32
  }
  func.func @transform_1(%arg0: i32) -> (i32, i32, i32) {
    %c0_i32 = arith.constant 0 : i32
    %c0_i32_0 = arith.constant 0 : i32
    %c0_i32_1 = arith.constant 0 : i32
    %c0_i32_2 = arith.constant 0 : i32
    return %c0_i32, %c0_i32_0, %c0_i32_1 : i32, i32, i32
  }
  func.func @transform_2(%arg0: i32) -> (i32, i32) {
    %c0_i32 = arith.constant 0 : i32
    %c0_i32_0 = arith.constant 0 : i32
    %c0_i32_1 = arith.constant 0 : i32
    return %c0_i32, %c0_i32_0 : i32, i32
  }
  func.func @transform_3(%arg0: i32) -> (i32, i32) {
    %c0_i32 = arith.constant 0 : i32
    %c0_i32_0 = arith.constant 0 : i32
    %c0_i32_1 = arith.constant 0 : i32
    return %c0_i32, %c0_i32_0 : i32, i32
  }
  func.func @transform_4(%arg0: i32) -> (i32, i32) {
    %c0_i32 = arith.constant 0 : i32
    %c0_i32_0 = arith.constant 0 : i32
    %c0_i32_1 = arith.constant 0 : i32
    return %c0_i32, %c0_i32_0 : i32, i32
  }
  func.func @transform_5(%arg0: i32) -> (i32, i32) {
    %c0_i32 = arith.constant 0 : i32
    %c0_i32_0 = arith.constant 0 : i32
    %c0_i32_1 = arith.constant 0 : i32
    return %c0_i32, %c0_i32_0 : i32, i32
  }
  func.func @transform_6(%arg0: i32) -> (i32, i32, i32) {
    %c0_i32 = arith.constant 0 : i32
    %c0_i32_0 = arith.constant 0 : i32
    %c0_i32_1 = arith.constant 0 : i32
    return %arg0, %c0_i32, %c0_i32_0 : i32, i32, i32
  }
}

module attributes {stable_mosaic.version = 11 : i64} {
  func.func @_stage_kernel(%arg0: i32, %arg1: memref<1x6x384xf32, #tpu.memory_space<vmem>>, %arg2: memref<3x384x64xbf16, #tpu.memory_space<vmem>>, %arg3: memref<1x64xf32, #tpu.memory_space<vmem>>, %arg4: memref<1x64xf32, #tpu.memory_space<vmem>>, %arg5: memref<1x64xf32, #tpu.memory_space<vmem>>, %arg6: memref<4x64xf32, #tpu.memory_space<vmem>>, %arg7: memref<1x4x64xf32, #tpu.memory_space<vmem>>) attributes {dimension_semantics = [#tpu.dimension_semantics<parallel>], iteration_bounds = array<i64: 2>, scalar_prefetch = 0 : i64, scratch_operands = 0 : i64, tpu.core_type = #tpu.core_type<tc>, window_params = [{transform_indices = @transform_0, window_bounds = array<i64: 1, 6, 384>}, {pipeline_mode = #tpu.pipeline_mode<synchronous>, transform_indices = @transform_1, window_bounds = array<i64: 3, 384, 64>}, {pipeline_mode = #tpu.pipeline_mode<synchronous>, transform_indices = @transform_2, window_bounds = array<i64: 1, 64>}, {pipeline_mode = #tpu.pipeline_mode<synchronous>, transform_indices = @transform_3, window_bounds = array<i64: 1, 64>}, {pipeline_mode = #tpu.pipeline_mode<synchronous>, transform_indices = @transform_4, window_bounds = array<i64: 1, 64>}, {pipeline_mode = #tpu.pipeline_mode<synchronous>, transform_indices = @transform_5, window_bounds = array<i64: 4, 64>}, {transform_indices = @transform_6, window_bounds = array<i64: 1, 4, 64>}]} {
    %cst = arith.constant 0.000000e+00 : f32
    %0 = vector.broadcast %cst : f32 to vector<4x64xf32>
    %c0 = arith.constant 0 : index
    %c0_0 = arith.constant 0 : index
    %c0_1 = arith.constant 0 : index
    %1 = vector.load %arg1[%c0, %c0_0, %c0_1] : memref<1x6x384xf32, #tpu.memory_space<vmem>>, vector<1x4x384xf32>
    %2 = vector.shape_cast %1 : vector<1x4x384xf32> to vector<4x384xf32>
    %3 = arith.truncf %2 : vector<4x384xf32> to vector<4x384xbf16>
    %c0_2 = arith.constant 0 : index
    %c0_3 = arith.constant 0 : index
    %c0_4 = arith.constant 0 : index
    %4 = vector.load %arg2[%c0_2, %c0_3, %c0_4] : memref<3x384x64xbf16, #tpu.memory_space<vmem>>, vector<1x384x64xbf16>
    %5 = vector.shape_cast %4 : vector<1x384x64xbf16> to vector<384x64xbf16>
    %cst_5 = arith.constant dense<0.000000e+00> : vector<4x64xf32>
    %6 = tpu.matmul %3, %5, %cst_5 {dimension_numbers = #tpu.dot_dimension_numbers<[1], [0], [0], [1], [0, 0, 1, 1], [], []>} : vector<4x384xbf16>, vector<384x64xbf16>, vector<4x64xf32> -> vector<4x64xf32>
    %7 = arith.addf %0, %6 : vector<4x64xf32>
    %c0_6 = arith.constant 0 : index
    %c1 = arith.constant 1 : index
    %c0_7 = arith.constant 0 : index
    %8 = vector.load %arg1[%c0_6, %c1, %c0_7] : memref<1x6x384xf32, #tpu.memory_space<vmem>>, vector<1x4x384xf32>
    %9 = vector.shape_cast %8 : vector<1x4x384xf32> to vector<4x384xf32>
    %10 = arith.truncf %9 : vector<4x384xf32> to vector<4x384xbf16>
    %c1_8 = arith.constant 1 : index
    %c0_9 = arith.constant 0 : index
    %c0_10 = arith.constant 0 : index
    %11 = vector.load %arg2[%c1_8, %c0_9, %c0_10] : memref<3x384x64xbf16, #tpu.memory_space<vmem>>, vector<1x384x64xbf16>
    %12 = vector.shape_cast %11 : vector<1x384x64xbf16> to vector<384x64xbf16>
    %cst_11 = arith.constant dense<0.000000e+00> : vector<4x64xf32>
    %13 = tpu.matmul %10, %12, %cst_11 {dimension_numbers = #tpu.dot_dimension_numbers<[1], [0], [0], [1], [0, 0, 1, 1], [], []>} : vector<4x384xbf16>, vector<384x64xbf16>, vector<4x64xf32> -> vector<4x64xf32>
    %14 = arith.addf %7, %13 : vector<4x64xf32>
    %c0_12 = arith.constant 0 : index
    %c2 = arith.constant 2 : index
    %c0_13 = arith.constant 0 : index
    %15 = vector.load %arg1[%c0_12, %c2, %c0_13] : memref<1x6x384xf32, #tpu.memory_space<vmem>>, vector<1x4x384xf32>
    %16 = vector.shape_cast %15 : vector<1x4x384xf32> to vector<4x384xf32>
    %17 = arith.truncf %16 : vector<4x384xf32> to vector<4x384xbf16>
    %c2_14 = arith.constant 2 : index
    %c0_15 = arith.constant 0 : index
    %c0_16 = arith.constant 0 : index
    %18 = vector.load %arg2[%c2_14, %c0_15, %c0_16] : memref<3x384x64xbf16, #tpu.memory_space<vmem>>, vector<1x384x64xbf16>
    %19 = vector.shape_cast %18 : vector<1x384x64xbf16> to vector<384x64xbf16>
    %cst_17 = arith.constant dense<0.000000e+00> : vector<4x64xf32>
    %20 = tpu.matmul %17, %19, %cst_17 {dimension_numbers = #tpu.dot_dimension_numbers<[1], [0], [0], [1], [0, 0, 1, 1], [], []>} : vector<4x384xbf16>, vector<384x64xbf16>, vector<4x64xf32> -> vector<4x64xf32>
    %21 = arith.addf %14, %20 : vector<4x64xf32>
    %c0_18 = arith.constant 0 : index
    %c0_19 = arith.constant 0 : index
    %22 = vector.load %arg3[%c0_18, %c0_19] : memref<1x64xf32, #tpu.memory_space<vmem>>, vector<1x64xf32>
    %23 = vector.broadcast %22 : vector<1x64xf32> to vector<4x64xf32>
    %24 = arith.addf %21, %23 : vector<4x64xf32>
    %c0_20 = arith.constant 0 : index
    %c0_21 = arith.constant 0 : index
    %25 = vector.load %arg6[%c0_20, %c0_21] : memref<4x64xf32, #tpu.memory_space<vmem>>, vector<4x64xf32>
    %cst_22 = arith.constant dense<0.000000e+00> : vector<64xf32>
    %26 = vector.multi_reduction <add>, %24, %cst_22 [0] : vector<4x64xf32> to vector<64xf32>
    %27 = vector.shape_cast %26 : vector<64xf32> to vector<1x64xf32>
    %28 = arith.mulf %24, %24 : vector<4x64xf32>
    %cst_23 = arith.constant dense<0.000000e+00> : vector<64xf32>
    %29 = vector.multi_reduction <add>, %28, %cst_23 [0] : vector<4x64xf32> to vector<64xf32>
    %30 = vector.shape_cast %29 : vector<64xf32> to vector<1x64xf32>
    %31 = vector.broadcast %27 : vector<1x64xf32> to vector<4x64xf32>
    %32 = arith.mulf %25, %31 : vector<4x64xf32>
    %cst_24 = arith.constant dense<0.000000e+00> : vector<4xf32>
    %33 = vector.multi_reduction <add>, %32, %cst_24 [1] : vector<4x64xf32> to vector<4xf32>
    %34 = vector.shape_cast %33 : vector<4xf32> to vector<4x1xf32>
    %35 = vector.broadcast %30 : vector<1x64xf32> to vector<4x64xf32>
    %36 = arith.mulf %25, %35 : vector<4x64xf32>
    %cst_25 = arith.constant dense<0.000000e+00> : vector<4xf32>
    %37 = vector.multi_reduction <add>, %36, %cst_25 [1] : vector<4x64xf32> to vector<4xf32>
    %38 = vector.shape_cast %37 : vector<4xf32> to vector<4x1xf32>
    %cst_26 = arith.constant 6.400000e+01 : f32
    %39 = vector.broadcast %cst_26 : f32 to vector<4x1xf32>
    %40 = arith.divf %34, %39 : vector<4x1xf32>
    %cst_27 = arith.constant 6.400000e+01 : f32
    %41 = vector.broadcast %cst_27 : f32 to vector<4x1xf32>
    %42 = arith.divf %38, %41 : vector<4x1xf32>
    %43 = arith.mulf %40, %40 : vector<4x1xf32>
    %44 = arith.subf %42, %43 : vector<4x1xf32>
    %cst_28 = arith.constant 9.99999974E-6 : f32
    %45 = vector.broadcast %cst_28 : f32 to vector<4x1xf32>
    %46 = arith.addf %44, %45 : vector<4x1xf32>
    %47 = math.rsqrt %46 : vector<4x1xf32>
    %48 = vector.broadcast %40 : vector<4x1xf32> to vector<4x64xf32>
    %49 = arith.mulf %25, %48 : vector<4x64xf32>
    %cst_29 = arith.constant dense<0.000000e+00> : vector<64xf32>
    %50 = vector.multi_reduction <add>, %49, %cst_29 [0] : vector<4x64xf32> to vector<64xf32>
    %51 = vector.shape_cast %50 : vector<64xf32> to vector<1x64xf32>
    %52 = vector.broadcast %47 : vector<4x1xf32> to vector<4x64xf32>
    %53 = arith.mulf %25, %52 : vector<4x64xf32>
    %cst_30 = arith.constant dense<0.000000e+00> : vector<64xf32>
    %54 = vector.multi_reduction <add>, %53, %cst_30 [0] : vector<4x64xf32> to vector<64xf32>
    %55 = vector.shape_cast %54 : vector<64xf32> to vector<1x64xf32>
    %56 = vector.broadcast %51 : vector<1x64xf32> to vector<4x64xf32>
    %57 = arith.subf %24, %56 : vector<4x64xf32>
    %58 = vector.broadcast %55 : vector<1x64xf32> to vector<4x64xf32>
    %59 = arith.mulf %57, %58 : vector<4x64xf32>
    %c0_31 = arith.constant 0 : index
    %c0_32 = arith.constant 0 : index
    %60 = vector.load %arg4[%c0_31, %c0_32] : memref<1x64xf32, #tpu.memory_space<vmem>>, vector<1x64xf32>
    %61 = vector.broadcast %60 : vector<1x64xf32> to vector<4x64xf32>
    %62 = arith.mulf %59, %61 : vector<4x64xf32>
    %c0_33 = arith.constant 0 : index
    %c0_34 = arith.constant 0 : index
    %63 = vector.load %arg5[%c0_33, %c0_34] : memref<1x64xf32, #tpu.memory_space<vmem>>, vector<1x64xf32>
    %64 = vector.broadcast %63 : vector<1x64xf32> to vector<4x64xf32>
    %65 = arith.addf %62, %64 : vector<4x64xf32>
    %cst_35 = arith.constant 0.000000e+00 : f32
    %66 = vector.broadcast %cst_35 : f32 to vector<4x64xf32>
    %67 = arith.maximumf %65, %66 : vector<4x64xf32>
    %c0_36 = arith.constant 0 : index
    %c0_37 = arith.constant 0 : index
    %c0_38 = arith.constant 0 : index
    %68 = vector.load %arg7[%c0_36, %c0_37, %c0_38] : memref<1x4x64xf32, #tpu.memory_space<vmem>>, vector<1x4x64xf32>
    %69 = vector.shape_cast %68 : vector<1x4x64xf32> to vector<4x64xf32>
    %70 = vector.shape_cast %67 : vector<4x64xf32> to vector<1x4x64xf32>
    tpu.vector_store %arg7[%c0_36, %c0_37, %c0_38], %70 {strides = array<i32>} : memref<1x4x64xf32, #tpu.memory_space<vmem>>, vector<1x4x64xf32>,
    return
  }
  func.func @transform_0(%arg0: i32) -> (i32, i32, i32) {
    %c0_i32 = arith.constant 0 : i32
    %c0_i32_0 = arith.constant 0 : i32
    %c0_i32_1 = arith.constant 0 : i32
    return %arg0, %c0_i32, %c0_i32_0 : i32, i32, i32
  }
  func.func @transform_1(%arg0: i32) -> (i32, i32, i32) {
    %c0_i32 = arith.constant 0 : i32
    %c0_i32_0 = arith.constant 0 : i32
    %c0_i32_1 = arith.constant 0 : i32
    %c0_i32_2 = arith.constant 0 : i32
    return %c0_i32, %c0_i32_0, %c0_i32_1 : i32, i32, i32
  }
  func.func @transform_2(%arg0: i32) -> (i32, i32) {
    %c0_i32 = arith.constant 0 : i32
    %c0_i32_0 = arith.constant 0 : i32
    %c0_i32_1 = arith.constant 0 : i32
    return %c0_i32, %c0_i32_0 : i32, i32
  }
  func.func @transform_3(%arg0: i32) -> (i32, i32) {
    %c0_i32 = arith.constant 0 : i32
    %c0_i32_0 = arith.constant 0 : i32
    %c0_i32_1 = arith.constant 0 : i32
    return %c0_i32, %c0_i32_0 : i32, i32
  }
  func.func @transform_4(%arg0: i32) -> (i32, i32) {
    %c0_i32 = arith.constant 0 : i32
    %c0_i32_0 = arith.constant 0 : i32
    %c0_i32_1 = arith.constant 0 : i32
    return %c0_i32, %c0_i32_0 : i32, i32
  }
  func.func @transform_5(%arg0: i32) -> (i32, i32) {
    %c0_i32 = arith.constant 0 : i32
    %c0_i32_0 = arith.constant 0 : i32
    %c0_i32_1 = arith.constant 0 : i32
    return %c0_i32, %c0_i32_0 : i32, i32
  }
  func.func @transform_6(%arg0: i32) -> (i32, i32, i32) {
    %c0_i32 = arith.constant 0 : i32
    %c0_i32_0 = arith.constant 0 : i32
    %c0_i32_1 = arith.constant 0 : i32
    return %arg0, %c0_i32, %c0_i32_0 : i32, i32, i32
  }
}

module attributes {stable_mosaic.version = 11 : i64} {
  func.func @_stage_kernel(%arg0: i32, %arg1: memref<1x10x320xf32, #tpu.memory_space<vmem>>, %arg2: memref<3x320x128xbf16, #tpu.memory_space<vmem>>, %arg3: memref<1x128xf32, #tpu.memory_space<vmem>>, %arg4: memref<1x128xf32, #tpu.memory_space<vmem>>, %arg5: memref<1x128xf32, #tpu.memory_space<vmem>>, %arg6: memref<4x128xf32, #tpu.memory_space<vmem>>, %arg7: memref<1x8x128xf32, #tpu.memory_space<vmem>>) attributes {dimension_semantics = [#tpu.dimension_semantics<parallel>], iteration_bounds = array<i64: 2>, scalar_prefetch = 0 : i64, scratch_operands = 0 : i64, tpu.core_type = #tpu.core_type<tc>, window_params = [{transform_indices = @transform_0, window_bounds = array<i64: 1, 10, 320>}, {pipeline_mode = #tpu.pipeline_mode<synchronous>, transform_indices = @transform_1, window_bounds = array<i64: 3, 320, 128>}, {pipeline_mode = #tpu.pipeline_mode<synchronous>, transform_indices = @transform_2, window_bounds = array<i64: 1, 128>}, {pipeline_mode = #tpu.pipeline_mode<synchronous>, transform_indices = @transform_3, window_bounds = array<i64: 1, 128>}, {pipeline_mode = #tpu.pipeline_mode<synchronous>, transform_indices = @transform_4, window_bounds = array<i64: 1, 128>}, {pipeline_mode = #tpu.pipeline_mode<synchronous>, transform_indices = @transform_5, window_bounds = array<i64: 4, 128>}, {transform_indices = @transform_6, window_bounds = array<i64: 1, 8, 128>}]} {
    %cst = arith.constant 0.000000e+00 : f32
    %0 = vector.broadcast %cst : f32 to vector<8x128xf32>
    %c0 = arith.constant 0 : index
    %c0_0 = arith.constant 0 : index
    %c0_1 = arith.constant 0 : index
    %1 = vector.load %arg1[%c0, %c0_0, %c0_1] : memref<1x10x320xf32, #tpu.memory_space<vmem>>, vector<1x8x320xf32>
    %2 = vector.shape_cast %1 : vector<1x8x320xf32> to vector<8x320xf32>
    %3 = arith.truncf %2 : vector<8x320xf32> to vector<8x320xbf16>
    %c0_2 = arith.constant 0 : index
    %c0_3 = arith.constant 0 : index
    %c0_4 = arith.constant 0 : index
    %4 = vector.load %arg2[%c0_2, %c0_3, %c0_4] : memref<3x320x128xbf16, #tpu.memory_space<vmem>>, vector<1x320x128xbf16>
    %5 = vector.shape_cast %4 : vector<1x320x128xbf16> to vector<320x128xbf16>
    %cst_5 = arith.constant dense<0.000000e+00> : vector<8x128xf32>
    %6 = tpu.matmul %3, %5, %cst_5 {dimension_numbers = #tpu.dot_dimension_numbers<[1], [0], [0], [1], [0, 0, 1, 1], [], []>} : vector<8x320xbf16>, vector<320x128xbf16>, vector<8x128xf32> -> vector<8x128xf32>
    %7 = arith.addf %0, %6 : vector<8x128xf32>
    %c0_6 = arith.constant 0 : index
    %c1 = arith.constant 1 : index
    %c0_7 = arith.constant 0 : index
    %8 = vector.load %arg1[%c0_6, %c1, %c0_7] : memref<1x10x320xf32, #tpu.memory_space<vmem>>, vector<1x8x320xf32>
    %9 = vector.shape_cast %8 : vector<1x8x320xf32> to vector<8x320xf32>
    %10 = arith.truncf %9 : vector<8x320xf32> to vector<8x320xbf16>
    %c1_8 = arith.constant 1 : index
    %c0_9 = arith.constant 0 : index
    %c0_10 = arith.constant 0 : index
    %11 = vector.load %arg2[%c1_8, %c0_9, %c0_10] : memref<3x320x128xbf16, #tpu.memory_space<vmem>>, vector<1x320x128xbf16>
    %12 = vector.shape_cast %11 : vector<1x320x128xbf16> to vector<320x128xbf16>
    %cst_11 = arith.constant dense<0.000000e+00> : vector<8x128xf32>
    %13 = tpu.matmul %10, %12, %cst_11 {dimension_numbers = #tpu.dot_dimension_numbers<[1], [0], [0], [1], [0, 0, 1, 1], [], []>} : vector<8x320xbf16>, vector<320x128xbf16>, vector<8x128xf32> -> vector<8x128xf32>
    %14 = arith.addf %7, %13 : vector<8x128xf32>
    %c0_12 = arith.constant 0 : index
    %c2 = arith.constant 2 : index
    %c0_13 = arith.constant 0 : index
    %15 = vector.load %arg1[%c0_12, %c2, %c0_13] : memref<1x10x320xf32, #tpu.memory_space<vmem>>, vector<1x8x320xf32>
    %16 = vector.shape_cast %15 : vector<1x8x320xf32> to vector<8x320xf32>
    %17 = arith.truncf %16 : vector<8x320xf32> to vector<8x320xbf16>
    %c2_14 = arith.constant 2 : index
    %c0_15 = arith.constant 0 : index
    %c0_16 = arith.constant 0 : index
    %18 = vector.load %arg2[%c2_14, %c0_15, %c0_16] : memref<3x320x128xbf16, #tpu.memory_space<vmem>>, vector<1x320x128xbf16>
    %19 = vector.shape_cast %18 : vector<1x320x128xbf16> to vector<320x128xbf16>
    %cst_17 = arith.constant dense<0.000000e+00> : vector<8x128xf32>
    %20 = tpu.matmul %17, %19, %cst_17 {dimension_numbers = #tpu.dot_dimension_numbers<[1], [0], [0], [1], [0, 0, 1, 1], [], []>} : vector<8x320xbf16>, vector<320x128xbf16>, vector<8x128xf32> -> vector<8x128xf32>
    %21 = arith.addf %14, %20 : vector<8x128xf32>
    %c0_18 = arith.constant 0 : index
    %c0_19 = arith.constant 0 : index
    %22 = vector.load %arg3[%c0_18, %c0_19] : memref<1x128xf32, #tpu.memory_space<vmem>>, vector<1x128xf32>
    %23 = vector.broadcast %22 : vector<1x128xf32> to vector<8x128xf32>
    %24 = arith.addf %21, %23 : vector<8x128xf32>
    %c0_20 = arith.constant 0 : index
    %c0_21 = arith.constant 0 : index
    %25 = vector.load %arg6[%c0_20, %c0_21] : memref<4x128xf32, #tpu.memory_space<vmem>>, vector<4x128xf32>
    %cst_22 = arith.constant dense<0.000000e+00> : vector<128xf32>
    %26 = vector.multi_reduction <add>, %24, %cst_22 [0] : vector<8x128xf32> to vector<128xf32>
    %27 = vector.shape_cast %26 : vector<128xf32> to vector<1x128xf32>
    %28 = arith.mulf %24, %24 : vector<8x128xf32>
    %cst_23 = arith.constant dense<0.000000e+00> : vector<128xf32>
    %29 = vector.multi_reduction <add>, %28, %cst_23 [0] : vector<8x128xf32> to vector<128xf32>
    %30 = vector.shape_cast %29 : vector<128xf32> to vector<1x128xf32>
    %31 = vector.broadcast %27 : vector<1x128xf32> to vector<4x128xf32>
    %32 = arith.mulf %25, %31 : vector<4x128xf32>
    %cst_24 = arith.constant dense<0.000000e+00> : vector<4xf32>
    %33 = vector.multi_reduction <add>, %32, %cst_24 [1] : vector<4x128xf32> to vector<4xf32>
    %34 = vector.shape_cast %33 : vector<4xf32> to vector<4x1xf32>
    %35 = vector.broadcast %30 : vector<1x128xf32> to vector<4x128xf32>
    %36 = arith.mulf %25, %35 : vector<4x128xf32>
    %cst_25 = arith.constant dense<0.000000e+00> : vector<4xf32>
    %37 = vector.multi_reduction <add>, %36, %cst_25 [1] : vector<4x128xf32> to vector<4xf32>
    %38 = vector.shape_cast %37 : vector<4xf32> to vector<4x1xf32>
    %cst_26 = arith.constant 2.560000e+02 : f32
    %39 = vector.broadcast %cst_26 : f32 to vector<4x1xf32>
    %40 = arith.divf %34, %39 : vector<4x1xf32>
    %cst_27 = arith.constant 2.560000e+02 : f32
    %41 = vector.broadcast %cst_27 : f32 to vector<4x1xf32>
    %42 = arith.divf %38, %41 : vector<4x1xf32>
    %43 = arith.mulf %40, %40 : vector<4x1xf32>
    %44 = arith.subf %42, %43 : vector<4x1xf32>
    %cst_28 = arith.constant 9.99999974E-6 : f32
    %45 = vector.broadcast %cst_28 : f32 to vector<4x1xf32>
    %46 = arith.addf %44, %45 : vector<4x1xf32>
    %47 = math.rsqrt %46 : vector<4x1xf32>
    %48 = vector.broadcast %40 : vector<4x1xf32> to vector<4x128xf32>
    %49 = arith.mulf %25, %48 : vector<4x128xf32>
    %cst_29 = arith.constant dense<0.000000e+00> : vector<128xf32>
    %50 = vector.multi_reduction <add>, %49, %cst_29 [0] : vector<4x128xf32> to vector<128xf32>
    %51 = vector.shape_cast %50 : vector<128xf32> to vector<1x128xf32>
    %52 = vector.broadcast %47 : vector<4x1xf32> to vector<4x128xf32>
    %53 = arith.mulf %25, %52 : vector<4x128xf32>
    %cst_30 = arith.constant dense<0.000000e+00> : vector<128xf32>
    %54 = vector.multi_reduction <add>, %53, %cst_30 [0] : vector<4x128xf32> to vector<128xf32>
    %55 = vector.shape_cast %54 : vector<128xf32> to vector<1x128xf32>
    %56 = vector.broadcast %51 : vector<1x128xf32> to vector<8x128xf32>
    %57 = arith.subf %24, %56 : vector<8x128xf32>
    %58 = vector.broadcast %55 : vector<1x128xf32> to vector<8x128xf32>
    %59 = arith.mulf %57, %58 : vector<8x128xf32>
    %c0_31 = arith.constant 0 : index
    %c0_32 = arith.constant 0 : index
    %60 = vector.load %arg4[%c0_31, %c0_32] : memref<1x128xf32, #tpu.memory_space<vmem>>, vector<1x128xf32>
    %61 = vector.broadcast %60 : vector<1x128xf32> to vector<8x128xf32>
    %62 = arith.mulf %59, %61 : vector<8x128xf32>
    %c0_33 = arith.constant 0 : index
    %c0_34 = arith.constant 0 : index
    %63 = vector.load %arg5[%c0_33, %c0_34] : memref<1x128xf32, #tpu.memory_space<vmem>>, vector<1x128xf32>
    %64 = vector.broadcast %63 : vector<1x128xf32> to vector<8x128xf32>
    %65 = arith.addf %62, %64 : vector<8x128xf32>
    %cst_35 = arith.constant 0.000000e+00 : f32
    %66 = vector.broadcast %cst_35 : f32 to vector<8x128xf32>
    %67 = arith.maximumf %65, %66 : vector<8x128xf32>
    %c0_36 = arith.constant 0 : index
    %c0_37 = arith.constant 0 : index
    %c0_38 = arith.constant 0 : index
    %68 = vector.load %arg7[%c0_36, %c0_37, %c0_38] : memref<1x8x128xf32, #tpu.memory_space<vmem>>, vector<1x8x128xf32>
    %69 = vector.shape_cast %68 : vector<1x8x128xf32> to vector<8x128xf32>
    %70 = vector.shape_cast %67 : vector<8x128xf32> to vector<1x8x128xf32>
    tpu.vector_store %arg7[%c0_36, %c0_37, %c0_38], %70 {strides = array<i32>} : memref<1x8x128xf32, #tpu.memory_space<vmem>>, vector<1x8x128xf32>,
    return
  }
  func.func @transform_0(%arg0: i32) -> (i32, i32, i32) {
    %c0_i32 = arith.constant 0 : i32
    %c0_i32_0 = arith.constant 0 : i32
    %c0_i32_1 = arith.constant 0 : i32
    return %arg0, %c0_i32, %c0_i32_0 : i32, i32, i32
  }
  func.func @transform_1(%arg0: i32) -> (i32, i32, i32) {
    %c0_i32 = arith.constant 0 : i32
    %c0_i32_0 = arith.constant 0 : i32
    %c0_i32_1 = arith.constant 0 : i32
    %c0_i32_2 = arith.constant 0 : i32
    return %c0_i32, %c0_i32_0, %c0_i32_1 : i32, i32, i32
  }
  func.func @transform_2(%arg0: i32) -> (i32, i32) {
    %c0_i32 = arith.constant 0 : i32
    %c0_i32_0 = arith.constant 0 : i32
    %c0_i32_1 = arith.constant 0 : i32
    return %c0_i32, %c0_i32_0 : i32, i32
  }
  func.func @transform_3(%arg0: i32) -> (i32, i32) {
    %c0_i32 = arith.constant 0 : i32
    %c0_i32_0 = arith.constant 0 : i32
    %c0_i32_1 = arith.constant 0 : i32
    return %c0_i32, %c0_i32_0 : i32, i32
  }
  func.func @transform_4(%arg0: i32) -> (i32, i32) {
    %c0_i32 = arith.constant 0 : i32
    %c0_i32_0 = arith.constant 0 : i32
    %c0_i32_1 = arith.constant 0 : i32
    return %c0_i32, %c0_i32_0 : i32, i32
  }
  func.func @transform_5(%arg0: i32) -> (i32, i32) {
    %c0_i32 = arith.constant 0 : i32
    %c0_i32_0 = arith.constant 0 : i32
    %c0_i32_1 = arith.constant 0 : i32
    return %c0_i32, %c0_i32_0 : i32, i32
  }
  func.func @transform_6(%arg0: i32) -> (i32, i32, i32) {
    %c0_i32 = arith.constant 0 : i32
    %c0_i32_0 = arith.constant 0 : i32
    %c0_i32_1 = arith.constant 0 : i32
    return %arg0, %c0_i32, %c0_i32_0 : i32, i32, i32
  }
}

module attributes {stable_mosaic.version = 11 : i64} {
  func.func @_stage_kernel(%arg0: i32, %arg1: memref<1x18x576xf32, #tpu.memory_space<vmem>>, %arg2: memref<3x576x128xbf16, #tpu.memory_space<vmem>>, %arg3: memref<1x128xf32, #tpu.memory_space<vmem>>, %arg4: memref<1x128xf32, #tpu.memory_space<vmem>>, %arg5: memref<1x128xf32, #tpu.memory_space<vmem>>, %arg6: memref<2x128xf32, #tpu.memory_space<vmem>>, %arg7: memref<1x16x128xf32, #tpu.memory_space<vmem>>) attributes {dimension_semantics = [#tpu.dimension_semantics<parallel>], iteration_bounds = array<i64: 2>, scalar_prefetch = 0 : i64, scratch_operands = 0 : i64, tpu.core_type = #tpu.core_type<tc>, window_params = [{transform_indices = @transform_0, window_bounds = array<i64: 1, 18, 576>}, {pipeline_mode = #tpu.pipeline_mode<synchronous>, transform_indices = @transform_1, window_bounds = array<i64: 3, 576, 128>}, {pipeline_mode = #tpu.pipeline_mode<synchronous>, transform_indices = @transform_2, window_bounds = array<i64: 1, 128>}, {pipeline_mode = #tpu.pipeline_mode<synchronous>, transform_indices = @transform_3, window_bounds = array<i64: 1, 128>}, {pipeline_mode = #tpu.pipeline_mode<synchronous>, transform_indices = @transform_4, window_bounds = array<i64: 1, 128>}, {pipeline_mode = #tpu.pipeline_mode<synchronous>, transform_indices = @transform_5, window_bounds = array<i64: 2, 128>}, {transform_indices = @transform_6, window_bounds = array<i64: 1, 16, 128>}]} {
    %cst = arith.constant 0.000000e+00 : f32
    %0 = vector.broadcast %cst : f32 to vector<16x128xf32>
    %c0 = arith.constant 0 : index
    %c0_0 = arith.constant 0 : index
    %c0_1 = arith.constant 0 : index
    %1 = vector.load %arg1[%c0, %c0_0, %c0_1] : memref<1x18x576xf32, #tpu.memory_space<vmem>>, vector<1x16x576xf32>
    %2 = vector.shape_cast %1 : vector<1x16x576xf32> to vector<16x576xf32>
    %3 = arith.truncf %2 : vector<16x576xf32> to vector<16x576xbf16>
    %c0_2 = arith.constant 0 : index
    %c0_3 = arith.constant 0 : index
    %c0_4 = arith.constant 0 : index
    %4 = vector.load %arg2[%c0_2, %c0_3, %c0_4] : memref<3x576x128xbf16, #tpu.memory_space<vmem>>, vector<1x576x128xbf16>
    %5 = vector.shape_cast %4 : vector<1x576x128xbf16> to vector<576x128xbf16>
    %cst_5 = arith.constant dense<0.000000e+00> : vector<16x128xf32>
    %6 = tpu.matmul %3, %5, %cst_5 {dimension_numbers = #tpu.dot_dimension_numbers<[1], [0], [0], [1], [0, 0, 1, 1], [], []>} : vector<16x576xbf16>, vector<576x128xbf16>, vector<16x128xf32> -> vector<16x128xf32>
    %7 = arith.addf %0, %6 : vector<16x128xf32>
    %c0_6 = arith.constant 0 : index
    %c1 = arith.constant 1 : index
    %c0_7 = arith.constant 0 : index
    %8 = vector.load %arg1[%c0_6, %c1, %c0_7] : memref<1x18x576xf32, #tpu.memory_space<vmem>>, vector<1x16x576xf32>
    %9 = vector.shape_cast %8 : vector<1x16x576xf32> to vector<16x576xf32>
    %10 = arith.truncf %9 : vector<16x576xf32> to vector<16x576xbf16>
    %c1_8 = arith.constant 1 : index
    %c0_9 = arith.constant 0 : index
    %c0_10 = arith.constant 0 : index
    %11 = vector.load %arg2[%c1_8, %c0_9, %c0_10] : memref<3x576x128xbf16, #tpu.memory_space<vmem>>, vector<1x576x128xbf16>
    %12 = vector.shape_cast %11 : vector<1x576x128xbf16> to vector<576x128xbf16>
    %cst_11 = arith.constant dense<0.000000e+00> : vector<16x128xf32>
    %13 = tpu.matmul %10, %12, %cst_11 {dimension_numbers = #tpu.dot_dimension_numbers<[1], [0], [0], [1], [0, 0, 1, 1], [], []>} : vector<16x576xbf16>, vector<576x128xbf16>, vector<16x128xf32> -> vector<16x128xf32>
    %14 = arith.addf %7, %13 : vector<16x128xf32>
    %c0_12 = arith.constant 0 : index
    %c2 = arith.constant 2 : index
    %c0_13 = arith.constant 0 : index
    %15 = vector.load %arg1[%c0_12, %c2, %c0_13] : memref<1x18x576xf32, #tpu.memory_space<vmem>>, vector<1x16x576xf32>
    %16 = vector.shape_cast %15 : vector<1x16x576xf32> to vector<16x576xf32>
    %17 = arith.truncf %16 : vector<16x576xf32> to vector<16x576xbf16>
    %c2_14 = arith.constant 2 : index
    %c0_15 = arith.constant 0 : index
    %c0_16 = arith.constant 0 : index
    %18 = vector.load %arg2[%c2_14, %c0_15, %c0_16] : memref<3x576x128xbf16, #tpu.memory_space<vmem>>, vector<1x576x128xbf16>
    %19 = vector.shape_cast %18 : vector<1x576x128xbf16> to vector<576x128xbf16>
    %cst_17 = arith.constant dense<0.000000e+00> : vector<16x128xf32>
    %20 = tpu.matmul %17, %19, %cst_17 {dimension_numbers = #tpu.dot_dimension_numbers<[1], [0], [0], [1], [0, 0, 1, 1], [], []>} : vector<16x576xbf16>, vector<576x128xbf16>, vector<16x128xf32> -> vector<16x128xf32>
    %21 = arith.addf %14, %20 : vector<16x128xf32>
    %c0_18 = arith.constant 0 : index
    %c0_19 = arith.constant 0 : index
    %22 = vector.load %arg3[%c0_18, %c0_19] : memref<1x128xf32, #tpu.memory_space<vmem>>, vector<1x128xf32>
    %23 = vector.broadcast %22 : vector<1x128xf32> to vector<16x128xf32>
    %24 = arith.addf %21, %23 : vector<16x128xf32>
    %c0_20 = arith.constant 0 : index
    %c0_21 = arith.constant 0 : index
    %25 = vector.load %arg6[%c0_20, %c0_21] : memref<2x128xf32, #tpu.memory_space<vmem>>, vector<2x128xf32>
    %cst_22 = arith.constant dense<0.000000e+00> : vector<128xf32>
    %26 = vector.multi_reduction <add>, %24, %cst_22 [0] : vector<16x128xf32> to vector<128xf32>
    %27 = vector.shape_cast %26 : vector<128xf32> to vector<1x128xf32>
    %28 = arith.mulf %24, %24 : vector<16x128xf32>
    %cst_23 = arith.constant dense<0.000000e+00> : vector<128xf32>
    %29 = vector.multi_reduction <add>, %28, %cst_23 [0] : vector<16x128xf32> to vector<128xf32>
    %30 = vector.shape_cast %29 : vector<128xf32> to vector<1x128xf32>
    %31 = vector.broadcast %27 : vector<1x128xf32> to vector<2x128xf32>
    %32 = arith.mulf %25, %31 : vector<2x128xf32>
    %cst_24 = arith.constant dense<0.000000e+00> : vector<2xf32>
    %33 = vector.multi_reduction <add>, %32, %cst_24 [1] : vector<2x128xf32> to vector<2xf32>
    %34 = vector.shape_cast %33 : vector<2xf32> to vector<2x1xf32>
    %35 = vector.broadcast %30 : vector<1x128xf32> to vector<2x128xf32>
    %36 = arith.mulf %25, %35 : vector<2x128xf32>
    %cst_25 = arith.constant dense<0.000000e+00> : vector<2xf32>
    %37 = vector.multi_reduction <add>, %36, %cst_25 [1] : vector<2x128xf32> to vector<2xf32>
    %38 = vector.shape_cast %37 : vector<2xf32> to vector<2x1xf32>
    %cst_26 = arith.constant 1.024000e+03 : f32
    %39 = vector.broadcast %cst_26 : f32 to vector<2x1xf32>
    %40 = arith.divf %34, %39 : vector<2x1xf32>
    %cst_27 = arith.constant 1.024000e+03 : f32
    %41 = vector.broadcast %cst_27 : f32 to vector<2x1xf32>
    %42 = arith.divf %38, %41 : vector<2x1xf32>
    %43 = arith.mulf %40, %40 : vector<2x1xf32>
    %44 = arith.subf %42, %43 : vector<2x1xf32>
    %cst_28 = arith.constant 9.99999974E-6 : f32
    %45 = vector.broadcast %cst_28 : f32 to vector<2x1xf32>
    %46 = arith.addf %44, %45 : vector<2x1xf32>
    %47 = math.rsqrt %46 : vector<2x1xf32>
    %48 = vector.broadcast %40 : vector<2x1xf32> to vector<2x128xf32>
    %49 = arith.mulf %25, %48 : vector<2x128xf32>
    %cst_29 = arith.constant dense<0.000000e+00> : vector<128xf32>
    %50 = vector.multi_reduction <add>, %49, %cst_29 [0] : vector<2x128xf32> to vector<128xf32>
    %51 = vector.shape_cast %50 : vector<128xf32> to vector<1x128xf32>
    %52 = vector.broadcast %47 : vector<2x1xf32> to vector<2x128xf32>
    %53 = arith.mulf %25, %52 : vector<2x128xf32>
    %cst_30 = arith.constant dense<0.000000e+00> : vector<128xf32>
    %54 = vector.multi_reduction <add>, %53, %cst_30 [0] : vector<2x128xf32> to vector<128xf32>
    %55 = vector.shape_cast %54 : vector<128xf32> to vector<1x128xf32>
    %56 = vector.broadcast %51 : vector<1x128xf32> to vector<16x128xf32>
    %57 = arith.subf %24, %56 : vector<16x128xf32>
    %58 = vector.broadcast %55 : vector<1x128xf32> to vector<16x128xf32>
    %59 = arith.mulf %57, %58 : vector<16x128xf32>
    %c0_31 = arith.constant 0 : index
    %c0_32 = arith.constant 0 : index
    %60 = vector.load %arg4[%c0_31, %c0_32] : memref<1x128xf32, #tpu.memory_space<vmem>>, vector<1x128xf32>
    %61 = vector.broadcast %60 : vector<1x128xf32> to vector<16x128xf32>
    %62 = arith.mulf %59, %61 : vector<16x128xf32>
    %c0_33 = arith.constant 0 : index
    %c0_34 = arith.constant 0 : index
    %63 = vector.load %arg5[%c0_33, %c0_34] : memref<1x128xf32, #tpu.memory_space<vmem>>, vector<1x128xf32>
    %64 = vector.broadcast %63 : vector<1x128xf32> to vector<16x128xf32>
    %65 = arith.addf %62, %64 : vector<16x128xf32>
    %cst_35 = arith.constant 0.000000e+00 : f32
    %66 = vector.broadcast %cst_35 : f32 to vector<16x128xf32>
    %67 = arith.maximumf %65, %66 : vector<16x128xf32>
    %c0_36 = arith.constant 0 : index
    %c0_37 = arith.constant 0 : index
    %c0_38 = arith.constant 0 : index
    %68 = vector.load %arg7[%c0_36, %c0_37, %c0_38] : memref<1x16x128xf32, #tpu.memory_space<vmem>>, vector<1x16x128xf32>
    %69 = vector.shape_cast %68 : vector<1x16x128xf32> to vector<16x128xf32>
    %70 = vector.shape_cast %67 : vector<16x128xf32> to vector<1x16x128xf32>
    tpu.vector_store %arg7[%c0_36, %c0_37, %c0_38], %70 {strides = array<i32>} : memref<1x16x128xf32, #tpu.memory_space<vmem>>, vector<1x16x128xf32>,
    return
  }
  func.func @transform_0(%arg0: i32) -> (i32, i32, i32) {
    %c0_i32 = arith.constant 0 : i32
    %c0_i32_0 = arith.constant 0 : i32
    %c0_i32_1 = arith.constant 0 : i32
    return %arg0, %c0_i32, %c0_i32_0 : i32, i32, i32
  }
  func.func @transform_1(%arg0: i32) -> (i32, i32, i32) {
    %c0_i32 = arith.constant 0 : i32
    %c0_i32_0 = arith.constant 0 : i32
    %c0_i32_1 = arith.constant 0 : i32
    %c0_i32_2 = arith.constant 0 : i32
    return %c0_i32, %c0_i32_0, %c0_i32_1 : i32, i32, i32
  }
  func.func @transform_2(%arg0: i32) -> (i32, i32) {
    %c0_i32 = arith.constant 0 : i32
    %c0_i32_0 = arith.constant 0 : i32
    %c0_i32_1 = arith.constant 0 : i32
    return %c0_i32, %c0_i32_0 : i32, i32
  }
  func.func @transform_3(%arg0: i32) -> (i32, i32) {
    %c0_i32 = arith.constant 0 : i32
    %c0_i32_0 = arith.constant 0 : i32
    %c0_i32_1 = arith.constant 0 : i32
    return %c0_i32, %c0_i32_0 : i32, i32
  }
  func.func @transform_4(%arg0: i32) -> (i32, i32) {
    %c0_i32 = arith.constant 0 : i32
    %c0_i32_0 = arith.constant 0 : i32
    %c0_i32_1 = arith.constant 0 : i32
    return %c0_i32, %c0_i32_0 : i32, i32
  }
  func.func @transform_5(%arg0: i32) -> (i32, i32) {
    %c0_i32 = arith.constant 0 : i32
    %c0_i32_0 = arith.constant 0 : i32
    %c0_i32_1 = arith.constant 0 : i32
    return %c0_i32, %c0_i32_0 : i32, i32
  }
  func.func @transform_6(%arg0: i32) -> (i32, i32, i32) {
    %c0_i32 = arith.constant 0 : i32
    %c0_i32_0 = arith.constant 0 : i32
    %c0_i32_1 = arith.constant 0 : i32
    return %arg0, %c0_i32, %c0_i32_0 : i32, i32, i32
  }
}

module attributes {stable_mosaic.version = 11 : i64} {
  func.func @_stage_kernel(%arg0: i32, %arg1: memref<1x34x544xf32, #tpu.memory_space<vmem>>, %arg2: memref<3x544x128xbf16, #tpu.memory_space<vmem>>, %arg3: memref<1x128xf32, #tpu.memory_space<vmem>>, %arg4: memref<1x128xf32, #tpu.memory_space<vmem>>, %arg5: memref<1x128xf32, #tpu.memory_space<vmem>>, %arg6: memref<2x128xf32, #tpu.memory_space<vmem>>, %arg7: memref<1x32x128xf32, #tpu.memory_space<vmem>>) attributes {dimension_semantics = [#tpu.dimension_semantics<parallel>], iteration_bounds = array<i64: 2>, scalar_prefetch = 0 : i64, scratch_operands = 0 : i64, tpu.core_type = #tpu.core_type<tc>, window_params = [{transform_indices = @transform_0, window_bounds = array<i64: 1, 34, 544>}, {pipeline_mode = #tpu.pipeline_mode<synchronous>, transform_indices = @transform_1, window_bounds = array<i64: 3, 544, 128>}, {pipeline_mode = #tpu.pipeline_mode<synchronous>, transform_indices = @transform_2, window_bounds = array<i64: 1, 128>}, {pipeline_mode = #tpu.pipeline_mode<synchronous>, transform_indices = @transform_3, window_bounds = array<i64: 1, 128>}, {pipeline_mode = #tpu.pipeline_mode<synchronous>, transform_indices = @transform_4, window_bounds = array<i64: 1, 128>}, {pipeline_mode = #tpu.pipeline_mode<synchronous>, transform_indices = @transform_5, window_bounds = array<i64: 2, 128>}, {transform_indices = @transform_6, window_bounds = array<i64: 1, 32, 128>}]} {
    %cst = arith.constant 0.000000e+00 : f32
    %0 = vector.broadcast %cst : f32 to vector<32x128xf32>
    %c0 = arith.constant 0 : index
    %c0_0 = arith.constant 0 : index
    %c0_1 = arith.constant 0 : index
    %1 = vector.load %arg1[%c0, %c0_0, %c0_1] : memref<1x34x544xf32, #tpu.memory_space<vmem>>, vector<1x32x544xf32>
    %2 = vector.shape_cast %1 : vector<1x32x544xf32> to vector<32x544xf32>
    %3 = arith.truncf %2 : vector<32x544xf32> to vector<32x544xbf16>
    %c0_2 = arith.constant 0 : index
    %c0_3 = arith.constant 0 : index
    %c0_4 = arith.constant 0 : index
    %4 = vector.load %arg2[%c0_2, %c0_3, %c0_4] : memref<3x544x128xbf16, #tpu.memory_space<vmem>>, vector<1x544x128xbf16>
    %5 = vector.shape_cast %4 : vector<1x544x128xbf16> to vector<544x128xbf16>
    %cst_5 = arith.constant dense<0.000000e+00> : vector<32x128xf32>
    %6 = tpu.matmul %3, %5, %cst_5 {dimension_numbers = #tpu.dot_dimension_numbers<[1], [0], [0], [1], [0, 0, 1, 1], [], []>} : vector<32x544xbf16>, vector<544x128xbf16>, vector<32x128xf32> -> vector<32x128xf32>
    %7 = arith.addf %0, %6 : vector<32x128xf32>
    %c0_6 = arith.constant 0 : index
    %c1 = arith.constant 1 : index
    %c0_7 = arith.constant 0 : index
    %8 = vector.load %arg1[%c0_6, %c1, %c0_7] : memref<1x34x544xf32, #tpu.memory_space<vmem>>, vector<1x32x544xf32>
    %9 = vector.shape_cast %8 : vector<1x32x544xf32> to vector<32x544xf32>
    %10 = arith.truncf %9 : vector<32x544xf32> to vector<32x544xbf16>
    %c1_8 = arith.constant 1 : index
    %c0_9 = arith.constant 0 : index
    %c0_10 = arith.constant 0 : index
    %11 = vector.load %arg2[%c1_8, %c0_9, %c0_10] : memref<3x544x128xbf16, #tpu.memory_space<vmem>>, vector<1x544x128xbf16>
    %12 = vector.shape_cast %11 : vector<1x544x128xbf16> to vector<544x128xbf16>
    %cst_11 = arith.constant dense<0.000000e+00> : vector<32x128xf32>
    %13 = tpu.matmul %10, %12, %cst_11 {dimension_numbers = #tpu.dot_dimension_numbers<[1], [0], [0], [1], [0, 0, 1, 1], [], []>} : vector<32x544xbf16>, vector<544x128xbf16>, vector<32x128xf32> -> vector<32x128xf32>
    %14 = arith.addf %7, %13 : vector<32x128xf32>
    %c0_12 = arith.constant 0 : index
    %c2 = arith.constant 2 : index
    %c0_13 = arith.constant 0 : index
    %15 = vector.load %arg1[%c0_12, %c2, %c0_13] : memref<1x34x544xf32, #tpu.memory_space<vmem>>, vector<1x32x544xf32>
    %16 = vector.shape_cast %15 : vector<1x32x544xf32> to vector<32x544xf32>
    %17 = arith.truncf %16 : vector<32x544xf32> to vector<32x544xbf16>
    %c2_14 = arith.constant 2 : index
    %c0_15 = arith.constant 0 : index
    %c0_16 = arith.constant 0 : index
    %18 = vector.load %arg2[%c2_14, %c0_15, %c0_16] : memref<3x544x128xbf16, #tpu.memory_space<vmem>>, vector<1x544x128xbf16>
    %19 = vector.shape_cast %18 : vector<1x544x128xbf16> to vector<544x128xbf16>
    %cst_17 = arith.constant dense<0.000000e+00> : vector<32x128xf32>
    %20 = tpu.matmul %17, %19, %cst_17 {dimension_numbers = #tpu.dot_dimension_numbers<[1], [0], [0], [1], [0, 0, 1, 1], [], []>} : vector<32x544xbf16>, vector<544x128xbf16>, vector<32x128xf32> -> vector<32x128xf32>
    %21 = arith.addf %14, %20 : vector<32x128xf32>
    %c0_18 = arith.constant 0 : index
    %c0_19 = arith.constant 0 : index
    %22 = vector.load %arg3[%c0_18, %c0_19] : memref<1x128xf32, #tpu.memory_space<vmem>>, vector<1x128xf32>
    %23 = vector.broadcast %22 : vector<1x128xf32> to vector<32x128xf32>
    %24 = arith.addf %21, %23 : vector<32x128xf32>
    %c0_20 = arith.constant 0 : index
    %c0_21 = arith.constant 0 : index
    %25 = vector.load %arg6[%c0_20, %c0_21] : memref<2x128xf32, #tpu.memory_space<vmem>>, vector<2x128xf32>
    %cst_22 = arith.constant dense<0.000000e+00> : vector<128xf32>
    %26 = vector.multi_reduction <add>, %24, %cst_22 [0] : vector<32x128xf32> to vector<128xf32>
    %27 = vector.shape_cast %26 : vector<128xf32> to vector<1x128xf32>
    %28 = arith.mulf %24, %24 : vector<32x128xf32>
    %cst_23 = arith.constant dense<0.000000e+00> : vector<128xf32>
    %29 = vector.multi_reduction <add>, %28, %cst_23 [0] : vector<32x128xf32> to vector<128xf32>
    %30 = vector.shape_cast %29 : vector<128xf32> to vector<1x128xf32>
    %31 = vector.broadcast %27 : vector<1x128xf32> to vector<2x128xf32>
    %32 = arith.mulf %25, %31 : vector<2x128xf32>
    %cst_24 = arith.constant dense<0.000000e+00> : vector<2xf32>
    %33 = vector.multi_reduction <add>, %32, %cst_24 [1] : vector<2x128xf32> to vector<2xf32>
    %34 = vector.shape_cast %33 : vector<2xf32> to vector<2x1xf32>
    %35 = vector.broadcast %30 : vector<1x128xf32> to vector<2x128xf32>
    %36 = arith.mulf %25, %35 : vector<2x128xf32>
    %cst_25 = arith.constant dense<0.000000e+00> : vector<2xf32>
    %37 = vector.multi_reduction <add>, %36, %cst_25 [1] : vector<2x128xf32> to vector<2xf32>
    %38 = vector.shape_cast %37 : vector<2xf32> to vector<2x1xf32>
    %cst_26 = arith.constant 2.048000e+03 : f32
    %39 = vector.broadcast %cst_26 : f32 to vector<2x1xf32>
    %40 = arith.divf %34, %39 : vector<2x1xf32>
    %cst_27 = arith.constant 2.048000e+03 : f32
    %41 = vector.broadcast %cst_27 : f32 to vector<2x1xf32>
    %42 = arith.divf %38, %41 : vector<2x1xf32>
    %43 = arith.mulf %40, %40 : vector<2x1xf32>
    %44 = arith.subf %42, %43 : vector<2x1xf32>
    %cst_28 = arith.constant 9.99999974E-6 : f32
    %45 = vector.broadcast %cst_28 : f32 to vector<2x1xf32>
    %46 = arith.addf %44, %45 : vector<2x1xf32>
    %47 = math.rsqrt %46 : vector<2x1xf32>
    %48 = vector.broadcast %40 : vector<2x1xf32> to vector<2x128xf32>
    %49 = arith.mulf %25, %48 : vector<2x128xf32>
    %cst_29 = arith.constant dense<0.000000e+00> : vector<128xf32>
    %50 = vector.multi_reduction <add>, %49, %cst_29 [0] : vector<2x128xf32> to vector<128xf32>
    %51 = vector.shape_cast %50 : vector<128xf32> to vector<1x128xf32>
    %52 = vector.broadcast %47 : vector<2x1xf32> to vector<2x128xf32>
    %53 = arith.mulf %25, %52 : vector<2x128xf32>
    %cst_30 = arith.constant dense<0.000000e+00> : vector<128xf32>
    %54 = vector.multi_reduction <add>, %53, %cst_30 [0] : vector<2x128xf32> to vector<128xf32>
    %55 = vector.shape_cast %54 : vector<128xf32> to vector<1x128xf32>
    %56 = vector.broadcast %51 : vector<1x128xf32> to vector<32x128xf32>
    %57 = arith.subf %24, %56 : vector<32x128xf32>
    %58 = vector.broadcast %55 : vector<1x128xf32> to vector<32x128xf32>
    %59 = arith.mulf %57, %58 : vector<32x128xf32>
    %c0_31 = arith.constant 0 : index
    %c0_32 = arith.constant 0 : index
    %60 = vector.load %arg4[%c0_31, %c0_32] : memref<1x128xf32, #tpu.memory_space<vmem>>, vector<1x128xf32>
    %61 = vector.broadcast %60 : vector<1x128xf32> to vector<32x128xf32>
    %62 = arith.mulf %59, %61 : vector<32x128xf32>
    %c0_33 = arith.constant 0 : index
    %c0_34 = arith.constant 0 : index
    %63 = vector.load %arg5[%c0_33, %c0_34] : memref<1x128xf32, #tpu.memory_space<vmem>>, vector<1x128xf32>
    %64 = vector.broadcast %63 : vector<1x128xf32> to vector<32x128xf32>
    %65 = arith.addf %62, %64 : vector<32x128xf32>
    %cst_35 = arith.constant 0.000000e+00 : f32
    %66 = vector.broadcast %cst_35 : f32 to vector<32x128xf32>
    %67 = arith.maximumf %65, %66 : vector<32x128xf32>
    %c0_36 = arith.constant 0 : index
    %c0_37 = arith.constant 0 : index
    %c0_38 = arith.constant 0 : index
    %68 = vector.load %arg7[%c0_36, %c0_37, %c0_38] : memref<1x32x128xf32, #tpu.memory_space<vmem>>, vector<1x32x128xf32>
    %69 = vector.shape_cast %68 : vector<1x32x128xf32> to vector<32x128xf32>
    %70 = vector.shape_cast %67 : vector<32x128xf32> to vector<1x32x128xf32>
    tpu.vector_store %arg7[%c0_36, %c0_37, %c0_38], %70 {strides = array<i32>} : memref<1x32x128xf32, #tpu.memory_space<vmem>>, vector<1x32x128xf32>,
    return
  }
  func.func @transform_0(%arg0: i32) -> (i32, i32, i32) {
    %c0_i32 = arith.constant 0 : i32
    %c0_i32_0 = arith.constant 0 : i32
    %c0_i32_1 = arith.constant 0 : i32
    return %arg0, %c0_i32, %c0_i32_0 : i32, i32, i32
  }
  func.func @transform_1(%arg0: i32) -> (i32, i32, i32) {
    %c0_i32 = arith.constant 0 : i32
    %c0_i32_0 = arith.constant 0 : i32
    %c0_i32_1 = arith.constant 0 : i32
    %c0_i32_2 = arith.constant 0 : i32
    return %c0_i32, %c0_i32_0, %c0_i32_1 : i32, i32, i32
  }
  func.func @transform_2(%arg0: i32) -> (i32, i32) {
    %c0_i32 = arith.constant 0 : i32
    %c0_i32_0 = arith.constant 0 : i32
    %c0_i32_1 = arith.constant 0 : i32
    return %c0_i32, %c0_i32_0 : i32, i32
  }
  func.func @transform_3(%arg0: i32) -> (i32, i32) {
    %c0_i32 = arith.constant 0 : i32
    %c0_i32_0 = arith.constant 0 : i32
    %c0_i32_1 = arith.constant 0 : i32
    return %c0_i32, %c0_i32_0 : i32, i32
  }
  func.func @transform_4(%arg0: i32) -> (i32, i32) {
    %c0_i32 = arith.constant 0 : i32
    %c0_i32_0 = arith.constant 0 : i32
    %c0_i32_1 = arith.constant 0 : i32
    return %c0_i32, %c0_i32_0 : i32, i32
  }
  func.func @transform_5(%arg0: i32) -> (i32, i32) {
    %c0_i32 = arith.constant 0 : i32
    %c0_i32_0 = arith.constant 0 : i32
    %c0_i32_1 = arith.constant 0 : i32
    return %c0_i32, %c0_i32_0 : i32, i32
  }
  func.func @transform_6(%arg0: i32) -> (i32, i32, i32) {
    %c0_i32 = arith.constant 0 : i32
    %c0_i32_0 = arith.constant 0 : i32
    %c0_i32_1 = arith.constant 0 : i32
    return %arg0, %c0_i32, %c0_i32_0 : i32, i32, i32
  }
}

module attributes {stable_mosaic.version = 11 : i64} {
  func.func @_stage_kernel(%arg0: i32, %arg1: memref<1x66x528xf32, #tpu.memory_space<vmem>>, %arg2: memref<3x528x256xbf16, #tpu.memory_space<vmem>>, %arg3: memref<1x256xf32, #tpu.memory_space<vmem>>, %arg4: memref<1x256xf32, #tpu.memory_space<vmem>>, %arg5: memref<1x256xf32, #tpu.memory_space<vmem>>, %arg6: memref<2x256xf32, #tpu.memory_space<vmem>>, %arg7: memref<1x64x256xf32, #tpu.memory_space<vmem>>) attributes {dimension_semantics = [#tpu.dimension_semantics<parallel>], iteration_bounds = array<i64: 2>, scalar_prefetch = 0 : i64, scratch_operands = 0 : i64, tpu.core_type = #tpu.core_type<tc>, window_params = [{transform_indices = @transform_0, window_bounds = array<i64: 1, 66, 528>}, {pipeline_mode = #tpu.pipeline_mode<synchronous>, transform_indices = @transform_1, window_bounds = array<i64: 3, 528, 256>}, {pipeline_mode = #tpu.pipeline_mode<synchronous>, transform_indices = @transform_2, window_bounds = array<i64: 1, 256>}, {pipeline_mode = #tpu.pipeline_mode<synchronous>, transform_indices = @transform_3, window_bounds = array<i64: 1, 256>}, {pipeline_mode = #tpu.pipeline_mode<synchronous>, transform_indices = @transform_4, window_bounds = array<i64: 1, 256>}, {pipeline_mode = #tpu.pipeline_mode<synchronous>, transform_indices = @transform_5, window_bounds = array<i64: 2, 256>}, {transform_indices = @transform_6, window_bounds = array<i64: 1, 64, 256>}]} {
    %cst = arith.constant 0.000000e+00 : f32
    %0 = vector.broadcast %cst : f32 to vector<64x256xf32>
    %c0 = arith.constant 0 : index
    %c0_0 = arith.constant 0 : index
    %c0_1 = arith.constant 0 : index
    %1 = vector.load %arg1[%c0, %c0_0, %c0_1] : memref<1x66x528xf32, #tpu.memory_space<vmem>>, vector<1x64x528xf32>
    %2 = vector.shape_cast %1 : vector<1x64x528xf32> to vector<64x528xf32>
    %3 = arith.truncf %2 : vector<64x528xf32> to vector<64x528xbf16>
    %c0_2 = arith.constant 0 : index
    %c0_3 = arith.constant 0 : index
    %c0_4 = arith.constant 0 : index
    %4 = vector.load %arg2[%c0_2, %c0_3, %c0_4] : memref<3x528x256xbf16, #tpu.memory_space<vmem>>, vector<1x528x256xbf16>
    %5 = vector.shape_cast %4 : vector<1x528x256xbf16> to vector<528x256xbf16>
    %cst_5 = arith.constant dense<0.000000e+00> : vector<64x256xf32>
    %6 = tpu.matmul %3, %5, %cst_5 {dimension_numbers = #tpu.dot_dimension_numbers<[1], [0], [0], [1], [0, 0, 1, 1], [], []>} : vector<64x528xbf16>, vector<528x256xbf16>, vector<64x256xf32> -> vector<64x256xf32>
    %7 = arith.addf %0, %6 : vector<64x256xf32>
    %c0_6 = arith.constant 0 : index
    %c1 = arith.constant 1 : index
    %c0_7 = arith.constant 0 : index
    %8 = vector.load %arg1[%c0_6, %c1, %c0_7] : memref<1x66x528xf32, #tpu.memory_space<vmem>>, vector<1x64x528xf32>
    %9 = vector.shape_cast %8 : vector<1x64x528xf32> to vector<64x528xf32>
    %10 = arith.truncf %9 : vector<64x528xf32> to vector<64x528xbf16>
    %c1_8 = arith.constant 1 : index
    %c0_9 = arith.constant 0 : index
    %c0_10 = arith.constant 0 : index
    %11 = vector.load %arg2[%c1_8, %c0_9, %c0_10] : memref<3x528x256xbf16, #tpu.memory_space<vmem>>, vector<1x528x256xbf16>
    %12 = vector.shape_cast %11 : vector<1x528x256xbf16> to vector<528x256xbf16>
    %cst_11 = arith.constant dense<0.000000e+00> : vector<64x256xf32>
    %13 = tpu.matmul %10, %12, %cst_11 {dimension_numbers = #tpu.dot_dimension_numbers<[1], [0], [0], [1], [0, 0, 1, 1], [], []>} : vector<64x528xbf16>, vector<528x256xbf16>, vector<64x256xf32> -> vector<64x256xf32>
    %14 = arith.addf %7, %13 : vector<64x256xf32>
    %c0_12 = arith.constant 0 : index
    %c2 = arith.constant 2 : index
    %c0_13 = arith.constant 0 : index
    %15 = vector.load %arg1[%c0_12, %c2, %c0_13] : memref<1x66x528xf32, #tpu.memory_space<vmem>>, vector<1x64x528xf32>
    %16 = vector.shape_cast %15 : vector<1x64x528xf32> to vector<64x528xf32>
    %17 = arith.truncf %16 : vector<64x528xf32> to vector<64x528xbf16>
    %c2_14 = arith.constant 2 : index
    %c0_15 = arith.constant 0 : index
    %c0_16 = arith.constant 0 : index
    %18 = vector.load %arg2[%c2_14, %c0_15, %c0_16] : memref<3x528x256xbf16, #tpu.memory_space<vmem>>, vector<1x528x256xbf16>
    %19 = vector.shape_cast %18 : vector<1x528x256xbf16> to vector<528x256xbf16>
    %cst_17 = arith.constant dense<0.000000e+00> : vector<64x256xf32>
    %20 = tpu.matmul %17, %19, %cst_17 {dimension_numbers = #tpu.dot_dimension_numbers<[1], [0], [0], [1], [0, 0, 1, 1], [], []>} : vector<64x528xbf16>, vector<528x256xbf16>, vector<64x256xf32> -> vector<64x256xf32>
    %21 = arith.addf %14, %20 : vector<64x256xf32>
    %c0_18 = arith.constant 0 : index
    %c0_19 = arith.constant 0 : index
    %22 = vector.load %arg3[%c0_18, %c0_19] : memref<1x256xf32, #tpu.memory_space<vmem>>, vector<1x256xf32>
    %23 = vector.broadcast %22 : vector<1x256xf32> to vector<64x256xf32>
    %24 = arith.addf %21, %23 : vector<64x256xf32>
    %c0_20 = arith.constant 0 : index
    %c0_21 = arith.constant 0 : index
    %25 = vector.load %arg6[%c0_20, %c0_21] : memref<2x256xf32, #tpu.memory_space<vmem>>, vector<2x256xf32>
    %cst_22 = arith.constant dense<0.000000e+00> : vector<256xf32>
    %26 = vector.multi_reduction <add>, %24, %cst_22 [0] : vector<64x256xf32> to vector<256xf32>
    %27 = vector.shape_cast %26 : vector<256xf32> to vector<1x256xf32>
    %28 = arith.mulf %24, %24 : vector<64x256xf32>
    %cst_23 = arith.constant dense<0.000000e+00> : vector<256xf32>
    %29 = vector.multi_reduction <add>, %28, %cst_23 [0] : vector<64x256xf32> to vector<256xf32>
    %30 = vector.shape_cast %29 : vector<256xf32> to vector<1x256xf32>
    %31 = vector.broadcast %27 : vector<1x256xf32> to vector<2x256xf32>
    %32 = arith.mulf %25, %31 : vector<2x256xf32>
    %cst_24 = arith.constant dense<0.000000e+00> : vector<2xf32>
    %33 = vector.multi_reduction <add>, %32, %cst_24 [1] : vector<2x256xf32> to vector<2xf32>
    %34 = vector.shape_cast %33 : vector<2xf32> to vector<2x1xf32>
    %35 = vector.broadcast %30 : vector<1x256xf32> to vector<2x256xf32>
    %36 = arith.mulf %25, %35 : vector<2x256xf32>
    %cst_25 = arith.constant dense<0.000000e+00> : vector<2xf32>
    %37 = vector.multi_reduction <add>, %36, %cst_25 [1] : vector<2x256xf32> to vector<2xf32>
    %38 = vector.shape_cast %37 : vector<2xf32> to vector<2x1xf32>
    %cst_26 = arith.constant 8.192000e+03 : f32
    %39 = vector.broadcast %cst_26 : f32 to vector<2x1xf32>
    %40 = arith.divf %34, %39 : vector<2x1xf32>
    %cst_27 = arith.constant 8.192000e+03 : f32
    %41 = vector.broadcast %cst_27 : f32 to vector<2x1xf32>
    %42 = arith.divf %38, %41 : vector<2x1xf32>
    %43 = arith.mulf %40, %40 : vector<2x1xf32>
    %44 = arith.subf %42, %43 : vector<2x1xf32>
    %cst_28 = arith.constant 9.99999974E-6 : f32
    %45 = vector.broadcast %cst_28 : f32 to vector<2x1xf32>
    %46 = arith.addf %44, %45 : vector<2x1xf32>
    %47 = math.rsqrt %46 : vector<2x1xf32>
    %48 = vector.broadcast %40 : vector<2x1xf32> to vector<2x256xf32>
    %49 = arith.mulf %25, %48 : vector<2x256xf32>
    %cst_29 = arith.constant dense<0.000000e+00> : vector<256xf32>
    %50 = vector.multi_reduction <add>, %49, %cst_29 [0] : vector<2x256xf32> to vector<256xf32>
    %51 = vector.shape_cast %50 : vector<256xf32> to vector<1x256xf32>
    %52 = vector.broadcast %47 : vector<2x1xf32> to vector<2x256xf32>
    %53 = arith.mulf %25, %52 : vector<2x256xf32>
    %cst_30 = arith.constant dense<0.000000e+00> : vector<256xf32>
    %54 = vector.multi_reduction <add>, %53, %cst_30 [0] : vector<2x256xf32> to vector<256xf32>
    %55 = vector.shape_cast %54 : vector<256xf32> to vector<1x256xf32>
    %56 = vector.broadcast %51 : vector<1x256xf32> to vector<64x256xf32>
    %57 = arith.subf %24, %56 : vector<64x256xf32>
    %58 = vector.broadcast %55 : vector<1x256xf32> to vector<64x256xf32>
    %59 = arith.mulf %57, %58 : vector<64x256xf32>
    %c0_31 = arith.constant 0 : index
    %c0_32 = arith.constant 0 : index
    %60 = vector.load %arg4[%c0_31, %c0_32] : memref<1x256xf32, #tpu.memory_space<vmem>>, vector<1x256xf32>
    %61 = vector.broadcast %60 : vector<1x256xf32> to vector<64x256xf32>
    %62 = arith.mulf %59, %61 : vector<64x256xf32>
    %c0_33 = arith.constant 0 : index
    %c0_34 = arith.constant 0 : index
    %63 = vector.load %arg5[%c0_33, %c0_34] : memref<1x256xf32, #tpu.memory_space<vmem>>, vector<1x256xf32>
    %64 = vector.broadcast %63 : vector<1x256xf32> to vector<64x256xf32>
    %65 = arith.addf %62, %64 : vector<64x256xf32>
    %cst_35 = arith.constant 0.000000e+00 : f32
    %66 = vector.broadcast %cst_35 : f32 to vector<64x256xf32>
    %67 = arith.maximumf %65, %66 : vector<64x256xf32>
    %c0_36 = arith.constant 0 : index
    %c0_37 = arith.constant 0 : index
    %c0_38 = arith.constant 0 : index
    %68 = vector.load %arg7[%c0_36, %c0_37, %c0_38] : memref<1x64x256xf32, #tpu.memory_space<vmem>>, vector<1x64x256xf32>
    %69 = vector.shape_cast %68 : vector<1x64x256xf32> to vector<64x256xf32>
    %70 = vector.shape_cast %67 : vector<64x256xf32> to vector<1x64x256xf32>
    tpu.vector_store %arg7[%c0_36, %c0_37, %c0_38], %70 {strides = array<i32>} : memref<1x64x256xf32, #tpu.memory_space<vmem>>, vector<1x64x256xf32>,
    return
  }
  func.func @transform_0(%arg0: i32) -> (i32, i32, i32) {
    %c0_i32 = arith.constant 0 : i32
    %c0_i32_0 = arith.constant 0 : i32
    %c0_i32_1 = arith.constant 0 : i32
    return %arg0, %c0_i32, %c0_i32_0 : i32, i32, i32
  }
  func.func @transform_1(%arg0: i32) -> (i32, i32, i32) {
    %c0_i32 = arith.constant 0 : i32
    %c0_i32_0 = arith.constant 0 : i32
    %c0_i32_1 = arith.constant 0 : i32
    %c0_i32_2 = arith.constant 0 : i32
    return %c0_i32, %c0_i32_0, %c0_i32_1 : i32, i32, i32
  }
  func.func @transform_2(%arg0: i32) -> (i32, i32) {
    %c0_i32 = arith.constant 0 : i32
    %c0_i32_0 = arith.constant 0 : i32
    %c0_i32_1 = arith.constant 0 : i32
    return %c0_i32, %c0_i32_0 : i32, i32
  }
  func.func @transform_3(%arg0: i32) -> (i32, i32) {
    %c0_i32 = arith.constant 0 : i32
    %c0_i32_0 = arith.constant 0 : i32
    %c0_i32_1 = arith.constant 0 : i32
    return %c0_i32, %c0_i32_0 : i32, i32
  }
  func.func @transform_4(%arg0: i32) -> (i32, i32) {
    %c0_i32 = arith.constant 0 : i32
    %c0_i32_0 = arith.constant 0 : i32
    %c0_i32_1 = arith.constant 0 : i32
    return %c0_i32, %c0_i32_0 : i32, i32
  }
  func.func @transform_5(%arg0: i32) -> (i32, i32) {
    %c0_i32 = arith.constant 0 : i32
    %c0_i32_0 = arith.constant 0 : i32
    %c0_i32_1 = arith.constant 0 : i32
    return %c0_i32, %c0_i32_0 : i32, i32
  }
  func.func @transform_6(%arg0: i32) -> (i32, i32, i32) {
    %c0_i32 = arith.constant 0 : i32
    %c0_i32_0 = arith.constant 0 : i32
    %c0_i32_1 = arith.constant 0 : i32
    return %arg0, %c0_i32, %c0_i32_0 : i32, i32, i32
  }
}

module attributes {stable_mosaic.version = 11 : i64} {
  func.func @_final_kernel(%arg0: i32, %arg1: memref<1x66x264xf32, #tpu.memory_space<vmem>>, %arg2: memref<3x264x192xf32, #tpu.memory_space<vmem>>, %arg3: memref<1x192xf32, #tpu.memory_space<vmem>>, %arg4: memref<1x64x192xf32, #tpu.memory_space<vmem>>) attributes {dimension_semantics = [#tpu.dimension_semantics<parallel>], iteration_bounds = array<i64: 2>, scalar_prefetch = 0 : i64, scratch_operands = 0 : i64, tpu.core_type = #tpu.core_type<tc>, window_params = [{transform_indices = @transform_0, window_bounds = array<i64: 1, 66, 264>}, {pipeline_mode = #tpu.pipeline_mode<synchronous>, transform_indices = @transform_1, window_bounds = array<i64: 3, 264, 192>}, {pipeline_mode = #tpu.pipeline_mode<synchronous>, transform_indices = @transform_2, window_bounds = array<i64: 1, 192>}, {transform_indices = @transform_3, window_bounds = array<i64: 1, 64, 192>}]} {
    %cst = arith.constant 0.000000e+00 : f32
    %0 = vector.broadcast %cst : f32 to vector<64x192xf32>
    %c0 = arith.constant 0 : index
    %c0_0 = arith.constant 0 : index
    %c0_1 = arith.constant 0 : index
    %1 = vector.load %arg1[%c0, %c0_0, %c0_1] : memref<1x66x264xf32, #tpu.memory_space<vmem>>, vector<1x64x264xf32>
    %2 = vector.shape_cast %1 : vector<1x64x264xf32> to vector<64x264xf32>
    %c0_2 = arith.constant 0 : index
    %c0_3 = arith.constant 0 : index
    %c0_4 = arith.constant 0 : index
    %3 = vector.load %arg2[%c0_2, %c0_3, %c0_4] : memref<3x264x192xf32, #tpu.memory_space<vmem>>, vector<1x264x192xf32>
    %4 = vector.shape_cast %3 : vector<1x264x192xf32> to vector<264x192xf32>
    %cst_5 = arith.constant dense<0.000000e+00> : vector<64x192xf32>
    %5 = tpu.matmul %2, %4, %cst_5 {dimension_numbers = #tpu.dot_dimension_numbers<[1], [0], [0], [1], [0, 0, 1, 1], [], []>} : vector<64x264xf32>, vector<264x192xf32>, vector<64x192xf32> -> vector<64x192xf32>
    %6 = arith.addf %0, %5 : vector<64x192xf32>
    %c0_6 = arith.constant 0 : index
    %c1 = arith.constant 1 : index
    %c0_7 = arith.constant 0 : index
    %7 = vector.load %arg1[%c0_6, %c1, %c0_7] : memref<1x66x264xf32, #tpu.memory_space<vmem>>, vector<1x64x264xf32>
    %8 = vector.shape_cast %7 : vector<1x64x264xf32> to vector<64x264xf32>
    %c1_8 = arith.constant 1 : index
    %c0_9 = arith.constant 0 : index
    %c0_10 = arith.constant 0 : index
    %9 = vector.load %arg2[%c1_8, %c0_9, %c0_10] : memref<3x264x192xf32, #tpu.memory_space<vmem>>, vector<1x264x192xf32>
    %10 = vector.shape_cast %9 : vector<1x264x192xf32> to vector<264x192xf32>
    %cst_11 = arith.constant dense<0.000000e+00> : vector<64x192xf32>
    %11 = tpu.matmul %8, %10, %cst_11 {dimension_numbers = #tpu.dot_dimension_numbers<[1], [0], [0], [1], [0, 0, 1, 1], [], []>} : vector<64x264xf32>, vector<264x192xf32>, vector<64x192xf32> -> vector<64x192xf32>
    %12 = arith.addf %6, %11 : vector<64x192xf32>
    %c0_12 = arith.constant 0 : index
    %c2 = arith.constant 2 : index
    %c0_13 = arith.constant 0 : index
    %13 = vector.load %arg1[%c0_12, %c2, %c0_13] : memref<1x66x264xf32, #tpu.memory_space<vmem>>, vector<1x64x264xf32>
    %14 = vector.shape_cast %13 : vector<1x64x264xf32> to vector<64x264xf32>
    %c2_14 = arith.constant 2 : index
    %c0_15 = arith.constant 0 : index
    %c0_16 = arith.constant 0 : index
    %15 = vector.load %arg2[%c2_14, %c0_15, %c0_16] : memref<3x264x192xf32, #tpu.memory_space<vmem>>, vector<1x264x192xf32>
    %16 = vector.shape_cast %15 : vector<1x264x192xf32> to vector<264x192xf32>
    %cst_17 = arith.constant dense<0.000000e+00> : vector<64x192xf32>
    %17 = tpu.matmul %14, %16, %cst_17 {dimension_numbers = #tpu.dot_dimension_numbers<[1], [0], [0], [1], [0, 0, 1, 1], [], []>} : vector<64x264xf32>, vector<264x192xf32>, vector<64x192xf32> -> vector<64x192xf32>
    %18 = arith.addf %12, %17 : vector<64x192xf32>
    %c0_18 = arith.constant 0 : index
    %c0_19 = arith.constant 0 : index
    %19 = vector.load %arg3[%c0_18, %c0_19] : memref<1x192xf32, #tpu.memory_space<vmem>>, vector<1x192xf32>
    %20 = vector.broadcast %19 : vector<1x192xf32> to vector<64x192xf32>
    %21 = arith.addf %18, %20 : vector<64x192xf32>
    %c0_20 = arith.constant 0 : index
    %c0_21 = arith.constant 0 : index
    %c0_22 = arith.constant 0 : index
    %22 = vector.load %arg4[%c0_20, %c0_21, %c0_22] : memref<1x64x192xf32, #tpu.memory_space<vmem>>, vector<1x64x192xf32>
    %23 = vector.shape_cast %22 : vector<1x64x192xf32> to vector<64x192xf32>
    %24 = vector.shape_cast %21 : vector<64x192xf32> to vector<1x64x192xf32>
    tpu.vector_store %arg4[%c0_20, %c0_21, %c0_22], %24 {strides = array<i32>} : memref<1x64x192xf32, #tpu.memory_space<vmem>>, vector<1x64x192xf32>,
    return
  }
  func.func @transform_0(%arg0: i32) -> (i32, i32, i32) {
    %c0_i32 = arith.constant 0 : i32
    %c0_i32_0 = arith.constant 0 : i32
    %c0_i32_1 = arith.constant 0 : i32
    return %arg0, %c0_i32, %c0_i32_0 : i32, i32, i32
  }
  func.func @transform_1(%arg0: i32) -> (i32, i32, i32) {
    %c0_i32 = arith.constant 0 : i32
    %c0_i32_0 = arith.constant 0 : i32
    %c0_i32_1 = arith.constant 0 : i32
    %c0_i32_2 = arith.constant 0 : i32
    return %c0_i32, %c0_i32_0, %c0_i32_1 : i32, i32, i32
  }
  func.func @transform_2(%arg0: i32) -> (i32, i32) {
    %c0_i32 = arith.constant 0 : i32
    %c0_i32_0 = arith.constant 0 : i32
    %c0_i32_1 = arith.constant 0 : i32
    return %c0_i32, %c0_i32_0 : i32, i32
  }
  func.func @transform_3(%arg0: i32) -> (i32, i32, i32) {
    %c0_i32 = arith.constant 0 : i32
    %c0_i32_0 = arith.constant 0 : i32
    %c0_i32_1 = arith.constant 0 : i32
    return %arg0, %c0_i32, %c0_i32_0 : i32, i32, i32
  }
}

</mosaic_0001>

<bundles_post_ra>
// kernel: decoder_forward_pallas.7
= control target key start
LH: loop header
LB: loop body
LE: loop exit
PB: predicated region body
PF: predicated region fallthrough
CT: control target
= control target key end

     0   :  { %s1275_s21 = smov 0   ;;  %s1470_s0 = inlined_call_operand.vmem [shape: f32[2,4,256], index: 0, kind: input, shape index: {}]   ;;  %s1471_s1 = inlined_call_operand.vmem [shape: bf16[3,256,64], index: 1, kind: input, shape index: {}]   ;;  %s1472_s2 = inlined_call_operand.vmem [shape: f32[1,64], index: 2, kind: input, shape index: {}]   ;;  %s1473_s3 = inlined_call_operand.vmem [shape: f32[1,64], index: 3, kind: input, shape index: {}]   ;;  %s1474_s4 = inlined_call_operand.vmem [shape: f32[1,64], index: 4, kind: input, shape index: {}]   ;;  %s1475_s5 = inlined_call_operand.vmem [shape: f32[8,64], index: 5, kind: input, shape index: {}]   ;;  %s1476_s6 = inlined_call_operand.vmem [shape: f32[2,2,64], index: 6, kind: output, shape index: {}]  }
   0x1 LB: > { %s900_s22 = sadd.s32 4294967295, %s1237_s21   ;;  %p904_p0 = scmp.ge.s32.totalorder %s1237_s21, 1  ;;  %s1237_s21 = sphi %s1275_s21, %s16_s21  }
   0x2   : > { %p212_p1 = scmp.lt.s32.totalorder %s1237_s21, 3 }
   0x4   : > { %p213_p2 = pnand %p904_p0, %p212_p1 }
   0x5   : > { %p241_p3 = scmp.lt.s32.totalorder (!%p213_p2), %s900_s22, 1 }
   0x6   : > { %216 = sbr.rel (%p213_p2) target bundleno = 396 (0x18c), region = 44 }
   0xb   : > { %v1190_v0 = vld [vmem:[%s1471_s1 + $0xb8] sm:$0xff]  ;;  %v1189_v2 = vld [vmem:[%s1471_s1 + $0xb0] sm:$0xff]  ;;  %s1478_s22 = smov (!%p241_p3, %s900_s22), 1  ;;  %v1188_v8 = vld [vmem:[%s1471_s1 + $0xa8] sm:$0xff]  ;;  %vm770_vm0 = vcmask 517120   ;;  %vm787_vm1 = vcmask 523264  }
   0xc   : > { %v1198_v1 = vld [vmem:[%s1471_s1 + $0xf8] sm:$0xff]  ;;  %445 = vmatpush.bf16.msra.mxu0 %v1190_v0  ;;  %v1197_v3 = vld [vmem:[%s1471_s1 + $0xf0] sm:$0xff]  ;;  %s1166_s15 = sshll.u32 %s1478_s22, 3  ;;  %v1196_v9 = vld [vmem:[%s1471_s1 + $0xe8] sm:$0xff]  ;;  %s907_s20 = sshll.u32 %s1478_s22, 1 }
   0xd   : > { %458 = vmatpush.bf16.msra.mxu1 %v1198_v1  ;;  %v1174_v4 = vld [vmem:[%s1471_s1 + $0x38] sm:$0xff]  ;;  %v1173_v6 = vld [vmem:[%s1471_s1 + $0x30] sm:$0xff]  ;;  %v1172_v10 = vld [vmem:[%s1471_s1 + $0x28] sm:$0xff]  ;;  %s1325_s28 = scalar_lea.vmem %s1470_s0, %s1166_s15  ;;  %s249_s25 = scalar_lea.vmem %s1476_s6, %s907_s20 }
   0xe   : > { %v1182_v5 = vld [vmem:[%s1471_s1 + $0x78] sm:$0xff]  ;;  %567 = vmatpush.bf16.msra.mxu2 %v1174_v4  ;;  %v1181_v7 = vld [vmem:[%s1471_s1 + $0x70] sm:$0xff]  ;;  %v1180_v11 = vld [vmem:[%s1471_s1 + $0x68] sm:$0xff] }
   0xf   : > { %580 = vmatpush.bf16.msra.mxu3 %v1182_v5  ;;  %v1187_v12 = vld [vmem:[%s1471_s1 + $0xa0] sm:$0xff]  ;;  %v1186_v17 = vld [vmem:[%s1471_s1 + $0x98] sm:$0xff]  ;;  %v1185_v22 = vld [vmem:[%s1471_s1 + $0x90] sm:$0xff] }
  0x10   : > { %446 = vmatpush.bf16.msra.mxu0 %v1189_v2  ;;  %v1195_v13 = vld [vmem:[%s1471_s1 + $0xe0] sm:$0xff]  ;;  %v1194_v18 = vld [vmem:[%s1471_s1 + $0xd8] sm:$0xff]  ;;  %v1193_v23 = vld [vmem:[%s1471_s1 + $0xd0] sm:$0xff] }
  0x11   : > { %459 = vmatpush.bf16.msra.mxu1 %v1197_v3  ;;  %v250_v14 = vld [vmem:[%s1325_s28] sm:$0x33]  ;;  %v1170_v19 = vld [vmem:[%s1471_s1 + $0x18] sm:$0xff]  ;;  %v1169_v26 = vld [vmem:[%s1471_s1 + $0x10] sm:$0xff] }
  0x12   : > { %568 = vmatpush.bf16.msra.mxu2 %v1173_v6  ;;  %v1171_v15 = vld [vmem:[%s1471_s1 + $0x20] sm:$0xff]  ;;  %252 = vst [vmem:[#allocation1] ss:$2 sm:$0xff] %v250_v14  ;;  %v1178_v20 = vld [vmem:[%s1471_s1 + $0x58] sm:$0xff]  ;;  %v1177_v27 = vld [vmem:[%s1471_s1 + $0x50] sm:$0xff] }
  0x13   : > { %581 = vmatpush.bf16.msra.mxu3 %v1181_v7  ;;  %v1179_v16 = vld [vmem:[%s1471_s1 + $0x60] sm:$0xff]  ;;  %v1184_v28 = vld [vmem:[%s1471_s1 + $0x88] sm:$0xff]  ;;  %v1206_v35 = vld [vmem:[%s1471_s1 + $0x138] sm:$0xff] }
  0x14   : > { %447 = vmatpush.bf16.msra.mxu0 %v1188_v8  ;;  %v291_v21 = vld [vmem:[%s1325_s28] sm:$0x66]  ;;  %v1192_v29 = vld [vmem:[%s1471_s1 + $0xc8] sm:$0xff]  ;;  %v1214_v36 = vld [vmem:[%s1471_s1 + $0x178] sm:$0xff] }
  0x15   : > { %460 = vmatpush.bf16.msra.mxu1 %v1196_v9  ;;  %v1168_v30 = vld [vmem:[%s1471_s1 + $0x8] sm:$0xff]  ;;  %v1183_v32 = vld [vmem:[%s1471_s1 + $0x80] sm:$0xff]  ;;  %v1205_v47 = vld [vmem:[%s1471_s1 + $0x130] sm:$0xff] }
  0x16   : > { %569 = vmatpush.bf16.msra.mxu2 %v1172_v10  ;;  %v1176_v31 = vld [vmem:[%s1471_s1 + $0x48] sm:$0xff]  ;;  %v593_v33 = vld [vmem:[%s1325_s28] sm:$0xcc]  ;;  %v1213_v48 = vld [vmem:[%s1471_s1 + $0x170] sm:$0xff] }
  0x17   : > { %582 = vmatpush.bf16.msra.mxu3 %v1180_v11  ;;  %v1191_v34 = vld [vmem:[%s1471_s1 + $0xc0] sm:$0xff]  ;;  %v1204_v55 = vld [vmem:[%s1471_s1 + $0x128] sm:$0xff]  ;;  %v1202_v59 = vld [vmem:[%s1471_s1 + $0x118] sm:$0xff] }
  0x18   : > { %448 = vmatpush.bf16.msra.mxu0 %v1187_v12  ;;  %v1167_v41 = vld [vmem:[%s1471_s1] sm:$0xff]  ;;  %v1212_v56 = vld [vmem:[%s1471_s1 + $0x168] sm:$0xff]  ;;  %v1210_v60 = vld [vmem:[%s1471_s1 + $0x158] sm:$0xff] }
  0x19   : > { %461 = vmatpush.bf16.msra.mxu1 %v1195_v13  ;;  %v253_v24 = vld.sshfl [vmem:[#allocation1] sm:$0xff pattern:$0x75316420]  ;;  %v254_v25 = vld.sshfl [vmem:[#allocation1 + $0x8] sm:$0xff pattern:$0x75316420] }
  0x1a   : > { %570 = vmatpush.bf16.msra.mxu2 %v1171_v15  ;;  %293 = vst [vmem:[#allocation1] ss:$2 sm:$0xff] %v291_v21  ;;  %v1175_v42 = vld [vmem:[%s1471_s1 + $0x40] sm:$0xff]  ;;  %v257_v51 = vpack.c.bf16 %v253_v24, %v253_v24  ;;  %v258_v52 = vpack.c.bf16 %v254_v25, %v254_v25  ;;  %v1201_v61 = vld [vmem:[%s1471_s1 + $0x110] sm:$0xff]  ;;  %v1200_v63 = vld [vmem:[%s1471_s1 + $0x108] sm:$0xff] }
  0x1b   : > { %583 = vmatpush.bf16.msra.mxu3 %v1179_v16  ;;  %v1203_v57 = vld [vmem:[%s1471_s1 + $0x120] sm:$0xff]  ;;  %v1209_v62 = vld [vmem:[%s1471_s1 + $0x150] sm:$0xff]  ;;  %v1208_v0 = vld [vmem:[%s1471_s1 + $0x148] sm:$0xff] }
  0x1c   : > { %449 = vmatpush.bf16.msra.mxu0 %v1186_v17  ;;  %v1211_v58 = vld [vmem:[%s1471_s1 + $0x160] sm:$0xff] }
  0x1d   : > { %462 = vmatpush.bf16.msra.mxu1 %v1194_v18  ;;  %v1199_v5 = vld [vmem:[%s1471_s1 + $0x100] sm:$0xff] }
  0x1e   : > { %571 = vmatpush.bf16.msra.mxu2 %v1170_v19  ;;  %v1207_v6 = vld [vmem:[%s1471_s1 + $0x140] sm:$0xff] }
  0x1f   : > { %584 = vmatpush.bf16.msra.mxu3 %v1178_v20 }
  0x20   : > { %450 = vmatpush.bf16.msra.mxu0 %v1185_v22 }
  0x21   : > { %463 = vmatpush.bf16.msra.mxu1 %v1193_v23  ;;  %v294_v37 = vld.sshfl [vmem:[#allocation1] sm:$0xff pattern:$0x75316420]  ;;  %v295_v38 = vld.sshfl [vmem:[#allocation1 + $0x8] sm:$0xff pattern:$0x75316420] }
  0x22   : > { %572 = vmatpush.bf16.msra.mxu2 %v1169_v26  ;;  %v298_v39 = vpack.c.bf16 %v294_v37, %v294_v37  ;;  %v299_v40 = vpack.c.bf16 %v295_v38, %v295_v38  ;;  %595 = vst [vmem:[#allocation1] ss:$2 sm:$0xff] %v593_v33  ;;  %v1224_v23 = vld [vmem:[%s1472_s2] ss:$0 sm:$0xff] }
  0x23   : > { %585 = vmatpush.bf16.msra.mxu3 %v1177_v27 }
  0x24   : > { %451 = vmatpush.bf16.msra.mxu0 %v1184_v28  ;;  %v334_v43 = vshrl.u32 %v298_v39, 16  ;;  %v336_v44 = vshll.u32 %v298_v39, 16  ;;  %v341_v45 = vshrl.u32 %v299_v40, 16  ;;  %v343_v46 = vshll.u32 %v299_v40, 16  ;;  %v769_v40 = vld [vmem:[%s1475_s5] sm:$0xff] }
  0x25   : > { %464 = vmatpush.bf16.msra.mxu1 %v1192_v29 }
  0x26   : > { %573 = vmatpush.bf16.msra.mxu2 %v1168_v30  ;;  %v338_v49 = vrot.slane %v336_v44, 1  ;;  %v345_v50 = vrot.slane %v343_v46, 1 }
  0x27   : > { %586 = vmatpush.bf16.msra.mxu3 %v1176_v31 }
  0x28   : > { %452 = vmatpush.bf16.msra.mxu0 %v1183_v32  ;;  %v339_v53 = vor.u32 %v338_v49, %v334_v43  ;;  %v346_v54 = vor.u32 %v345_v50, %v341_v45 }
  0x29   : > { %465 = vmatpush.bf16.msra.mxu1 %v1191_v34  ;;  %v596_v1 = vld.sshfl [vmem:[#allocation1] sm:$0xff pattern:$0x75316420]  ;;  %v597_v2 = vld.sshfl [vmem:[#allocation1 + $0x8] sm:$0xff pattern:$0x75316420] }
  0x2a   : > { %574 = vmatpush.bf16.msra.mxu2 %v1167_v41  ;;  %v600_v3 = vpack.c.bf16 %v596_v1, %v596_v1  ;;  %v601_v4 = vpack.c.bf16 %v597_v2, %v597_v2 }
  0x2b   : > { %587 = vmatpush.bf16.msra.mxu3 %v1175_v42  ;;  %453 = vmatmul.bf16.vlgmr.msra.gmra.mxu0 %v339_v53 }
  0x2c   : > { %737 = vmatpush.bf16.msrb.mxu0 %v1206_v35  ;;  %466 = vmatmul.bf16.vlgmr.msra.gmra.mxu1 %v346_v54  ;;  %v637_v7 = vrot.slane %v600_v3, 1  ;;  %v638_v8 = vrot.slane %v601_v4, 1 }
  0x2d   : > { %750 = vmatpush.bf16.msrb.mxu1 %v1214_v36  ;;  %575 = vmatmul.bf16.vlgmr.msra.gmra.mxu2 %v257_v51 }
  0x2e   : > { %588 = vmatmul.bf16.vlgmr.msra.gmra.mxu3 %v258_v52 }
  0x30   : > { %738 = vmatpush.bf16.msrb.mxu0 %v1205_v47 }
  0x31   : > { %751 = vmatpush.bf16.msrb.mxu1 %v1213_v48  ;;  %v1239_v48 = vmov 16.0  }
  0x32   : > { %1227 = vrcp.f32 %v1239_v48 }
  0x34   : > { %739 = vmatpush.bf16.msrb.mxu0 %v1204_v55 }
  0x35   : > { %752 = vmatpush.bf16.msrb.mxu1 %v1212_v56 }
  0x38   : > { %740 = vmatpush.bf16.msrb.mxu0 %v1203_v57  ;;  %v1228_v49 = vpop.eup %1227 }
  0x39   : > { %753 = vmatpush.bf16.msrb.mxu1 %v1211_v58  ;;  %v796_v50 = vmul.f32 16.0, %v1228_v49  ;;  %vm800_vm2 = vweird.f32 %v1228_v49 }
  0x3b   : > { %v797_v51 = vsub.f32 1.0, %v796_v50 }
  0x3c   : > { %741 = vmatpush.bf16.msrb.mxu0 %v1202_v59 }
  0x3d   : > { %754 = vmatpush.bf16.msrb.mxu1 %v1210_v60  ;;  %v798_v52 = vmul.f32 %v1228_v49, %v797_v51 }
  0x3f   : > { %v799_v53 = vadd.f32 %v1228_v49, %v798_v52 }
  0x40   : > { %742 = vmatpush.bf16.msrb.mxu0 %v1201_v61 }
  0x41   : > { %755 = vmatpush.bf16.msrb.mxu1 %v1209_v62  ;;  %v801_v55 = vsel %vm800_vm2, %v1228_v49, %v799_v53 }
  0x44   : > { %743 = vmatpush.bf16.msrb.mxu0 %v1200_v63 }
  0x45   : > { %756 = vmatpush.bf16.msrb.mxu1 %v1208_v0 }
  0x48   : > { %744 = vmatpush.bf16.msrb.mxu0 %v1199_v5 }
  0x49   : > { %757 = vmatpush.bf16.msrb.mxu1 %v1207_v6 }
  0x4b   : > { %745 = vmatmul.bf16.vlgmr.msrb.gmra.mxu0 %v637_v7 }
  0x4c   : > { %758 = vmatmul.bf16.vlgmr.msrb.gmra.mxu1 %v638_v8 }
  0xa8   : > { %v454_v9 = vpop.f32.mrf.mxu0 }
  0xa9   : > { %v467_v10 = vpop.f32.mrf.mxu1 }
  0xaa   : > { %v468_v17 = vadd.f32 %v467_v10, %v454_v9 }
  0xb0   : > { %v576_v11 = vpop.f32.mrf.mxu2  ;;  %v456_v13 = vpop.f32.mrf.mxu0 }
  0xb1   : > { %v589_v12 = vpop.f32.mrf.mxu3  ;;  %v469_v14 = vpop.f32.mrf.mxu1  ;;  %v577_v18 = vadd.f32 %v576_v11, %v468_v17 }
  0xb3   : > { %v590_v21 = vadd.f32 %v589_v12, %v577_v18 }
  0xb8   : > { %v578_v15 = vpop.f32.mrf.mxu2 }
  0xb9   : > { %v591_v16 = vpop.f32.mrf.mxu3 }
  0xc8   : > { %v746_v19 = vpop.f32.mrf.mxu0 }
  0xc9   : > { %v759_v20 = vpop.f32.mrf.mxu1 }
  0xca   : > { %v760_v22 = vadd.f32 %v759_v20, %v746_v19 }
  0xcc   : > { %v763_v24 = vadd.f32 %v760_v22, %v590_v21  ;;  %v1225_v21 = vld [vmem:[%s1473_s3] ss:$0 sm:$0xff] }
  0xce   : > { %v1441_v25 = vadd.f32 %v1224_v23, %v763_v24  ;;  %v1226_v23 = vld [vmem:[%s1474_s4] ss:$0 sm:$0xff] }
  0xd0   : > { %v778_v26 = vmul.f32 %v1441_v25, %v1441_v25  ;;  %v771_v27 = vsel %vm770_vm0, %v1441_v25, 0.0  ;;  %v748_v28 = vpop.f32.mrf.mxu0 }
  0xd1   : > { %v761_v29 = vpop.f32.mrf.mxu1  ;;  %v772_v30 = vrot.slane %v771_v27, 4 }
  0xd2   : > { %v779_v31 = vsel %vm770_vm0, %v778_v26, 0.0 }
  0xd3   : > { %v773_v32 = vadd.f32 %v772_v30, %v771_v27  ;;  %v780_v33 = vrot.slane %v779_v31, 4 }
  0xd5   : > { %v774_v34 = vrot.slane %v773_v32, 2  ;;  %v781_v35 = vadd.f32 %v780_v33, %v779_v31 }
  0xd7   : > { %v775_v36 = vadd.f32 %v774_v34, %v773_v32  ;;  %v782_v37 = vrot.slane %v781_v35, 2 }
  0xd9   : > { %v776_v38 = vrot.slane %v775_v36, 1  ;;  %v783_v39 = vadd.f32 %v782_v37, %v781_v35 }
  0xdb   : > { %v777_v41 = vadd.f32 %v776_v38, %v775_v36  ;;  %v784_v42 = vrot.slane %v783_v39, 1 }
  0xdd   : > { %v786_v43 = vmul.f32 %v777_v41, %v769_v40  ;;  %v785_v45 = vadd.f32 %v784_v42, %v783_v39 }
  0xdf   : > { %v788_v44 = vsel %vm787_vm1, %v786_v43, 0.0  ;;  %v791_v46 = vmul.f32 %v785_v45, %v769_v40 }
  0xe0   : > { %789 = vadd.xlane.f32.xlu0 %v788_v44 }
  0xe1   : > { %v792_v47 = vsel %vm787_vm1, %v791_v46, 0.0 }
  0xe8   : > { %793 = vadd.xlane.f32.xlu0 %v792_v47 }
 0x153   : > { %v790_v54 = vpop.xlane.xlu0 %789 }
 0x154   : > { %v802_v56 = vmul.f32 %v801_v55, %v790_v54 }
 0x156   : > { %v804_v58 = vmul.f32 %v802_v56, %v802_v56  ;;  %v817_v62 = vmul.f32 %v802_v56, %v769_v40 }
 0x158   : > { %v818_v63 = vsel %vm787_vm1, %v817_v62, 0.0 }
 0x159   : > { %v819_v1 = vrot.slane %v818_v63, 4 }
 0x15b   : > { %v794_v57 = vpop.xlane.xlu0 %793  ;;  %v820_v4 = vadd.f32 %v819_v1, %v818_v63 }
 0x15c   : > { %v803_v59 = vmul.f32 %v801_v55, %v794_v57 }
 0x15d   : > { %v821_v7 = vrot.slane %v820_v4, 2 }
 0x15e   : > { %v805_v60 = vsub.f32 %v803_v59, %v804_v58 }
 0x15f   : > { %v822_v11 = vadd.f32 %v821_v7, %v820_v4 }
 0x160   : > { %v806_v61 = vadd.f32 1e-05, %v805_v60 }
 0x161   : > { %v823_v14 = vrot.slane %v822_v11, 1 }
 0x162   : > { %1229 = vrsqrt.f32 %v806_v61  ;;  %vm813_vm4 = vweird.f32 %v806_v61 }
 0x163   : > { %v824_v17 = vadd.f32 %v823_v14, %v822_v11 }
 0x165   : > { %v833_v20 = vsub.f32 %v1441_v25, %v824_v17 }
 0x168   : > { %v1230_v0 = vpop.eup %1229 }
 0x169   : > { %v808_v2 = vmul.f32 %v1230_v0, %v806_v61  ;;  %vm814_vm3 = vweird.f32 %v1230_v0 }
 0x16a   : > { %vm815_vm5 = vmor %vm813_vm4, %vm814_vm3 }
 0x16b   : > { %v809_v3 = vmul.f32 %v1230_v0, %v808_v2 }
 0x16d   : > { %v810_v5 = vmul.f32 0.5, %v809_v3 }
 0x16f   : > { %v811_v6 = vsub.f32 1.5, %v810_v5 }
 0x171   : > { %v812_v8 = vmul.f32 %v1230_v0, %v811_v6 }
 0x173   : > { %v816_v9 = vsel %vm815_vm5, %v1230_v0, %v812_v8 }
 0x174   : > { %v825_v10 = vmul.f32 %v816_v9, %v769_v40 }
 0x176   : > { %v826_v12 = vsel %vm787_vm1, %v825_v10, 0.0 }
 0x177   : > { %v827_v13 = vrot.slane %v826_v12, 4 }
 0x179   : > { %v828_v15 = vadd.f32 %v827_v13, %v826_v12 }
 0x17b   : > { %v829_v16 = vrot.slane %v828_v15, 2 }
 0x17d   : > { %v830_v18 = vadd.f32 %v829_v16, %v828_v15 }
 0x17f   : > { %v831_v19 = vrot.slane %v830_v18, 1 }
 0x181   : > { %v832_v22 = vadd.f32 %v831_v19, %v830_v18 }
 0x183   : > { %v834_v24 = vmul.f32 %v833_v20, %v832_v22 }
 0x185   : > { %v839_v26 = vmul.f32 %v1225_v21, %v834_v24 }
 0x187   : > { %v844_v27 = vadd.f32 %v1226_v23, %v839_v26 }
 0x189   : > { %v845_v28 = vmax.f32 %v844_v27, 0.0 }
 0x18b   : > { %846 = vst.msk [vmem:[%s249_s25] sm:$0x3] %vm770_vm0, %v845_v28 }
 0x18c PF: > { %s16_s21 = sadd.s32 1, %s1237_s21  }
 0x18d   : > { %p13_p4 = scmp.ge.s32.totalorder %s16_s21, 4  }
 0x18f   :  { %15 = sbr.rel (!%p13_p4) target bundleno = 1 (0x1), region = 76 }

// kernel: decoder_forward_pallas.8
= control target key start
LH: loop header
LB: loop body
LE: loop exit
PB: predicated region body
PF: predicated region fallthrough
CT: control target
= control target key end

     0   :  { %s1658_s21 = smov 0   ;;  %s1931_s0 = inlined_call_operand.vmem [shape: f32[2,6,384], index: 0, kind: input, shape index: {}]   ;;  %s1932_s1 = inlined_call_operand.vmem [shape: bf16[3,384,64], index: 1, kind: input, shape index: {}]   ;;  %s1933_s2 = inlined_call_operand.vmem [shape: f32[1,64], index: 2, kind: input, shape index: {}]   ;;  %s1934_s3 = inlined_call_operand.vmem [shape: f32[1,64], index: 3, kind: input, shape index: {}]   ;;  %s1935_s4 = inlined_call_operand.vmem [shape: f32[1,64], index: 4, kind: input, shape index: {}]   ;;  %s1936_s5 = inlined_call_operand.vmem [shape: f32[4,64], index: 5, kind: input, shape index: {}]   ;;  %s1937_s6 = inlined_call_operand.vmem [shape: f32[2,4,64], index: 6, kind: output, shape index: {}]  }
   0x1 LB: > { %s1132_s22 = sadd.s32 4294967295, %s1620_s21   ;;  %p1136_p0 = scmp.ge.s32.totalorder %s1620_s21, 1  ;;  %s1620_s21 = sphi %s1658_s21, %s16_s21  }
   0x2   : > { %p212_p1 = scmp.lt.s32.totalorder %s1620_s21, 3 }
   0x4   : > { %p213_p2 = pnand %p1136_p0, %p212_p1 }
   0x5   : > { %p241_p3 = scmp.lt.s32.totalorder (!%p213_p2), %s1132_s22, 1 }
   0x6   : > { %216 = sbr.rel (%p213_p2) target bundleno = 427 (0x1ab), region = 44 }
   0xb   : > { %v1556_v0 = vld [vmem:[%s1932_s1 + $0xf8] sm:$0xff]  ;;  %v1555_v2 = vld [vmem:[%s1932_s1 + $0xf0] sm:$0xff]  ;;  %s1939_s22 = smov (!%p241_p3, %s1132_s22), 1  ;;  %v1554_v8 = vld [vmem:[%s1932_s1 + $0xe8] sm:$0xff]  ;;  %vm1003_vm0 = vcmask 519168  }
   0xc   : > { %v1564_v1 = vld [vmem:[%s1932_s1 + $0x138] sm:$0xff]  ;;  %527 = vmatpush.bf16.msra.mxu0 %v1556_v0  ;;  %v1563_v3 = vld [vmem:[%s1932_s1 + $0x130] sm:$0xff]  ;;  %v1562_v9 = vld [vmem:[%s1932_s1 + $0x128] sm:$0xff]  ;;  %s1597_s25 = smul.u32 24, %s1939_s22  ;;  %s1138_s29 = sshll.u32 %s1939_s22, 2 }
   0xd   : > { %540 = vmatpush.bf16.msra.mxu1 %v1564_v1  ;;  %v1572_v4 = vld [vmem:[%s1932_s1 + $0x178] sm:$0xff]  ;;  %v1571_v6 = vld [vmem:[%s1932_s1 + $0x170] sm:$0xff]  ;;  %v1570_v10 = vld [vmem:[%s1932_s1 + $0x168] sm:$0xff]  ;;  %s249_s8 = scalar_lea.vmem %s1937_s6, %s1138_s29 }
   0xe   : > { %v1532_v5 = vld [vmem:[%s1932_s1 + $0x38] sm:$0xff]  ;;  %553 = vmatpush.bf16.msra.mxu2 %v1572_v4  ;;  %v1531_v7 = vld [vmem:[%s1932_s1 + $0x30] sm:$0xff]  ;;  %v1530_v11 = vld [vmem:[%s1932_s1 + $0x28] sm:$0xff]  ;;  %s1720_s12 = scalar_lea.vmem %s1931_s0, %s1597_s25 }
   0xf   : > { %710 = vmatpush.bf16.msra.mxu3 %v1532_v5  ;;  %v1553_v12 = vld [vmem:[%s1932_s1 + $0xe0] sm:$0xff]  ;;  %v1552_v16 = vld [vmem:[%s1932_s1 + $0xd8] sm:$0xff]  ;;  %v305_v20 = vld [vmem:[%s1720_s12 + $0x8] sm:$0x1e] }
  0x10   : > { %528 = vmatpush.bf16.msra.mxu0 %v1555_v2  ;;  %v1561_v13 = vld [vmem:[%s1932_s1 + $0x120] sm:$0xff]  ;;  %v1560_v17 = vld [vmem:[%s1932_s1 + $0x118] sm:$0xff]  ;;  %v306_v22 = vld [vmem:[%s1720_s12 + $0x10] sm:$0x1e]  ;;  %v308_v26 = vpack.c.bf16 %v305_v20, %v305_v20 }
  0x11   : > { %541 = vmatpush.bf16.msra.mxu1 %v1563_v3  ;;  %v1569_v14 = vld [vmem:[%s1932_s1 + $0x160] sm:$0xff]  ;;  %v1568_v18 = vld [vmem:[%s1932_s1 + $0x158] sm:$0xff]  ;;  %v1551_v23 = vld [vmem:[%s1932_s1 + $0xd0] sm:$0xff]  ;;  %v309_v29 = vpack.c.bf16 %v306_v22, %v306_v22 }
  0x12   : > { %554 = vmatpush.bf16.msra.mxu2 %v1571_v6  ;;  %v1529_v15 = vld [vmem:[%s1932_s1 + $0x20] sm:$0xff]  ;;  %v1528_v21 = vld [vmem:[%s1932_s1 + $0x18] sm:$0xff]  ;;  %v1559_v24 = vld [vmem:[%s1932_s1 + $0x110] sm:$0xff]  ;;  %v369_v33 = vshll.u32 %v308_v26, 16  ;;  %v367_v41 = vshrl.u32 %v308_v26, 16 }
  0x13   : > { %711 = vmatpush.bf16.msra.mxu3 %v1531_v7  ;;  %v304_v19 = vld [vmem:[%s1720_s12] sm:$0x1e]  ;;  %v1567_v27 = vld [vmem:[%s1932_s1 + $0x150] sm:$0xff]  ;;  %v1550_v30 = vld [vmem:[%s1932_s1 + $0xc8] sm:$0xff]  ;;  %v376_v36 = vshll.u32 %v309_v29, 16  ;;  %v374_v47 = vshrl.u32 %v309_v29, 16 }
  0x14   : > { %529 = vmatpush.bf16.msra.mxu0 %v1554_v8  ;;  %v307_v25 = vpack.c.bf16 %v304_v19, %v304_v19  ;;  %v1527_v28 = vld [vmem:[%s1932_s1 + $0x10] sm:$0xff]  ;;  %v1558_v31 = vld [vmem:[%s1932_s1 + $0x108] sm:$0xff]  ;;  %v1549_v37 = vld [vmem:[%s1932_s1 + $0xc0] sm:$0xff]  ;;  %v371_v42 = vrot.slane %v369_v33, 1 }
  0x15   : > { %542 = vmatpush.bf16.msra.mxu1 %v1562_v9  ;;  %v1566_v34 = vld [vmem:[%s1932_s1 + $0x148] sm:$0xff]  ;;  %v1557_v38 = vld [vmem:[%s1932_s1 + $0x100] sm:$0xff]  ;;  %v1540_v43 = vld [vmem:[%s1932_s1 + $0x78] sm:$0xff]  ;;  %v378_v48 = vrot.slane %v376_v36, 1 }
  0x16   : > { %555 = vmatpush.bf16.msra.mxu2 %v1570_v10  ;;  %v362_v32 = vshll.u32 %v307_v25, 16  ;;  %v1526_v35 = vld [vmem:[%s1932_s1 + $0x8] sm:$0xff]  ;;  %v360_v39 = vshrl.u32 %v307_v25, 16  ;;  %v1548_v44 = vld [vmem:[%s1932_s1 + $0xb8] sm:$0xff]  ;;  %v1565_v45 = vld [vmem:[%s1932_s1 + $0x140] sm:$0xff]  ;;  %v372_v53 = vor.u32 %v371_v42, %v367_v41 }
  0x17   : > { %712 = vmatpush.bf16.msra.mxu3 %v1530_v11  ;;  %v1525_v46 = vld [vmem:[%s1932_s1] sm:$0xff]  ;;  %v1580_v49 = vld [vmem:[%s1932_s1 + $0x1b8] sm:$0xff]  ;;  %v1539_v54 = vld [vmem:[%s1932_s1 + $0x70] sm:$0xff]  ;;  %v379_v56 = vor.u32 %v378_v48, %v374_v47 }
  0x18   : > { %530 = vmatpush.bf16.msra.mxu0 %v1553_v12  ;;  %v364_v40 = vrot.slane %v362_v32, 1  ;;  %v1588_v50 = vld [vmem:[%s1932_s1 + $0x1f8] sm:$0xff]  ;;  %v250_v51 = vld [vmem:[%s1720_s12] sm:$0xf]  ;;  %v1547_v55 = vld [vmem:[%s1932_s1 + $0xb0] sm:$0xff] }
  0x19   : > { %543 = vmatpush.bf16.msra.mxu1 %v1561_v13  ;;  %v253_v57 = vpack.c.bf16 %v250_v51, %v250_v51  ;;  %v1579_v58 = vld [vmem:[%s1932_s1 + $0x1b0] sm:$0xff]  ;;  %v1538_v60 = vld [vmem:[%s1932_s1 + $0x68] sm:$0xff]  ;;  %v1537_v0 = vld [vmem:[%s1932_s1 + $0x60] sm:$0xff] }
  0x1a   : > { %556 = vmatpush.bf16.msra.mxu2 %v1569_v14  ;;  %v365_v52 = vor.u32 %v364_v40, %v360_v39  ;;  %v1587_v59 = vld [vmem:[%s1932_s1 + $0x1f0] sm:$0xff]  ;;  %v1546_v61 = vld [vmem:[%s1932_s1 + $0xa8] sm:$0xff]  ;;  %v1545_v1 = vld [vmem:[%s1932_s1 + $0xa0] sm:$0xff] }
  0x1b   : > { %713 = vmatpush.bf16.msra.mxu3 %v1529_v15  ;;  %v1578_v62 = vld [vmem:[%s1932_s1 + $0x1a8] sm:$0xff]  ;;  %v1577_v2 = vld [vmem:[%s1932_s1 + $0x1a0] sm:$0xff]  ;;  %v1536_v4 = vld [vmem:[%s1932_s1 + $0x58] sm:$0xff] }
  0x1c   : > { %531 = vmatpush.bf16.msra.mxu0 %v1552_v16  ;;  %v1586_v63 = vld [vmem:[%s1932_s1 + $0x1e8] sm:$0xff]  ;;  %v1585_v3 = vld [vmem:[%s1932_s1 + $0x1e0] sm:$0xff]  ;;  %v1544_v5 = vld [vmem:[%s1932_s1 + $0x98] sm:$0xff] }
  0x1d   : > { %544 = vmatpush.bf16.msra.mxu1 %v1560_v17  ;;  %v1576_v6 = vld [vmem:[%s1932_s1 + $0x198] sm:$0xff]  ;;  %v1535_v8 = vld [vmem:[%s1932_s1 + $0x50] sm:$0xff]  ;;  %v1534_v12 = vld [vmem:[%s1932_s1 + $0x48] sm:$0xff] }
  0x1e   : > { %557 = vmatpush.bf16.msra.mxu2 %v1568_v18  ;;  %v1584_v7 = vld [vmem:[%s1932_s1 + $0x1d8] sm:$0xff]  ;;  %v1543_v9 = vld [vmem:[%s1932_s1 + $0x90] sm:$0xff]  ;;  %v1542_v13 = vld [vmem:[%s1932_s1 + $0x88] sm:$0xff] }
  0x1f   : > { %714 = vmatpush.bf16.msra.mxu3 %v1528_v21  ;;  %v1575_v10 = vld [vmem:[%s1932_s1 + $0x190] sm:$0xff]  ;;  %v1574_v14 = vld [vmem:[%s1932_s1 + $0x188] sm:$0xff]  ;;  %v749_v16 = vld [vmem:[%s1720_s12] sm:$0x3c] }
  0x20   : > { %532 = vmatpush.bf16.msra.mxu0 %v1551_v23  ;;  %v1583_v11 = vld [vmem:[%s1932_s1 + $0x1d0] sm:$0xff]  ;;  %v1582_v15 = vld [vmem:[%s1932_s1 + $0x1c8] sm:$0xff]  ;;  %v1533_v17 = vld [vmem:[%s1932_s1 + $0x40] sm:$0xff]  ;;  %v752_v23 = vpack.c.bf16 %v749_v16, %v749_v16 }
  0x21   : > { %545 = vmatpush.bf16.msra.mxu1 %v1559_v24  ;;  %v750_v18 = vld [vmem:[%s1720_s12 + $0x8] sm:$0x3c]  ;;  %v1541_v19 = vld [vmem:[%s1932_s1 + $0x80] sm:$0xff]  ;;  %v252_v21 = vld [vmem:[%s1720_s12 + $0x10] sm:$0xf] }
  0x22   : > { %558 = vmatpush.bf16.msra.mxu2 %v1567_v27  ;;  %v251_v20 = vld [vmem:[%s1720_s12 + $0x8] sm:$0xf]  ;;  %v1596_v22 = vld [vmem:[%s1932_s1 + $0x238] sm:$0xff]  ;;  %v1573_v24 = vld [vmem:[%s1932_s1 + $0x180] sm:$0xff]  ;;  %v753_v26 = vpack.c.bf16 %v750_v18, %v750_v18 }
  0x23   : > { %715 = vmatpush.bf16.msra.mxu3 %v1527_v28  ;;  %v1581_v25 = vld [vmem:[%s1932_s1 + $0x1c0] sm:$0xff]  ;;  %v254_v27 = vpack.c.bf16 %v251_v20, %v251_v20  ;;  %v255_v28 = vpack.c.bf16 %v252_v21, %v252_v21  ;;  %v1595_v29 = vld [vmem:[%s1932_s1 + $0x230] sm:$0xff]  ;;  %v1594_v32 = vld [vmem:[%s1932_s1 + $0x228] sm:$0xff] }
  0x24   : > { %533 = vmatpush.bf16.msra.mxu0 %v1550_v30  ;;  %v807_v30 = vrot.slane %v752_v23, 1  ;;  %v1593_v33 = vld [vmem:[%s1932_s1 + $0x220] sm:$0xff]  ;;  %v1590_v36 = vld [vmem:[%s1932_s1 + $0x208] sm:$0xff] }
  0x25   : > { %546 = vmatpush.bf16.msra.mxu1 %v1558_v31  ;;  %v808_v31 = vrot.slane %v753_v26, 1  ;;  %v1589_v39 = vld [vmem:[%s1932_s1 + $0x200] sm:$0xff] }
  0x26   : > { %559 = vmatpush.bf16.msra.mxu2 %v1566_v34  ;;  %v1592_v34 = vld [vmem:[%s1932_s1 + $0x218] sm:$0xff] }
  0x27   : > { %716 = vmatpush.bf16.msra.mxu3 %v1526_v35  ;;  %v1591_v35 = vld [vmem:[%s1932_s1 + $0x210] sm:$0xff] }
  0x28   : > { %534 = vmatpush.bf16.msra.mxu0 %v1549_v37  ;;  %v751_v37 = vld [vmem:[%s1720_s12 + $0x10] sm:$0x3c] }
  0x29   : > { %547 = vmatpush.bf16.msra.mxu1 %v1557_v38  ;;  %v754_v38 = vpack.c.bf16 %v751_v37, %v751_v37 }
  0x2a   : > { %560 = vmatpush.bf16.msra.mxu2 %v1565_v45 }
  0x2b   : > { %717 = vmatpush.bf16.msra.mxu3 %v1525_v46  ;;  %535 = vmatmul.bf16.vlgmr.msra.gmra.mxu0 %v365_v52  ;;  %v809_v40 = vrot.slane %v754_v38, 1 }
  0x2c   : > { %723 = vmatpush.bf16.msrb.mxu0 %v1540_v43  ;;  %548 = vmatmul.bf16.vlgmr.msra.gmra.mxu1 %v372_v53 }
  0x2d   : > { %736 = vmatpush.bf16.msrb.mxu1 %v1548_v44  ;;  %561 = vmatmul.bf16.vlgmr.msra.gmra.mxu2 %v379_v56 }
  0x2e   : > { %957 = vmatpush.bf16.msrb.mxu2 %v1580_v49  ;;  %718 = vmatmul.bf16.vlgmr.msra.gmra.mxu3 %v253_v57 }
  0x2f   : > { %970 = vmatpush.bf16.msrb.mxu3 %v1588_v50 }
  0x30   : > { %724 = vmatpush.bf16.msrb.mxu0 %v1539_v54 }
  0x31   : > { %737 = vmatpush.bf16.msrb.mxu1 %v1547_v55 }
  0x32   : > { %958 = vmatpush.bf16.msrb.mxu2 %v1579_v58 }
  0x33   : > { %971 = vmatpush.bf16.msrb.mxu3 %v1587_v59 }
  0x34   : > { %725 = vmatpush.bf16.msrb.mxu0 %v1538_v60 }
  0x35   : > { %738 = vmatpush.bf16.msrb.mxu1 %v1546_v61 }
  0x36   : > { %959 = vmatpush.bf16.msrb.mxu2 %v1578_v62 }
  0x37   : > { %972 = vmatpush.bf16.msrb.mxu3 %v1586_v63 }
  0x38   : > { %726 = vmatpush.bf16.msrb.mxu0 %v1537_v0 }
  0x39   : > { %739 = vmatpush.bf16.msrb.mxu1 %v1545_v1  ;;  %v1607_v1 = vld [vmem:[%s1933_s2] ss:$0 sm:$0xff] }
  0x3a   : > { %960 = vmatpush.bf16.msrb.mxu2 %v1577_v2 }
  0x3b   : > { %973 = vmatpush.bf16.msrb.mxu3 %v1585_v3 }
  0x3c   : > { %727 = vmatpush.bf16.msrb.mxu0 %v1536_v4 }
  0x3d   : > { %740 = vmatpush.bf16.msrb.mxu1 %v1544_v5 }
  0x3e   : > { %961 = vmatpush.bf16.msrb.mxu2 %v1576_v6 }
  0x3f   : > { %974 = vmatpush.bf16.msrb.mxu3 %v1584_v7 }
  0x40   : > { %728 = vmatpush.bf16.msrb.mxu0 %v1535_v8 }
  0x41   : > { %741 = vmatpush.bf16.msrb.mxu1 %v1543_v9 }
  0x42   : > { %962 = vmatpush.bf16.msrb.mxu2 %v1575_v10 }
  0x43   : > { %975 = vmatpush.bf16.msrb.mxu3 %v1583_v11 }
  0x44   : > { %729 = vmatpush.bf16.msrb.mxu0 %v1534_v12 }
  0x45   : > { %742 = vmatpush.bf16.msrb.mxu1 %v1542_v13 }
  0x46   : > { %963 = vmatpush.bf16.msrb.mxu2 %v1574_v14 }
  0x47   : > { %976 = vmatpush.bf16.msrb.mxu3 %v1582_v15 }
  0x48   : > { %730 = vmatpush.bf16.msrb.mxu0 %v1533_v17  ;;  %v1002_v17 = vld [vmem:[%s1936_s5] sm:$0xf] }
  0x49   : > { %743 = vmatpush.bf16.msrb.mxu1 %v1541_v19 }
  0x4a   : > { %964 = vmatpush.bf16.msrb.mxu2 %v1573_v24 }
  0x4b   : > { %977 = vmatpush.bf16.msrb.mxu3 %v1581_v25  ;;  %731 = vmatmul.bf16.vlgmr.msrb.gmra.mxu0 %v254_v27  ;;  %v1622_v25 = vmov 64.0  }
  0x4c   : > { %983 = vmatpush.bf16.msra.mxu0 %v1596_v22  ;;  %744 = vmatmul.bf16.vlgmr.msrb.gmra.mxu1 %v255_v28  ;;  %1610 = vrcp.f32 %v1622_v25 }
  0x4d   : > { %965 = vmatmul.bf16.vlgmr.msrb.gmra.mxu2 %v807_v30 }
  0x4e   : > { %978 = vmatmul.bf16.vlgmr.msrb.gmra.mxu3 %v808_v31 }
  0x50   : > { %984 = vmatpush.bf16.msra.mxu0 %v1595_v29 }
  0x52   : > { %v1611_v26 = vpop.eup %1610 }
  0x53   : > { %v1028_v27 = vmul.f32 64.0, %v1611_v26  ;;  %vm1032_vm1 = vweird.f32 %v1611_v26 }
  0x54   : > { %985 = vmatpush.bf16.msra.mxu0 %v1594_v32 }
  0x55   : > { %v1029_v28 = vsub.f32 1.0, %v1028_v27 }
  0x57   : > { %v1030_v29 = vmul.f32 %v1611_v26, %v1029_v28 }
  0x58   : > { %986 = vmatpush.bf16.msra.mxu0 %v1593_v33 }
  0x59   : > { %v1031_v30 = vadd.f32 %v1611_v26, %v1030_v29 }
  0x5b   : > { %v1033_v32 = vsel %vm1032_vm1, %v1611_v26, %v1031_v30 }
  0x5c   : > { %987 = vmatpush.bf16.msra.mxu0 %v1592_v34 }
  0x60   : > { %988 = vmatpush.bf16.msra.mxu0 %v1591_v35 }
  0x64   : > { %989 = vmatpush.bf16.msra.mxu0 %v1590_v36 }
  0x68   : > { %990 = vmatpush.bf16.msra.mxu0 %v1589_v39 }
  0x6b   : > { %991 = vmatmul.bf16.vlgmr.msra.gmra.mxu0 %v809_v40 }
  0xa8   : > { %v536_v41 = vpop.f32.mrf.mxu0 }
  0xa9   : > { %v549_v42 = vpop.f32.mrf.mxu1 }
  0xaa   : > { %v550_v55 = vadd.f32 %v549_v42, %v536_v41 }
  0xb0   : > { %v538_v43 = vpop.f32.mrf.mxu0  ;;  %v562_v45 = vpop.f32.mrf.mxu2 }
  0xb1   : > { %v551_v44 = vpop.f32.mrf.mxu1  ;;  %v719_v46 = vpop.f32.mrf.mxu3  ;;  %v563_v58 = vadd.f32 %v562_v45, %v550_v55 }
  0xb3   : > { %v720_v59 = vadd.f32 %v719_v46, %v563_v58 }
  0xb8   : > { %v564_v47 = vpop.f32.mrf.mxu2 }
  0xb9   : > { %v721_v48 = vpop.f32.mrf.mxu3 }
  0xc8   : > { %v732_v49 = vpop.f32.mrf.mxu0 }
  0xc9   : > { %v745_v50 = vpop.f32.mrf.mxu1  ;;  %v733_v60 = vadd.f32 %v732_v49, %v720_v59 }
  0xcb   : > { %v746_v63 = vadd.f32 %v745_v50, %v733_v60 }
  0xd0   : > { %v734_v51 = vpop.f32.mrf.mxu0  ;;  %v966_v52 = vpop.f32.mrf.mxu2 }
  0xd1   : > { %v979_v53 = vpop.f32.mrf.mxu3  ;;  %v747_v54 = vpop.f32.mrf.mxu1 }
  0xd2   : > { %v980_v61 = vadd.f32 %v979_v53, %v966_v52 }
  0xd8   : > { %v968_v56 = vpop.f32.mrf.mxu2 }
  0xd9   : > { %v981_v57 = vpop.f32.mrf.mxu3 }
  0xe8   : > { %v992_v62 = vpop.f32.mrf.mxu0 }
  0xe9   : > { %v993_v0 = vadd.f32 %v992_v62, %v980_v61  ;;  %v1608_v62 = vld [vmem:[%s1934_s3] ss:$0 sm:$0xff] }
  0xeb   : > { %v996_v2 = vadd.f32 %v993_v0, %v746_v63  ;;  %v1609_v0 = vld [vmem:[%s1935_s4] ss:$0 sm:$0xff] }
  0xed   : > { %v1902_v3 = vadd.f32 %v1607_v1, %v996_v2 }
  0xef   : > { %v1011_v4 = vmul.f32 %v1902_v3, %v1902_v3  ;;  %v1004_v5 = vsel %vm1003_vm0, %v1902_v3, 0.0 }
  0xf0   : > { %v994_v6 = vpop.f32.mrf.mxu0  ;;  %v1005_v7 = vrot.slane %v1004_v5, 4 }
  0xf1   : > { %v1012_v8 = vsel %vm1003_vm0, %v1011_v4, 0.0 }
  0xf2   : > { %v1006_v9 = vadd.f32 %v1005_v7, %v1004_v5  ;;  %v1013_v10 = vrot.slane %v1012_v8, 4 }
  0xf4   : > { %v1007_v11 = vrot.slane %v1006_v9, 2  ;;  %v1014_v12 = vadd.f32 %v1013_v10, %v1012_v8 }
  0xf6   : > { %v1008_v13 = vadd.f32 %v1007_v11, %v1006_v9  ;;  %v1015_v14 = vrot.slane %v1014_v12, 2 }
  0xf8   : > { %v1009_v15 = vrot.slane %v1008_v13, 1  ;;  %v1016_v16 = vadd.f32 %v1015_v14, %v1014_v12 }
  0xfa   : > { %v1010_v18 = vadd.f32 %v1009_v15, %v1008_v13  ;;  %v1017_v19 = vrot.slane %v1016_v16, 1 }
  0xfc   : > { %v1019_v20 = vmul.f32 %v1010_v18, %v1002_v17  ;;  %v1018_v22 = vadd.f32 %v1017_v19, %v1016_v16 }
  0xfe   : > { %v1020_v21 = vsel %vm1003_vm0, %v1019_v20, 0.0  ;;  %v1023_v23 = vmul.f32 %v1018_v22, %v1002_v17 }
  0xff   : > { %1021 = vadd.xlane.f32.xlu0 %v1020_v21 }
 0x100   : > { %v1024_v24 = vsel %vm1003_vm0, %v1023_v23, 0.0 }
 0x107   : > { %1025 = vadd.xlane.f32.xlu0 %v1024_v24 }
 0x172   : > { %v1022_v31 = vpop.xlane.xlu0 %1021 }
 0x173   : > { %v1034_v33 = vmul.f32 %v1033_v32, %v1022_v31 }
 0x175   : > { %v1036_v35 = vmul.f32 %v1034_v33, %v1034_v33  ;;  %v1049_v39 = vmul.f32 %v1034_v33, %v1002_v17 }
 0x177   : > { %v1050_v40 = vsel %vm1003_vm0, %v1049_v39, 0.0 }
 0x178   : > { %v1051_v42 = vrot.slane %v1050_v40, 4 }
 0x17a   : > { %v1026_v34 = vpop.xlane.xlu0 %1025  ;;  %v1052_v45 = vadd.f32 %v1051_v42, %v1050_v40 }
 0x17b   : > { %v1035_v36 = vmul.f32 %v1033_v32, %v1026_v34 }
 0x17c   : > { %v1053_v48 = vrot.slane %v1052_v45, 2 }
 0x17d   : > { %v1037_v37 = vsub.f32 %v1035_v36, %v1036_v35 }
 0x17e   : > { %v1054_v52 = vadd.f32 %v1053_v48, %v1052_v45 }
 0x17f   : > { %v1038_v38 = vadd.f32 1e-05, %v1037_v37 }
 0x180   : > { %v1055_v55 = vrot.slane %v1054_v52, 1 }
 0x181   : > { %1612 = vrsqrt.f32 %v1038_v38  ;;  %vm1045_vm3 = vweird.f32 %v1038_v38 }
 0x182   : > { %v1056_v58 = vadd.f32 %v1055_v55, %v1054_v52 }
 0x184   : > { %v1065_v61 = vsub.f32 %v1902_v3, %v1056_v58 }
 0x187   : > { %v1613_v41 = vpop.eup %1612 }
 0x188   : > { %v1040_v43 = vmul.f32 %v1613_v41, %v1038_v38  ;;  %vm1046_vm2 = vweird.f32 %v1613_v41 }
 0x189   : > { %vm1047_vm4 = vmor %vm1045_vm3, %vm1046_vm2 }
 0x18a   : > { %v1041_v44 = vmul.f32 %v1613_v41, %v1040_v43 }
 0x18c   : > { %v1042_v46 = vmul.f32 0.5, %v1041_v44 }
 0x18e   : > { %v1043_v47 = vsub.f32 1.5, %v1042_v46 }
 0x190   : > { %v1044_v49 = vmul.f32 %v1613_v41, %v1043_v47 }
 0x192   : > { %v1048_v50 = vsel %vm1047_vm4, %v1613_v41, %v1044_v49 }
 0x193   : > { %v1057_v51 = vmul.f32 %v1048_v50, %v1002_v17 }
 0x195   : > { %v1058_v53 = vsel %vm1003_vm0, %v1057_v51, 0.0 }
 0x196   : > { %v1059_v54 = vrot.slane %v1058_v53, 4 }
 0x198   : > { %v1060_v56 = vadd.f32 %v1059_v54, %v1058_v53 }
 0x19a   : > { %v1061_v57 = vrot.slane %v1060_v56, 2 }
 0x19c   : > { %v1062_v59 = vadd.f32 %v1061_v57, %v1060_v56 }
 0x19e   : > { %v1063_v60 = vrot.slane %v1062_v59, 1 }
 0x1a0   : > { %v1064_v63 = vadd.f32 %v1063_v60, %v1062_v59 }
 0x1a2   : > { %v1066_v1 = vmul.f32 %v1065_v61, %v1064_v63 }
 0x1a4   : > { %v1071_v2 = vmul.f32 %v1608_v62, %v1066_v1 }
 0x1a6   : > { %v1076_v4 = vadd.f32 %v1609_v0, %v1071_v2 }
 0x1a8   : > { %v1077_v5 = vmax.f32 %v1076_v4, 0.0 }
 0x1aa   : > { %1078 = vst.msk [vmem:[%s249_s8] sm:$0xf] %vm1003_vm0, %v1077_v5 }
 0x1ab PF: > { %s16_s21 = sadd.s32 1, %s1620_s21  }
 0x1ac   : > { %p13_p4 = scmp.ge.s32.totalorder %s16_s21, 4  }
 0x1ae   :  { %15 = sbr.rel (!%p13_p4) target bundleno = 1 (0x1), region = 76 }

// kernel: decoder_forward_pallas.9
= control target key start
LH: loop header
LB: loop body
LE: loop exit
PB: predicated region body
PF: predicated region fallthrough
CT: control target
= control target key end

     0   :  { %s1502_s21 = smov 0   ;;  %s1746_s0 = inlined_call_operand.vmem [shape: f32[2,10,320], index: 0, kind: input, shape index: {}]   ;;  %s1747_s1 = inlined_call_operand.vmem [shape: bf16[3,320,128], index: 1, kind: input, shape index: {}]   ;;  %s1748_s2 = inlined_call_operand.vmem [shape: f32[1,128], index: 2, kind: input, shape index: {}]   ;;  %s1749_s3 = inlined_call_operand.vmem [shape: f32[1,128], index: 3, kind: input, shape index: {}]   ;;  %s1750_s4 = inlined_call_operand.vmem [shape: f32[1,128], index: 4, kind: input, shape index: {}]   ;;  %s1751_s5 = inlined_call_operand.vmem [shape: f32[4,128], index: 5, kind: input, shape index: {}]   ;;  %s1752_s6 = inlined_call_operand.vmem [shape: f32[2,8,128], index: 6, kind: output, shape index: {}]  }
   0x1 LB: > { %s1049_s22 = sadd.s32 4294967295, %s1464_s21   ;;  %p1053_p0 = scmp.ge.s32.totalorder %s1464_s21, 1  ;;  %s1464_s21 = sphi %s1502_s21, %s16_s21  }
   0x2   : > { %p212_p1 = scmp.lt.s32.totalorder %s1464_s21, 3 }
   0x4   : > { %p213_p2 = pnand %p1053_p0, %p212_p1 }
   0x5   : > { %p241_p3 = scmp.lt.s32.totalorder (!%p213_p2), %s1049_s22, 1 }
   0x6   : > { %216 = sbr.rel (%p213_p2) target bundleno = 405 (0x195), region = 44 }
   0xb   : > { %v1408_v0 = vld [vmem:[%s1747_s1 + $0xd8] sm:$0xff]  ;;  %v1407_v4 = vld [vmem:[%s1747_s1 + $0xd0] sm:$0xff]  ;;  %s1754_s22 = smov (!%p241_p3, %s1049_s22), 1  ;;  %v1406_v8 = vld [vmem:[%s1747_s1 + $0xc8] sm:$0xff]  ;;  %vm490_vm0 = vcmask 523264   ;;  %vm936_vm1 = vcmask 1043456  }
   0xc   : > { %v1416_v1 = vld [vmem:[%s1747_s1 + $0x118] sm:$0xff]  ;;  %494 = vmatpush.bf16.msra.mxu0 %v1408_v0  ;;  %v1415_v5 = vld [vmem:[%s1747_s1 + $0x110] sm:$0xff]  ;;  %s1441_s15 = smul.u32 48, %s1754_s22  ;;  %v1414_v9 = vld [vmem:[%s1747_s1 + $0x108] sm:$0xff]  ;;  %s1055_s26 = sshll.u32 %s1754_s22, 3 }
   0xd   : > { %v1420_v2 = vld [vmem:[%s1747_s1 + $0x138] sm:$0xff]  ;;  %507 = vmatpush.bf16.msra.mxu1 %v1416_v1  ;;  %v1419_v6 = vld [vmem:[%s1747_s1 + $0x130] sm:$0xff]  ;;  %v1418_v10 = vld [vmem:[%s1747_s1 + $0x128] sm:$0xff]  ;;  %s249_s30 = scalar_lea.vmem %s1752_s6, %s1055_s26 }
   0xe   : > { %v1388_v3 = vld [vmem:[%s1747_s1 + $0x38] sm:$0xff]  ;;  %524 = vmatpush.bf16.msra.mxu2 %v1420_v2  ;;  %v1387_v7 = vld [vmem:[%s1747_s1 + $0x30] sm:$0xff]  ;;  %v1386_v11 = vld [vmem:[%s1747_s1 + $0x28] sm:$0xff]  ;;  %s1552_s28 = scalar_lea.vmem %s1746_s0, %s1441_s15 }
   0xf   : > { %656 = vmatpush.bf16.msra.mxu3 %v1388_v3  ;;  %v1405_v12 = vld [vmem:[%s1747_s1 + $0xc0] sm:$0xff]  ;;  %v299_v14 = vld [vmem:[%s1552_s28 + $0x10] sm:$0xfe]  ;;  %v302_v15 = vld [vmem:[%s1552_s28 + $0x28] sm:$0x1] }
  0x10   : > { %495 = vmatpush.bf16.msra.mxu0 %v1407_v4  ;;  %v1413_v13 = vld [vmem:[%s1747_s1 + $0x100] sm:$0xff]  ;;  %v305_v18 = vpack.c.bf16 %v302_v15, %v299_v14  ;;  %v1396_v19 = vld [vmem:[%s1747_s1 + $0x78] sm:$0xff]  ;;  %v298_v26 = vld [vmem:[%s1552_s28 + $0x8] sm:$0xfe] }
  0x11   : > { %508 = vmatpush.bf16.msra.mxu1 %v1415_v5  ;;  %v1417_v16 = vld [vmem:[%s1747_s1 + $0x120] sm:$0xff]  ;;  %v1404_v20 = vld [vmem:[%s1747_s1 + $0xb8] sm:$0xff]  ;;  %v1395_v30 = vld [vmem:[%s1747_s1 + $0x70] sm:$0xff] }
  0x12   : > { %525 = vmatpush.bf16.msra.mxu2 %v1419_v6  ;;  %v1385_v17 = vld [vmem:[%s1747_s1 + $0x20] sm:$0xff]  ;;  %v1412_v21 = vld [vmem:[%s1747_s1 + $0xf8] sm:$0xff]  ;;  %v362_v22 = vshrl.u32 %v305_v18, 16  ;;  %v364_v23 = vshll.u32 %v305_v18, 16  ;;  %v1403_v34 = vld [vmem:[%s1747_s1 + $0xb0] sm:$0xff] }
  0x13   : > { %657 = vmatpush.bf16.msra.mxu3 %v1387_v7  ;;  %v297_v24 = vld [vmem:[%s1552_s28] sm:$0xfe]  ;;  %v300_v25 = vld [vmem:[%s1552_s28 + $0x18] sm:$0x1]  ;;  %v301_v29 = vld [vmem:[%s1552_s28 + $0x20] sm:$0x1] }
  0x14   : > { %496 = vmatpush.bf16.msra.mxu0 %v1406_v8  ;;  %v1384_v27 = vld [vmem:[%s1747_s1 + $0x18] sm:$0xff]  ;;  %v366_v28 = vrot.slane %v364_v23, 1  ;;  %v303_v32 = vpack.c.bf16 %v300_v25, %v297_v24  ;;  %v304_v33 = vpack.c.bf16 %v301_v29, %v298_v26  ;;  %v1411_v35 = vld [vmem:[%s1747_s1 + $0xf0] sm:$0xff]  ;;  %v1394_v37 = vld [vmem:[%s1747_s1 + $0x68] sm:$0xff] }
  0x15   : > { %509 = vmatpush.bf16.msra.mxu1 %v1414_v9  ;;  %v1383_v36 = vld [vmem:[%s1747_s1 + $0x10] sm:$0xff]  ;;  %v1402_v38 = vld [vmem:[%s1747_s1 + $0xa8] sm:$0xff]  ;;  %v1393_v43 = vld [vmem:[%s1747_s1 + $0x60] sm:$0xff] }
  0x16   : > { %526 = vmatpush.bf16.msra.mxu2 %v1418_v10  ;;  %v367_v31 = vor.u32 %v366_v28, %v362_v22  ;;  %v350_v39 = vshll.u32 %v303_v32, 16  ;;  %v357_v40 = vshll.u32 %v304_v33, 16  ;;  %v1410_v41 = vld [vmem:[%s1747_s1 + $0xe8] sm:$0xff]  ;;  %v348_v44 = vshrl.u32 %v303_v32, 16  ;;  %v1401_v48 = vld [vmem:[%s1747_s1 + $0xa0] sm:$0xff]  ;;  %v1428_v51 = vld [vmem:[%s1747_s1 + $0x178] sm:$0xff] }
  0x17   : > { %658 = vmatpush.bf16.msra.mxu3 %v1386_v11  ;;  %v1382_v42 = vld [vmem:[%s1747_s1 + $0x8] sm:$0xff]  ;;  %v355_v46 = vshrl.u32 %v304_v33, 16  ;;  %v1409_v49 = vld [vmem:[%s1747_s1 + $0xe0] sm:$0xff]  ;;  %v1392_v53 = vld [vmem:[%s1747_s1 + $0x58] sm:$0xff] }
  0x18   : > { %497 = vmatpush.bf16.msra.mxu0 %v1405_v12  ;;  %v352_v45 = vrot.slane %v350_v39, 1  ;;  %v359_v47 = vrot.slane %v357_v40, 1  ;;  %v1381_v50 = vld [vmem:[%s1747_s1] sm:$0xff]  ;;  %v1436_v54 = vld [vmem:[%s1747_s1 + $0x1b8] sm:$0xff]  ;;  %v1427_v59 = vld [vmem:[%s1747_s1 + $0x170] sm:$0xff] }
  0x19   : > { %510 = vmatpush.bf16.msra.mxu1 %v1413_v13  ;;  %v251_v52 = vld [vmem:[%s1552_s28] sm:$0xff]  ;;  %v1400_v57 = vld [vmem:[%s1747_s1 + $0x98] sm:$0xff]  ;;  %v1391_v60 = vld [vmem:[%s1747_s1 + $0x50] sm:$0xff] }
  0x1a   : > { %527 = vmatpush.bf16.msra.mxu2 %v1417_v16  ;;  %v353_v55 = vor.u32 %v352_v45, %v348_v44  ;;  %v360_v56 = vor.u32 %v359_v47, %v355_v46  ;;  %v254_v58 = vpack.c.bf16 %v251_v52, %v251_v52  ;;  %v1435_v61 = vld [vmem:[%s1747_s1 + $0x1b0] sm:$0xff]  ;;  %v1426_v63 = vld [vmem:[%s1747_s1 + $0x168] sm:$0xff]  ;;  %v1425_v3 = vld [vmem:[%s1747_s1 + $0x160] sm:$0xff] }
  0x1b   : > { %659 = vmatpush.bf16.msra.mxu3 %v1385_v17  ;;  %v1399_v62 = vld [vmem:[%s1747_s1 + $0x90] sm:$0xff]  ;;  %v1390_v0 = vld [vmem:[%s1747_s1 + $0x48] sm:$0xff]  ;;  %v1389_v4 = vld [vmem:[%s1747_s1 + $0x40] sm:$0xff] }
  0x1c   : > { %498 = vmatpush.bf16.msra.mxu0 %v1404_v20  ;;  %v1434_v1 = vld [vmem:[%s1747_s1 + $0x1a8] sm:$0xff]  ;;  %v1433_v5 = vld [vmem:[%s1747_s1 + $0x1a0] sm:$0xff]  ;;  %v253_v8 = vld [vmem:[%s1552_s28 + $0x10] sm:$0xff] }
  0x1d   : > { %511 = vmatpush.bf16.msra.mxu1 %v1412_v21  ;;  %1176 = vmatmul.msk.bf16.vlgmr.msra.gmra.mxu2 %vm490_vm0, %v367_v31  ;;  %v1398_v2 = vld [vmem:[%s1747_s1 + $0x88] sm:$0xff]  ;;  %v1397_v7 = vld [vmem:[%s1747_s1 + $0x80] sm:$0xff]  ;;  %v1424_v10 = vld [vmem:[%s1747_s1 + $0x158] sm:$0xff]  ;;  %v256_v13 = vpack.c.bf16 %v253_v8, %v253_v8 }
  0x1e   : > { %669 = vmatpush.bf16.msrb.mxu2 %v1396_v19  ;;  %v252_v6 = vld [vmem:[%s1552_s28 + $0x8] sm:$0xff]  ;;  %v1432_v11 = vld [vmem:[%s1747_s1 + $0x198] sm:$0xff]  ;;  %v1423_v14 = vld [vmem:[%s1747_s1 + $0x150] sm:$0xff] }
  0x1f   : > { %660 = vmatpush.bf16.msra.mxu3 %v1384_v27  ;;  %v255_v9 = vpack.c.bf16 %v252_v6, %v252_v6  ;;  %v1440_v12 = vld [vmem:[%s1747_s1 + $0x1d8] sm:$0xff]  ;;  %v1431_v15 = vld [vmem:[%s1747_s1 + $0x190] sm:$0xff]  ;;  %v1422_v17 = vld [vmem:[%s1747_s1 + $0x148] sm:$0xff] }
  0x20   : > { %499 = vmatpush.bf16.msra.mxu0 %v1403_v34  ;;  %v1439_v16 = vld [vmem:[%s1747_s1 + $0x1d0] sm:$0xff]  ;;  %v1430_v18 = vld [vmem:[%s1747_s1 + $0x188] sm:$0xff]  ;;  %v695_v19 = vld [vmem:[%s1552_s28] sm:$0xfc] }
  0x21   : > { %512 = vmatpush.bf16.msra.mxu1 %v1411_v35  ;;  %v698_v20 = vld [vmem:[%s1552_s28 + $0x18] sm:$0x3]  ;;  %v1438_v21 = vld [vmem:[%s1747_s1 + $0x1c8] sm:$0xff]  ;;  %v699_v23 = vld [vmem:[%s1552_s28 + $0x20] sm:$0x3] }
  0x22   : > { %670 = vmatpush.bf16.msrb.mxu2 %v1395_v30  ;;  %v696_v22 = vld [vmem:[%s1552_s28 + $0x8] sm:$0xfc]  ;;  %v701_v24 = vpack.c.bf16 %v698_v20, %v695_v19  ;;  %v697_v25 = vld [vmem:[%s1552_s28 + $0x10] sm:$0xfc]  ;;  %v700_v26 = vld [vmem:[%s1552_s28 + $0x28] sm:$0x3] }
  0x23   : > { %661 = vmatpush.bf16.msra.mxu3 %v1383_v36  ;;  %v1421_v27 = vld [vmem:[%s1747_s1 + $0x140] sm:$0xff]  ;;  %v702_v28 = vpack.c.bf16 %v699_v23, %v696_v22  ;;  %v703_v31 = vpack.c.bf16 %v700_v26, %v697_v25 }
  0x24   : > { %500 = vmatpush.bf16.msra.mxu0 %v1402_v38  ;;  %v1429_v29 = vld [vmem:[%s1747_s1 + $0x180] sm:$0xff]  ;;  %v748_v32 = vrot.slane %v701_v24, 1 }
  0x25   : > { %513 = vmatpush.bf16.msra.mxu1 %v1410_v41  ;;  %v1437_v30 = vld [vmem:[%s1747_s1 + $0x1c0] sm:$0xff]  ;;  %v749_v33 = vrot.slane %v702_v28, 1  ;;  %v750_v34 = vrot.slane %v703_v31, 1 }
  0x26   : > { %671 = vmatpush.bf16.msrb.mxu2 %v1394_v37 }
  0x27   : > { %662 = vmatpush.bf16.msra.mxu3 %v1382_v42 }
  0x28   : > { %501 = vmatpush.bf16.msra.mxu0 %v1401_v48 }
  0x29   : > { %514 = vmatpush.bf16.msra.mxu1 %v1409_v49 }
  0x2a   : > { %672 = vmatpush.bf16.msrb.mxu2 %v1393_v43 }
  0x2b   : > { %663 = vmatpush.bf16.msra.mxu3 %v1381_v50  ;;  %502 = vmatmul.bf16.vlgmr.msra.gmra.mxu0 %v353_v55 }
  0x2c   : > { %515 = vmatmul.bf16.vlgmr.msra.gmra.mxu1 %v360_v56  ;;  %686 = vmatpush.bf16.msrb.mxu0 %v1400_v57 }
  0x2d   : > { %876 = vmatpush.bf16.msrb.mxu1 %v1428_v51 }
  0x2e   : > { %673 = vmatpush.bf16.msrb.mxu2 %v1392_v53  ;;  %664 = vmatmul.bf16.vlgmr.msra.gmra.mxu3 %v254_v58  ;;  %v1451_v58 = vld [vmem:[%s1748_s2] ss:$0 sm:$0xff] }
  0x2f   : > { %889 = vmatpush.bf16.msrb.mxu3 %v1436_v54 }
  0x30   : > { %687 = vmatpush.bf16.msrb.mxu0 %v1399_v62 }
  0x31   : > { %877 = vmatpush.bf16.msrb.mxu1 %v1427_v59 }
  0x32   : > { %674 = vmatpush.bf16.msrb.mxu2 %v1391_v60 }
  0x33   : > { %890 = vmatpush.bf16.msrb.mxu3 %v1435_v61 }
  0x34   : > { %688 = vmatpush.bf16.msrb.mxu0 %v1398_v2 }
  0x35   : > { %878 = vmatpush.bf16.msrb.mxu1 %v1426_v63 }
  0x36   : > { %675 = vmatpush.bf16.msrb.mxu2 %v1390_v0 }
  0x37   : > { %891 = vmatpush.bf16.msrb.mxu3 %v1434_v1 }
  0x38   : > { %689 = vmatpush.bf16.msrb.mxu0 %v1397_v7 }
  0x39   : > { %879 = vmatpush.bf16.msrb.mxu1 %v1425_v3 }
  0x3a   : > { %676 = vmatpush.bf16.msrb.mxu2 %v1389_v4 }
  0x3b   : > { %892 = vmatpush.bf16.msrb.mxu3 %v1433_v5  ;;  %1257 = vmatmul.msk.bf16.vlgmr.msrb.gmra.mxu0 %vm490_vm0, %v256_v13 }
  0x3c   : > { %906 = vmatpush.bf16.msra.mxu0 %v1440_v12 }
  0x3d   : > { %677 = vmatmul.bf16.vlgmr.msrb.gmra.mxu2 %v255_v9  ;;  %880 = vmatpush.bf16.msrb.mxu1 %v1424_v10  ;;  %v921_v9 = vld [vmem:[%s1751_s5] sm:$0xf] }
  0x3f   : > { %893 = vmatpush.bf16.msrb.mxu3 %v1432_v11 }
  0x40   : > { %907 = vmatpush.bf16.msra.mxu0 %v1439_v16 }
  0x41   : > { %881 = vmatpush.bf16.msrb.mxu1 %v1423_v14 }
  0x43   : > { %894 = vmatpush.bf16.msrb.mxu3 %v1431_v15 }
  0x44   : > { %908 = vmatpush.bf16.msra.mxu0 %v1438_v21 }
  0x45   : > { %882 = vmatpush.bf16.msrb.mxu1 %v1422_v17  ;;  %v1466_v17 = vmov 256.0  }
  0x46   : > { %1454 = vrcp.f32 %v1466_v17 }
  0x47   : > { %895 = vmatpush.bf16.msrb.mxu3 %v1430_v18 }
  0x48   : > { %909 = vmatpush.bf16.msra.mxu0 %v1437_v30 }
  0x49   : > { %883 = vmatpush.bf16.msrb.mxu1 %v1421_v27 }
  0x4b   : > { %896 = vmatpush.bf16.msrb.mxu3 %v1429_v29  ;;  %1378 = vmatmul.msk.bf16.vlgmr.msra.gmra.mxu0 %vm490_vm0, %v750_v34 }
  0x4c   : > { %884 = vmatmul.bf16.vlgmr.msrb.gmra.mxu1 %v748_v32  ;;  %v1455_v18 = vpop.eup %1454 }
  0x4d   : > { %v945_v19 = vmul.f32 256.0, %v1455_v18  ;;  %vm949_vm2 = vweird.f32 %v1455_v18 }
  0x4e   : > { %897 = vmatmul.bf16.vlgmr.msrb.gmra.mxu3 %v749_v33 }
  0x4f   : > { %v946_v20 = vsub.f32 1.0, %v945_v19 }
  0x51   : > { %v947_v21 = vmul.f32 %v1455_v18, %v946_v20 }
  0x53   : > { %v948_v22 = vadd.f32 %v1455_v18, %v947_v21 }
  0x55   : > { %v950_v24 = vsel %vm949_vm2, %v1455_v18, %v948_v22 }
  0xa0   : > { %v529_v35 = vpop.f32.mrf.mxu2 }
  0xa8   : > { %v503_v36 = vpop.f32.mrf.mxu0  ;;  %v531_v38 = vpop.f32.mrf.mxu2 }
  0xa9   : > { %v516_v37 = vpop.f32.mrf.mxu1 }
  0xaa   : > { %v517_v46 = vadd.f32 %v516_v37, %v503_v36 }
  0xac   : > { %v530_v48 = vadd.f32 %v529_v35, %v517_v46 }
  0xb0   : > { %v505_v40 = vpop.f32.mrf.mxu0 }
  0xb1   : > { %v665_v39 = vpop.f32.mrf.mxu3  ;;  %v518_v41 = vpop.f32.mrf.mxu1 }
  0xb2   : > { %v666_v51 = vadd.f32 %v665_v39, %v530_v48 }
  0xb8   : > { %v691_v43 = vpop.f32.mrf.mxu0 }
  0xb9   : > { %v667_v42 = vpop.f32.mrf.mxu3 }
  0xc0   : > { %v678_v44 = vpop.f32.mrf.mxu2  ;;  %v693_v45 = vpop.f32.mrf.mxu0 }
  0xc1   : > { %v679_v52 = vadd.f32 %v678_v44, %v666_v51 }
  0xc3   : > { %v692_v56 = vadd.f32 %v691_v43, %v679_v52 }
  0xc8   : > { %v680_v47 = vpop.f32.mrf.mxu2  ;;  %v911_v50 = vpop.f32.mrf.mxu0 }
  0xc9   : > { %v885_v49 = vpop.f32.mrf.mxu1 }
  0xd0   : > { %v913_v59 = vpop.f32.mrf.mxu0 }
  0xd1   : > { %v898_v53 = vpop.f32.mrf.mxu3  ;;  %v887_v55 = vpop.f32.mrf.mxu1 }
  0xd2   : > { %v899_v54 = vadd.f32 %v898_v53, %v885_v49 }
  0xd4   : > { %v912_v57 = vadd.f32 %v911_v50, %v899_v54  ;;  %v1452_v54 = vld [vmem:[%s1749_s3] ss:$0 sm:$0xff] }
  0xd6   : > { %v915_v60 = vadd.f32 %v912_v57, %v692_v56  ;;  %v1453_v56 = vld [vmem:[%s1750_s4] ss:$0 sm:$0xff] }
  0xd8   : > { %v1719_v61 = vadd.f32 %v1451_v58, %v915_v60 }
  0xd9   : > { %v900_v62 = vpop.f32.mrf.mxu3 }
  0xda   : > { %v922_v63 = vrot.slane %v1719_v61, 4  ;;  %v928_v0 = vmul.f32 %v1719_v61, %v1719_v61 }
  0xdc   : > { %v923_v1 = vadd.f32 %v922_v63, %v1719_v61  ;;  %v929_v2 = vrot.slane %v928_v0, 4 }
  0xde   : > { %v924_v3 = vrot.slane %v923_v1, 2  ;;  %v930_v4 = vadd.f32 %v929_v2, %v928_v0 }
  0xe0   : > { %v925_v5 = vadd.f32 %v924_v3, %v923_v1  ;;  %v931_v6 = vrot.slane %v930_v4, 2 }
  0xe2   : > { %v926_v7 = vrot.slane %v925_v5, 1  ;;  %v932_v8 = vadd.f32 %v931_v6, %v930_v4 }
  0xe4   : > { %v927_v10 = vadd.f32 %v926_v7, %v925_v5  ;;  %v933_v11 = vrot.slane %v932_v8, 1 }
  0xe6   : > { %v935_v12 = vmul.f32 %v927_v10, %v921_v9  ;;  %v934_v14 = vadd.f32 %v933_v11, %v932_v8 }
  0xe8   : > { %v937_v13 = vsel %vm936_vm1, %v935_v12, 0.0  ;;  %v940_v15 = vmul.f32 %v934_v14, %v921_v9 }
  0xe9   : > { %938 = vadd.xlane.f32.xlu0 %v937_v13 }
  0xea   : > { %v941_v16 = vsel %vm936_vm1, %v940_v15, 0.0 }
  0xf1   : > { %942 = vadd.xlane.f32.xlu0 %v941_v16 }
 0x15c   : > { %v939_v23 = vpop.xlane.xlu0 %938 }
 0x15d   : > { %v951_v25 = vmul.f32 %v950_v24, %v939_v23 }
 0x15f   : > { %v953_v27 = vmul.f32 %v951_v25, %v951_v25  ;;  %v966_v31 = vmul.f32 %v951_v25, %v921_v9 }
 0x161   : > { %v967_v32 = vsel %vm936_vm1, %v966_v31, 0.0 }
 0x162   : > { %v968_v34 = vrot.slane %v967_v32, 4 }
 0x164   : > { %v943_v26 = vpop.xlane.xlu0 %942  ;;  %v969_v37 = vadd.f32 %v968_v34, %v967_v32 }
 0x165   : > { %v952_v28 = vmul.f32 %v950_v24, %v943_v26 }
 0x166   : > { %v970_v40 = vrot.slane %v969_v37, 2 }
 0x167   : > { %v954_v29 = vsub.f32 %v952_v28, %v953_v27 }
 0x168   : > { %v971_v44 = vadd.f32 %v970_v40, %v969_v37 }
 0x169   : > { %v955_v30 = vadd.f32 1e-05, %v954_v29 }
 0x16a   : > { %v972_v47 = vrot.slane %v971_v44, 1 }
 0x16b   : > { %1456 = vrsqrt.f32 %v955_v30  ;;  %vm962_vm4 = vweird.f32 %v955_v30 }
 0x16c   : > { %v973_v50 = vadd.f32 %v972_v47, %v971_v44 }
 0x16e   : > { %v982_v53 = vsub.f32 %v1719_v61, %v973_v50 }
 0x171   : > { %v1457_v33 = vpop.eup %1456 }
 0x172   : > { %v957_v35 = vmul.f32 %v1457_v33, %v955_v30  ;;  %vm963_vm3 = vweird.f32 %v1457_v33 }
 0x173   : > { %vm964_vm5 = vmor %vm962_vm4, %vm963_vm3 }
 0x174   : > { %v958_v36 = vmul.f32 %v1457_v33, %v957_v35 }
 0x176   : > { %v959_v38 = vmul.f32 0.5, %v958_v36 }
 0x178   : > { %v960_v39 = vsub.f32 1.5, %v959_v38 }
 0x17a   : > { %v961_v41 = vmul.f32 %v1457_v33, %v960_v39 }
 0x17c   : > { %v965_v42 = vsel %vm964_vm5, %v1457_v33, %v961_v41 }
 0x17d   : > { %v974_v43 = vmul.f32 %v965_v42, %v921_v9 }
 0x17f   : > { %v975_v45 = vsel %vm936_vm1, %v974_v43, 0.0 }
 0x180   : > { %v976_v46 = vrot.slane %v975_v45, 4 }
 0x182   : > { %v977_v48 = vadd.f32 %v976_v46, %v975_v45 }
 0x184   : > { %v978_v49 = vrot.slane %v977_v48, 2 }
 0x186   : > { %v979_v51 = vadd.f32 %v978_v49, %v977_v48 }
 0x188   : > { %v980_v52 = vrot.slane %v979_v51, 1 }
 0x18a   : > { %v981_v55 = vadd.f32 %v980_v52, %v979_v51 }
 0x18c   : > { %v983_v57 = vmul.f32 %v982_v53, %v981_v55 }
 0x18e   : > { %v988_v58 = vmul.f32 %v1452_v54, %v983_v57 }
 0x190   : > { %v993_v59 = vadd.f32 %v1453_v56, %v988_v58 }
 0x192   : > { %v994_v60 = vmax.f32 %v993_v59, 0.0 }
 0x194   : > { %995 = vst [vmem:[%s249_s30] sm:$0xff] %v994_v60 }
 0x195 PF: > { %s16_s21 = sadd.s32 1, %s1464_s21  }
 0x196   : > { %p13_p4 = scmp.ge.s32.totalorder %s16_s21, 4  }
 0x198   :  { %15 = sbr.rel (!%p13_p4) target bundleno = 1 (0x1), region = 76 }

// kernel: decoder_forward_pallas.10
= control target key start
LH: loop header
LB: loop body
LE: loop exit
PB: predicated region body
PF: predicated region fallthrough
CT: control target
= control target key end

     0   :  { %s2395_s21 = smov 0   ;;  %s2851_s0 = inlined_call_operand.vmem [shape: f32[2,18,576], index: 0, kind: input, shape index: {}]   ;;  %s2852_s1 = inlined_call_operand.vmem [shape: bf16[3,576,128], index: 1, kind: input, shape index: {}]   ;;  %s2853_s2 = inlined_call_operand.vmem [shape: f32[1,128], index: 2, kind: input, shape index: {}]   ;;  %s2854_s3 = inlined_call_operand.vmem [shape: f32[1,128], index: 3, kind: input, shape index: {}]   ;;  %s2855_s4 = inlined_call_operand.vmem [shape: f32[1,128], index: 4, kind: input, shape index: {}]   ;;  %s2856_s5 = inlined_call_operand.vmem [shape: f32[2,128], index: 5, kind: input, shape index: {}]   ;;  %s2857_s6 = inlined_call_operand.vmem [shape: f32[2,16,128], index: 6, kind: output, shape index: {}]  }
   0x1 LB: > { %s1636_s22 = sadd.s32 4294967295, %s2357_s21   ;;  %p1640_p0 = scmp.ge.s32.totalorder %s2357_s21, 1  ;;  %s2357_s21 = sphi %s2395_s21, %s16_s21  }
   0x2   : > { %p212_p1 = scmp.lt.s32.totalorder %s2357_s21, 3 }
   0x4   : > { %p213_p2 = pnand %p1640_p0, %p212_p1 }
   0x5   : > { %p242_p3 = scmp.lt.s32.totalorder (!%p213_p2), %s1636_s22, 1 }
   0x6   : > { %216 = sbr.rel (%p213_p2) target bundleno = 461 (0x1cd), region = 44 }
   0xb   : > { %v2269_v0 = vld [vmem:[%s2852_s1 + $0x158] sm:$0xff]  ;;  %v2268_v4 = vld [vmem:[%s2852_s1 + $0x150] sm:$0xff]  ;;  %s2859_s22 = smov (!%p242_p3, %s1636_s22), 1  ;;  %v2267_v8 = vld [vmem:[%s2852_s1 + $0x148] sm:$0xff]  ;;  %vm433_vm0 = vsmask.f32 7424 }
   0xc   : > { %v2277_v1 = vld [vmem:[%s2852_s1 + $0x198] sm:$0xff]  ;;  %718 = vmatpush.bf16.msra.mxu0 %v2269_v0  ;;  %v2276_v5 = vld [vmem:[%s2852_s1 + $0x190] sm:$0xff]  ;;  %s2334_s15 = smul.u32 120, %s2859_s22  ;;  %v2275_v9 = vld [vmem:[%s2852_s1 + $0x188] sm:$0xff]  ;;  %vm714_vm1 = vcmask 523264   ;;  %vm1180_vm2 = vcmask 1046528  }
   0xd   : > { %v2285_v2 = vld [vmem:[%s2852_s1 + $0x1d8] sm:$0xff]  ;;  %732 = vmatpush.bf16.msra.mxu1 %v2277_v1  ;;  %v2284_v6 = vld [vmem:[%s2852_s1 + $0x1d0] sm:$0xff]  ;;  %v2283_v10 = vld [vmem:[%s2852_s1 + $0x1c8] sm:$0xff]  ;;  %vm1515_vm3 = vcmask 1041408  }
   0xe   : > { %v2293_v3 = vld [vmem:[%s2852_s1 + $0x218] sm:$0xff]  ;;  %746 = vmatpush.bf16.msra.mxu2 %v2285_v2  ;;  %v2292_v7 = vld [vmem:[%s2852_s1 + $0x210] sm:$0xff]  ;;  %v2291_v11 = vld [vmem:[%s2852_s1 + $0x208] sm:$0xff]  ;;  %s2445_s28 = scalar_lea.vmem %s2851_s0, %s2334_s15  ;;  %s2225_s15 = sshll.u32 %s2859_s22, 4 }
   0xf   : > { %760 = vmatpush.bf16.msra.mxu3 %v2293_v3  ;;  %v2266_v12 = vld [vmem:[%s2852_s1 + $0x140] sm:$0xff]  ;;  %v2460_v16 = vld [vmem:[%s2445_s28 + $0x28] sm:$0xff]  ;;  %v2265_v18 = vld [vmem:[%s2852_s1 + $0x138] sm:$0xff]  ;;  %s251_s18 = scalar_lea.vmem %s2857_s6, %s2225_s15 }
  0x10   : > { %719 = vmatpush.bf16.msra.mxu0 %v2268_v4  ;;  %v2274_v13 = vld [vmem:[%s2852_s1 + $0x180] sm:$0xff]  ;;  %v2273_v19 = vld [vmem:[%s2852_s1 + $0x178] sm:$0xff]  ;;  %v342_v23 = vld [vmem:[%s2445_s28 + $0x10] sm:$0xfe] }
  0x11   : > { %733 = vmatpush.bf16.msra.mxu1 %v2276_v5  ;;  %v2282_v14 = vld [vmem:[%s2852_s1 + $0x1c0] sm:$0xff]  ;;  %v2281_v20 = vld [vmem:[%s2852_s1 + $0x1b8] sm:$0xff]  ;;  %v345_v25 = vld [vmem:[%s2445_s28 + $0x50] sm:$0x1] }
  0x12   : > { %747 = vmatpush.bf16.msra.mxu2 %v2284_v6  ;;  %v2290_v15 = vld [vmem:[%s2852_s1 + $0x200] sm:$0xff]  ;;  %v2476_v22 = vld [vmem:[%s2445_s28 + $0x38] sm:$0xff]  ;;  %v348_v30 = vld [vmem:[%s2445_s28 + $0x68] sm:$0x1]  ;;  %v355_v33 = vpack.c.bf16 %v345_v25, %v345_v25 }
  0x13   : > { %761 = vmatpush.bf16.msra.mxu3 %v2292_v7  ;;  %v340_v17 = vld [vmem:[%s2445_s28] sm:$0xfe]  ;;  %v2289_v24 = vld [vmem:[%s2852_s1 + $0x1f8] sm:$0xff]  ;;  %v352_v26 = vpack.c.bf16 %v2476_v22, %v342_v23  ;;  %v347_v28 = vld [vmem:[%s2445_s28 + $0x60] sm:$0x1]  ;;  %v358_v42 = vpack.c.bf16 %v348_v30, %v348_v30 }
  0x14   : > { %720 = vmatpush.bf16.msra.mxu0 %v2267_v8  ;;  %v2473_v21 = vpack.c.bf16 %v2460_v16, %v340_v17  ;;  %v2485_v27 = vld [vmem:[%s2445_s28 + $0x40] sm:$0xff]  ;;  %v343_v29 = vld [vmem:[%s2445_s28 + $0x18] sm:$0xfe]  ;;  %v2264_v31 = vld [vmem:[%s2852_s1 + $0x130] sm:$0xff]  ;;  %v357_v40 = vpack.c.bf16 %v347_v28, %v347_v28  ;;  %v442_v51 = vshll.u32 %v355_v33, 16 }
  0x15   : > { %734 = vmatpush.bf16.msra.mxu1 %v2275_v9  ;;  %v2272_v32 = vld [vmem:[%s2852_s1 + $0x170] sm:$0xff]  ;;  %v353_v35 = vpack.c.bf16 %v2485_v27, %v343_v29  ;;  %v341_v37 = vld [vmem:[%s2445_s28 + $0x8] sm:$0xfe]  ;;  %v461_v41 = vshll.u32 %v352_v26, 16  ;;  %v346_v43 = vld [vmem:[%s2445_s28 + $0x58] sm:$0x1] }
  0x16   : > { %748 = vmatpush.bf16.msra.mxu2 %v2283_v10  ;;  %v437_v34 = vshll.u32 %v2473_v21, 16  ;;  %v2499_v36 = vld [vmem:[%s2445_s28 + $0x30] sm:$0xff]  ;;  %v435_v46 = vshrl.u32 %v2473_v21, 16  ;;  %v356_v47 = vpack.c.bf16 %v346_v43, %v346_v43  ;;  %v2263_v48 = vld [vmem:[%s2852_s1 + $0x128] sm:$0xff]  ;;  %v459_v52 = vshrl.u32 %v352_v26, 16  ;;  %v2262_v0 = vld [vmem:[%s2852_s1 + $0x120] sm:$0xff] }
  0x17   : > { %762 = vmatpush.bf16.msra.mxu3 %v2291_v11  ;;  %v2280_v38 = vld [vmem:[%s2852_s1 + $0x1b0] sm:$0xff]  ;;  %v351_v44 = vpack.c.bf16 %v2499_v36, %v341_v37  ;;  %v473_v45 = vshll.u32 %v353_v35, 16  ;;  %v2271_v49 = vld [vmem:[%s2852_s1 + $0x168] sm:$0xff]  ;;  %v463_v56 = vrot.slane %v461_v41, 1  ;;  %v466_v57 = vshll.u32 %v357_v40, 16  ;;  %v2270_v1 = vld [vmem:[%s2852_s1 + $0x160] sm:$0xff] }
  0x18   : > { %721 = vmatpush.bf16.msra.mxu0 %v2266_v12  ;;  %v2288_v39 = vld [vmem:[%s2852_s1 + $0x1f0] sm:$0xff]  ;;  %v439_v50 = vrot.slane %v437_v34, 1  ;;  %v2279_v54 = vld [vmem:[%s2852_s1 + $0x1a8] sm:$0xff]  ;;  %v471_v58 = vshrl.u32 %v353_v35, 16  ;;  %v478_v59 = vshll.u32 %v358_v42, 16  ;;  %v454_v63 = vshll.u32 %v356_v47, 16 }
  0x19   : > { %735 = vmatpush.bf16.msra.mxu1 %v2274_v13  ;;  %v449_v53 = vshll.u32 %v351_v44, 16  ;;  %v2287_v55 = vld [vmem:[%s2852_s1 + $0x1e8] sm:$0xff]  ;;  %v475_v60 = vrot.slane %v473_v45, 1  ;;  %v447_v61 = vshrl.u32 %v351_v44, 16  ;;  %v2278_v2 = vld [vmem:[%s2852_s1 + $0x1a0] sm:$0xff]  ;;  %v2297_v4 = vld [vmem:[%s2852_s1 + $0x238] sm:$0xff]  ;;  %v464_v7 = vor.u32 %v463_v56, %v459_v52 }
  0x1a   : > { %749 = vmatpush.bf16.msra.mxu2 %v2282_v14  ;;  %v2286_v3 = vld [vmem:[%s2852_s1 + $0x1e0] sm:$0xff]  ;;  %v440_v5 = vor.u32 %v439_v50, %v435_v46  ;;  %v444_v6 = vrot.slane %v442_v51, 1  ;;  %v468_v8 = vrot.slane %v466_v57, 1  ;;  %v2233_v9 = vld [vmem:[%s2852_s1 + $0x38] sm:$0xff]  ;;  %v480_v13 = vrot.slane %v478_v59, 1  ;;  %v2548_v17 = vld [vmem:[%s2445_s28 + $0x48] sm:$0xff] }
  0x1b   : > { %763 = vmatpush.bf16.msra.mxu3 %v2290_v15  ;;  %v451_v62 = vrot.slane %v449_v53, 1  ;;  %v2241_v10 = vld [vmem:[%s2852_s1 + $0x78] sm:$0xff]  ;;  %v476_v12 = vor.u32 %v475_v60, %v471_v58  ;;  %v456_v15 = vrot.slane %v454_v63, 1  ;;  %v2296_v21 = vld [vmem:[%s2852_s1 + $0x230] sm:$0xff]  ;;  %v2239_v35 = vld [vmem:[%s2852_s1 + $0x68] sm:$0xff] }
  0x1c   : > { %722 = vmatpush.bf16.msra.mxu0 %v2265_v18  ;;  %v2249_v11 = vld [vmem:[%s2852_s1 + $0xb8] sm:$0xff]  ;;  %v344_v18 = vld [vmem:[%s2445_s28 + $0x20] sm:$0xfe]  ;;  %v2232_v23 = vld [vmem:[%s2852_s1 + $0x30] sm:$0xff] }
  0x1d   : > { %736 = vmatpush.bf16.msra.mxu1 %v2273_v19  ;;  %v452_v14 = vor.u32 %v451_v62, %v447_v61  ;;  %v445_v19 = vsel %vm433_vm0, %v440_v5, %v444_v6  ;;  %v354_v26 = vpack.c.bf16 %v2548_v17, %v344_v18  ;;  %v2240_v28 = vld [vmem:[%s2852_s1 + $0x70] sm:$0xff]  ;;  %v2247_v37 = vld [vmem:[%s2852_s1 + $0xa8] sm:$0xff]  ;;  %v2238_v43 = vld [vmem:[%s2852_s1 + $0x60] sm:$0xff] }
  0x1e   : > { %750 = vmatpush.bf16.msra.mxu2 %v2281_v20  ;;  %v469_v20 = vsel %vm433_vm0, %v464_v7, %v468_v8  ;;  %v2248_v29 = vld [vmem:[%s2852_s1 + $0xb0] sm:$0xff]  ;;  %v2246_v44 = vld [vmem:[%s2852_s1 + $0xa0] sm:$0xff]  ;;  %v2257_v45 = vld [vmem:[%s2852_s1 + $0xf8] sm:$0xff] }
  0x1f   : > { %764 = vmatpush.bf16.msra.mxu3 %v2289_v24  ;;  %v481_v24 = vsel %vm433_vm0, %v476_v12, %v480_v13  ;;  %v457_v25 = vsel %vm433_vm0, %v452_v14, %v456_v15  ;;  %v349_v30 = vld [vmem:[%s2445_s28 + $0x70] sm:$0x1]  ;;  %v485_v34 = vshll.u32 %v354_v26, 16  ;;  %v483_v40 = vshrl.u32 %v354_v26, 16  ;;  %v2229_v46 = vld [vmem:[%s2852_s1 + $0x18] sm:$0xff]  ;;  %v2255_v56 = vld [vmem:[%s2852_s1 + $0xe8] sm:$0xff] }
  0x20   : > { %723 = vmatpush.bf16.msra.mxu0 %v2264_v31  ;;  %v2295_v31 = vld [vmem:[%s2852_s1 + $0x228] sm:$0xff]  ;;  %v359_v33 = vpack.c.bf16 %v349_v30, %v349_v30  ;;  %v2245_v50 = vld [vmem:[%s2852_s1 + $0x98] sm:$0xff]  ;;  %v2256_v51 = vld [vmem:[%s2852_s1 + $0xf0] sm:$0xff] }
  0x21   : > { %737 = vmatpush.bf16.msra.mxu1 %v2272_v32  ;;  %v2231_v32 = vld [vmem:[%s2852_s1 + $0x28] sm:$0xff]  ;;  %v487_v41 = vrot.slane %v485_v34, 1  ;;  %v2228_v53 = vld [vmem:[%s2852_s1 + $0x10] sm:$0xff]  ;;  %v2254_v60 = vld [vmem:[%s2852_s1 + $0xe0] sm:$0xff] }
  0x22   : > { %751 = vmatpush.bf16.msra.mxu2 %v2280_v38  ;;  %v2294_v38 = vld [vmem:[%s2852_s1 + $0x220] sm:$0xff]  ;;  %v490_v42 = vshll.u32 %v359_v33, 16  ;;  %v2227_v57 = vld [vmem:[%s2852_s1 + $0x8] sm:$0xff]  ;;  %v2253_v6 = vld [vmem:[%s2852_s1 + $0xd8] sm:$0xff] }
  0x23   : > { %765 = vmatpush.bf16.msra.mxu3 %v2288_v39  ;;  %v2230_v39 = vld [vmem:[%s2852_s1 + $0x20] sm:$0xff]  ;;  %v488_v47 = vor.u32 %v487_v41, %v483_v40  ;;  %v2235_v58 = vld [vmem:[%s2852_s1 + $0x48] sm:$0xff]  ;;  %v2261_v7 = vld [vmem:[%s2852_s1 + $0x118] sm:$0xff] }
  0x24   : > { %724 = vmatpush.bf16.msra.mxu0 %v2263_v48  ;;  %v492_v48 = vrot.slane %v490_v42, 1  ;;  %v2243_v59 = vld [vmem:[%s2852_s1 + $0x88] sm:$0xff]  ;;  %v2226_v61 = vld [vmem:[%s2852_s1] sm:$0xff]  ;;  %v255_v8 = vld [vmem:[%s2445_s28 + $0x10] sm:$0xff] }
  0x25   : > { %738 = vmatpush.bf16.msra.mxu1 %v2271_v49  ;;  %v2237_v49 = vld [vmem:[%s2852_s1 + $0x58] sm:$0xff]  ;;  %v2234_v62 = vld [vmem:[%s2852_s1 + $0x40] sm:$0xff]  ;;  %v265_v15 = vpack.c.bf16 %v2476_v22, %v255_v8  ;;  %v2311_v26 = vld [vmem:[%s2852_s1 + $0x2a8] sm:$0xff] }
  0x26   : > { %752 = vmatpush.bf16.msra.mxu2 %v2279_v54  ;;  %v493_v52 = vsel %vm433_vm0, %v488_v47, %v492_v48  ;;  %v2236_v54 = vld [vmem:[%s2852_s1 + $0x50] sm:$0xff]  ;;  %v1077_v63 = vld [vmem:[%s2445_s28] sm:$0xfc]  ;;  %v2329_v42 = vld [vmem:[%s2852_s1 + $0x338] sm:$0xff] }
  0x27   : > { %766 = vmatpush.bf16.msra.mxu3 %v2287_v55  ;;  %v2244_v55 = vld [vmem:[%s2852_s1 + $0x90] sm:$0xff]  ;;  %v257_v48 = vld [vmem:[%s2445_s28 + $0x20] sm:$0xff]  ;;  %v2333_v8 = vld [vmem:[%s2852_s1 + $0x358] sm:$0xff] }
  0x28   : > { %725 = vmatpush.bf16.msra.mxu0 %v2262_v0  ;;  %v1082_v0 = vld [vmem:[%s2445_s28 + $0x50] sm:$0x3]  ;;  %v1079_v30 = vld [vmem:[%s2445_s28 + $0x10] sm:$0xfc] }
  0x29   : > { %739 = vmatpush.bf16.msra.mxu1 %v2270_v1  ;;  %v2242_v1 = vld [vmem:[%s2852_s1 + $0x80] sm:$0xff]  ;;  %v1092_v5 = vpack.c.bf16 %v1082_v0, %v1082_v0  ;;  %v1089_v33 = vpack.c.bf16 %v2476_v22, %v1079_v30  ;;  %v2321_v22 = vld [vmem:[%s2852_s1 + $0x2f8] sm:$0xff] }
  0x2a   : > { %753 = vmatpush.bf16.msra.mxu2 %v2278_v2  ;;  %v253_v2 = vld [vmem:[%s2445_s28] sm:$0xff] }
  0x2b   : > { %767 = vmatpush.bf16.msra.mxu3 %v2286_v3  ;;  %726 = vmatmul.bf16.vlgmr.msra.gmra.mxu0 %v445_v19  ;;  %v254_v3 = vld [vmem:[%s2445_s28 + $0x8] sm:$0xff]  ;;  %v1182_v12 = vrot.slane %v1092_v5, 1  ;;  %v263_v13 = vpack.c.bf16 %v2460_v16, %v253_v2  ;;  %v2252_v19 = vld [vmem:[%s2852_s1 + $0xd0] sm:$0xff]  ;;  %v2326_v2 = vld [vmem:[%s2852_s1 + $0x320] sm:$0xff] }
  0x2c   : > { %778 = vmatpush.bf16.msrb.mxu0 %v2297_v4  ;;  %740 = vmatmul.bf16.vlgmr.msra.gmra.mxu1 %v457_v25  ;;  %v1087_v4 = vpack.c.bf16 %v2460_v16, %v1077_v63  ;;  %v264_v14 = vpack.c.bf16 %v2499_v36, %v254_v3  ;;  %v2260_v16 = vld [vmem:[%s2852_s1 + $0x110] sm:$0xff]  ;;  %v2303_v25 = vld [vmem:[%s2852_s1 + $0x268] sm:$0xff]  ;;  %v2298_v3 = vld [vmem:[%s2852_s1 + $0x240] sm:$0xff] }
  0x2d   : > { %1007 = vmatpush.bf16.msrb.mxu1 %v2233_v9  ;;  %754 = vmatmul.bf16.vlgmr.msra.gmra.mxu2 %v469_v20  ;;  %v2305_v9 = vld [vmem:[%s2852_s1 + $0x278] sm:$0xff]  ;;  %v2304_v20 = vld [vmem:[%s2852_s1 + $0x270] sm:$0xff] }
  0x2e   : > { %1021 = vmatpush.bf16.msrb.mxu2 %v2241_v10  ;;  %768 = vmatmul.bf16.vlgmr.msra.gmra.mxu3 %v481_v24  ;;  %v2313_v10 = vld [vmem:[%s2852_s1 + $0x2b8] sm:$0xff]  ;;  %v2259_v24 = vld [vmem:[%s2852_s1 + $0x108] sm:$0xff] }
  0x2f   : > { %1035 = vmatpush.bf16.msrb.mxu3 %v2249_v11  ;;  %v1181_v11 = vrot.slane %v1087_v4, 1 }
  0x30   : > { %779 = vmatpush.bf16.msrb.mxu0 %v2296_v21  ;;  %v2312_v21 = vld [vmem:[%s2852_s1 + $0x2b0] sm:$0xff] }
  0x31   : > { %1008 = vmatpush.bf16.msrb.mxu1 %v2232_v23  ;;  %v2665_v18 = vsel %vm1180_vm2, %v1181_v11, %v1182_v12  ;;  %v2251_v23 = vld [vmem:[%s2852_s1 + $0xc8] sm:$0xff]  ;;  %v2324_v11 = vld [vmem:[%s2852_s1 + $0x310] sm:$0xff] }
  0x32   : > { %1022 = vmatpush.bf16.msrb.mxu2 %v2240_v28  ;;  %v2250_v28 = vld [vmem:[%s2852_s1 + $0xc0] sm:$0xff]  ;;  %v2332_v12 = vld [vmem:[%s2852_s1 + $0x350] sm:$0xff] }
  0x33   : > { %1036 = vmatpush.bf16.msrb.mxu3 %v2248_v29  ;;  %v2258_v29 = vld [vmem:[%s2852_s1 + $0x100] sm:$0xff] }
  0x34   : > { %780 = vmatpush.bf16.msrb.mxu0 %v2295_v31  ;;  %v1084_v31 = vld [vmem:[%s2445_s28 + $0x60] sm:$0x3] }
  0x35   : > { %1009 = vmatpush.bf16.msrb.mxu1 %v2231_v32  ;;  %v256_v32 = vld [vmem:[%s2445_s28 + $0x18] sm:$0xff]  ;;  %v1094_v34 = vpack.c.bf16 %v1084_v31, %v1084_v31 }
  0x36   : > { %1023 = vmatpush.bf16.msrb.mxu2 %v2239_v35  ;;  %v1080_v35 = vld [vmem:[%s2445_s28 + $0x18] sm:$0xfc] }
  0x37   : > { %1037 = vmatpush.bf16.msrb.mxu3 %v2247_v37  ;;  %v1085_v37 = vld [vmem:[%s2445_s28 + $0x68] sm:$0x3]  ;;  %v1090_v40 = vpack.c.bf16 %v2485_v27, %v1080_v35 }
  0x38   : > { %781 = vmatpush.bf16.msrb.mxu0 %v2294_v38  ;;  %v2302_v38 = vld [vmem:[%s2852_s1 + $0x260] sm:$0xff]  ;;  %v1095_v41 = vpack.c.bf16 %v1085_v37, %v1085_v37 }
  0x39   : > { %1010 = vmatpush.bf16.msrb.mxu1 %v2230_v39  ;;  %v2310_v39 = vld [vmem:[%s2852_s1 + $0x2a0] sm:$0xff] }
  0x3a   : > { %1024 = vmatpush.bf16.msrb.mxu2 %v2238_v43  ;;  %v1187_v43 = vrot.slane %v1089_v33, 1  ;;  %v1191_v47 = vrot.slane %v1095_v41, 1 }
  0x3b   : > { %1038 = vmatpush.bf16.msrb.mxu3 %v2246_v44  ;;  %1860 = vmatmul.msk.bf16.vlgmr.msrb.gmra.mxu0 %vm714_vm1, %v493_v52  ;;  %v1188_v44 = vrot.slane %v1094_v34, 1  ;;  %v2320_v52 = vld [vmem:[%s2852_s1 + $0x2f0] sm:$0xff] }
  0x3c   : > { %1049 = vmatpush.bf16.msra.mxu0 %v2257_v45  ;;  %v266_v45 = vpack.c.bf16 %v2485_v27, %v256_v32 }
  0x3d   : > { %1011 = vmatpush.bf16.msrb.mxu1 %v2229_v46  ;;  %v1190_v46 = vrot.slane %v1090_v40, 1 }
  0x3e   : > { %1025 = vmatpush.bf16.msrb.mxu2 %v2237_v49  ;;  %v2719_v49 = vsel %vm1180_vm2, %v1187_v43, %v1188_v44 }
  0x3f   : > { %1039 = vmatpush.bf16.msrb.mxu3 %v2245_v50  ;;  %v2301_v50 = vld [vmem:[%s2852_s1 + $0x258] sm:$0xff]  ;;  %v2728_v27 = vsel %vm1180_vm2, %v1190_v46, %v1191_v47 }
  0x40   : > { %1050 = vmatpush.bf16.msra.mxu0 %v2256_v51  ;;  %v2309_v51 = vld [vmem:[%s2852_s1 + $0x298] sm:$0xff] }
  0x41   : > { %1012 = vmatpush.bf16.msrb.mxu1 %v2228_v53  ;;  %v2328_v53 = vld [vmem:[%s2852_s1 + $0x330] sm:$0xff] }
  0x42   : > { %1026 = vmatpush.bf16.msrb.mxu2 %v2236_v54  ;;  %v267_v54 = vpack.c.bf16 %v2548_v17, %v257_v48 }
  0x43   : > { %1040 = vmatpush.bf16.msrb.mxu3 %v2244_v55  ;;  %v2300_v55 = vld [vmem:[%s2852_s1 + $0x250] sm:$0xff] }
  0x44   : > { %1051 = vmatpush.bf16.msra.mxu0 %v2255_v56  ;;  %v2308_v56 = vld [vmem:[%s2852_s1 + $0x290] sm:$0xff] }
  0x45   : > { %1013 = vmatpush.bf16.msrb.mxu1 %v2227_v57  ;;  %v2319_v57 = vld [vmem:[%s2852_s1 + $0x2e8] sm:$0xff] }
  0x46   : > { %1027 = vmatpush.bf16.msrb.mxu2 %v2235_v58  ;;  %v2327_v58 = vld [vmem:[%s2852_s1 + $0x328] sm:$0xff] }
  0x47   : > { %1041 = vmatpush.bf16.msrb.mxu3 %v2243_v59  ;;  %v1078_v59 = vld [vmem:[%s2445_s28 + $0x8] sm:$0xfc] }
  0x48   : > { %1052 = vmatpush.bf16.msra.mxu0 %v2254_v60  ;;  %v1083_v60 = vld [vmem:[%s2445_s28 + $0x58] sm:$0x3]  ;;  %v1088_v63 = vpack.c.bf16 %v2499_v36, %v1078_v59  ;;  %v2306_v36 = vld [vmem:[%s2852_s1 + $0x280] sm:$0xff] }
  0x49   : > { %1014 = vmatpush.bf16.msrb.mxu1 %v2226_v61  ;;  %v2299_v61 = vld [vmem:[%s2852_s1 + $0x248] sm:$0xff]  ;;  %v1093_v0 = vpack.c.bf16 %v1083_v60, %v1083_v60 }
  0x4a   : > { %1028 = vmatpush.bf16.msrb.mxu2 %v2234_v62  ;;  %v2307_v62 = vld [vmem:[%s2852_s1 + $0x288] sm:$0xff]  ;;  %v1184_v4 = vrot.slane %v1088_v63, 1 }
  0x4b   : > { %1042 = vmatpush.bf16.msrb.mxu3 %v2242_v1  ;;  %v2318_v1 = vld [vmem:[%s2852_s1 + $0x2e0] sm:$0xff]  ;;  %v1185_v5 = vrot.slane %v1093_v0, 1 }
  0x4c   : > { %1053 = vmatpush.bf16.msra.mxu0 %v2253_v6  ;;  %1015 = vmatmul.bf16.vlgmr.msrb.gmra.mxu1 %v263_v13  ;;  %v2317_v6 = vld [vmem:[%s2852_s1 + $0x2d8] sm:$0xff]  ;;  %v2315_v13 = vld [vmem:[%s2852_s1 + $0x2c8] sm:$0xff] }
  0x4d   : > { %1067 = vmatpush.bf16.msra.mxu1 %v2261_v7  ;;  %1029 = vmatmul.bf16.vlgmr.msrb.gmra.mxu2 %v264_v14  ;;  %v2325_v7 = vld [vmem:[%s2852_s1 + $0x318] sm:$0xff]  ;;  %v2323_v14 = vld [vmem:[%s2852_s1 + $0x308] sm:$0xff] }
  0x4e   : > { %1419 = vmatpush.bf16.msra.mxu2 %v2305_v9  ;;  %1043 = vmatmul.bf16.vlgmr.msrb.gmra.mxu3 %v265_v15  ;;  %v1186_v9 = vsel %vm1180_vm2, %v1184_v4, %v1185_v5  ;;  %v1081_v15 = vld [vmem:[%s2445_s28 + $0x20] sm:$0xfc] }
  0x4f   : > { %1433 = vmatpush.bf16.msra.mxu3 %v2313_v10  ;;  %v2316_v10 = vld [vmem:[%s2852_s1 + $0x2d0] sm:$0xff] }
  0x50   : > { %1054 = vmatpush.bf16.msra.mxu0 %v2252_v19  ;;  %v1086_v19 = vld [vmem:[%s2445_s28 + $0x70] sm:$0x3] }
  0x51   : > { %1068 = vmatpush.bf16.msra.mxu1 %v2260_v16  ;;  %v2331_v16 = vld [vmem:[%s2852_s1 + $0x348] sm:$0xff] }
  0x52   : > { %1420 = vmatpush.bf16.msra.mxu2 %v2304_v20  ;;  %v1096_v20 = vpack.c.bf16 %v1086_v19, %v1086_v19  ;;  %v2344_v19 = vld [vmem:[%s2853_s2] ss:$0 sm:$0xff] }
  0x53   : > { %1434 = vmatpush.bf16.msra.mxu3 %v2312_v21  ;;  %v2314_v21 = vld [vmem:[%s2852_s1 + $0x2c0] sm:$0xff] }
  0x54   : > { %1055 = vmatpush.bf16.msra.mxu0 %v2251_v23  ;;  %v2322_v23 = vld [vmem:[%s2852_s1 + $0x300] sm:$0xff] }
  0x55   : > { %1069 = vmatpush.bf16.msra.mxu1 %v2259_v24  ;;  %v2330_v24 = vld [vmem:[%s2852_s1 + $0x340] sm:$0xff] }
  0x56   : > { %1421 = vmatpush.bf16.msra.mxu2 %v2303_v25 }
  0x57   : > { %1435 = vmatpush.bf16.msra.mxu3 %v2311_v26  ;;  %v1194_v26 = vrot.slane %v1096_v20, 1 }
  0x58   : > { %1056 = vmatpush.bf16.msra.mxu0 %v2250_v28 }
  0x59   : > { %1070 = vmatpush.bf16.msra.mxu1 %v2258_v29 }
  0x5a   : > { %1422 = vmatpush.bf16.msra.mxu2 %v2302_v38 }
  0x5b   : > { %1436 = vmatpush.bf16.msra.mxu3 %v2310_v39  ;;  %1057 = vmatmul.bf16.vlgmr.msra.gmra.mxu0 %v266_v45 }
  0x5c   : > { %1447 = vmatpush.bf16.msrb.mxu0 %v2321_v22  ;;  %2005 = vmatmul.msk.bf16.vlgmr.msra.gmra.mxu1 %vm714_vm1, %v267_v54 }
  0x5d   : > { %1461 = vmatpush.bf16.msrb.mxu1 %v2329_v42 }
  0x5e   : > { %1423 = vmatpush.bf16.msra.mxu2 %v2301_v50 }
  0x5f   : > { %1437 = vmatpush.bf16.msra.mxu3 %v2309_v51 }
  0x60   : > { %1448 = vmatpush.bf16.msrb.mxu0 %v2320_v52 }
  0x61   : > { %1462 = vmatpush.bf16.msrb.mxu1 %v2328_v53 }
  0x62   : > { %1424 = vmatpush.bf16.msra.mxu2 %v2300_v55 }
  0x63   : > { %1438 = vmatpush.bf16.msra.mxu3 %v2308_v56 }
  0x64   : > { %1449 = vmatpush.bf16.msrb.mxu0 %v2319_v57 }
  0x65   : > { %1463 = vmatpush.bf16.msrb.mxu1 %v2327_v58 }
  0x66   : > { %1425 = vmatpush.bf16.msra.mxu2 %v2299_v61 }
  0x67   : > { %1439 = vmatpush.bf16.msra.mxu3 %v2307_v62 }
  0x68   : > { %1450 = vmatpush.bf16.msrb.mxu0 %v2318_v1 }
  0x69   : > { %1464 = vmatpush.bf16.msrb.mxu1 %v2326_v2 }
  0x6a   : > { %1426 = vmatpush.bf16.msra.mxu2 %v2298_v3 }
  0x6b   : > { %1440 = vmatpush.bf16.msra.mxu3 %v2306_v36 }
  0x6c   : > { %1451 = vmatpush.bf16.msrb.mxu0 %v2317_v6 }
  0x6d   : > { %1465 = vmatpush.bf16.msrb.mxu1 %v2325_v7  ;;  %1427 = vmatmul.bf16.vlgmr.msra.gmra.mxu2 %v2665_v18  ;;  %v1091_v18 = vpack.c.bf16 %v2548_v17, %v1081_v15 }
  0x6e   : > { %1479 = vmatpush.bf16.msrb.mxu2 %v2333_v8  ;;  %1441 = vmatmul.bf16.vlgmr.msra.gmra.mxu3 %v1186_v9 }
  0x6f   : > { %v1193_v25 = vrot.slane %v1091_v18, 1 }
  0x70   : > { %1452 = vmatpush.bf16.msrb.mxu0 %v2316_v10 }
  0x71   : > { %1466 = vmatpush.bf16.msrb.mxu1 %v2324_v11  ;;  %v1195_v17 = vsel %vm1180_vm2, %v1193_v25, %v1194_v26 }
  0x72   : > { %1480 = vmatpush.bf16.msrb.mxu2 %v2332_v12 }
  0x74   : > { %1453 = vmatpush.bf16.msrb.mxu0 %v2315_v13 }
  0x75   : > { %1467 = vmatpush.bf16.msrb.mxu1 %v2323_v14 }
  0x76   : > { %1481 = vmatpush.bf16.msrb.mxu2 %v2331_v16 }
  0x78   : > { %1454 = vmatpush.bf16.msrb.mxu0 %v2314_v21 }
  0x79   : > { %1468 = vmatpush.bf16.msrb.mxu1 %v2322_v23 }
  0x7a   : > { %1482 = vmatpush.bf16.msrb.mxu2 %v2330_v24 }
  0x7b   : > { %1455 = vmatmul.bf16.vlgmr.msrb.gmra.mxu0 %v2719_v49 }
  0x7c   : > { %1469 = vmatmul.bf16.vlgmr.msrb.gmra.mxu1 %v2728_v27 }
  0x7d   : > { %2222 = vmatmul.msk.bf16.vlgmr.msrb.gmra.mxu2 %vm714_vm1, %v1195_v17 }
  0xa8   : > { %v727_v28 = vpop.f32.mrf.mxu0 }
  0xa9   : > { %v741_v29 = vpop.f32.mrf.mxu1 }
  0xaa   : > { %v742_v45 = vadd.f32 %v741_v29, %v727_v28 }
  0xb0   : > { %v729_v30 = vpop.f32.mrf.mxu0  ;;  %v755_v31 = vpop.f32.mrf.mxu2 }
  0xb1   : > { %v743_v32 = vpop.f32.mrf.mxu1  ;;  %v769_v33 = vpop.f32.mrf.mxu3  ;;  %v756_v47 = vadd.f32 %v755_v31, %v742_v45 }
  0xb2   : > { %v744_v50 = vadd.f32 %v743_v32, %v729_v30 }
  0xb3   : > { %v770_v51 = vadd.f32 %v769_v33, %v756_v47 }
  0xb8   : > { %v783_v34 = vpop.f32.mrf.mxu0  ;;  %v757_v35 = vpop.f32.mrf.mxu2 }
  0xb9   : > { %v771_v38 = vpop.f32.mrf.mxu3  ;;  %v758_v53 = vadd.f32 %v757_v35, %v744_v50  ;;  %v784_v54 = vadd.f32 %v783_v34, %v770_v51 }
  0xbb   : > { %v772_v57 = vadd.f32 %v771_v38, %v758_v53 }
  0xc0   : > { %v785_v39 = vpop.f32.mrf.mxu0 }
  0xc1   : > { %v786_v59 = vadd.f32 %v785_v39, %v772_v57  ;;  %v1497_v39 = vld [vmem:[%s2856_s5] sm:$0x3] }
  0xc9   : > { %v1016_v37 = vpop.f32.mrf.mxu1 }
  0xca   : > { %v1017_v58 = vadd.f32 %v1016_v37, %v784_v54 }
  0xd0   : > { %v1030_v40 = vpop.f32.mrf.mxu2 }
  0xd1   : > { %v1018_v41 = vpop.f32.mrf.mxu1  ;;  %v1044_v22 = vpop.f32.mrf.mxu3  ;;  %v1031_v60 = vadd.f32 %v1030_v40, %v1017_v58 }
  0xd2   : > { %v1019_v63 = vadd.f32 %v1018_v41, %v786_v59 }
  0xd3   : > { %v1045_v2 = vadd.f32 %v1044_v22, %v1031_v60 }
  0xd8   : > { %v1058_v42 = vpop.f32.mrf.mxu0  ;;  %v1032_v43 = vpop.f32.mrf.mxu2 }
  0xd9   : > { %v1072_v44 = vpop.f32.mrf.mxu1  ;;  %v1046_v46 = vpop.f32.mrf.mxu3  ;;  %v1033_v3 = vadd.f32 %v1032_v43, %v1019_v63  ;;  %v1059_v5 = vadd.f32 %v1058_v42, %v1045_v2 }
  0xdb   : > { %v1047_v8 = vadd.f32 %v1046_v46, %v1033_v3  ;;  %v1073_v11 = vadd.f32 %v1072_v44, %v1059_v5  ;;  %v2359_v46 = vmov 1024.0  }
  0xdc   : > { %2347 = vrcp.f32 %v2359_v46 }
  0xe0   : > { %v1060_v48 = vpop.f32.mrf.mxu0 }
  0xe1   : > { %v1074_v27 = vpop.f32.mrf.mxu1  ;;  %v1061_v12 = vadd.f32 %v1060_v48, %v1047_v8 }
  0xe2   : > { %v2348_v47 = vpop.eup %2347 }
  0xe3   : > { %v1075_v18 = vadd.f32 %v1074_v27, %v1061_v12  ;;  %v1524_v48 = vmul.f32 1024.0, %v2348_v47  ;;  %vm1528_vm4 = vweird.f32 %v2348_v47 }
  0xf0   : > { %v1428_v49 = vpop.f32.mrf.mxu2 }
  0xf1   : > { %v1442_v52 = vpop.f32.mrf.mxu3 }
  0xf2   : > { %v1443_v61 = vadd.f32 %v1442_v52, %v1428_v49  ;;  %v1525_v49 = vsub.f32 1.0, %v1524_v48 }
  0xf4   : > { %v1526_v50 = vmul.f32 %v2348_v47, %v1525_v49 }
  0xf6   : > { %v1527_v51 = vadd.f32 %v2348_v47, %v1526_v50 }
  0xf8   : > { %v1456_v55 = vpop.f32.mrf.mxu0  ;;  %v1430_v56 = vpop.f32.mrf.mxu2  ;;  %v1529_v52 = vsel %vm1528_vm4, %v2348_v47, %v1527_v51 }
  0xf9   : > { %v1470_v62 = vpop.f32.mrf.mxu1  ;;  %v1457_v0 = vadd.f32 %v1456_v55, %v1443_v61  ;;  %v1444_v1 = vpop.f32.mrf.mxu3 }
  0xfa   : > { %v1445_v7 = vadd.f32 %v1444_v1, %v1430_v56 }
  0xfb   : > { %v1471_v6 = vadd.f32 %v1470_v62, %v1457_v0 }
 0x100   : > { %v1458_v36 = vpop.f32.mrf.mxu0  ;;  %v1484_v4 = vpop.f32.mrf.mxu2 }
 0x101   : > { %v1459_v9 = vadd.f32 %v1458_v36, %v1445_v7  ;;  %v1485_v10 = vadd.f32 %v1484_v4, %v1471_v6  ;;  %v1472_v13 = vpop.f32.mrf.mxu1 }
 0x103   : > { %v1473_v14 = vadd.f32 %v1472_v13, %v1459_v9  ;;  %v1489_v15 = vadd.f32 %v1485_v10, %v1073_v11 }
 0x105   : > { %v2819_v21 = vadd.f32 %v2344_v19, %v1489_v15 }
 0x107   : > { %v1505_v25 = vmul.f32 %v2819_v21, %v2819_v21 }
 0x108   : > { %v1486_v16 = vpop.f32.mrf.mxu2 }
 0x109   : > { %v1487_v20 = vadd.f32 %v1486_v16, %v1473_v14 }
 0x10b   : > { %v1490_v23 = vadd.f32 %v1487_v20, %v1075_v18  ;;  %v2345_v18 = vld [vmem:[%s2854_s3] ss:$0 sm:$0xff] }
 0x10d   : > { %v2821_v24 = vadd.f32 %v2344_v19, %v1490_v23  ;;  %v2346_v23 = vld [vmem:[%s2855_s4] ss:$0 sm:$0xff] }
 0x10f   : > { %v1498_v26 = vadd.f32 %v2821_v24, %v2819_v21  ;;  %v1506_v17 = vmul.f32 %v2821_v24, %v2821_v24 }
 0x111   : > { %v1499_v28 = vrot.slane %v1498_v26, 4  ;;  %v1507_v29 = vadd.f32 %v1506_v17, %v1505_v25 }
 0x113   : > { %v1500_v30 = vadd.f32 %v1499_v28, %v1498_v26  ;;  %v1508_v31 = vrot.slane %v1507_v29, 4 }
 0x115   : > { %v1501_v32 = vrot.slane %v1500_v30, 2  ;;  %v1509_v33 = vadd.f32 %v1508_v31, %v1507_v29 }
 0x117   : > { %v1502_v34 = vadd.f32 %v1501_v32, %v1500_v30  ;;  %v1510_v35 = vrot.slane %v1509_v33, 2 }
 0x119   : > { %v1503_v37 = vrot.slane %v1502_v34, 1  ;;  %v1511_v38 = vadd.f32 %v1510_v35, %v1509_v33 }
 0x11b   : > { %v1504_v40 = vadd.f32 %v1503_v37, %v1502_v34  ;;  %v1512_v41 = vrot.slane %v1511_v38, 1 }
 0x11d   : > { %v1514_v22 = vmul.f32 %v1504_v40, %v1497_v39  ;;  %v1513_v43 = vadd.f32 %v1512_v41, %v1511_v38 }
 0x11f   : > { %v1516_v42 = vsel %vm1515_vm3, %v1514_v22, 0.0  ;;  %v1519_v44 = vmul.f32 %v1513_v43, %v1497_v39 }
 0x120   : > { %1517 = vadd.xlane.f32.xlu0 %v1516_v42 }
 0x121   : > { %v1520_v45 = vsel %vm1515_vm3, %v1519_v44, 0.0 }
 0x128   : > { %1521 = vadd.xlane.f32.xlu0 %v1520_v45 }
 0x193   : > { %v1518_v27 = vpop.xlane.xlu0 %1517 }
 0x194   : > { %v1530_v53 = vmul.f32 %v1529_v52, %v1518_v27 }
 0x196   : > { %v1532_v55 = vmul.f32 %v1530_v53, %v1530_v53  ;;  %v1545_v59 = vmul.f32 %v1530_v53, %v1497_v39 }
 0x198   : > { %v1546_v60 = vsel %vm1515_vm3, %v1545_v59, 0.0 }
 0x199   : > { %v1547_v62 = vrot.slane %v1546_v60, 4 }
 0x19b   : > { %v1522_v54 = vpop.xlane.xlu0 %1521  ;;  %v1548_v1 = vadd.f32 %v1547_v62, %v1546_v60 }
 0x19c   : > { %v1531_v56 = vmul.f32 %v1529_v52, %v1522_v54 }
 0x19d   : > { %v1549_v36 = vrot.slane %v1548_v1, 2 }
 0x19e   : > { %v1533_v57 = vsub.f32 %v1531_v56, %v1532_v55 }
 0x19f   : > { %v1550_v7 = vadd.f32 %v1549_v36, %v1548_v1 }
 0x1a0   : > { %v1534_v58 = vadd.f32 1e-05, %v1533_v57 }
 0x1a1   : > { %v1551_v10 = vrot.slane %v1550_v7, 1 }
 0x1a2   : > { %2349 = vrsqrt.f32 %v1534_v58  ;;  %vm1541_vm6 = vweird.f32 %v1534_v58 }
 0x1a3   : > { %v1552_v13 = vadd.f32 %v1551_v10, %v1550_v7 }
 0x1a5   : > { %v1561_v19 = vsub.f32 %v2819_v21, %v1552_v13  ;;  %v1562_v16 = vsub.f32 %v2821_v24, %v1552_v13 }
 0x1a8   : > { %v2350_v61 = vpop.eup %2349 }
 0x1a9   : > { %v1536_v63 = vmul.f32 %v2350_v61, %v1534_v58  ;;  %vm1542_vm5 = vweird.f32 %v2350_v61 }
 0x1aa   : > { %vm1543_vm7 = vmor %vm1541_vm6, %vm1542_vm5 }
 0x1ab   : > { %v1537_v0 = vmul.f32 %v2350_v61, %v1536_v63 }
 0x1ad   : > { %v1538_v2 = vmul.f32 0.5, %v1537_v0 }
 0x1af   : > { %v1539_v3 = vsub.f32 1.5, %v1538_v2 }
 0x1b1   : > { %v1540_v4 = vmul.f32 %v2350_v61, %v1539_v3 }
 0x1b3   : > { %v1544_v5 = vsel %vm1543_vm7, %v2350_v61, %v1540_v4 }
 0x1b4   : > { %v1553_v6 = vmul.f32 %v1544_v5, %v1497_v39 }
 0x1b6   : > { %v1554_v8 = vsel %vm1515_vm3, %v1553_v6, 0.0 }
 0x1b7   : > { %v1555_v9 = vrot.slane %v1554_v8, 4 }
 0x1b9   : > { %v1556_v11 = vadd.f32 %v1555_v9, %v1554_v8 }
 0x1bb   : > { %v1557_v12 = vrot.slane %v1556_v11, 2 }
 0x1bd   : > { %v1558_v14 = vadd.f32 %v1557_v12, %v1556_v11 }
 0x1bf   : > { %v1559_v15 = vrot.slane %v1558_v14, 1 }
 0x1c1   : > { %v1560_v20 = vadd.f32 %v1559_v15, %v1558_v14 }
 0x1c3   : > { %v1563_v25 = vmul.f32 %v1561_v19, %v1560_v20  ;;  %v1564_v26 = vmul.f32 %v1562_v16, %v1560_v20 }
 0x1c5   : > { %v1569_v17 = vmul.f32 %v2345_v18, %v1563_v25  ;;  %v1570_v28 = vmul.f32 %v2345_v18, %v1564_v26 }
 0x1c7   : > { %v1575_v29 = vadd.f32 %v2346_v23, %v1569_v17  ;;  %v1576_v30 = vadd.f32 %v2346_v23, %v1570_v28 }
 0x1c9   : > { %v1577_v21 = vmax.f32 %v1575_v29, 0.0  ;;  %v1578_v24 = vmax.f32 %v1576_v30, 0.0 }
 0x1cb   : > { %1579 = vst [vmem:[%s251_s18] sm:$0xff] %v1577_v21 }
 0x1cc   : > { %1580 = vst [vmem:[%s251_s18 + $0x8] sm:$0xff] %v1578_v24 }
 0x1cd PF: > { %s16_s21 = sadd.s32 1, %s2357_s21  }
 0x1ce   : > { %p13_p4 = scmp.ge.s32.totalorder %s16_s21, 4  }
 0x1d0   :  { %15 = sbr.rel (!%p13_p4) target bundleno = 1 (0x1), region = 76 }

// kernel: decoder_forward_pallas.11
= control target key start
LH: loop header
LB: loop body
LE: loop exit
PB: predicated region body
PF: predicated region fallthrough
CT: control target
= control target key end

     0   :  { %s2503_s21 = smov 0   ;;  %s3017_s0 = inlined_call_operand.vmem [shape: f32[2,34,544], index: 0, kind: input, shape index: {}]   ;;  %s3018_s1 = inlined_call_operand.vmem [shape: bf16[3,544,128], index: 1, kind: input, shape index: {}]   ;;  %s3019_s2 = inlined_call_operand.vmem [shape: f32[1,128], index: 2, kind: input, shape index: {}]   ;;  %s3020_s3 = inlined_call_operand.vmem [shape: f32[1,128], index: 3, kind: input, shape index: {}]   ;;  %s3021_s4 = inlined_call_operand.vmem [shape: f32[1,128], index: 4, kind: input, shape index: {}]   ;;  %s3022_s5 = inlined_call_operand.vmem [shape: f32[2,128], index: 5, kind: input, shape index: {}]   ;;  %s3023_s6 = inlined_call_operand.vmem [shape: f32[2,32,128], index: 6, kind: output, shape index: {}]  }
   0x1 LB: > { %s1771_s22 = sadd.s32 4294967295, %s2465_s21   ;;  %p1775_p0 = scmp.ge.s32.totalorder %s2465_s21, 1  ;;  %s2465_s21 = sphi %s2503_s21, %s16_s21  }
   0x2   : > { %p212_p1 = scmp.lt.s32.totalorder %s2465_s21, 3 }
   0x4   : > { %p213_p2 = pnand %p1775_p0, %p212_p1 }
   0x5   : > { %p242_p3 = scmp.lt.s32.totalorder (!%p213_p2), %s1771_s22, 1 }
   0x6   : > { %216 = sbr.rel (%p213_p2) target bundleno = 495 (0x1ef), region = 44 }
   0xb   : > { %v2373_v0 = vld [vmem:[%s3018_s1 + $0x148] sm:$0xff]  ;;  %v2372_v4 = vld [vmem:[%s3018_s1 + $0x140] sm:$0xff]  ;;  %s3025_s22 = smov (!%p242_p3, %s1771_s22), 1  ;;  %v2371_v8 = vld [vmem:[%s3018_s1 + $0x138] sm:$0xff]  ;;  %vm440_vm0 = vsmask.f32 7424 }
   0xc   : > { %v2381_v1 = vld [vmem:[%s3018_s1 + $0x188] sm:$0xff]  ;;  %760 = vmatpush.bf16.msra.mxu0 %v2373_v0  ;;  %v2380_v5 = vld [vmem:[%s3018_s1 + $0x180] sm:$0xff]  ;;  %s2442_s15 = smul.u32 200, %s3025_s22  ;;  %v2379_v9 = vld [vmem:[%s3018_s1 + $0x178] sm:$0xff]  ;;  %vm753_vm1 = vcmask 261120   ;;  %vm1263_vm2 = vcmask 1046528  }
   0xd   : > { %v2389_v2 = vld [vmem:[%s3018_s1 + $0x1c8] sm:$0xff]  ;;  %779 = vmatpush.bf16.msra.mxu1 %v2381_v1  ;;  %v2388_v6 = vld [vmem:[%s3018_s1 + $0x1c0] sm:$0xff]  ;;  %v2387_v10 = vld [vmem:[%s3018_s1 + $0x1b8] sm:$0xff]  ;;  %vm1638_vm3 = vcmask 1041408   ;;  %s2331_s26 = sshll.u32 %s3025_s22, 5 }
   0xe   : > { %v2397_v3 = vld [vmem:[%s3018_s1 + $0x208] sm:$0xff]  ;;  %798 = vmatpush.bf16.msra.mxu2 %v2389_v2  ;;  %v2396_v7 = vld [vmem:[%s3018_s1 + $0x200] sm:$0xff]  ;;  %v2395_v11 = vld [vmem:[%s3018_s1 + $0x1f8] sm:$0xff]  ;;  %s2553_s28 = scalar_lea.vmem %s3017_s0, %s2442_s15  ;;  %s251_s30 = scalar_lea.vmem %s3023_s6, %s2331_s26 }
   0xf   : > { %817 = vmatpush.bf16.msra.mxu3 %v2397_v3  ;;  %v2370_v12 = vld [vmem:[%s3018_s1 + $0x130] sm:$0xff]  ;;  %v2562_v14 = vld [vmem:[%s2553_s28 + $0x28] sm:$0xff]  ;;  %v351_v17 = vld [vmem:[%s2553_s28] sm:$0xfe] }
  0x10   : > { %761 = vmatpush.bf16.msra.mxu0 %v2372_v4  ;;  %v2378_v13 = vld [vmem:[%s3018_s1 + $0x170] sm:$0xff]  ;;  %v2369_v18 = vld [vmem:[%s3018_s1 + $0x128] sm:$0xff]  ;;  %v268_v24 = vld [vmem:[%s2553_s28 + $0x78] sm:$0xff]  ;;  %v361_v25 = vpack.c.bf16 %v2562_v14, %v351_v17 }
  0x11   : > { %780 = vmatpush.bf16.msra.mxu1 %v2380_v5  ;;  %v2386_v15 = vld [vmem:[%s3018_s1 + $0x1b0] sm:$0xff]  ;;  %v2377_v19 = vld [vmem:[%s3018_s1 + $0x168] sm:$0xff]  ;;  %v2591_v27 = vld [vmem:[%s2553_s28 + $0x38] sm:$0xff] }
  0x12   : > { %799 = vmatpush.bf16.msra.mxu2 %v2388_v6  ;;  %v2394_v16 = vld [vmem:[%s3018_s1 + $0x1f0] sm:$0xff]  ;;  %v2385_v22 = vld [vmem:[%s3018_s1 + $0x1a8] sm:$0xff]  ;;  %v264_v28 = vld [vmem:[%s2553_s28 + $0x58] sm:$0xff]  ;;  %v444_v40 = vshll.u32 %v361_v25, 16  ;;  %v442_v52 = vshrl.u32 %v361_v25, 16 }
  0x13   : > { %818 = vmatpush.bf16.msra.mxu3 %v2396_v7  ;;  %v263_v20 = vld [vmem:[%s2553_s28 + $0x50] sm:$0xff]  ;;  %v2393_v23 = vld [vmem:[%s3018_s1 + $0x1e8] sm:$0xff]  ;;  %v269_v29 = vld [vmem:[%s2553_s28 + $0x80] sm:$0xff] }
  0x14   : > { %762 = vmatpush.bf16.msra.mxu0 %v2371_v8  ;;  %v2579_v21 = vld [vmem:[%s2553_s28 + $0x30] sm:$0xff]  ;;  %v352_v26 = vld [vmem:[%s2553_s28 + $0x8] sm:$0xfe]  ;;  %v265_v32 = vld [vmem:[%s2553_s28 + $0x60] sm:$0xff]  ;;  %v2606_v39 = vpack.c.bf16 %v268_v24, %v263_v20  ;;  %v2608_v41 = vpack.c.bf16 %v269_v29, %v264_v28  ;;  %v446_v53 = vrot.slane %v444_v40, 1 }
  0x15   : > { %781 = vmatpush.bf16.msra.mxu1 %v2379_v9  ;;  %v362_v30 = vpack.c.bf16 %v2579_v21, %v352_v26  ;;  %v353_v31 = vld [vmem:[%s2553_s28 + $0x10] sm:$0xfe]  ;;  %v270_v33 = vld [vmem:[%s2553_s28 + $0x88] sm:$0xff]  ;;  %v2601_v35 = vld [vmem:[%s2553_s28 + $0x40] sm:$0xff] }
  0x16   : > { %800 = vmatpush.bf16.msra.mxu2 %v2387_v10  ;;  %v363_v34 = vpack.c.bf16 %v2591_v27, %v353_v31  ;;  %v266_v36 = vld [vmem:[%s2553_s28 + $0x68] sm:$0xff]  ;;  %v271_v37 = vld [vmem:[%s2553_s28 + $0x90] sm:$0xff]  ;;  %v354_v38 = vld [vmem:[%s2553_s28 + $0x18] sm:$0xfe]  ;;  %v2616_v45 = vpack.c.bf16 %v270_v33, %v265_v32  ;;  %v449_v54 = vshll.u32 %v2606_v39, 16  ;;  %v461_v55 = vshll.u32 %v2608_v41, 16 }
  0x17   : > { %819 = vmatpush.bf16.msra.mxu3 %v2395_v11  ;;  %v2368_v42 = vld [vmem:[%s3018_s1 + $0x120] sm:$0xff]  ;;  %v456_v44 = vshll.u32 %v362_v30, 16  ;;  %v364_v46 = vpack.c.bf16 %v2601_v35, %v354_v38  ;;  %v2625_v50 = vpack.c.bf16 %v271_v37, %v266_v36  ;;  %v2367_v56 = vld [vmem:[%s3018_s1 + $0x118] sm:$0xff]  ;;  %v454_v58 = vshrl.u32 %v362_v30, 16  ;;  %v2366_v4 = vld [vmem:[%s3018_s1 + $0x110] sm:$0xff] }
  0x18   : > { %763 = vmatpush.bf16.msra.mxu0 %v2370_v12  ;;  %v2376_v43 = vld [vmem:[%s3018_s1 + $0x160] sm:$0xff]  ;;  %v468_v49 = vshll.u32 %v363_v34, 16  ;;  %v2375_v57 = vld [vmem:[%s3018_s1 + $0x158] sm:$0xff]  ;;  %v466_v60 = vshrl.u32 %v363_v34, 16  ;;  %v473_v61 = vshll.u32 %v2616_v45, 16  ;;  %v2374_v5 = vld [vmem:[%s3018_s1 + $0x150] sm:$0xff]  ;;  %v447_v6 = vor.u32 %v446_v53, %v442_v52 }
  0x19   : > { %782 = vmatpush.bf16.msra.mxu1 %v2378_v13  ;;  %v2384_v47 = vld [vmem:[%s3018_s1 + $0x1a0] sm:$0xff]  ;;  %v480_v51 = vshll.u32 %v364_v46, 16  ;;  %v458_v59 = vrot.slane %v456_v44, 1  ;;  %v2383_v62 = vld [vmem:[%s3018_s1 + $0x198] sm:$0xff]  ;;  %v478_v1 = vshrl.u32 %v364_v46, 16  ;;  %v485_v3 = vshll.u32 %v2625_v50, 16 }
  0x1a   : > { %801 = vmatpush.bf16.msra.mxu2 %v2386_v15  ;;  %v2392_v48 = vld [vmem:[%s3018_s1 + $0x1e0] sm:$0xff]  ;;  %v2391_v63 = vld [vmem:[%s3018_s1 + $0x1d8] sm:$0xff]  ;;  %v470_v0 = vrot.slane %v468_v49, 1  ;;  %v2649_v7 = vrot.slane %v449_v54, 1  ;;  %v2651_v9 = vrot.slane %v461_v55, 1  ;;  %v2382_v10 = vld [vmem:[%s3018_s1 + $0x190] sm:$0xff] }
  0x1b   : > { %820 = vmatpush.bf16.msra.mxu3 %v2394_v16  ;;  %v482_v2 = vrot.slane %v480_v51, 1  ;;  %v459_v8 = vor.u32 %v458_v59, %v454_v58  ;;  %v2390_v11 = vld [vmem:[%s3018_s1 + $0x1d0] sm:$0xff]  ;;  %v2659_v13 = vrot.slane %v473_v61, 1  ;;  %v2661_v16 = vrot.slane %v485_v3, 1  ;;  %v2347_v17 = vld [vmem:[%s3018_s1 + $0x78] sm:$0xff]  ;;  %v2353_v51 = vld [vmem:[%s3018_s1 + $0xa8] sm:$0xff] }
  0x1c   : > { %764 = vmatpush.bf16.msra.mxu0 %v2369_v18  ;;  %v471_v12 = vor.u32 %v470_v0, %v466_v60  ;;  %v2339_v18 = vld [vmem:[%s3018_s1 + $0x38] sm:$0xff]  ;;  %v356_v28 = vld [vmem:[%s2553_s28 + $0xa0] sm:$0x1]  ;;  %v357_v29 = vld [vmem:[%s2553_s28 + $0xa8] sm:$0x1]  ;;  %v501_v46 = vshrl.u32 %v2606_v39, 16 }
  0x1d   : > { %783 = vmatpush.bf16.msra.mxu1 %v2377_v19  ;;  %v483_v15 = vor.u32 %v482_v2, %v478_v1  ;;  %v452_v19 = vsel %vm440_vm0, %v447_v6, %v2649_v7  ;;  %v464_v20 = vsel %vm440_vm0, %v459_v8, %v2651_v9  ;;  %v2399_v26 = vld [vmem:[%s3018_s1 + $0x218] sm:$0xff]  ;;  %v2338_v30 = vld [vmem:[%s3018_s1 + $0x30] sm:$0xff]  ;;  %v366_v33 = vpack.c.bf16 %v356_v28, %v356_v28 }
  0x1e   : > { %802 = vmatpush.bf16.msra.mxu2 %v2385_v22  ;;  %v2355_v22 = vld [vmem:[%s3018_s1 + $0xb8] sm:$0xff]  ;;  %v476_v24 = vsel %vm440_vm0, %v471_v12, %v2659_v13  ;;  %v358_v31 = vld [vmem:[%s2553_s28 + $0xb0] sm:$0x1]  ;;  %v367_v34 = vpack.c.bf16 %v357_v29, %v357_v29  ;;  %v517_v52 = vshrl.u32 %v2616_v45, 16  ;;  %v525_v54 = vshrl.u32 %v2625_v50, 16 }
  0x1f   : > { %821 = vmatpush.bf16.msra.mxu3 %v2393_v23  ;;  %v2346_v23 = vld [vmem:[%s3018_s1 + $0x70] sm:$0xff]  ;;  %v488_v25 = vsel %vm440_vm0, %v483_v15, %v2661_v16  ;;  %v359_v32 = vld [vmem:[%s2553_s28 + $0xb8] sm:$0x1]  ;;  %v368_v37 = vpack.c.bf16 %v358_v31, %v358_v31  ;;  %v503_v59 = vor.u32 %v501_v46, %v2649_v7  ;;  %v2349_v31 = vld [vmem:[%s3018_s1 + $0x88] sm:$0xff] }
  0x20   : > { %765 = vmatpush.bf16.msra.mxu0 %v2368_v42  ;;  %v2354_v36 = vld [vmem:[%s3018_s1 + $0xb0] sm:$0xff]  ;;  %v369_v38 = vpack.c.bf16 %v359_v32, %v359_v32  ;;  %v2345_v42 = vld [vmem:[%s3018_s1 + $0x68] sm:$0xff]  ;;  %v2363_v44 = vld [vmem:[%s3018_s1 + $0xf8] sm:$0xff]  ;;  %v513_v49 = vshll.u32 %v367_v34, 16  ;;  %v519_v0 = vor.u32 %v517_v52, %v2659_v13  ;;  %v527_v2 = vor.u32 %v525_v54, %v2661_v16 }
  0x21   : > { %784 = vmatpush.bf16.msra.mxu1 %v2376_v43  ;;  %v2398_v40 = vld [vmem:[%s3018_s1 + $0x210] sm:$0xff]  ;;  %v2337_v43 = vld [vmem:[%s3018_s1 + $0x28] sm:$0xff]  ;;  %v521_v53 = vshll.u32 %v368_v37, 16  ;;  %v2343_v6 = vld [vmem:[%s3018_s1 + $0x58] sm:$0xff] }
  0x22   : > { %803 = vmatpush.bf16.msra.mxu2 %v2384_v47  ;;  %v505_v47 = vshll.u32 %v366_v33, 16  ;;  %v529_v55 = vshll.u32 %v369_v38, 16  ;;  %v2362_v58 = vld [vmem:[%s3018_s1 + $0xf0] sm:$0xff]  ;;  %v2335_v7 = vld [vmem:[%s3018_s1 + $0x18] sm:$0xff]  ;;  %v2340_v33 = vld [vmem:[%s3018_s1 + $0x40] sm:$0xff] }
  0x23   : > { %822 = vmatpush.bf16.msra.mxu3 %v2392_v48  ;;  %v509_v48 = vshrl.u32 %v2608_v41, 16  ;;  %v523_v1 = vrot.slane %v521_v53, 1  ;;  %v267_v15 = vld [vmem:[%s2553_s28 + $0x70] sm:$0xff]  ;;  %v272_v16 = vld [vmem:[%s2553_s28 + $0x98] sm:$0xff]  ;;  %v2332_v34 = vld [vmem:[%s3018_s1] sm:$0xff] }
  0x24   : > { %766 = vmatpush.bf16.msra.mxu0 %v2367_v56  ;;  %v2344_v56 = vld [vmem:[%s3018_s1 + $0x60] sm:$0xff]  ;;  %v507_v60 = vrot.slane %v505_v47, 1  ;;  %v531_v3 = vrot.slane %v529_v55, 1  ;;  %v2359_v32 = vld [vmem:[%s3018_s1 + $0xd8] sm:$0xff]  ;;  %v2365_v37 = vld [vmem:[%s3018_s1 + $0x108] sm:$0xff] }
  0x25   : > { %785 = vmatpush.bf16.msra.mxu1 %v2375_v57  ;;  %v2336_v57 = vld [vmem:[%s3018_s1 + $0x20] sm:$0xff]  ;;  %v511_v61 = vor.u32 %v509_v48, %v2651_v9  ;;  %v524_v12 = vsel %vm440_vm0, %v519_v0, %v523_v1  ;;  %v255_v46 = vld [vmem:[%s2553_s28 + $0x10] sm:$0xff]  ;;  %v2415_v48 = vld [vmem:[%s3018_s1 + $0x298] sm:$0xff] }
  0x26   : > { %804 = vmatpush.bf16.msra.mxu2 %v2383_v62  ;;  %v515_v62 = vrot.slane %v513_v49, 1  ;;  %v508_v8 = vsel %vm440_vm0, %v503_v59, %v507_v60  ;;  %v532_v13 = vsel %vm440_vm0, %v527_v2, %v531_v3  ;;  %v2348_v38 = vld [vmem:[%s3018_s1 + $0x80] sm:$0xff]  ;;  %v2358_v47 = vld [vmem:[%s3018_s1 + $0xd0] sm:$0xff]  ;;  %v275_v53 = vpack.c.bf16 %v2591_v27, %v255_v46  ;;  %v2431_v59 = vld [vmem:[%s3018_s1 + $0x318] sm:$0xff] }
  0x27   : > { %823 = vmatpush.bf16.msra.mxu3 %v2391_v63  ;;  %v2352_v63 = vld [vmem:[%s3018_s1 + $0xa0] sm:$0xff]  ;;  %v2406_v54 = vld [vmem:[%s3018_s1 + $0x250] sm:$0xff]  ;;  %v2838_v0 = vld [vmem:[%s3018_s1 + $0x2d8] sm:$0xff] }
  0x28   : > { %767 = vmatpush.bf16.msra.mxu0 %v2366_v4  ;;  %v2732_v4 = vld [vmem:[%s2553_s28 + $0x48] sm:$0xff]  ;;  %v516_v9 = vsel %vm440_vm0, %v511_v61, %v515_v62  ;;  %v360_v55 = vld [vmem:[%s2553_s28 + $0xc0] sm:$0x1]  ;;  %v2430_v1 = vld [vmem:[%s3018_s1 + $0x310] sm:$0xff] }
  0x29   : > { %786 = vmatpush.bf16.msra.mxu1 %v2374_v5  ;;  %v355_v5 = vld [vmem:[%s2553_s28 + $0x20] sm:$0xfe]  ;;  %v370_v60 = vpack.c.bf16 %v360_v55, %v360_v55  ;;  %v2405_v61 = vld [vmem:[%s3018_s1 + $0x248] sm:$0xff] }
  0x2a   : > { %805 = vmatpush.bf16.msra.mxu2 %v2382_v10  ;;  %v2351_v10 = vld [vmem:[%s3018_s1 + $0x98] sm:$0xff]  ;;  %v2413_v62 = vld [vmem:[%s3018_s1 + $0x288] sm:$0xff] }
  0x2b   : > { %824 = vmatpush.bf16.msra.mxu3 %v2390_v11  ;;  %768 = vmatmul.bf16.vlgmr.msra.gmra.mxu0 %v452_v19  ;;  %v365_v11 = vpack.c.bf16 %v2732_v4, %v355_v5  ;;  %v2334_v19 = vld [vmem:[%s3018_s1 + $0x10] sm:$0xff]  ;;  %v537_v3 = vshll.u32 %v370_v60, 16  ;;  %v2404_v5 = vld [vmem:[%s3018_s1 + $0x240] sm:$0xff] }
  0x2c   : > { %787 = vmatmul.bf16.vlgmr.msra.gmra.mxu1 %v464_v20  ;;  %842 = vmatpush.bf16.msrb.mxu0 %v2399_v26  ;;  %v2760_v20 = vpack.c.bf16 %v272_v16, %v267_v15  ;;  %v2333_v26 = vld [vmem:[%s3018_s1 + $0x8] sm:$0xff]  ;;  %v2402_v15 = vld [vmem:[%s3018_s1 + $0x230] sm:$0xff] }
  0x2d   : > { %1064 = vmatpush.bf16.msrb.mxu1 %v2339_v18  ;;  %806 = vmatmul.bf16.vlgmr.msra.gmra.mxu2 %v476_v24  ;;  %v2342_v18 = vld [vmem:[%s3018_s1 + $0x50] sm:$0xff]  ;;  %v2360_v24 = vld [vmem:[%s3018_s1 + $0xe0] sm:$0xff]  ;;  %v490_v28 = vshrl.u32 %v365_v11, 16  ;;  %v2421_v16 = vld [vmem:[%s3018_s1 + $0x2c8] sm:$0xff] }
  0x2e   : > { %1083 = vmatpush.bf16.msrb.mxu2 %v2347_v17  ;;  %825 = vmatmul.bf16.vlgmr.msra.gmra.mxu3 %v488_v25  ;;  %v2361_v17 = vld [vmem:[%s3018_s1 + $0xe8] sm:$0xff]  ;;  %v533_v2 = vshrl.u32 %v2760_v20, 16  ;;  %v1161_v60 = vld [vmem:[%s2553_s28 + $0x10] sm:$0xfc] }
  0x2f   : > { %1102 = vmatpush.bf16.msrb.mxu3 %v2355_v22  ;;  %v492_v22 = vshll.u32 %v365_v11, 16  ;;  %v2341_v25 = vld [vmem:[%s3018_s1 + $0x48] sm:$0xff]  ;;  %v2403_v11 = vld [vmem:[%s3018_s1 + $0x238] sm:$0xff] }
  0x30   : > { %843 = vmatpush.bf16.msrb.mxu0 %v2398_v40 }
  0x31   : > { %1065 = vmatpush.bf16.msrb.mxu1 %v2338_v30  ;;  %v494_v29 = vrot.slane %v492_v22, 1  ;;  %v497_v30 = vshll.u32 %v2760_v20, 16  ;;  %v2409_v22 = vld [vmem:[%s3018_s1 + $0x268] sm:$0xff] }
  0x32   : > { %1084 = vmatpush.bf16.msrb.mxu2 %v2346_v23  ;;  %v2350_v23 = vld [vmem:[%s3018_s1 + $0x90] sm:$0xff] }
  0x33   : > { %1103 = vmatpush.bf16.msrb.mxu3 %v2354_v36  ;;  %v2407_v36 = vld [vmem:[%s3018_s1 + $0x258] sm:$0xff]  ;;  %v495_v40 = vor.u32 %v494_v29, %v490_v28  ;;  %v2400_v28 = vld [vmem:[%s3018_s1 + $0x220] sm:$0xff] }
  0x34   : > { %1121 = vmatpush.bf16.msra.mxu0 %v2363_v44  ;;  %v254_v44 = vld [vmem:[%s2553_s28 + $0x8] sm:$0xff] }
  0x35   : > { %1066 = vmatpush.bf16.msrb.mxu1 %v2337_v43  ;;  %v253_v43 = vld [vmem:[%s2553_s28] sm:$0xff]  ;;  %v274_v52 = vpack.c.bf16 %v2579_v21, %v254_v44 }
  0x36   : > { %1085 = vmatpush.bf16.msrb.mxu2 %v2345_v42  ;;  %v499_v42 = vrot.slane %v497_v30, 1  ;;  %v273_v49 = vpack.c.bf16 %v2562_v14, %v253_v43  ;;  %v2432_v43 = vld [vmem:[%s3018_s1 + $0x320] sm:$0xff] }
  0x37   : > { %1104 = vmatpush.bf16.msrb.mxu3 %v2353_v51 }
  0x38   : > { %1122 = vmatpush.bf16.msra.mxu0 %v2362_v58  ;;  %v500_v51 = vsel %vm440_vm0, %v495_v40, %v499_v42  ;;  %v2357_v58 = vld [vmem:[%s3018_s1 + $0xc8] sm:$0xff]  ;;  %v1268_v40 = vrot.slane %v2608_v41, 1 }
  0x39   : > { %1067 = vmatpush.bf16.msrb.mxu1 %v2336_v57  ;;  %v2414_v57 = vld [vmem:[%s3018_s1 + $0x290] sm:$0xff] }
  0x3a   : > { %1086 = vmatpush.bf16.msrb.mxu2 %v2344_v56  ;;  %v2364_v56 = vld [vmem:[%s3018_s1 + $0x100] sm:$0xff] }
  0x3b   : > { %1105 = vmatpush.bf16.msrb.mxu3 %v2352_v63  ;;  %773 = vmatmul.bf16.gmra.mxu0 %v508_v8  ;;  %v2356_v63 = vld [vmem:[%s3018_s1 + $0xc0] sm:$0xff]  ;;  %v2429_v8 = vld [vmem:[%s3018_s1 + $0x308] sm:$0xff] }
  0x3c   : > { %792 = vmatmul.bf16.gmra.mxu1 %v516_v9  ;;  %1123 = vmatpush.bf16.msra.mxu0 %v2361_v17  ;;  %v535_v9 = vor.u32 %v533_v2, %v499_v42  ;;  %v2410_v17 = vld [vmem:[%s3018_s1 + $0x270] sm:$0xff] }
  0x3d   : > { %1068 = vmatpush.bf16.msrb.mxu1 %v2335_v7  ;;  %811 = vmatmul.bf16.gmra.mxu2 %v524_v12  ;;  %v2854_v7 = vld [vmem:[%s3018_s1 + $0x2d0] sm:$0xff]  ;;  %v2411_v12 = vld [vmem:[%s3018_s1 + $0x278] sm:$0xff] }
  0x3e   : > { %1087 = vmatpush.bf16.msrb.mxu2 %v2343_v6  ;;  %830 = vmatmul.bf16.gmra.mxu3 %v532_v13  ;;  %v2412_v6 = vld [vmem:[%s3018_s1 + $0x280] sm:$0xff]  ;;  %v2418_v42 = vld [vmem:[%s3018_s1 + $0x2b0] sm:$0xff] }
  0x3f   : > { %1106 = vmatpush.bf16.msrb.mxu3 %v2351_v10  ;;  %v539_v10 = vrot.slane %v537_v3, 1 }
  0x40   : > { %1124 = vmatpush.bf16.msra.mxu0 %v2360_v24  ;;  %v1159_v24 = vld [vmem:[%s2553_s28] sm:$0xfc] }
  0x41   : > { %1069 = vmatpush.bf16.msrb.mxu1 %v2334_v19  ;;  %v540_v13 = vsel %vm440_vm0, %v535_v9, %v539_v10  ;;  %v2401_v19 = vld [vmem:[%s3018_s1 + $0x228] sm:$0xff]  ;;  %v1169_v29 = vpack.c.bf16 %v2562_v14, %v1159_v24  ;;  %v2426_v14 = vld [vmem:[%s3018_s1 + $0x2f0] sm:$0xff] }
  0x42   : > { %1088 = vmatpush.bf16.msrb.mxu2 %v2342_v18  ;;  %v2428_v18 = vld [vmem:[%s3018_s1 + $0x300] sm:$0xff] }
  0x43   : > { %1107 = vmatpush.bf16.msrb.mxu3 %v2350_v23  ;;  %v2420_v23 = vld [vmem:[%s3018_s1 + $0x2c0] sm:$0xff] }
  0x44   : > { %1125 = vmatpush.bf16.msra.mxu0 %v2359_v32  ;;  %v2408_v32 = vld [vmem:[%s3018_s1 + $0x260] sm:$0xff] }
  0x45   : > { %1070 = vmatpush.bf16.msrb.mxu1 %v2333_v26  ;;  %v2427_v26 = vld [vmem:[%s3018_s1 + $0x2f8] sm:$0xff] }
  0x46   : > { %1089 = vmatpush.bf16.msrb.mxu2 %v2341_v25  ;;  %v1160_v25 = vld [vmem:[%s2553_s28 + $0x8] sm:$0xfc] }
  0x47   : > { %1108 = vmatpush.bf16.msrb.mxu3 %v2349_v31  ;;  %v1170_v30 = vpack.c.bf16 %v2579_v21, %v1160_v25  ;;  %v2419_v31 = vld [vmem:[%s3018_s1 + $0x2b8] sm:$0xff] }
  0x48   : > { %1126 = vmatpush.bf16.msra.mxu0 %v2358_v47  ;;  %v256_v21 = vld [vmem:[%s2553_s28 + $0x18] sm:$0xff]  ;;  %v2417_v47 = vld [vmem:[%s3018_s1 + $0x2a8] sm:$0xff] }
  0x49   : > { %1071 = vmatpush.bf16.msrb.mxu1 %v2332_v34  ;;  %v257_v34 = vld [vmem:[%s2553_s28 + $0x20] sm:$0xff]  ;;  %v276_v44 = vpack.c.bf16 %v2601_v35, %v256_v21 }
  0x4a   : > { %1090 = vmatpush.bf16.msrb.mxu2 %v2340_v33  ;;  %v2433_v33 = vld [vmem:[%s3018_s1 + $0x328] sm:$0xff]  ;;  %v277_v46 = vpack.c.bf16 %v2732_v4, %v257_v34 }
  0x4b   : > { %1109 = vmatpush.bf16.msrb.mxu3 %v2348_v38  ;;  %1983 = vmatmul.msk.bf16.vlgmr.msrb.gmra.mxu0 %vm753_vm1, %v500_v51  ;;  %v1267_v38 = vrot.slane %v1170_v30, 1  ;;  %v1164_v51 = vld [vmem:[%s2553_s28 + $0xa0] sm:$0x3] }
  0x4c   : > { %1072 = vmatmul.bf16.vlgmr.msrb.gmra.mxu1 %v273_v49  ;;  %1127 = vmatpush.bf16.msra.mxu0 %v2357_v58  ;;  %v2416_v49 = vld [vmem:[%s3018_s1 + $0x2a0] sm:$0xff] }
  0x4d   : > { %1146 = vmatpush.bf16.msra.mxu1 %v2365_v37  ;;  %1091 = vmatmul.bf16.vlgmr.msrb.gmra.mxu2 %v274_v52  ;;  %v1265_v37 = vrot.slane %v2606_v39, 1  ;;  %v1165_v52 = vld [vmem:[%s2553_s28 + $0xa8] sm:$0x3] }
  0x4e   : > { %1507 = vmatpush.bf16.msra.mxu2 %v2407_v36  ;;  %1110 = vmatmul.bf16.vlgmr.msrb.gmra.mxu3 %v275_v53  ;;  %v1264_v36 = vrot.slane %v1169_v29, 1  ;;  %v2424_v53 = vld [vmem:[%s3018_s1 + $0x2e0] sm:$0xff]  ;;  %v1175_v55 = vpack.c.bf16 %v1165_v52, %v1165_v52 }
  0x4f   : > { %1526 = vmatpush.bf16.msra.mxu3 %v2415_v48  ;;  %v2425_v48 = vld [vmem:[%s3018_s1 + $0x2e8] sm:$0xff] }
  0x50   : > { %1128 = vmatpush.bf16.msra.mxu0 %v2356_v63  ;;  %v1163_v63 = vld [vmem:[%s2553_s28 + $0x20] sm:$0xfc] }
  0x51   : > { %1147 = vmatpush.bf16.msra.mxu1 %v2364_v56  ;;  %v1173_v3 = vpack.c.bf16 %v2732_v4, %v1163_v63 }
  0x52   : > { %1508 = vmatpush.bf16.msra.mxu2 %v2406_v54  ;;  %v1174_v54 = vpack.c.bf16 %v1164_v51, %v1164_v51 }
  0x53   : > { %1527 = vmatpush.bf16.msra.mxu3 %v2414_v57  ;;  %v1281_v57 = vrot.slane %v1175_v55, 1  ;;  %v1276_v10 = vrot.slane %v1173_v3, 1 }
  0x54   : > { %1545 = vmatpush.bf16.msrb.mxu0 %v2838_v0  ;;  %v1279_v56 = vrot.slane %v1174_v54, 1 }
  0x55   : > { %1564 = vmatpush.bf16.msrb.mxu1 %v2431_v59  ;;  %v1282_v59 = vsel %vm1263_vm2, %v1268_v40, %v1281_v57 }
  0x56   : > { %1509 = vmatpush.bf16.msra.mxu2 %v2405_v61  ;;  %v1280_v58 = vsel %vm1263_vm2, %v1265_v37, %v1279_v56  ;;  %v1162_v61 = vld [vmem:[%s2553_s28 + $0x18] sm:$0xfc] }
  0x57   : > { %1528 = vmatpush.bf16.msra.mxu3 %v2413_v62  ;;  %v1166_v62 = vld [vmem:[%s2553_s28 + $0xb0] sm:$0x3] }
  0x58   : > { %1546 = vmatpush.bf16.msrb.mxu0 %v2854_v7  ;;  %v1176_v2 = vpack.c.bf16 %v1166_v62, %v1166_v62 }
  0x59   : > { %1565 = vmatpush.bf16.msrb.mxu1 %v2430_v1  ;;  %v1172_v1 = vpack.c.bf16 %v2601_v35, %v1162_v61 }
  0x5a   : > { %1510 = vmatpush.bf16.msra.mxu2 %v2404_v5  ;;  %v1283_v9 = vrot.slane %v1176_v2, 1 }
  0x5b   : > { %1529 = vmatpush.bf16.msra.mxu3 %v2412_v6  ;;  %1984 = vmatmul.msk.bf16.gmra.mxu0 %vm753_vm1, %v540_v13  ;;  %v1271_v6 = vrot.slane %v2616_v45, 1 }
  0x5c   : > { %1077 = vmatmul.bf16.gmra.mxu1 %v2606_v39  ;;  %1547 = vmatpush.bf16.msrb.mxu0 %v2421_v16  ;;  %v1266_v39 = vsel %vm1263_vm2, %v1264_v36, %v1265_v37 }
  0x5d   : > { %1566 = vmatpush.bf16.msrb.mxu1 %v2429_v8  ;;  %1096 = vmatmul.bf16.gmra.mxu2 %v2608_v41  ;;  %v1269_v41 = vsel %vm1263_vm2, %v1267_v38, %v1268_v40  ;;  %v1274_v8 = vrot.slane %v2625_v50, 1 }
  0x5e   : > { %1511 = vmatpush.bf16.msra.mxu2 %v2403_v11  ;;  %1115 = vmatmul.bf16.gmra.mxu3 %v2616_v45  ;;  %v1277_v11 = vrot.slane %v2760_v20, 1  ;;  %v1167_v45 = vld [vmem:[%s2553_s28 + $0xb8] sm:$0x3] }
  0x5f   : > { %1530 = vmatpush.bf16.msra.mxu3 %v2411_v12  ;;  %v1284_v12 = vsel %vm1263_vm2, %v1271_v6, %v1283_v9  ;;  %v1177_v13 = vpack.c.bf16 %v1167_v45, %v1167_v45 }
  0x60   : > { %1548 = vmatpush.bf16.msrb.mxu0 %v2420_v23  ;;  %v1278_v4 = vsel %vm1263_vm2, %v1276_v10, %v1277_v11 }
  0x61   : > { %1567 = vmatpush.bf16.msrb.mxu1 %v2428_v18 }
  0x62   : > { %1512 = vmatpush.bf16.msra.mxu2 %v2402_v15 }
  0x63   : > { %1531 = vmatpush.bf16.msra.mxu3 %v2410_v17 }
  0x64   : > { %1549 = vmatpush.bf16.msrb.mxu0 %v2419_v31 }
  0x65   : > { %1568 = vmatpush.bf16.msrb.mxu1 %v2427_v26 }
  0x66   : > { %1513 = vmatpush.bf16.msra.mxu2 %v2401_v19 }
  0x67   : > { %1532 = vmatpush.bf16.msra.mxu3 %v2409_v22 }
  0x68   : > { %1550 = vmatpush.bf16.msrb.mxu0 %v2418_v42 }
  0x69   : > { %1569 = vmatpush.bf16.msrb.mxu1 %v2426_v14 }
  0x6a   : > { %1514 = vmatpush.bf16.msra.mxu2 %v2400_v28 }
  0x6b   : > { %1533 = vmatpush.bf16.msra.mxu3 %v2408_v32  ;;  %1129 = vmatmul.bf16.vlgmr.msra.gmra.mxu0 %v276_v44 }
  0x6c   : > { %2121 = vmatmul.msk.bf16.vlgmr.msra.gmra.mxu1 %vm753_vm1, %v277_v46  ;;  %1551 = vmatpush.bf16.msrb.mxu0 %v2417_v47 }
  0x6d   : > { %1515 = vmatmul.bf16.vlgmr.msra.gmra.mxu2 %v1266_v39  ;;  %1570 = vmatpush.bf16.msrb.mxu1 %v2425_v48 }
  0x6e   : > { %1589 = vmatpush.bf16.msrb.mxu2 %v2433_v33  ;;  %1534 = vmatmul.bf16.vlgmr.msra.gmra.mxu3 %v1269_v41 }
  0x6f   : > { %2434 = vmatpush.bf16.msrb.mxu3 %v2838_v0  ;;  %v1171_v0 = vpack.c.bf16 %v2591_v27, %v1161_v60 }
  0x70   : > { %1552 = vmatpush.bf16.msrb.mxu0 %v2416_v49 }
  0x71   : > { %1571 = vmatpush.bf16.msrb.mxu1 %v2424_v53  ;;  %v1270_v5 = vrot.slane %v1171_v0, 1 }
  0x72   : > { %1590 = vmatpush.bf16.msrb.mxu2 %v2432_v43 }
  0x73   : > { %2435 = vmatpush.bf16.msrb.mxu3 %v2854_v7  ;;  %v1273_v7 = vrot.slane %v1172_v1, 1  ;;  %v1272_v27 = vsel %vm1263_vm2, %v1270_v5, %v1271_v6 }
  0x75   : > { %v1275_v35 = vsel %vm1263_vm2, %v1273_v7, %v1274_v8 }
  0x77   : > { %2436 = vmatpush.bf16.msrb.mxu3 %v2421_v16  ;;  %v1285_v16 = vrot.slane %v1177_v13, 1 }
  0x7b   : > { %2437 = vmatpush.bf16.msrb.mxu3 %v2420_v23  ;;  %1134 = vmatmul.bf16.gmra.mxu0 %v2625_v50  ;;  %v1168_v50 = vld [vmem:[%s2553_s28 + $0xc0] sm:$0x3] }
  0x7c   : > { %2122 = vmatmul.msk.bf16.gmra.mxu1 %vm753_vm1, %v2760_v20  ;;  %v1178_v15 = vpack.c.bf16 %v1168_v50, %v1168_v50  ;;  %v1286_v20 = vsel %vm1263_vm2, %v1274_v8, %v1285_v16 }
  0x7d   : > { %1520 = vmatmul.bf16.gmra.mxu2 %v1280_v58 }
  0x7e   : > { %1539 = vmatmul.bf16.gmra.mxu3 %v1282_v59  ;;  %v1287_v17 = vrot.slane %v1178_v15, 1 }
  0x7f   : > { %2438 = vmatpush.bf16.msrb.mxu3 %v2419_v31 }
  0x80   : > { %v1288_v18 = vsel %vm1263_vm2, %v1277_v11, %v1287_v17 }
  0x83   : > { %2439 = vmatpush.bf16.msrb.mxu3 %v2418_v42 }
  0x87   : > { %2440 = vmatpush.bf16.msrb.mxu3 %v2417_v47 }
  0x8b   : > { %2441 = vmatpush.bf16.msrb.mxu3 %v2416_v49  ;;  %1553 = vmatmul.bf16.vlgmr.msrb.gmra.mxu0 %v1272_v27 }
  0x8c   : > { %1572 = vmatmul.bf16.vlgmr.msrb.gmra.mxu1 %v1275_v35 }
  0x8d   : > { %2327 = vmatmul.msk.bf16.vlgmr.msrb.gmra.mxu2 %vm753_vm1, %v1278_v4 }
  0x8e   : > { %1558 = vmatmul.bf16.vlgmr.msrb.gmra.mxu3 %v1284_v12 }
  0x9c   : > { %1577 = vmatmul.bf16.gmra.mxu1 %v1286_v20 }
  0x9d   : > { %2328 = vmatmul.msk.bf16.gmra.mxu2 %vm753_vm1, %v1288_v18 }
  0xa8   : > { %v769_v19 = vpop.f32.mrf.mxu0 }
  0xa9   : > { %v788_v22 = vpop.f32.mrf.mxu1 }
  0xaa   : > { %v789_v23 = vadd.f32 %v788_v22, %v769_v19 }
  0xb0   : > { %v807_v24 = vpop.f32.mrf.mxu2  ;;  %v771_v28 = vpop.f32.mrf.mxu0 }
  0xb1   : > { %v826_v25 = vpop.f32.mrf.mxu3  ;;  %v808_v26 = vadd.f32 %v807_v24, %v789_v23  ;;  %v790_v29 = vpop.f32.mrf.mxu1 }
  0xb2   : > { %v791_v30 = vadd.f32 %v790_v29, %v771_v28 }
  0xb3   : > { %v827_v31 = vadd.f32 %v826_v25, %v808_v26 }
  0xb8   : > { %v809_v32 = vpop.f32.mrf.mxu2  ;;  %v774_v21 = vpop.f32.mrf.mxu0 }
  0xb9   : > { %v828_v33 = vpop.f32.mrf.mxu3  ;;  %v810_v14 = vadd.f32 %v809_v32, %v791_v30  ;;  %v793_v34 = vpop.f32.mrf.mxu1 }
  0xba   : > { %v794_v36 = vadd.f32 %v793_v34, %v774_v21 }
  0xbb   : > { %v829_v37 = vadd.f32 %v828_v33, %v810_v14 }
  0xc0   : > { %v812_v38 = vpop.f32.mrf.mxu2  ;;  %v776_v43 = vpop.f32.mrf.mxu0 }
  0xc1   : > { %v831_v40 = vpop.f32.mrf.mxu3  ;;  %v813_v42 = vadd.f32 %v812_v38, %v794_v36  ;;  %v795_v44 = vpop.f32.mrf.mxu1 }
  0xc2   : > { %v796_v46 = vadd.f32 %v795_v44, %v776_v43 }
  0xc3   : > { %v832_v39 = vadd.f32 %v831_v40, %v813_v42 }
  0xc8   : > { %v814_v41 = vpop.f32.mrf.mxu2  ;;  %v845_v49 = vpop.f32.mrf.mxu0 }
  0xc9   : > { %v833_v47 = vpop.f32.mrf.mxu3  ;;  %v815_v48 = vadd.f32 %v814_v41, %v796_v46  ;;  %v1073_v51 = vpop.f32.mrf.mxu1  ;;  %v846_v52 = vadd.f32 %v845_v49, %v827_v31 }
  0xcb   : > { %v834_v53 = vadd.f32 %v833_v47, %v815_v48  ;;  %v1074_v54 = vadd.f32 %v1073_v51, %v846_v52 }
  0xd0   : > { %v1092_v55 = vpop.f32.mrf.mxu2  ;;  %v847_v58 = vpop.f32.mrf.mxu0 }
  0xd1   : > { %v1111_v56 = vpop.f32.mrf.mxu3  ;;  %v1093_v57 = vadd.f32 %v1092_v55, %v1074_v54  ;;  %v1075_v59 = vpop.f32.mrf.mxu1  ;;  %v848_v60 = vadd.f32 %v847_v58, %v829_v37 }
  0xd3   : > { %v1112_v61 = vadd.f32 %v1111_v56, %v1093_v57  ;;  %v1076_v62 = vadd.f32 %v1075_v59, %v848_v60 }
  0xd8   : > { %v1094_v63 = vpop.f32.mrf.mxu2  ;;  %v850_v2 = vpop.f32.mrf.mxu0 }
  0xd9   : > { %v1113_v0 = vpop.f32.mrf.mxu3  ;;  %v1095_v1 = vadd.f32 %v1094_v63, %v1076_v62  ;;  %v1078_v3 = vpop.f32.mrf.mxu1  ;;  %v851_v5 = vadd.f32 %v850_v2, %v832_v39 }
  0xdb   : > { %v1079_v6 = vadd.f32 %v1078_v3, %v851_v5  ;;  %v1114_v38 = vadd.f32 %v1113_v0, %v1095_v1 }
  0xe0   : > { %v1097_v7 = vpop.f32.mrf.mxu2  ;;  %v852_v10 = vpop.f32.mrf.mxu0 }
  0xe1   : > { %v1116_v8 = vpop.f32.mrf.mxu3  ;;  %v1098_v9 = vadd.f32 %v1097_v7, %v1079_v6  ;;  %v1080_v11 = vpop.f32.mrf.mxu1  ;;  %v853_v34 = vadd.f32 %v852_v10, %v834_v53 }
  0xe3   : > { %v1117_v43 = vadd.f32 %v1116_v8, %v1098_v9  ;;  %v1081_v41 = vadd.f32 %v1080_v11, %v853_v34 }
  0xe8   : > { %v1099_v27 = vpop.f32.mrf.mxu2  ;;  %v1130_v12 = vpop.f32.mrf.mxu0 }
  0xe9   : > { %v1118_v35 = vpop.f32.mrf.mxu3  ;;  %v1149_v4 = vpop.f32.mrf.mxu1  ;;  %v1131_v47 = vadd.f32 %v1130_v12, %v1112_v61  ;;  %v1100_v54 = vadd.f32 %v1099_v27, %v1081_v41  ;;  %v2452_v61 = vld [vmem:[%s3019_s2] ss:$0 sm:$0xff] }
  0xeb   : > { %v1150_v58 = vadd.f32 %v1149_v4, %v1131_v47  ;;  %v1119_v0 = vadd.f32 %v1118_v35, %v1100_v54 }
  0xf0   : > { %v1516_v45 = vpop.f32.mrf.mxu2  ;;  %v1132_v13 = vpop.f32.mrf.mxu0 }
  0xf1   : > { %v1535_v50 = vpop.f32.mrf.mxu3  ;;  %v1151_v15 = vpop.f32.mrf.mxu1  ;;  %v1133_v44 = vadd.f32 %v1132_v13, %v1114_v38 }
  0xf2   : > { %v1536_v14 = vadd.f32 %v1535_v50, %v1516_v45 }
  0xf3   : > { %v1152_v55 = vadd.f32 %v1151_v15, %v1133_v44 }
  0xf8   : > { %v1518_v16 = vpop.f32.mrf.mxu2  ;;  %v1135_v17 = vpop.f32.mrf.mxu0 }
  0xf9   : > { %v1154_v20 = vpop.f32.mrf.mxu1  ;;  %v1537_v18 = vpop.f32.mrf.mxu3  ;;  %v1136_v48 = vadd.f32 %v1135_v17, %v1117_v43  ;;  %v2467_v43 = vmov 2048.0  }
  0xfa   : > { %v1538_v33 = vadd.f32 %v1537_v18, %v1518_v16  ;;  %2455 = vrcp.f32 %v2467_v43 }
  0xfb   : > { %v1155_v59 = vadd.f32 %v1154_v20, %v1136_v48 }
 0x100   : > { %v1521_v19 = vpop.f32.mrf.mxu2  ;;  %v1137_v22 = vpop.f32.mrf.mxu0 }
 0x101   : > { %v1156_v23 = vpop.f32.mrf.mxu1  ;;  %v1540_v24 = vpop.f32.mrf.mxu3  ;;  %v1138_v6 = vadd.f32 %v1137_v22, %v1119_v0 }
 0x102   : > { %v1541_v46 = vadd.f32 %v1540_v24, %v1521_v19  ;;  %v2456_v44 = vpop.eup %2455 }
 0x103   : > { %v1157_v12 = vadd.f32 %v1156_v23, %v1138_v6  ;;  %vm1651_vm4 = vweird.f32 %v2456_v44 }
 0x108   : > { %v1523_v25 = vpop.f32.mrf.mxu2  ;;  %v1554_v28 = vpop.f32.mrf.mxu0 }
 0x109   : > { %v1573_v26 = vpop.f32.mrf.mxu1  ;;  %v1542_v29 = vpop.f32.mrf.mxu3  ;;  %v1555_v40 = vadd.f32 %v1554_v28, %v1536_v14  ;;  %v1614_v14 = vld [vmem:[%s3022_s5] sm:$0x3] }
 0x10a   : > { %v1543_v1 = vadd.f32 %v1542_v29, %v1523_v25 }
 0x10b   : > { %v1574_v49 = vadd.f32 %v1573_v26, %v1555_v40 }
 0x110   : > { %v1592_v30 = vpop.f32.mrf.mxu2  ;;  %v1556_v32 = vpop.f32.mrf.mxu0 }
 0x111   : > { %v1575_v31 = vpop.f32.mrf.mxu1  ;;  %v1557_v21 = vadd.f32 %v1556_v32, %v1538_v33  ;;  %v1559_v36 = vpop.f32.mrf.mxu3  ;;  %v1593_v56 = vadd.f32 %v1592_v30, %v1574_v49 }
 0x112   : > { %v1560_v51 = vadd.f32 %v1559_v36, %v1541_v46  ;;  %v1647_v46 = vmul.f32 2048.0, %v2456_v44 }
 0x113   : > { %v1576_v39 = vadd.f32 %v1575_v31, %v1557_v21  ;;  %v1602_v2 = vadd.f32 %v1593_v56, %v1150_v58 }
 0x115   : > { %v2975_v9 = vadd.f32 %v2452_v61, %v1602_v2 }
 0x117   : > { %v1624_v45 = vmul.f32 %v2975_v9, %v2975_v9 }
 0x118   : > { %v1594_v37 = vpop.f32.mrf.mxu2 }
 0x119   : > { %v1578_v42 = vpop.f32.mrf.mxu1  ;;  %v1595_v52 = vadd.f32 %v1594_v37, %v1576_v39  ;;  %v1561_v63 = vpop.f32.mrf.mxu3  ;;  %v1648_v39 = vsub.f32 1.0, %v1647_v46 }
 0x11a   : > { %v1579_v57 = vadd.f32 %v1578_v42, %v1560_v51  ;;  %v1562_v7 = vadd.f32 %v1561_v63, %v1543_v1 }
 0x11b   : > { %v1603_v60 = vadd.f32 %v1595_v52, %v1152_v55  ;;  %v1649_v41 = vmul.f32 %v2456_v44, %v1648_v39 }
 0x11d   : > { %v2973_v8 = vadd.f32 %v2452_v61, %v1603_v60  ;;  %v1650_v47 = vadd.f32 %v2456_v44, %v1649_v41 }
 0x11f   : > { %v1625_v35 = vmul.f32 %v2973_v8, %v2973_v8  ;;  %v1615_v50 = vadd.f32 %v2973_v8, %v2975_v9  ;;  %v1652_v49 = vsel %vm1651_vm4, %v2456_v44, %v1650_v47 }
 0x120   : > { %v1597_v53 = vpop.f32.mrf.mxu2 }
 0x121   : > { %v1598_v62 = vadd.f32 %v1597_v53, %v1579_v57  ;;  %v1580_v5 = vpop.f32.mrf.mxu1  ;;  %v1628_v16 = vadd.f32 %v1625_v35, %v1624_v45 }
 0x122   : > { %v1581_v11 = vadd.f32 %v1580_v5, %v1562_v7 }
 0x123   : > { %v1604_v3 = vadd.f32 %v1598_v62, %v1155_v59 }
 0x125   : > { %v2977_v10 = vadd.f32 %v2452_v61, %v1604_v3 }
 0x127   : > { %v1626_v13 = vmul.f32 %v2977_v10, %v2977_v10  ;;  %v1616_v17 = vadd.f32 %v1615_v50, %v2977_v10 }
 0x128   : > { %v1599_v27 = vpop.f32.mrf.mxu2 }
 0x129   : > { %v1600_v4 = vadd.f32 %v1599_v27, %v1581_v11  ;;  %v1629_v18 = vadd.f32 %v1628_v16, %v1626_v13 }
 0x12b   : > { %v1605_v15 = vadd.f32 %v1600_v4, %v1157_v12 }
 0x12d   : > { %v2988_v20 = vadd.f32 %v2452_v61, %v1605_v15 }
 0x12f   : > { %v1617_v19 = vadd.f32 %v1616_v17, %v2988_v20  ;;  %v1627_v22 = vmul.f32 %v2988_v20, %v2988_v20 }
 0x131   : > { %v1618_v23 = vrot.slane %v1617_v19, 4  ;;  %v1630_v24 = vadd.f32 %v1629_v18, %v1627_v22 }
 0x133   : > { %v1619_v25 = vadd.f32 %v1618_v23, %v1617_v19  ;;  %v1631_v26 = vrot.slane %v1630_v24, 4  ;;  %v2453_v19 = vld [vmem:[%s3020_s3] ss:$0 sm:$0xff] }
 0x134   : > { %v2454_v23 = vld [vmem:[%s3021_s4] ss:$0 sm:$0xff] }
 0x135   : > { %v1620_v28 = vrot.slane %v1619_v25, 2  ;;  %v1632_v29 = vadd.f32 %v1631_v26, %v1630_v24 }
 0x137   : > { %v1621_v30 = vadd.f32 %v1620_v28, %v1619_v25  ;;  %v1633_v31 = vrot.slane %v1632_v29, 2 }
 0x139   : > { %v1622_v32 = vrot.slane %v1621_v30, 1  ;;  %v1634_v33 = vadd.f32 %v1633_v31, %v1632_v29 }
 0x13b   : > { %v1623_v21 = vadd.f32 %v1622_v32, %v1621_v30  ;;  %v1635_v34 = vrot.slane %v1634_v33, 1 }
 0x13d   : > { %v1637_v36 = vmul.f32 %v1623_v21, %v1614_v14  ;;  %v1636_v38 = vadd.f32 %v1635_v34, %v1634_v33 }
 0x13f   : > { %v1639_v37 = vsel %vm1638_vm3, %v1637_v36, 0.0  ;;  %v1642_v40 = vmul.f32 %v1636_v38, %v1614_v14 }
 0x140   : > { %1640 = vadd.xlane.f32.xlu0 %v1639_v37 }
 0x141   : > { %v1643_v42 = vsel %vm1638_vm3, %v1642_v40, 0.0 }
 0x148   : > { %1644 = vadd.xlane.f32.xlu0 %v1643_v42 }
 0x1b3   : > { %v1641_v48 = vpop.xlane.xlu0 %1640 }
 0x1b4   : > { %v1653_v51 = vmul.f32 %v1652_v49, %v1641_v48 }
 0x1b6   : > { %v1655_v54 = vmul.f32 %v1653_v51, %v1653_v51  ;;  %v1668_v53 = vmul.f32 %v1653_v51, %v1614_v14 }
 0x1b8   : > { %v1669_v58 = vsel %vm1638_vm3, %v1668_v53, 0.0 }
 0x1b9   : > { %v1670_v60 = vrot.slane %v1669_v58, 4 }
 0x1bb   : > { %v1645_v52 = vpop.xlane.xlu0 %1644  ;;  %v1671_v0 = vadd.f32 %v1670_v60, %v1669_v58 }
 0x1bc   : > { %v1654_v55 = vmul.f32 %v1652_v49, %v1645_v52 }
 0x1bd   : > { %v1672_v61 = vrot.slane %v1671_v0, 2 }
 0x1be   : > { %v1656_v56 = vsub.f32 %v1654_v55, %v1655_v54 }
 0x1bf   : > { %v1673_v6 = vadd.f32 %v1672_v61, %v1671_v0 }
 0x1c0   : > { %v1657_v57 = vadd.f32 1e-05, %v1656_v56 }
 0x1c1   : > { %v1674_v12 = vrot.slane %v1673_v6, 1 }
 0x1c2   : > { %2457 = vrsqrt.f32 %v1657_v57  ;;  %vm1664_vm6 = vweird.f32 %v1657_v57 }
 0x1c3   : > { %v1675_v45 = vadd.f32 %v1674_v12, %v1673_v6 }
 0x1c5   : > { %v1684_v15 = vsub.f32 %v2975_v9, %v1675_v45  ;;  %v1685_v16 = vsub.f32 %v2973_v8, %v1675_v45  ;;  %v1686_v17 = vsub.f32 %v2977_v10, %v1675_v45  ;;  %v1687_v18 = vsub.f32 %v2988_v20, %v1675_v45 }
 0x1c8   : > { %v2458_v59 = vpop.eup %2457 }
 0x1c9   : > { %v1659_v62 = vmul.f32 %v2458_v59, %v1657_v57  ;;  %vm1665_vm5 = vweird.f32 %v2458_v59 }
 0x1ca   : > { %vm1666_vm7 = vmor %vm1664_vm6, %vm1665_vm5 }
 0x1cb   : > { %v1660_v63 = vmul.f32 %v2458_v59, %v1659_v62 }
 0x1cd   : > { %v1661_v1 = vmul.f32 0.5, %v1660_v63 }
 0x1cf   : > { %v1662_v2 = vsub.f32 1.5, %v1661_v1 }
 0x1d1   : > { %v1663_v3 = vmul.f32 %v2458_v59, %v1662_v2 }
 0x1d3   : > { %v1667_v5 = vsel %vm1666_vm7, %v2458_v59, %v1663_v3 }
 0x1d4   : > { %v1676_v7 = vmul.f32 %v1667_v5, %v1614_v14 }
 0x1d6   : > { %v1677_v11 = vsel %vm1638_vm3, %v1676_v7, 0.0 }
 0x1d7   : > { %v1678_v27 = vrot.slane %v1677_v11, 4 }
 0x1d9   : > { %v1679_v35 = vadd.f32 %v1678_v27, %v1677_v11 }
 0x1db   : > { %v1680_v4 = vrot.slane %v1679_v35, 2 }
 0x1dd   : > { %v1681_v50 = vadd.f32 %v1680_v4, %v1679_v35 }
 0x1df   : > { %v1682_v13 = vrot.slane %v1681_v50, 1 }
 0x1e1   : > { %v1683_v22 = vadd.f32 %v1682_v13, %v1681_v50 }
 0x1e3   : > { %v1688_v24 = vmul.f32 %v1684_v15, %v1683_v22  ;;  %v1689_v25 = vmul.f32 %v1685_v16, %v1683_v22  ;;  %v1690_v26 = vmul.f32 %v1686_v17, %v1683_v22  ;;  %v1691_v28 = vmul.f32 %v1687_v18, %v1683_v22 }
 0x1e5   : > { %v1696_v9 = vmul.f32 %v2453_v19, %v1688_v24  ;;  %v1697_v8 = vmul.f32 %v2453_v19, %v1689_v25  ;;  %v1698_v29 = vmul.f32 %v2453_v19, %v1690_v26  ;;  %v1699_v10 = vmul.f32 %v2453_v19, %v1691_v28 }
 0x1e7   : > { %v1704_v30 = vadd.f32 %v2454_v23, %v1696_v9  ;;  %v1705_v20 = vadd.f32 %v2454_v23, %v1697_v8  ;;  %v1706_v31 = vadd.f32 %v2454_v23, %v1698_v29  ;;  %v1707_v32 = vadd.f32 %v2454_v23, %v1699_v10 }
 0x1e9   : > { %v1708_v33 = vmax.f32 %v1704_v30, 0.0  ;;  %v1709_v14 = vmax.f32 %v1705_v20, 0.0  ;;  %v1710_v21 = vmax.f32 %v1706_v31, 0.0  ;;  %v1711_v34 = vmax.f32 %v1707_v32, 0.0 }
 0x1eb   : > { %1712 = vst [vmem:[%s251_s30] sm:$0xff] %v1708_v33 }
 0x1ec   : > { %1713 = vst [vmem:[%s251_s30 + $0x8] sm:$0xff] %v1709_v14 }
 0x1ed   : > { %1714 = vst [vmem:[%s251_s30 + $0x10] sm:$0xff] %v1710_v21 }
 0x1ee   : > { %1715 = vst [vmem:[%s251_s30 + $0x18] sm:$0xff] %v1711_v34 }
 0x1ef PF: > { %s16_s21 = sadd.s32 1, %s2465_s21  }
 0x1f0   : > { %p13_p4 = scmp.ge.s32.totalorder %s16_s21, 4  }
 0x1f2   :  { %15 = sbr.rel (!%p13_p4) target bundleno = 1 (0x1), region = 76 }

// kernel: decoder_forward_pallas.12
= control target key start
LH: loop header
LB: loop body
LE: loop exit
PB: predicated region body
PF: predicated region fallthrough
CT: control target
= control target key end

     0   :  { %s4350_s21 = smov 0   ;;  %s6576_s0 = inlined_call_operand.vmem [shape: f32[2,66,528], index: 0, kind: input, shape index: {}]   ;;  %s6577_s1 = inlined_call_operand.vmem [shape: bf16[3,528,256], index: 1, kind: input, shape index: {}]   ;;  %s6578_s2 = inlined_call_operand.vmem [shape: f32[1,256], index: 2, kind: input, shape index: {}]   ;;  %s6579_s3 = inlined_call_operand.vmem [shape: f32[1,256], index: 3, kind: input, shape index: {}]   ;;  %s6580_s4 = inlined_call_operand.vmem [shape: f32[1,256], index: 4, kind: input, shape index: {}]   ;;  %s6581_s5 = inlined_call_operand.vmem [shape: f32[2,256], index: 5, kind: input, shape index: {}]   ;;  %s6582_s6 = inlined_call_operand.vmem [shape: f32[2,64,256], index: 6, kind: output, shape index: {}]  }
   0x1 LB: > { %s3112_s22 = sadd.s32 4294967295, %s4311_s21   ;;  %p3116_p0 = scmp.ge.s32.totalorder %s4311_s21, 1  ;;  %s4311_s21 = sphi %s4350_s21, %s16_s21  }
   0x2   : > { %p212_p1 = scmp.lt.s32.totalorder %s4311_s21, 3 }
   0x4   : > { %p213_p2 = pnand %p3116_p0, %p212_p1 }
   0x5   : > { %p242_p3 = scmp.lt.s32.totalorder (!%p213_p2), %s3112_s22, 1 }
   0x6   : > { %216 = sbr.rel (%p213_p2) target bundleno = 890 (0x37a), region = 44 }
   0xb   : > { %v3244_v0 = vld [vmem:[%s6577_s1 + $0x280] sm:$0xf]  ;;  %v4152_v1 = vld [vmem:[%s6577_s1 + $0x284] sm:$0xf0]  ;;  %v3236_v5 = vld [vmem:[%s6577_s1 + $0x270] sm:$0xf] }
   0xc   : > { %v3308_v2 = vld [vmem:[%s6577_s1 + $0x300] sm:$0xf]  ;;  %v3245_v3 = vor.u32 %v4152_v1, %v3244_v0  ;;  %v4168_v4 = vld [vmem:[%s6577_s1 + $0x304] sm:$0xf0]  ;;  %v4150_v6 = vld [vmem:[%s6577_s1 + $0x274] sm:$0xf0] }
   0xd   : > { %v3309_v7 = vor.u32 %v4168_v4, %v3308_v2  ;;  %v3300_v8 = vld [vmem:[%s6577_s1 + $0x2f0] sm:$0xf]  ;;  %v4166_v9 = vld [vmem:[%s6577_s1 + $0x2f4] sm:$0xf0]  ;;  %v3237_v10 = vor.u32 %v4150_v6, %v3236_v5  ;;  %v3228_v12 = vld [vmem:[%s6577_s1 + $0x260] sm:$0xf] }
   0xe   : > { %4269 = vmatpush.bf16.msra.mxu2 %v3245_v3  ;;  %1006 = vmatpush.bf16.msra.mxu0 %v3245_v3  ;;  %v3301_v11 = vor.u32 %v4166_v9, %v3300_v8  ;;  %v4148_v13 = vld [vmem:[%s6577_s1 + $0x264] sm:$0xf0]  ;;  %v3292_v14 = vld [vmem:[%s6577_s1 + $0x2e0] sm:$0xf]  ;;  %v3220_v18 = vld [vmem:[%s6577_s1 + $0x250] sm:$0xf] }
   0xf   : > { %4277 = vmatpush.bf16.msra.mxu3 %v3309_v7  ;;  %1035 = vmatpush.bf16.msra.mxu1 %v3309_v7  ;;  %v4164_v15 = vld [vmem:[%s6577_s1 + $0x2e4] sm:$0xf0]  ;;  %v3229_v16 = vor.u32 %v4148_v13, %v3228_v12  ;;  %v4146_v19 = vld [vmem:[%s6577_s1 + $0x254] sm:$0xf0]  ;;  %v3284_v20 = vld [vmem:[%s6577_s1 + $0x2d0] sm:$0xf] }
  0x10   : > { %v3293_v17 = vor.u32 %v4164_v15, %v3292_v14  ;;  %v4162_v21 = vld [vmem:[%s6577_s1 + $0x2d4] sm:$0xf0]  ;;  %v3221_v22 = vor.u32 %v4146_v19, %v3220_v18  ;;  %v3212_v24 = vld [vmem:[%s6577_s1 + $0x240] sm:$0xf]  ;;  %v4144_v25 = vld [vmem:[%s6577_s1 + $0x244] sm:$0xf0] }
  0x11   : > { %v3285_v23 = vor.u32 %v4162_v21, %v3284_v20  ;;  %s6584_s22 = smov (!%p242_p3, %s3112_s22), 1  ;;  %v3276_v26 = vld [vmem:[%s6577_s1 + $0x2c0] sm:$0xf]  ;;  %v4160_v27 = vld [vmem:[%s6577_s1 + $0x2c4] sm:$0xf0]  ;;  %v3213_v30 = vor.u32 %v4144_v25, %v3212_v24  ;;  %vm993_vm1 = vcmask 130048  }
  0x12   : > { %4270 = vmatpush.bf16.msra.mxu2 %v3237_v10  ;;  %1007 = vmatpush.bf16.msra.mxu0 %v3237_v10  ;;  %v3204_v28 = vld [vmem:[%s6577_s1 + $0x230] sm:$0xf]  ;;  %v4142_v29 = vld [vmem:[%s6577_s1 + $0x234] sm:$0xf0]  ;;  %s4285_s23 = smul.u32 360, %s6584_s22  ;;  %v3277_v34 = vor.u32 %v4160_v27, %v3276_v26  ;;  %vm2037_vm2 = vcmask 1046528  }
  0x13   : > { %4278 = vmatpush.bf16.msra.mxu3 %v3301_v11  ;;  %1036 = vmatpush.bf16.msra.mxu1 %v3301_v11  ;;  %v3268_v31 = vld [vmem:[%s6577_s1 + $0x2b0] sm:$0xf]  ;;  %v4158_v32 = vld [vmem:[%s6577_s1 + $0x2b4] sm:$0xf0]  ;;  %v3196_v33 = vld [vmem:[%s6577_s1 + $0x220] sm:$0xf]  ;;  %v3205_v45 = vor.u32 %v4142_v29, %v3204_v28 }
  0x14   : > { %v4140_v35 = vld [vmem:[%s6577_s1 + $0x224] sm:$0xf0]  ;;  %v3260_v36 = vld [vmem:[%s6577_s1 + $0x2a0] sm:$0xf]  ;;  %s4452_s14 = scalar_lea.vmem %s6576_s0, %s4285_s23  ;;  %v3269_v51 = vor.u32 %v4158_v32, %v3268_v31  ;;  %v3188_v59 = vld [vmem:[%s6577_s1 + $0x210] sm:$0xf] }
  0x15   : > { %v4156_v37 = vld [vmem:[%s6577_s1 + $0x2a4] sm:$0xf0]  ;;  %v273_v38 = vld [vmem:[%s4452_s14 + $0xa0] sm:$0xff]  ;;  %v283_v40 = vld [vmem:[%s4452_s14 + $0xf0] sm:$0xff]  ;;  %v3197_v52 = vor.u32 %v4140_v35, %v3196_v33  ;;  %vm466_vm0 = vsmask.f32 7424 }
  0x16   : > { %4271 = vmatpush.bf16.msra.mxu2 %v3229_v16  ;;  %1008 = vmatpush.bf16.msra.mxu0 %v3229_v16  ;;  %v278_v39 = vld [vmem:[%s4452_s14 + $0xc8] sm:$0xff]  ;;  %v288_v41 = vld [vmem:[%s4452_s14 + $0x118] sm:$0xff]  ;;  %v279_v44 = vld [vmem:[%s4452_s14 + $0xd0] sm:$0xff]  ;;  %v3261_v58 = vor.u32 %v4156_v37, %v3260_v36  ;;  %vm2841_vm3 = vcmask 1041408   ;;  %s4070_s25 = sshll.u32 %s6584_s22, 7 }
  0x17   : > { %4279 = vmatpush.bf16.msra.mxu3 %v3293_v17  ;;  %1037 = vmatpush.bf16.msra.mxu1 %v3293_v17  ;;  %v4458_v42 = vpack.c.bf16 %v278_v39, %v273_v38  ;;  %v274_v43 = vld [vmem:[%s4452_s14 + $0xa8] sm:$0xff]  ;;  %v4462_v46 = vpack.c.bf16 %v288_v41, %v283_v40  ;;  %v284_v47 = vld [vmem:[%s4452_s14 + $0xf8] sm:$0xff]  ;;  %v289_v48 = vld [vmem:[%s4452_s14 + $0x120] sm:$0xff]  ;;  %s6537_s27 = scalar_lea.vmem %s6582_s6, %s4070_s25 }
  0x18   : > { %v4466_v49 = vpack.c.bf16 %v279_v44, %v274_v43  ;;  %v258_v50 = vld [vmem:[%s4452_s14 + $0x28] sm:$0xff]  ;;  %v4470_v54 = vpack.c.bf16 %v289_v48, %v284_v47  ;;  %v263_v55 = vld [vmem:[%s4452_s14 + $0x50] sm:$0xff]  ;;  %v268_v56 = vld [vmem:[%s4452_s14 + $0x78] sm:$0xff] }
  0x19   : > { %v531_v53 = vshll.u32 %v4458_v42, 16  ;;  %v379_v57 = vld [vmem:[%s4452_s14] sm:$0xfe]  ;;  %v4138_v60 = vld [vmem:[%s6577_s1 + $0x214] sm:$0xf0]  ;;  %v4482_v62 = vpack.c.bf16 %v268_v56, %v263_v55  ;;  %v259_v63 = vld [vmem:[%s4452_s14 + $0x30] sm:$0xff] }
  0x1a   : > { %4272 = vmatpush.bf16.msra.mxu2 %v3221_v22  ;;  %1009 = vmatpush.bf16.msra.mxu0 %v3221_v22  ;;  %v539_v61 = vshll.u32 %v4466_v49, 16  ;;  %v264_v0 = vld [vmem:[%s4452_s14 + $0x58] sm:$0xff]  ;;  %v269_v1 = vld [vmem:[%s4452_s14 + $0x80] sm:$0xff]  ;;  %v3252_v2 = vld [vmem:[%s6577_s1 + $0x290] sm:$0xf]  ;;  %v567_v3 = vshrl.u32 %v4458_v42, 16  ;;  %v389_v5 = vpack.c.bf16 %v258_v50, %v379_v57  ;;  %v3189_v21 = vor.u32 %v4138_v60, %v3188_v59 }
  0x1b   : > { %4280 = vmatpush.bf16.msra.mxu3 %v3285_v23  ;;  %1038 = vmatpush.bf16.msra.mxu1 %v3285_v23  ;;  %v571_v4 = vshll.u32 %v4462_v46, 16  ;;  %v4492_v6 = vpack.c.bf16 %v269_v1, %v264_v0  ;;  %v380_v7 = vld [vmem:[%s4452_s14 + $0x8] sm:$0xfe]  ;;  %v4154_v8 = vld [vmem:[%s6577_s1 + $0x294] sm:$0xf0]  ;;  %v4498_v9 = vrot.slane %v531_v53, 1 }
  0x1c   : > { %v575_v10 = vshrl.u32 %v4466_v49, 16  ;;  %v475_v11 = vshll.u32 %v4482_v62, 16  ;;  %v390_v12 = vpack.c.bf16 %v259_v63, %v380_v7  ;;  %v4502_v13 = vrot.slane %v539_v61, 1  ;;  %v3372_v17 = vld [vmem:[%s6577_s1 + $0x380] sm:$0xf] }
  0x1d   : > { %v579_v14 = vshll.u32 %v4470_v54, 16  ;;  %v468_v15 = vshrl.u32 %v389_v5, 16  ;;  %v470_v16 = vshll.u32 %v389_v5, 16  ;;  %v4184_v18 = vld [vmem:[%s6577_s1 + $0x384] sm:$0xf0]  ;;  %v3253_v22 = vor.u32 %v4154_v8, %v3252_v2 }
  0x1e   : > { %4273 = vmatpush.bf16.msra.mxu2 %v3213_v30  ;;  %1010 = vmatpush.bf16.msra.mxu0 %v3213_v30  ;;  %v480_v19 = vshrl.u32 %v390_v12, 16  ;;  %v482_v20 = vshll.u32 %v390_v12, 16  ;;  %v3436_v23 = vld [vmem:[%s6577_s1 + $0x400] sm:$0xf]  ;;  %v4200_v24 = vld [vmem:[%s6577_s1 + $0x404] sm:$0xf0]  ;;  %v569_v27 = vor.u32 %v567_v3, %v4498_v9  ;;  %v577_v31 = vor.u32 %v575_v10, %v4502_v13 }
  0x1f   : > { %4281 = vmatpush.bf16.msra.mxu3 %v3277_v34  ;;  %1039 = vmatpush.bf16.msra.mxu1 %v3277_v34  ;;  %v472_v25 = vrot.slane %v470_v16, 1  ;;  %v487_v26 = vshll.u32 %v4492_v6, 16  ;;  %v4519_v28 = vrot.slane %v571_v4, 1  ;;  %v4521_v29 = vrot.slane %v475_v11, 1  ;;  %v4151_v35 = vld [vmem:[%s6577_s1 + $0x284] sm:$0xf] }
  0x20   : > { %v484_v30 = vrot.slane %v482_v20, 1  ;;  %v4524_v32 = vrot.slane %v579_v14, 1  ;;  %v3246_v36 = vld [vmem:[%s6577_s1 + $0x288] sm:$0xf0]  ;;  %v3373_v37 = vor.u32 %v4184_v18, %v3372_v17  ;;  %v3437_v38 = vor.u32 %v4200_v24, %v3436_v23  ;;  %v3364_v40 = vld [vmem:[%s6577_s1 + $0x370] sm:$0xf] }
  0x21   : > { %v473_v33 = vor.u32 %v472_v25, %v468_v15  ;;  %v4526_v34 = vrot.slane %v487_v26, 1  ;;  %v3444_v41 = vld [vmem:[%s6577_s1 + $0x410] sm:$0xf]  ;;  %v4202_v43 = vld [vmem:[%s6577_s1 + $0x414] sm:$0xf0]  ;;  %v4554_v48 = vsel %vm466_vm0, %v569_v27, %v4519_v28  ;;  %v607_v17 = vshrl.u32 %v4462_v46, 16 }
  0x22   : > { %4274 = vmatpush.bf16.msra.mxu2 %v3205_v45  ;;  %1011 = vmatpush.bf16.msra.mxu0 %v3205_v45  ;;  %v485_v39 = vor.u32 %v484_v30, %v480_v19  ;;  %v4182_v44 = vld [vmem:[%s6577_s1 + $0x374] sm:$0xf0]  ;;  %v3428_v45 = vld [vmem:[%s6577_s1 + $0x3f0] sm:$0xf]  ;;  %v4149_v55 = vld [vmem:[%s6577_s1 + $0x274] sm:$0xf]  ;;  %v3445_v56 = vor.u32 %v4202_v43, %v3444_v41 }
  0x23   : > { %4282 = vmatpush.bf16.msra.mxu3 %v3269_v51  ;;  %1040 = vmatpush.bf16.msra.mxu1 %v3269_v51  ;;  %v4198_v47 = vld [vmem:[%s6577_s1 + $0x3f4] sm:$0xf0]  ;;  %v4558_v50 = vsel %vm466_vm0, %v473_v33, %v4521_v29  ;;  %v3249_v51 = vor.u32 %v4151_v35, %v3246_v36  ;;  %v384_v57 = vld [vmem:[%s4452_s14 + $0x140] sm:$0x1]  ;;  %v3238_v60 = vld [vmem:[%s6577_s1 + $0x278] sm:$0xf0]  ;;  %v609_v36 = vor.u32 %v607_v17, %v4519_v28 }
  0x24   : > { %v4566_v53 = vsel %vm466_vm0, %v485_v39, %v4526_v34  ;;  %v3429_v59 = vor.u32 %v4198_v47, %v3428_v45  ;;  %v3356_v61 = vld [vmem:[%s6577_s1 + $0x360] sm:$0xf]  ;;  %v385_v63 = vld [vmem:[%s4452_s14 + $0x148] sm:$0x1]  ;;  %v394_v3 = vpack.c.bf16 %v384_v57, %v384_v57  ;;  %v3241_v4 = vor.u32 %v4149_v55, %v3238_v60  ;;  %v4147_v10 = vld [vmem:[%s6577_s1 + $0x264] sm:$0xf] }
  0x25   : > { %v4180_v0 = vld [vmem:[%s6577_s1 + $0x364] sm:$0xf0]  ;;  %v3420_v1 = vld [vmem:[%s6577_s1 + $0x3e0] sm:$0xf]  ;;  %v395_v5 = vpack.c.bf16 %v385_v63, %v385_v63  ;;  %v3230_v11 = vld [vmem:[%s6577_s1 + $0x268] sm:$0xf0] }
  0x26   : > { %4275 = vmatpush.bf16.msra.mxu2 %v3197_v52  ;;  %1012 = vmatpush.bf16.msra.mxu0 %v3197_v52  ;;  %v4562_v52 = vsel %vm466_vm0, %v577_v31, %v4524_v32  ;;  %v4196_v2 = vld [vmem:[%s6577_s1 + $0x3e4] sm:$0xf0]  ;;  %v3357_v7 = vor.u32 %v4180_v0, %v3356_v61  ;;  %v3348_v12 = vld [vmem:[%s6577_s1 + $0x350] sm:$0xf]  ;;  %v4178_v14 = vld [vmem:[%s6577_s1 + $0x354] sm:$0xf0]  ;;  %v3233_v20 = vor.u32 %v4147_v10, %v3230_v11 }
  0x27   : > { %4283 = vmatpush.bf16.msra.mxu3 %v3261_v58  ;;  %1041 = vmatpush.bf16.msra.mxu1 %v3261_v58  ;;  %v3365_v58 = vor.u32 %v4182_v44, %v3364_v40  ;;  %v3421_v8 = vor.u32 %v4196_v2, %v3420_v1  ;;  %v3412_v15 = vld [vmem:[%s6577_s1 + $0x3d0] sm:$0xf]  ;;  %v4194_v16 = vld [vmem:[%s6577_s1 + $0x3d4] sm:$0xf0]  ;;  %v611_v18 = vshll.u32 %v394_v3, 16  ;;  %v527_v19 = vshrl.u32 %v4482_v62, 16 }
  0x28   : > { %v535_v23 = vshrl.u32 %v4492_v6, 16  ;;  %v3349_v24 = vor.u32 %v4178_v14, %v3348_v12  ;;  %v3413_v25 = vor.u32 %v4194_v16, %v3412_v15  ;;  %v4145_v26 = vld [vmem:[%s6577_s1 + $0x254] sm:$0xf]  ;;  %v3222_v27 = vld [vmem:[%s6577_s1 + $0x258] sm:$0xf0]  ;;  %v262_v47 = vld [vmem:[%s4452_s14 + $0x48] sm:$0xff] }
  0x29   : > { %v3340_v30 = vld [vmem:[%s6577_s1 + $0x340] sm:$0xf]  ;;  %v4176_v31 = vld [vmem:[%s6577_s1 + $0x344] sm:$0xf0]  ;;  %v4143_v39 = vld [vmem:[%s6577_s1 + $0x244] sm:$0xf]  ;;  %v3225_v43 = vor.u32 %v4145_v26, %v3222_v27 }
  0x2a   : > { %4276 = vmatpush.bf16.msra.mxu2 %v3189_v21  ;;  %1013 = vmatpush.bf16.msra.mxu0 %v3189_v21  ;;  %v615_v21 = vshrl.u32 %v4470_v54, 16  ;;  %v3404_v33 = vld [vmem:[%s6577_s1 + $0x3c0] sm:$0xf]  ;;  %v4192_v35 = vld [vmem:[%s6577_s1 + $0x3c4] sm:$0xf0]  ;;  %v4641_v41 = vld [vmem:[%s4452_s14 + $0x38] sm:$0xff]  ;;  %v3341_v55 = vor.u32 %v4176_v31, %v3340_v30 }
  0x2b   : > { %4284 = vmatpush.bf16.msra.mxu3 %v3253_v22  ;;  %1042 = vmatpush.bf16.msra.mxu1 %v3253_v22  ;;  %v619_v22 = vshll.u32 %v395_v5, 16  ;;  %v3214_v40 = vld [vmem:[%s6577_s1 + $0x248] sm:$0xf0]  ;;  %v381_v45 = vld [vmem:[%s4452_s14 + $0x10] sm:$0xfe]  ;;  %v4654_v60 = vld [vmem:[%s4452_s14 + $0x40] sm:$0xff] }
  0x2c   : > { %v617_v28 = vor.u32 %v615_v21, %v4524_v32  ;;  %v3332_v57 = vld [vmem:[%s6577_s1 + $0x330] sm:$0xf]  ;;  %v382_v32 = vld [vmem:[%s4452_s14 + $0x18] sm:$0xfe]  ;;  %v3217_v61 = vor.u32 %v4143_v39, %v3214_v40  ;;  %v4674_v3 = vpack.c.bf16 %v4641_v41, %v381_v45  ;;  %v4172_v21 = vld [vmem:[%s6577_s1 + $0x324] sm:$0xf0] }
  0x2d   : > { %1024 = vmatmul.bf16.vlgmr.msra.gmra.mxu2 %v4554_v48  ;;  %1014 = vmatmul.bf16.vlgmr.msra.gmra.mxu0 %v4558_v50  ;;  %v621_v44 = vrot.slane %v619_v22, 1  ;;  %v3396_v63 = vld [vmem:[%s6577_s1 + $0x3b0] sm:$0xf]  ;;  %v4190_v0 = vld [vmem:[%s6577_s1 + $0x3b4] sm:$0xf0]  ;;  %v4694_v12 = vpack.c.bf16 %v4654_v60, %v382_v32 }
  0x2e   : > { %1064 = vmatpush.bf16.msrb.mxu2 %v3373_v37  ;;  %1053 = vmatmul.bf16.vlgmr.msra.gmra.mxu3 %v4562_v52  ;;  %v613_v37 = vrot.slane %v611_v18, 1  ;;  %v271_v11 = vld [vmem:[%s4452_s14 + $0x90] sm:$0xff]  ;;  %v272_v15 = vld [vmem:[%s4452_s14 + $0x98] sm:$0xff]  ;;  %v3397_v18 = vor.u32 %v4190_v0, %v3396_v63  ;;  %v3388_v22 = vld [vmem:[%s6577_s1 + $0x3a0] sm:$0xf]  ;;  %v494_v27 = vshll.u32 %v4674_v3, 16 }
  0x2f   : > { %1093 = vmatpush.bf16.msrb.mxu3 %v3437_v38  ;;  %1043 = vmatmul.bf16.vlgmr.msra.gmra.mxu1 %v4566_v53  ;;  %v529_v38 = vor.u32 %v527_v19, %v4521_v29  ;;  %v537_v29 = vor.u32 %v535_v23, %v4526_v34  ;;  %v4174_v34 = vld [vmem:[%s6577_s1 + $0x334] sm:$0xf0]  ;;  %v4686_v10 = vsel %vm466_vm0, %v617_v28, %v621_v44  ;;  %v267_v14 = vld [vmem:[%s4452_s14 + $0x70] sm:$0xff]  ;;  %v4188_v23 = vld [vmem:[%s6577_s1 + $0x3a4] sm:$0xf0]  ;;  %v506_v40 = vshll.u32 %v4694_v12, 16 }
  0x30   : > { %1151 = vmatpush.bf16.msrb.mxu1 %v3249_v51  ;;  %1129 = vmatpush.bf16.msrb.mxu0 %v3445_v56  ;;  %v383_v51 = vld [vmem:[%s4452_s14 + $0x20] sm:$0xfe]  ;;  %v3405_v56 = vor.u32 %v4192_v35, %v3404_v33  ;;  %v4667_v1 = vsel %vm466_vm0, %v609_v36, %v613_v37  ;;  %v3333_v17 = vor.u32 %v4174_v34, %v3332_v57  ;;  %v4141_v19 = vld [vmem:[%s6577_s1 + $0x234] sm:$0xf]  ;;  %v3198_v26 = vld [vmem:[%s6577_s1 + $0x228] sm:$0xf0] }
  0x31   : > { %v4671_v2 = vsel %vm466_vm0, %v529_v38, %v4498_v9  ;;  %v4677_v5 = vpack.c.bf16 %v262_v47, %v383_v51  ;;  %v4690_v9 = vsel %vm466_vm0, %v537_v29, %v4502_v13  ;;  %v3206_v13 = vld [vmem:[%s6577_s1 + $0x238] sm:$0xf0]  ;;  %v4729_v30 = vpack.c.bf16 %v272_v15, %v267_v14  ;;  %v3316_v35 = vld [vmem:[%s6577_s1 + $0x310] sm:$0xf]  ;;  %v4170_v36 = vld [vmem:[%s6577_s1 + $0x314] sm:$0xf0] }
  0x32   : > { %1065 = vmatpush.bf16.msrb.mxu2 %v3365_v58  ;;  %v265_v58 = vld [vmem:[%s4452_s14 + $0x60] sm:$0xff]  ;;  %v3209_v33 = vor.u32 %v4141_v19, %v3206_v13  ;;  %v3380_v37 = vld [vmem:[%s6577_s1 + $0x390] sm:$0xf]  ;;  %v4186_v38 = vld [vmem:[%s6577_s1 + $0x394] sm:$0xf0]  ;;  %v3389_v44 = vor.u32 %v4188_v23, %v3388_v22  ;;  %v492_v51 = vshrl.u32 %v4674_v3, 16 }
  0x33   : > { %1094 = vmatpush.bf16.msrb.mxu3 %v3429_v59  ;;  %v270_v59 = vld [vmem:[%s4452_s14 + $0x88] sm:$0xff]  ;;  %v518_v31 = vshll.u32 %v4677_v5, 16  ;;  %v4167_v29 = vld [vmem:[%s6577_s1 + $0x304] sm:$0xf]  ;;  %v3430_v47 = vld [vmem:[%s6577_s1 + $0x3f8] sm:$0xf0] }
  0x34   : > { %1152 = vmatpush.bf16.msrb.mxu1 %v3241_v4  ;;  %v266_v4 = vld [vmem:[%s4452_s14 + $0x68] sm:$0xff]  ;;  %v516_v32 = vshrl.u32 %v4677_v5, 16  ;;  %v523_v34 = vshll.u32 %v4729_v30, 16  ;;  %v4195_v63 = vld [vmem:[%s6577_s1 + $0x3e4] sm:$0xf]  ;;  %v504_v3 = vshrl.u32 %v4694_v12, 16  ;;  %v3317_v5 = vor.u32 %v4170_v36, %v3316_v35 }
  0x35   : > { %v4744_v39 = vpack.c.bf16 %v271_v11, %v266_v4  ;;  %v3310_v45 = vld [vmem:[%s6577_s1 + $0x308] sm:$0xf0]  ;;  %v508_v4 = vrot.slane %v506_v40, 1  ;;  %v3381_v11 = vor.u32 %v4186_v38, %v3380_v37  ;;  %v4137_v14 = vld [vmem:[%s6577_s1 + $0x214] sm:$0xf] }
  0x36   : > { %1066 = vmatpush.bf16.msrb.mxu2 %v3357_v7  ;;  %v4199_v7 = vld [vmem:[%s6577_s1 + $0x404] sm:$0xf]  ;;  %v3374_v57 = vld [vmem:[%s6577_s1 + $0x388] sm:$0xf0]  ;;  %v3190_v12 = vld [vmem:[%s6577_s1 + $0x218] sm:$0xf0] }
  0x37   : > { %1095 = vmatpush.bf16.msrb.mxu3 %v3421_v8  ;;  %v3438_v8 = vld [vmem:[%s6577_s1 + $0x408] sm:$0xf0]  ;;  %v3446_v19 = vld [vmem:[%s6577_s1 + $0x418] sm:$0xf0]  ;;  %v4791_v22 = vrot.slane %v523_v34, 1  ;;  %v3193_v23 = vor.u32 %v4137_v14, %v3190_v12  ;;  %v275_v37 = vld [vmem:[%s4452_s14 + $0xb0] sm:$0xff] }
  0x38   : > { %1153 = vmatpush.bf16.msrb.mxu1 %v3233_v20  ;;  %v3441_v16 = vor.u32 %v4199_v7, %v3438_v8  ;;  %v3324_v20 = vld [vmem:[%s6577_s1 + $0x320] sm:$0xf]  ;;  %v511_v7 = vshll.u32 %v4744_v39, 16  ;;  %v3422_v8 = vld [vmem:[%s6577_s1 + $0x3e8] sm:$0xf0] }
  0x39   : > { %v3325_v28 = vor.u32 %v4172_v21, %v3324_v20  ;;  %v3425_v15 = vor.u32 %v4195_v63, %v3422_v8  ;;  %v3366_v35 = vld [vmem:[%s6577_s1 + $0x378] sm:$0xf0]  ;;  %v4177_v8 = vld [vmem:[%s6577_s1 + $0x354] sm:$0xf]  ;;  %v4191_v12 = vld [vmem:[%s6577_s1 + $0x3c4] sm:$0xf] }
  0x3a   : > { %1067 = vmatpush.bf16.msrb.mxu2 %v3349_v24  ;;  %v4718_v24 = vpack.c.bf16 %v270_v59, %v265_v58  ;;  %1238 = vmatpush.bf16.msra.mxu0 %v3441_v16  ;;  %v496_v59 = vrot.slane %v494_v27, 1  ;;  %v3313_v16 = vor.u32 %v4167_v29, %v3310_v45  ;;  %v4165_v27 = vld [vmem:[%s6577_s1 + $0x2f4] sm:$0xf] }
  0x3b   : > { %1096 = vmatpush.bf16.msrb.mxu3 %v3413_v25  ;;  %v4139_v25 = vld [vmem:[%s6577_s1 + $0x224] sm:$0xf] }
  0x3c   : > { %1154 = vmatpush.bf16.msrb.mxu1 %v3225_v43  ;;  %v4197_v43 = vld [vmem:[%s6577_s1 + $0x3f4] sm:$0xf]  ;;  %v3201_v0 = vor.u32 %v4139_v25, %v3198_v26  ;;  %v497_v13 = vor.u32 %v496_v59, %v492_v51  ;;  %v509_v25 = vor.u32 %v508_v4, %v504_v3  ;;  %v4793_v26 = vrot.slane %v511_v7, 1  ;;  %v4163_v51 = vld [vmem:[%s6577_s1 + $0x2e4] sm:$0xf] }
  0x3d   : > { %1029 = vmatmul.bf16.gmra.mxu2 %v4667_v1  ;;  %1019 = vmatmul.bf16.gmra.mxu0 %v4671_v2  ;;  %v3433_v58 = vor.u32 %v4197_v43, %v3430_v47  ;;  %v280_v43 = vld [vmem:[%s4452_s14 + $0xd8] sm:$0xff]  ;;  %v3358_v59 = vld [vmem:[%s6577_s1 + $0x368] sm:$0xf0]  ;;  %v4161_v3 = vld [vmem:[%s6577_s1 + $0x2d4] sm:$0xf]  ;;  %v543_v14 = vshrl.u32 %v4718_v24, 16 }
  0x3e   : > { %1068 = vmatpush.bf16.msrb.mxu2 %v3341_v55  ;;  %1058 = vmatmul.bf16.gmra.mxu3 %v4686_v10  ;;  %v499_v55 = vshll.u32 %v4718_v24, 16  ;;  %v4821_v29 = vsel %vm466_vm0, %v509_v25, %v4793_v26  ;;  %v4193_v4 = vld [vmem:[%s6577_s1 + $0x3d4] sm:$0xf]  ;;  %v3286_v7 = vld [vmem:[%s6577_s1 + $0x2d8] sm:$0xf0] }
  0x3f   : > { %1097 = vmatpush.bf16.msrb.mxu3 %v3405_v56  ;;  %1048 = vmatmul.bf16.gmra.mxu1 %v4690_v9  ;;  %v4183_v56 = vld [vmem:[%s6577_s1 + $0x384] sm:$0xf] }
  0x40   : > { %1155 = vmatpush.bf16.msrb.mxu1 %v3217_v61  ;;  %v520_v61 = vrot.slane %v518_v31, 1  ;;  %1239 = vmatpush.bf16.msra.mxu0 %v3433_v58  ;;  %v4789_v20 = vrot.slane %v499_v55, 1  ;;  %v3302_v31 = vld [vmem:[%s6577_s1 + $0x2f8] sm:$0xf0]  ;;  %v277_v55 = vld [vmem:[%s4452_s14 + $0xc0] sm:$0xff] }
  0x41   : > { %v3305_v45 = vor.u32 %v4165_v27, %v3302_v31  ;;  %v4179_v58 = vld [vmem:[%s6577_s1 + $0x364] sm:$0xf]  ;;  %v3278_v31 = vld [vmem:[%s6577_s1 + $0x2c8] sm:$0xf0] }
  0x42   : > { %1069 = vmatpush.bf16.msrb.mxu2 %v3333_v17  ;;  %v3377_v17 = vor.u32 %v4183_v56, %v3374_v57  ;;  %v521_v21 = vor.u32 %v520_v61, %v516_v32  ;;  %v4810_v38 = vsel %vm466_vm0, %v497_v13, %v4789_v20  ;;  %v282_v56 = vld [vmem:[%s4452_s14 + $0xe8] sm:$0xff]  ;;  %v4842_v32 = vpack.c.bf16 %v280_v43, %v275_v37  ;;  %v4159_v27 = vld [vmem:[%s6577_s1 + $0x2c4] sm:$0xf] }
  0x43   : > { %1098 = vmatpush.bf16.msrb.mxu3 %v3397_v18  ;;  %v4201_v18 = vld [vmem:[%s6577_s1 + $0x414] sm:$0xf]  ;;  %v3294_v57 = vld [vmem:[%s6577_s1 + $0x2e8] sm:$0xf0]  ;;  %v4844_v61 = vpack.c.bf16 %v282_v56, %v277_v55  ;;  %v551_v13 = vshrl.u32 %v4744_v39, 16 }
  0x44   : > { %1156 = vmatpush.bf16.msrb.mxu1 %v3209_v33  ;;  %1240 = vmatpush.bf16.msra.mxu0 %v3425_v15  ;;  %v4181_v33 = vld [vmem:[%s6577_s1 + $0x374] sm:$0xf]  ;;  %v3449_v36 = vor.u32 %v4201_v18, %v3446_v19  ;;  %v4814_v40 = vsel %vm466_vm0, %v521_v21, %v4791_v22  ;;  %v3297_v63 = vor.u32 %v4163_v51, %v3294_v57  ;;  %v3406_v15 = vld [vmem:[%s6577_s1 + $0x3c8] sm:$0xf0]  ;;  %v3334_v55 = vld [vmem:[%s6577_s1 + $0x338] sm:$0xf0] }
  0x45   : > { %v3369_v47 = vor.u32 %v4181_v33, %v3366_v35  ;;  %v563_v18 = vshll.u32 %v4844_v61, 16  ;;  %v3409_v19 = vor.u32 %v4191_v12, %v3406_v15  ;;  %v4175_v33 = vld [vmem:[%s6577_s1 + $0x344] sm:$0xf]  ;;  %v3342_v35 = vld [vmem:[%s6577_s1 + $0x348] sm:$0xf0] }
  0x46   : > { %1070 = vmatpush.bf16.msrb.mxu2 %v3325_v28  ;;  %v276_v28 = vld [vmem:[%s4452_s14 + $0xb8] sm:$0xff]  ;;  %v3345_v51 = vor.u32 %v4175_v33, %v3342_v35  ;;  %v4155_v12 = vld [vmem:[%s6577_s1 + $0x2a4] sm:$0xf]  ;;  %v3262_v15 = vld [vmem:[%s6577_s1 + $0x2a8] sm:$0xf0] }
  0x47   : > { %1099 = vmatpush.bf16.msrb.mxu3 %v3389_v44  ;;  %v281_v44 = vld [vmem:[%s4452_s14 + $0xe0] sm:$0xff]  ;;  %v3318_v33 = vld [vmem:[%s6577_s1 + $0x318] sm:$0xf0] }
  0x48   : > { %1157 = vmatpush.bf16.msrb.mxu1 %v3201_v0  ;;  %v4846_v34 = vpack.c.bf16 %v281_v44, %v276_v28  ;;  %v3361_v0 = vor.u32 %v4179_v58, %v3358_v59  ;;  %v4894_v28 = vrot.slane %v563_v18, 1  ;;  %v553_v44 = vor.u32 %v551_v13, %v4793_v26  ;;  %v4173_v26 = vld [vmem:[%s6577_s1 + $0x334] sm:$0xf]  ;;  %v285_v58 = vld [vmem:[%s4452_s14 + $0x100] sm:$0xff]  ;;  %v3326_v18 = vld [vmem:[%s6577_s1 + $0x328] sm:$0xf0] }
  0x49   : > { %v3398_v13 = vld [vmem:[%s6577_s1 + $0x3b8] sm:$0xf0]  ;;  %v4187_v35 = vld [vmem:[%s6577_s1 + $0x3a4] sm:$0xf] }
  0x4a   : > { %1071 = vmatpush.bf16.msrb.mxu2 %v3317_v5  ;;  %v3350_v5 = vld [vmem:[%s6577_s1 + $0x358] sm:$0xf0]  ;;  %v555_v21 = vshll.u32 %v4846_v34, 16 }
  0x4b   : > { %1100 = vmatpush.bf16.msrb.mxu3 %v3381_v11  ;;  %v3353_v25 = vor.u32 %v4177_v8, %v3350_v5  ;;  %v291_v8 = vld [vmem:[%s4452_s14 + $0x130] sm:$0xff]  ;;  %v583_v5 = vshrl.u32 %v4842_v32, 16 }
  0x4c   : > { %1158 = vmatpush.bf16.msrb.mxu1 %v3193_v23  ;;  %v3289_v23 = vor.u32 %v4161_v3, %v3286_v7  ;;  %v292_v3 = vld [vmem:[%s4452_s14 + $0x138] sm:$0xff]  ;;  %v286_v7 = vld [vmem:[%s4452_s14 + $0x108] sm:$0xff] }
  0x4d   : > { %1072 = vmatmul.bf16.vlgmr.msrb.gmra.mxu2 %v4810_v38  ;;  %3450 = vmatmul.msk.bf16.vlgmr.msrb.gmra.mxu0 %vm993_vm1, %v4814_v40 }
  0x4e   : > { %1180 = vmatpush.bf16.msra.mxu2 %v3313_v16  ;;  %1101 = vmatmul.bf16.vlgmr.msrb.gmra.mxu3 %v4821_v29  ;;  %v547_v16 = vshll.u32 %v4842_v32, 16 }
  0x4f   : > { %1209 = vmatpush.bf16.msra.mxu3 %v3377_v17  ;;  %1159 = vmatmul.bf16.vlgmr.msrb.gmra.mxu1 %v4558_v50  ;;  %v3414_v50 = vld [vmem:[%s6577_s1 + $0x3d8] sm:$0xf0]  ;;  %v559_v17 = vshrl.u32 %v4729_v30, 16 }
  0x50   : > { %1274 = vmatpush.bf16.msra.mxu1 %v3449_v36  ;;  %v3417_v11 = vor.u32 %v4193_v4, %v3414_v50  ;;  %v545_v36 = vor.u32 %v543_v14, %v4789_v20  ;;  %v4891_v37 = vrot.slane %v547_v16, 1  ;;  %v4157_v20 = vld [vmem:[%s6577_s1 + $0x2b4] sm:$0xf]  ;;  %v3337_v50 = vor.u32 %v4173_v26, %v3334_v55  ;;  %v4171_v16 = vld [vmem:[%s6577_s1 + $0x324] sm:$0xf] }
  0x51   : > { %v561_v43 = vor.u32 %v559_v17, %v4791_v22  ;;  %v3270_v22 = vld [vmem:[%s6577_s1 + $0x2b8] sm:$0xf0]  ;;  %v4948_v17 = vpack.c.bf16 %v291_v8, %v286_v7  ;;  %v386_v7 = vld [vmem:[%s4452_s14 + $0x150] sm:$0x1] }
  0x52   : > { %1181 = vmatpush.bf16.msra.mxu2 %v3305_v45  ;;  %1241 = vmatpush.bf16.msra.mxu0 %v3417_v11  ;;  %v4897_v45 = vrot.slane %v555_v21, 1  ;;  %v4913_v56 = vsel %vm466_vm0, %v545_v36, %v4891_v37  ;;  %v3273_v4 = vor.u32 %v4157_v20, %v3270_v22  ;;  %v3329_v21 = vor.u32 %v4171_v16, %v3326_v18  ;;  %v3390_v36 = vld [vmem:[%s6577_s1 + $0x3a8] sm:$0xf0]  ;;  %v387_v18 = vld [vmem:[%s4452_s14 + $0x158] sm:$0x1] }
  0x53   : > { %1210 = vmatpush.bf16.msra.mxu3 %v3369_v47  ;;  %v3281_v47 = vor.u32 %v4159_v27, %v3278_v31  ;;  %v4917_v57 = vsel %vm466_vm0, %v561_v43, %v4894_v28  ;;  %v3254_v27 = vld [vmem:[%s6577_s1 + $0x298] sm:$0xf0]  ;;  %v4169_v31 = vld [vmem:[%s6577_s1 + $0x314] sm:$0xf]  ;;  %v591_v20 = vshrl.u32 %v4846_v34, 16  ;;  %v595_v22 = vshll.u32 %v4948_v17, 16 }
  0x54   : > { %v4922_v59 = vsel %vm466_vm0, %v553_v44, %v4897_v45  ;;  %v599_v44 = vshrl.u32 %v4844_v61, 16  ;;  %v3321_v55 = vor.u32 %v4169_v31, %v3318_v33  ;;  %v396_v16 = vpack.c.bf16 %v386_v7, %v386_v7 }
  0x55   : > { %v397_v31 = vpack.c.bf16 %v387_v18, %v387_v18  ;;  %v631_v7 = vshrl.u32 %v4948_v17, 16 }
  0x56   : > { %1182 = vmatpush.bf16.msra.mxu2 %v3297_v63  ;;  %1242 = vmatpush.bf16.msra.mxu0 %v3409_v19  ;;  %v290_v63 = vld [vmem:[%s4452_s14 + $0x128] sm:$0xff]  ;;  %v4189_v19 = vld [vmem:[%s6577_s1 + $0x3b4] sm:$0xf] }
  0x57   : > { %1211 = vmatpush.bf16.msra.mxu3 %v3361_v0  ;;  %v287_v0 = vld [vmem:[%s4452_s14 + $0x110] sm:$0xff]  ;;  %v4935_v11 = vpack.c.bf16 %v290_v63, %v285_v58  ;;  %v3382_v63 = vld [vmem:[%s6577_s1 + $0x398] sm:$0xf0] }
  0x58   : > { %v4937_v14 = vpack.c.bf16 %v292_v3, %v287_v0  ;;  %v4185_v58 = vld [vmem:[%s6577_s1 + $0x394] sm:$0xf]  ;;  %v585_v0 = vor.u32 %v583_v5, %v4891_v37 }
  0x59   : > { %v587_v43 = vshll.u32 %v4935_v11, 16  ;;  %v3385_v8 = vor.u32 %v4185_v58, %v3382_v63 }
  0x5a   : > { %1183 = vmatpush.bf16.msra.mxu2 %v3289_v23  ;;  %v3401_v23 = vor.u32 %v4189_v19, %v3398_v13  ;;  %v627_v19 = vshll.u32 %v396_v16, 16  ;;  %v639_v13 = vshrl.u32 %v4937_v14, 16 }
  0x5b   : > { %1212 = vmatpush.bf16.msra.mxu3 %v3353_v25  ;;  %v4153_v25 = vld [vmem:[%s6577_s1 + $0x294] sm:$0xf]  ;;  %v589_v3 = vrot.slane %v587_v43, 1 }
  0x5c   : > { %1243 = vmatpush.bf16.msra.mxu0 %v3401_v23  ;;  %v3257_v26 = vor.u32 %v4153_v25, %v3254_v27  ;;  %v3516_v23 = vld [vmem:[%s6577_s1 + $0x70] sm:$0xf]  ;;  %v4086_v25 = vld [vmem:[%s6577_s1 + $0x74] sm:$0xf0]  ;;  %v629_v16 = vrot.slane %v627_v19, 1 }
  0x5d   : > { %1077 = vmatmul.bf16.gmra.mxu2 %v4913_v56  ;;  %3451 = vmatmul.msk.bf16.gmra.mxu0 %vm993_vm1, %v4917_v57  ;;  %v3580_v27 = vld [vmem:[%s6577_s1 + $0xf0] sm:$0xf]  ;;  %v3517_v33 = vor.u32 %v4086_v25, %v3516_v23  ;;  %v4098_v19 = vld [vmem:[%s6577_s1 + $0xd4] sm:$0xf0] }
  0x5e   : > { %1184 = vmatpush.bf16.msra.mxu2 %v3281_v47  ;;  %1106 = vmatmul.bf16.gmra.mxu3 %v4922_v59  ;;  %v603_v47 = vshll.u32 %v4937_v14, 16 }
  0x5f   : > { %1213 = vmatpush.bf16.msra.mxu3 %v3345_v51  ;;  %1164 = vmatmul.bf16.gmra.mxu1 %v4671_v2  ;;  %v3265_v2 = vor.u32 %v4155_v12, %v3262_v15  ;;  %v3393_v51 = vor.u32 %v4187_v35, %v3390_v36  ;;  %v593_v12 = vor.u32 %v591_v20, %v4897_v45  ;;  %v597_v15 = vrot.slane %v595_v22, 1  ;;  %v4102_v35 = vld [vmem:[%s6577_s1 + $0xf4] sm:$0xf0]  ;;  %v4084_v36 = vld [vmem:[%s6577_s1 + $0x64] sm:$0xf0] }
  0x60   : > { %v623_v45 = vshrl.u32 %v4935_v11, 16  ;;  %v3581_v43 = vor.u32 %v4102_v35, %v3580_v27  ;;  %v4118_v22 = vld [vmem:[%s6577_s1 + $0x174] sm:$0xf0] }
  0x61   : > { %1244 = vmatpush.bf16.msra.mxu0 %v3393_v51  ;;  %v4999_v5 = vsel %vm466_vm0, %v593_v12, %v597_v15  ;;  %v3644_v51 = vld [vmem:[%s6577_s1 + $0x170] sm:$0xf]  ;;  %v633_v23 = vor.u32 %v631_v7, %v597_v15 }
  0x62   : > { %1185 = vmatpush.bf16.msra.mxu2 %v3273_v4  ;;  %v601_v4 = vor.u32 %v599_v44, %v4894_v28  ;;  %v388_v28 = vld [vmem:[%s4452_s14 + $0x160] sm:$0x1]  ;;  %v625_v12 = vor.u32 %v623_v45, %v589_v3  ;;  %v3564_v15 = vld [vmem:[%s6577_s1 + $0xd0] sm:$0xf] }
  0x63   : > { %1214 = vmatpush.bf16.msra.mxu3 %v3337_v50  ;;  %v605_v50 = vrot.slane %v603_v47, 1  ;;  %v3572_v44 = vld [vmem:[%s6577_s1 + $0xe0] sm:$0xf]  ;;  %v4100_v47 = vld [vmem:[%s6577_s1 + $0xe4] sm:$0xf0] }
  0x64   : > { %v3573_v63 = vor.u32 %v4100_v47, %v3572_v44  ;;  %v5048_v27 = vsel %vm466_vm0, %v625_v12, %v629_v16  ;;  %v4080_v47 = vld [vmem:[%s6577_s1 + $0x44] sm:$0xf0]  ;;  %v4078_v12 = vld [vmem:[%s6577_s1 + $0x34] sm:$0xf0]  ;;  %v3548_v16 = vld [vmem:[%s6577_s1 + $0xb0] sm:$0xf] }
  0x65   : > { %v4996_v37 = vsel %vm466_vm0, %v601_v4, %v605_v50  ;;  %1245 = vmatpush.bf16.msra.mxu0 %v3385_v8  ;;  %v635_v8 = vshll.u32 %v397_v31, 16  ;;  %v3565_v31 = vor.u32 %v4098_v19, %v3564_v15  ;;  %v4076_v15 = vld [vmem:[%s6577_s1 + $0x24] sm:$0xf0] }
  0x66   : > { %1186 = vmatpush.bf16.msra.mxu2 %v3265_v2  ;;  %v4993_v2 = vsel %vm466_vm0, %v585_v0, %v589_v3  ;;  %v3645_v0 = vor.u32 %v4118_v22, %v3644_v51  ;;  %v3500_v3 = vld [vmem:[%s6577_s1 + $0x50] sm:$0xf]  ;;  %v3556_v51 = vld [vmem:[%s6577_s1 + $0xc0] sm:$0xf] }
  0x67   : > { %1215 = vmatpush.bf16.msra.mxu3 %v3329_v21  ;;  %v398_v21 = vpack.c.bf16 %v388_v28, %v388_v28  ;;  %v641_v28 = vor.u32 %v639_v13, %v605_v50  ;;  %v637_v25 = vrot.slane %v635_v8, 1  ;;  %v4082_v50 = vld [vmem:[%s6577_s1 + $0x54] sm:$0xf0]  ;;  %v4116_v13 = vld [vmem:[%s6577_s1 + $0x164] sm:$0xf0] }
  0x68   : > { %v3501_v45 = vor.u32 %v4082_v50, %v3500_v3  ;;  %v3484_v8 = vld [vmem:[%s6577_s1 + $0x30] sm:$0xf]  ;;  %v3476_v50 = vld [vmem:[%s6577_s1 + $0x20] sm:$0xf] }
  0x69   : > { %v643_v58 = vshll.u32 %v398_v21, 16  ;;  %1693 = vmatpush.bf16.msrb.mxu0 %v3645_v0  ;;  %v3477_v19 = vor.u32 %v4076_v15, %v3476_v50  ;;  %v3652_v50 = vld [vmem:[%s6577_s1 + $0x180] sm:$0xf] }
  0x6a   : > { %1187 = vmatpush.bf16.msra.mxu2 %v3257_v26  ;;  %v3708_v26 = vld [vmem:[%s6577_s1 + $0x1f0] sm:$0xf] }
  0x6b   : > { %1216 = vmatpush.bf16.msra.mxu3 %v3321_v55  ;;  %v4134_v55 = vld [vmem:[%s6577_s1 + $0x1f4] sm:$0xf0]  ;;  %v645_v18 = vrot.slane %v643_v58, 1 }
  0x6c   : > { %v3709_v4 = vor.u32 %v4134_v55, %v3708_v26  ;;  %v3628_v55 = vld [vmem:[%s6577_s1 + $0x150] sm:$0xf]  ;;  %v4114_v58 = vld [vmem:[%s6577_s1 + $0x154] sm:$0xf0] }
  0x6d   : > { %1082 = vmatmul.bf16.gmra.mxu2 %v4993_v2  ;;  %3452 = vmatmul.msk.bf16.gmra.mxu0 %vm993_vm1, %v4996_v37  ;;  %v5051_v21 = vsel %vm466_vm0, %v641_v28, %v645_v18  ;;  %v3629_v0 = vor.u32 %v4114_v58, %v3628_v55  ;;  %v3668_v55 = vld [vmem:[%s6577_s1 + $0x1a0] sm:$0xf]  ;;  %v4124_v58 = vld [vmem:[%s6577_s1 + $0x1a4] sm:$0xf0] }
  0x6e   : > { %1111 = vmatmul.bf16.gmra.mxu3 %v4999_v5  ;;  %1635 = vmatpush.bf16.msrb.mxu2 %v3517_v33  ;;  %v5054_v33 = vsel %vm466_vm0, %v633_v23, %v637_v25  ;;  %v3684_v23 = vld [vmem:[%s6577_s1 + $0x1c0] sm:$0xf]  ;;  %v4128_v25 = vld [vmem:[%s6577_s1 + $0x1c4] sm:$0xf0] }
  0x6f   : > { %1169 = vmatmul.bf16.gmra.mxu1 %v4554_v48  ;;  %v3508_v48 = vld [vmem:[%s6577_s1 + $0x60] sm:$0xf]  ;;  %1664 = vmatpush.bf16.msrb.mxu3 %v3581_v43  ;;  %v3685_v3 = vor.u32 %v4128_v25, %v3684_v23 }
  0x70   : > { %v3509_v20 = vor.u32 %v4084_v36, %v3508_v48  ;;  %1722 = vmatpush.bf16.msrb.mxu1 %v3709_v4  ;;  %v3700_v48 = vld [vmem:[%s6577_s1 + $0x1e0] sm:$0xf]  ;;  %v4132_v36 = vld [vmem:[%s6577_s1 + $0x1e4] sm:$0xf0]  ;;  %v4130_v4 = vld [vmem:[%s6577_s1 + $0x1d4] sm:$0xf0] }
  0x71   : > { %v3492_v43 = vld [vmem:[%s6577_s1 + $0x40] sm:$0xf]  ;;  %v3701_v44 = vor.u32 %v4132_v36, %v3700_v48  ;;  %v3676_v36 = vld [vmem:[%s6577_s1 + $0x1b0] sm:$0xf] }
  0x72   : > { %1636 = vmatpush.bf16.msrb.mxu2 %v3509_v20  ;;  %v4096_v20 = vld [vmem:[%s6577_s1 + $0xc4] sm:$0xf0]  ;;  %v3493_v22 = vor.u32 %v4080_v47, %v3492_v43  ;;  %v4126_v43 = vld [vmem:[%s6577_s1 + $0x1b4] sm:$0xf0]  ;;  %v3468_v47 = vld [vmem:[%s6577_s1 + $0x10] sm:$0xf] }
  0x73   : > { %1665 = vmatpush.bf16.msrb.mxu3 %v3573_v63  ;;  %v3557_v26 = vor.u32 %v4096_v20, %v3556_v51  ;;  %v3692_v63 = vld [vmem:[%s6577_s1 + $0x1d0] sm:$0xf]  ;;  %v4074_v51 = vld [vmem:[%s6577_s1 + $0x14] sm:$0xf0]  ;;  %v3588_v25 = vld [vmem:[%s6577_s1 + $0x100] sm:$0xf] }
  0x74   : > { %1723 = vmatpush.bf16.msrb.mxu1 %v3701_v44  ;;  %v3693_v7 = vor.u32 %v4130_v4, %v3692_v63  ;;  %v3677_v44 = vor.u32 %v4126_v43, %v3676_v36  ;;  %v3532_v20 = vld [vmem:[%s6577_s1 + $0x90] sm:$0xf]  ;;  %v3669_v63 = vor.u32 %v4124_v58, %v3668_v55  ;;  %v4072_v4 = vld [vmem:[%s6577_s1 + $0x4] sm:$0xf0] }
  0x76   : > { %1637 = vmatpush.bf16.msrb.mxu2 %v3501_v45  ;;  %v3540_v45 = vld [vmem:[%s6577_s1 + $0xa0] sm:$0xf] }
  0x77   : > { %1666 = vmatpush.bf16.msrb.mxu3 %v3565_v31  ;;  %v4110_v31 = vld [vmem:[%s6577_s1 + $0x134] sm:$0xf0] }
  0x78   : > { %1724 = vmatpush.bf16.msrb.mxu1 %v3693_v7  ;;  %v3524_v7 = vld [vmem:[%s6577_s1 + $0x80] sm:$0xf] }
  0x7a   : > { %1638 = vmatpush.bf16.msrb.mxu2 %v3493_v22 }
  0x7b   : > { %1667 = vmatpush.bf16.msrb.mxu3 %v3557_v26 }
  0x7c   : > { %1725 = vmatpush.bf16.msrb.mxu1 %v3685_v3  ;;  %v4104_v3 = vld [vmem:[%s6577_s1 + $0x104] sm:$0xf0] }
  0x7d   : > { %1087 = vmatmul.bf16.gmra.mxu2 %v5048_v27  ;;  %3453 = vmatmul.msk.bf16.gmra.mxu0 %vm993_vm1, %v5051_v21 }
  0x7e   : > { %1116 = vmatmul.bf16.gmra.mxu3 %v5054_v33 }
  0x7f   : > { %1174 = vmatmul.bf16.gmra.mxu1 %v4667_v1  ;;  %v3636_v1 = vld [vmem:[%s6577_s1 + $0x160] sm:$0xf] }
  0x80   : > { %v3637_v35 = vor.u32 %v4116_v13, %v3636_v1  ;;  %v4092_v1 = vld [vmem:[%s6577_s1 + $0xa4] sm:$0xf0]  ;;  %v3612_v13 = vld [vmem:[%s6577_s1 + $0x130] sm:$0xf]  ;;  %1726 = vmatpush.bf16.msrb.mxu1 %v3677_v44 }
  0x81   : > { %v3613_v48 = vor.u32 %v4110_v31, %v3612_v13  ;;  %v3716_v31 = vld [vmem:[%s6577_s1 + $0x200] sm:$0xf] }
  0x82   : > { %1694 = vmatpush.bf16.msrb.mxu0 %v3637_v35  ;;  %v3541_v35 = vor.u32 %v4092_v1, %v3540_v45  ;;  %v3589_v45 = vor.u32 %v4104_v3, %v3588_v25  ;;  %v3638_v25 = vld [vmem:[%s6577_s1 + $0x168] sm:$0xf0]  ;;  %v4079_v3 = vld [vmem:[%s6577_s1 + $0x44] sm:$0xf] }
  0x84   : > { %1727 = vmatpush.bf16.msrb.mxu1 %v3669_v63 }
  0x86   : > { %1695 = vmatpush.bf16.msrb.mxu0 %v3629_v0  ;;  %v3460_v0 = vld [vmem:[%s6577_s1] sm:$0xf] }
  0x8d   : > { %1188 = vmatmul.bf16.vlgmr.msra.gmra.mxu2 %v4566_v53  ;;  %1246 = vmatmul.bf16.vlgmr.msra.gmra.mxu0 %v4821_v29  ;;  %v3485_v53 = vor.u32 %v4078_v12, %v3484_v8  ;;  %v4112_v29 = vld [vmem:[%s6577_s1 + $0x144] sm:$0xf0]  ;;  %v3461_v8 = vor.u32 %v4072_v4, %v3460_v0  ;;  %v4117_v4 = vld [vmem:[%s6577_s1 + $0x174] sm:$0xf] }
  0x8e   : > { %1217 = vmatmul.bf16.vlgmr.msra.gmra.mxu3 %v4810_v38  ;;  %v4094_v38 = vld [vmem:[%s6577_s1 + $0xb4] sm:$0xf0]  ;;  %v4088_v12 = vld [vmem:[%s6577_s1 + $0x84] sm:$0xf0] }
  0x8f   : > { %3454 = vmatmul.msk.bf16.vlgmr.msra.gmra.mxu1 %vm993_vm1, %v4814_v40  ;;  %v3620_v40 = vld [vmem:[%s6577_s1 + $0x140] sm:$0xf]  ;;  %v3549_v28 = vor.u32 %v4094_v38, %v3548_v16  ;;  %1639 = vmatpush.bf16.msrb.mxu2 %v3485_v53  ;;  %v3596_v16 = vld [vmem:[%s6577_s1 + $0x110] sm:$0xf]  ;;  %v4106_v53 = vld [vmem:[%s6577_s1 + $0x114] sm:$0xf0]  ;;  %v3525_v38 = vor.u32 %v4088_v12, %v3524_v7 }
  0x90   : > { %v3621_v18 = vor.u32 %v4112_v29, %v3620_v40  ;;  %v3597_v40 = vor.u32 %v4106_v53, %v3596_v16  ;;  %v3660_v29 = vld [vmem:[%s6577_s1 + $0x190] sm:$0xf]  ;;  %v3646_v7 = vld [vmem:[%s6577_s1 + $0x178] sm:$0xf0]  ;;  %v4081_v16 = vld [vmem:[%s6577_s1 + $0x54] sm:$0xf] }
  0x91   : > { %1668 = vmatpush.bf16.msrb.mxu3 %v3549_v28  ;;  %v4122_v28 = vld [vmem:[%s6577_s1 + $0x194] sm:$0xf0]  ;;  %v3649_v12 = vor.u32 %v4117_v4, %v3646_v7  ;;  %v3502_v53 = vld [vmem:[%s6577_s1 + $0x58] sm:$0xf0]  ;;  %v4095_v4 = vld [vmem:[%s6577_s1 + $0xc4] sm:$0xf] }
  0x92   : > { %1696 = vmatpush.bf16.msrb.mxu0 %v3621_v18  ;;  %v3661_v18 = vor.u32 %v4122_v28, %v3660_v29 }
  0x93   : > { %1640 = vmatpush.bf16.msrb.mxu2 %v3477_v19  ;;  %v4120_v19 = vld [vmem:[%s6577_s1 + $0x184] sm:$0xf0] }
  0x94   : > { %1728 = vmatpush.bf16.msrb.mxu1 %v3661_v18  ;;  %v3653_v13 = vor.u32 %v4120_v19, %v3652_v50  ;;  %v4097_v19 = vld [vmem:[%s6577_s1 + $0xd4] sm:$0xf] }
  0x95   : > { %1669 = vmatpush.bf16.msrb.mxu3 %v3541_v35  ;;  %v4136_v35 = vld [vmem:[%s6577_s1 + $0x204] sm:$0xf0] }
  0x96   : > { %1697 = vmatpush.bf16.msrb.mxu0 %v3613_v48  ;;  %v4085_v48 = vld [vmem:[%s6577_s1 + $0x74] sm:$0xf] }
  0x98   : > { %1729 = vmatpush.bf16.msrb.mxu1 %v3653_v13  ;;  %v3566_v13 = vld [vmem:[%s6577_s1 + $0xd8] sm:$0xf0] }
  0x9c   : > { %1838 = vmatpush.bf16.msra.mxu1 %v3649_v12  ;;  %v3558_v12 = vld [vmem:[%s6577_s1 + $0xc8] sm:$0xf0] }
  0x9d   : > { %1193 = vmatmul.bf16.gmra.mxu2 %v4690_v9  ;;  %1251 = vmatmul.bf16.gmra.mxu0 %v4922_v59  ;;  %v3469_v9 = vor.u32 %v4074_v51, %v3468_v47  ;;  %v4108_v59 = vld [vmem:[%s6577_s1 + $0x124] sm:$0xf0]  ;;  %v4083_v51 = vld [vmem:[%s6577_s1 + $0x64] sm:$0xf] }
  0x9e   : > { %1222 = vmatmul.bf16.gmra.mxu3 %v4913_v56  ;;  %v4090_v56 = vld [vmem:[%s6577_s1 + $0x94] sm:$0xf0] }
  0x9f   : > { %3455 = vmatmul.msk.bf16.gmra.mxu1 %vm993_vm1, %v4917_v57  ;;  %v3604_v57 = vld [vmem:[%s6577_s1 + $0x120] sm:$0xf]  ;;  %v3533_v22 = vor.u32 %v4090_v56, %v3532_v20  ;;  %1641 = vmatpush.bf16.msrb.mxu2 %v3469_v9  ;;  %v3510_v20 = vld [vmem:[%s6577_s1 + $0x68] sm:$0xf0]  ;;  %v4101_v9 = vld [vmem:[%s6577_s1 + $0xf4] sm:$0xf] }
  0xa0   : > { %v3605_v26 = vor.u32 %v4108_v59, %v3604_v57  ;;  %v3513_v57 = vor.u32 %v4083_v51, %v3510_v20  ;;  %v3582_v59 = vld [vmem:[%s6577_s1 + $0xf8] sm:$0xf0] }
  0xa1   : > { %1670 = vmatpush.bf16.msrb.mxu3 %v3533_v22  ;;  %v3585_v22 = vor.u32 %v4101_v9, %v3582_v59 }
  0xa2   : > { %1698 = vmatpush.bf16.msrb.mxu0 %v3605_v26 }
  0xa3   : > { %1642 = vmatpush.bf16.msrb.mxu2 %v3461_v8 }
  0xa5   : > { %1671 = vmatpush.bf16.msrb.mxu3 %v3525_v38  ;;  %v4099_v38 = vld [vmem:[%s6577_s1 + $0xe4] sm:$0xf] }
  0xa6   : > { %1699 = vmatpush.bf16.msrb.mxu0 %v3597_v40 }
  0xaa   : > { %v1015_v23 = vpop.f32.mrf.mxu0  ;;  %1700 = vmatpush.bf16.msrb.mxu0 %v3589_v45  ;;  %v3494_v45 = vld [vmem:[%s6577_s1 + $0x48] sm:$0xf0] }
  0xac   : > { %v1044_v15 = vpop.f32.mrf.mxu1 }
  0xad   : > { %v5227_v1 = vadd.f32 %v1044_v15, %v1015_v23  ;;  %1198 = vmatmul.bf16.gmra.mxu2 %v4562_v52  ;;  %1256 = vmatmul.bf16.gmra.mxu0 %v4999_v5  ;;  %v3717_v52 = vor.u32 %v4136_v35, %v3716_v31  ;;  %v4115_v23 = vld [vmem:[%s6577_s1 + $0x164] sm:$0xf]  ;;  %v3497_v31 = vor.u32 %v4079_v3, %v3494_v45  ;;  %v3550_v3 = vld [vmem:[%s6577_s1 + $0xb8] sm:$0xf0] }
  0xae   : > { %1227 = vmatmul.bf16.gmra.mxu3 %v4993_v2  ;;  %v3518_v2 = vld [vmem:[%s6577_s1 + $0x78] sm:$0xf0]  ;;  %1809 = vmatpush.bf16.msra.mxu0 %v3585_v22  ;;  %v3641_v15 = vor.u32 %v4115_v23, %v3638_v25  ;;  %v3569_v35 = vor.u32 %v4097_v19, %v3566_v13  ;;  %v3478_v23 = vld [vmem:[%s6577_s1 + $0x28] sm:$0xf0]  ;;  %v4093_v25 = vld [vmem:[%s6577_s1 + $0xb4] sm:$0xf] }
  0xaf   : > { %3456 = vmatmul.msk.bf16.gmra.mxu1 %vm993_vm1, %v4996_v37  ;;  %v3521_v5 = vor.u32 %v4085_v48, %v3518_v2  ;;  %1758 = vmatpush.bf16.msra.mxu2 %v3717_v52  ;;  %v253_v48 = vld [vmem:[%s4452_s14] sm:$0xff]  ;;  %v255_v52 = vld [vmem:[%s4452_s14 + $0x10] sm:$0xff]  ;;  %v254_v2 = vld [vmem:[%s4452_s14 + $0x8] sm:$0xff]  ;;  %v3553_v45 = vor.u32 %v4093_v25, %v3550_v3 }
  0xb0   : > { %v1025_v37 = vpop.f32.mrf.mxu2  ;;  %1839 = vmatpush.bf16.msra.mxu1 %v3641_v15  ;;  %v5322_v51 = vpack.c.bf16 %v4641_v41, %v255_v52  ;;  %v3630_v41 = vld [vmem:[%s6577_s1 + $0x158] sm:$0xf0]  ;;  %v4105_v3 = vld [vmem:[%s6577_s1 + $0x114] sm:$0xf] }
  0xb1   : > { %v1054_v36 = vpop.f32.mrf.mxu3  ;;  %1780 = vmatpush.bf16.msra.mxu3 %v3521_v5 }
  0xb2   : > { %v5246_v43 = vadd.f32 %v1054_v36, %v1025_v37  ;;  %v1017_v44 = vpop.f32.mrf.mxu0  ;;  %v256_v37 = vld [vmem:[%s4452_s14 + $0x18] sm:$0xff] }
  0xb3   : > { %v5333_v22 = vpack.c.bf16 %v4654_v60, %v256_v37  ;;  %v4077_v60 = vld [vmem:[%s6577_s1 + $0x34] sm:$0xf] }
  0xb4   : > { %v1046_v47 = vpop.f32.mrf.mxu1  ;;  %v4109_v37 = vld [vmem:[%s6577_s1 + $0x134] sm:$0xf] }
  0xb5   : > { %v5257_v56 = vadd.f32 %v1046_v47, %v1017_v44  ;;  %1781 = vmatpush.bf16.msra.mxu3 %v3513_v57  ;;  %v5316_v44 = vld [vmem:[%s4452_s14 + $0x28] sm:$0xff]  ;;  %v5327_v57 = vld [vmem:[%s4452_s14 + $0x30] sm:$0xff] }
  0xb6   : > { %v5319_v47 = vpack.c.bf16 %v5316_v44, %v253_v48  ;;  %v5330_v59 = vpack.c.bf16 %v5327_v57, %v254_v2 }
  0xb8   : > { %v1027_v26 = vpop.f32.mrf.mxu2 }
  0xb9   : > { %v1056_v55 = vpop.f32.mrf.mxu3 }
  0xba   : > { %v5262_v58 = vadd.f32 %v1056_v55, %v1027_v26  ;;  %v1020_v63 = vpop.f32.mrf.mxu0  ;;  %v4113_v55 = vld [vmem:[%s6577_s1 + $0x154] sm:$0xf] }
  0xbc   : > { %v1049_v0 = vpop.f32.mrf.mxu1 }
  0xbd   : > { %v5270_v8 = vadd.f32 %v1049_v0, %v1020_v63  ;;  %1203 = vmatmul.bf16.gmra.mxu2 %v4686_v10  ;;  %1261 = vmatmul.bf16.gmra.mxu0 %v5054_v33  ;;  %v3505_v10 = vor.u32 %v4081_v16, %v3502_v53  ;;  %v3633_v63 = vor.u32 %v4113_v55, %v3630_v41  ;;  %v3486_v0 = vld [vmem:[%s6577_s1 + $0x38] sm:$0xf0]  ;;  %v4091_v41 = vld [vmem:[%s6577_s1 + $0xa4] sm:$0xf] }
  0xbe   : > { %1232 = vmatmul.bf16.gmra.mxu3 %v5048_v27  ;;  %v3574_v27 = vld [vmem:[%s6577_s1 + $0xe8] sm:$0xf0]  ;;  %v3489_v7 = vor.u32 %v4077_v60, %v3486_v0  ;;  %v3561_v53 = vor.u32 %v4095_v4, %v3558_v12  ;;  %v3470_v55 = vld [vmem:[%s6577_s1 + $0x18] sm:$0xf0] }
  0xbf   : > { %3457 = vmatmul.msk.bf16.gmra.mxu1 %vm993_vm1, %v5051_v21  ;;  %v3577_v21 = vor.u32 %v4099_v38, %v3574_v27  ;;  %1782 = vmatpush.bf16.msra.mxu3 %v3505_v10  ;;  %v3542_v60 = vld [vmem:[%s6577_s1 + $0xa8] sm:$0xf0] }
  0xc0   : > { %v1030_v33 = vpop.f32.mrf.mxu2  ;;  %1840 = vmatpush.bf16.msra.mxu1 %v3633_v63  ;;  %v3545_v4 = vor.u32 %v4091_v41, %v3542_v60  ;;  %v4133_v60 = vld [vmem:[%s6577_s1 + $0x1f4] sm:$0xf] }
  0xc1   : > { %v1059_v40 = vpop.f32.mrf.mxu3  ;;  %1810 = vmatpush.bf16.msra.mxu0 %v3577_v21 }
  0xc2   : > { %v5289_v29 = vadd.f32 %v1059_v40, %v1030_v33  ;;  %v1022_v28 = vpop.f32.mrf.mxu0  ;;  %v4111_v40 = vld [vmem:[%s6577_s1 + $0x144] sm:$0xf] }
  0xc3   : > { %1783 = vmatpush.bf16.msra.mxu3 %v3497_v31 }
  0xc4   : > { %v1051_v18 = vpop.f32.mrf.mxu1 }
  0xc5   : > { %v5300_v50 = vadd.f32 %v1051_v18, %v1022_v28  ;;  %1811 = vmatpush.bf16.msra.mxu0 %v3569_v35  ;;  %v3622_v28 = vld [vmem:[%s6577_s1 + $0x148] sm:$0xf0]  ;;  %v4075_v18 = vld [vmem:[%s6577_s1 + $0x24] sm:$0xf] }
  0xc6   : > { %v3481_v15 = vor.u32 %v4075_v18, %v3478_v23 }
  0xc7   : > { %1784 = vmatpush.bf16.msra.mxu3 %v3489_v7 }
  0xc8   : > { %v1032_v5 = vpop.f32.mrf.mxu2 }
  0xc9   : > { %v1061_v36 = vpop.f32.mrf.mxu3  ;;  %1812 = vmatpush.bf16.msra.mxu0 %v3561_v53  ;;  %v4107_v53 = vld [vmem:[%s6577_s1 + $0x124] sm:$0xf] }
  0xca   : > { %v5324_v20 = vadd.f32 %v1061_v36, %v1032_v5  ;;  %v1131_v9 = vpop.f32.mrf.mxu0  ;;  %v3614_v5 = vld [vmem:[%s6577_s1 + $0x138] sm:$0xf0] }
  0xcb   : > { %1785 = vmatpush.bf16.msra.mxu3 %v3481_v15  ;;  %v3617_v36 = vor.u32 %v4109_v37, %v3614_v5  ;;  %v3598_v15 = vld [vmem:[%s6577_s1 + $0x118] sm:$0xf0]  ;;  %v3526_v37 = vld [vmem:[%s6577_s1 + $0x88] sm:$0xf0]  ;;  %v4103_v5 = vld [vmem:[%s6577_s1 + $0x104] sm:$0xf] }
  0xcc   : > { %v5335_v26 = vpop.f32.mrf.mxu1 }
  0xcd   : > { %1643 = vmatmul.bf16.vlgmr.msrb.gmra.mxu2 %v5319_v47  ;;  %1701 = vmatmul.bf16.vlgmr.msrb.gmra.mxu0 %v5322_v51 }
  0xce   : > { %1672 = vmatmul.bf16.vlgmr.msrb.gmra.mxu3 %v5330_v59  ;;  %1813 = vmatpush.bf16.msra.mxu0 %v3553_v45  ;;  %v3601_v45 = vor.u32 %v4105_v3, %v3598_v15  ;;  %v4218_v3 = vld [vmem:[%s6577_s1 + $0x494] sm:$0xf0] }
  0xcf   : > { %1730 = vmatmul.bf16.vlgmr.msrb.gmra.mxu1 %v5333_v22 }
  0xd0   : > { %v1073_v16 = vpop.f32.mrf.mxu2 }
  0xd1   : > { %v1074_v38 = vadd.f32 %v1073_v16, %v5227_v1  ;;  %v1102_v10 = vpop.f32.mrf.mxu3  ;;  %v3625_v1 = vor.u32 %v4111_v40, %v3622_v28  ;;  %v3462_v40 = vld [vmem:[%s6577_s1 + $0x8] sm:$0xf0]  ;;  %v4089_v28 = vld [vmem:[%s6577_s1 + $0x94] sm:$0xf] }
  0xd2   : > { %v1133_v27 = vpop.f32.mrf.mxu0  ;;  %1814 = vmatpush.bf16.msra.mxu0 %v3545_v4  ;;  %v4135_v4 = vld [vmem:[%s6577_s1 + $0x204] sm:$0xf] }
  0xd3   : > { %v1103_v33 = vadd.f32 %v1102_v10, %v1074_v38  ;;  %1841 = vmatpush.bf16.msra.mxu1 %v3625_v1  ;;  %v3606_v38 = vld [vmem:[%s6577_s1 + $0x128] sm:$0xf0]  ;;  %v3534_v1 = vld [vmem:[%s6577_s1 + $0x98] sm:$0xf0] }
  0xd4   : > { %v5360_v21 = vpop.f32.mrf.mxu1  ;;  %v3537_v23 = vor.u32 %v4089_v28, %v3534_v1  ;;  %v4131_v28 = vld [vmem:[%s6577_s1 + $0x1e4] sm:$0xf]  ;;  %v3854_v1 = vld [vmem:[%s6577_s1 + $0x490] sm:$0xf] }
  0xd5   : > { %v5380_v19 = vadd.f32 %v1131_v9, %v1103_v33  ;;  %v3609_v33 = vor.u32 %v4107_v53, %v3606_v38  ;;  %v3855_v15 = vor.u32 %v4218_v3, %v3854_v1  ;;  %v3838_v3 = vld [vmem:[%s6577_s1 + $0x470] sm:$0xf] }
  0xd6   : > { %1815 = vmatpush.bf16.msra.mxu0 %v3537_v23 }
  0xd7   : > { %1842 = vmatpush.bf16.msra.mxu1 %v3617_v36 }
  0xd8   : > { %v1075_v13 = vpop.f32.mrf.mxu2 }
  0xd9   : > { %v1076_v31 = vadd.f32 %v1075_v13, %v5257_v56  ;;  %v1104_v35 = vpop.f32.mrf.mxu3  ;;  %v4073_v56 = vld [vmem:[%s6577_s1 + $0x14] sm:$0xf] }
  0xda   : > { %v1136_v48 = vpop.f32.mrf.mxu0  ;;  %v3473_v63 = vor.u32 %v4073_v56, %v3470_v55 }
  0xdb   : > { %v1105_v52 = vadd.f32 %v1104_v35, %v1076_v31  ;;  %1843 = vmatpush.bf16.msra.mxu1 %v3609_v33 }
  0xdc   : > { %v5383_v2 = vpop.f32.mrf.mxu1  ;;  %1786 = vmatpush.bf16.msra.mxu3 %v3473_v63 }
  0xdd   : > { %1648 = vmatmul.bf16.gmra.mxu2 %v4482_v62  ;;  %1706 = vmatmul.bf16.gmra.mxu0 %v4718_v24  ;;  %v5393_v9 = vadd.f32 %v1133_v27, %v1105_v52 }
  0xde   : > { %1677 = vmatmul.bf16.gmra.mxu3 %v4492_v6 }
  0xdf   : > { %1735 = vmatmul.bf16.gmra.mxu1 %v4744_v39 }
  0xe0   : > { %v1078_v0 = vpop.f32.mrf.mxu2  ;;  %1844 = vmatpush.bf16.msra.mxu1 %v3601_v45 }
  0xe1   : > { %v1079_v7 = vadd.f32 %v1078_v0, %v5270_v8  ;;  %v1107_v12 = vpop.f32.mrf.mxu3  ;;  %v4071_v8 = vld [vmem:[%s6577_s1 + $0x4] sm:$0xf]  ;;  %v3710_v0 = vld [vmem:[%s6577_s1 + $0x1f8] sm:$0xf0] }
  0xe2   : > { %v1138_v16 = vpop.f32.mrf.mxu0  ;;  %v3465_v18 = vor.u32 %v4071_v8, %v3462_v40 }
  0xe3   : > { %v1108_v10 = vadd.f32 %v1107_v12, %v1079_v7  ;;  %v3713_v7 = vor.u32 %v4133_v60, %v3710_v0  ;;  %v3718_v12 = vld [vmem:[%s6577_s1 + $0x208] sm:$0xf0]  ;;  %v4216_v0 = vld [vmem:[%s6577_s1 + $0x484] sm:$0xf0] }
  0xe4   : > { %v5416_v27 = vpop.f32.mrf.mxu1  ;;  %1787 = vmatpush.bf16.msra.mxu3 %v3465_v18  ;;  %v3721_v53 = vor.u32 %v4135_v4, %v3718_v12  ;;  %v3702_v18 = vld [vmem:[%s6577_s1 + $0x1e8] sm:$0xf0] }
  0xe5   : > { %v5430_v25 = vadd.f32 %v1136_v48, %v1108_v10  ;;  %v4087_v48 = vld [vmem:[%s6577_s1 + $0x84] sm:$0xf]  ;;  %1867 = vmatpush.bf16.msrb.mxu2 %v3713_v7  ;;  %v3705_v23 = vor.u32 %v4131_v28, %v3702_v18  ;;  %v4232_v28 = vld [vmem:[%s6577_s1 + $0x504] sm:$0xf0] }
  0xe6   : > { %v3529_v55 = vor.u32 %v4087_v48, %v3526_v37 }
  0xe8   : > { %v1080_v13 = vpop.f32.mrf.mxu2  ;;  %1816 = vmatpush.bf16.msra.mxu0 %v3529_v55  ;;  %1903 = vmatpush.bf16.msrb.mxu3 %v3721_v53  ;;  %v4129_v55 = vld [vmem:[%s6577_s1 + $0x1d4] sm:$0xf] }
  0xe9   : > { %v1081_v31 = vadd.f32 %v1080_v13, %v5300_v50  ;;  %v1109_v35 = vpop.f32.mrf.mxu3  ;;  %v3590_v50 = vld [vmem:[%s6577_s1 + $0x108] sm:$0xf0]  ;;  %1868 = vmatpush.bf16.msrb.mxu2 %v3705_v23 }
  0xea   : > { %v1141_v52 = vpop.f32.mrf.mxu0  ;;  %v3593_v41 = vor.u32 %v4103_v5, %v3590_v50  ;;  %v4234_v5 = vld [vmem:[%s6577_s1 + $0x514] sm:$0xf0]  ;;  %v3694_v50 = vld [vmem:[%s6577_s1 + $0x1d8] sm:$0xf0]  ;;  %v3686_v23 = vld [vmem:[%s6577_s1 + $0x1c8] sm:$0xf0] }
  0xeb   : > { %v1110_v36 = vadd.f32 %v1109_v35, %v1081_v31  ;;  %v3697_v60 = vor.u32 %v4129_v55, %v3694_v50 }
  0xec   : > { %v5448_v56 = vpop.f32.mrf.mxu1  ;;  %1845 = vmatpush.bf16.msra.mxu1 %v3593_v41  ;;  %2441 = vmatpush.bf16.msrb.mxu0 %v3855_v15  ;;  %v3846_v41 = vld [vmem:[%s6577_s1 + $0x480] sm:$0xf]  ;;  %v4214_v15 = vld [vmem:[%s6577_s1 + $0x474] sm:$0xf0] }
  0xed   : > { %1653 = vmatmul.bf16.gmra.mxu2 %v4458_v42  ;;  %1711 = vmatmul.bf16.gmra.mxu0 %v4842_v32  ;;  %v5455_v63 = vadd.f32 %v1138_v16, %v1110_v36  ;;  %v3847_v7 = vor.u32 %v4216_v0, %v3846_v41  ;;  %v3902_v41 = vld [vmem:[%s6577_s1 + $0x4f0] sm:$0xf] }
  0xee   : > { %1682 = vmatmul.bf16.gmra.mxu3 %v4466_v49  ;;  %1869 = vmatpush.bf16.msrb.mxu2 %v3697_v60  ;;  %v4230_v60 = vld [vmem:[%s6577_s1 + $0x4f4] sm:$0xf0] }
  0xef   : > { %1740 = vmatmul.bf16.gmra.mxu1 %v4846_v34  ;;  %v3903_v0 = vor.u32 %v4230_v60, %v3902_v41 }
  0xf0   : > { %v1083_v16 = vpop.f32.mrf.mxu2  ;;  %2442 = vmatpush.bf16.msrb.mxu0 %v3847_v7  ;;  %v3830_v7 = vld [vmem:[%s6577_s1 + $0x460] sm:$0xf] }
  0xf1   : > { %v1084_v38 = vadd.f32 %v1083_v16, %v5246_v43  ;;  %v1112_v10 = vpop.f32.mrf.mxu3 }
  0xf2   : > { %v1143_v33 = vpop.f32.mrf.mxu0 }
  0xf3   : > { %v1113_v8 = vadd.f32 %v1112_v10, %v1084_v38 }
  0xf4   : > { %v5472_v40 = vpop.f32.mrf.mxu1 }
  0xf5   : > { %v5483_v43 = vadd.f32 %v1141_v52, %v1113_v8  ;;  %v3918_v52 = vld [vmem:[%s6577_s1 + $0x510] sm:$0xf]  ;;  %v3910_v8 = vld [vmem:[%s6577_s1 + $0x500] sm:$0xf] }
  0xf6   : > { %v3911_v1 = vor.u32 %v4232_v28, %v3910_v8 }
  0xf8   : > { %v1085_v45 = vpop.f32.mrf.mxu2 }
  0xf9   : > { %v1086_v13 = vadd.f32 %v1085_v45, %v5262_v58  ;;  %v1114_v31 = vpop.f32.mrf.mxu3  ;;  %v3919_v58 = vor.u32 %v4234_v5, %v3918_v52 }
  0xfa   : > { %v1146_v35 = vpop.f32.mrf.mxu0 }
  0xfb   : > { %v1115_v48 = vadd.f32 %v1114_v31, %v1086_v13  ;;  %2470 = vmatpush.bf16.msrb.mxu1 %v3919_v58  ;;  %v3839_v13 = vor.u32 %v4214_v15, %v3838_v3  ;;  %v4123_v3 = vld [vmem:[%s6577_s1 + $0x1a4] sm:$0xf]  ;;  %v3670_v15 = vld [vmem:[%s6577_s1 + $0x1a8] sm:$0xf0] }
  0xfc   : > { %v5489_v37 = vpop.f32.mrf.mxu1 }
  0xfd   : > { %1658 = vmatmul.bf16.gmra.mxu2 %v4462_v46  ;;  %1716 = vmatmul.bf16.gmra.mxu0 %v4935_v11  ;;  %v5499_v36 = vadd.f32 %v1143_v33, %v1115_v48  ;;  %v257_v33 = vld [vmem:[%s4452_s14 + $0x20] sm:$0xff]  ;;  %v5540_v48 = vld [vmem:[%s4452_s14 + $0x48] sm:$0xff] }
  0xfe   : > { %1687 = vmatmul.bf16.gmra.mxu3 %v4470_v54  ;;  %2443 = vmatpush.bf16.msrb.mxu0 %v3839_v13  ;;  %v4210_v13 = vld [vmem:[%s6577_s1 + $0x454] sm:$0xf0] }
  0xff   : > { %1745 = vmatmul.bf16.gmra.mxu1 %v4948_v17 }
 0x100   : > { %v1088_v4 = vpop.f32.mrf.mxu2  ;;  %2471 = vmatpush.bf16.msrb.mxu1 %v3911_v1  ;;  %v3894_v1 = vld [vmem:[%s6577_s1 + $0x4e0] sm:$0xf] }
 0x101   : > { %v1089_v12 = vadd.f32 %v1088_v4, %v5289_v29  ;;  %v1117_v16 = vpop.f32.mrf.mxu3  ;;  %v4127_v29 = vld [vmem:[%s6577_s1 + $0x1c4] sm:$0xf]  ;;  %v4125_v4 = vld [vmem:[%s6577_s1 + $0x1b4] sm:$0xf] }
 0x102   : > { %v1148_v53 = vpop.f32.mrf.mxu0  ;;  %v3689_v45 = vor.u32 %v4127_v29, %v3686_v23  ;;  %v4228_v23 = vld [vmem:[%s6577_s1 + $0x4e4] sm:$0xf0] }
 0x103   : > { %v1118_v38 = vadd.f32 %v1117_v16, %v1089_v12 }
 0x104   : > { %v5516_v10 = vpop.f32.mrf.mxu1  ;;  %1870 = vmatpush.bf16.msrb.mxu2 %v3689_v45  ;;  %2472 = vmatpush.bf16.msrb.mxu1 %v3903_v0  ;;  %v3822_v45 = vld [vmem:[%s6577_s1 + $0x450] sm:$0xf] }
 0x105   : > { %v5528_v18 = vadd.f32 %v1146_v35, %v1118_v38  ;;  %v5543_v35 = vpack.c.bf16 %v5540_v48, %v257_v33 }
 0x108   : > { %v1090_v31 = vpop.f32.mrf.mxu2 }
 0x109   : > { %v1091_v52 = vadd.f32 %v1090_v31, %v5324_v20  ;;  %v1119_v5 = vpop.f32.mrf.mxu3  ;;  %v3673_v31 = vor.u32 %v4123_v3, %v3670_v15  ;;  %v3878_v3 = vld [vmem:[%s6577_s1 + $0x4c0] sm:$0xf] }
 0x10a   : > { %v1247_v58 = vpop.f32.mrf.mxu0 }
 0x10b   : > { %v1120_v55 = vadd.f32 %v1119_v5, %v1091_v52  ;;  %v3823_v52 = vor.u32 %v4210_v13, %v3822_v45 }
 0x10c   : > { %v1276_v50 = vpop.f32.mrf.mxu1 }
 0x10d   : > { %3722 = vmatmul.msk.bf16.vlgmr.msra.gmra.mxu2 %vm993_vm1, %v5543_v35  ;;  %1817 = vmatmul.bf16.vlgmr.msra.gmra.mxu0 %v5330_v59  ;;  %v5555_v20 = vadd.f32 %v1148_v53, %v1120_v55  ;;  %v3678_v59 = vld [vmem:[%s6577_s1 + $0x1b8] sm:$0xf0] }
 0x10e   : > { %1788 = vmatmul.bf16.vlgmr.msra.gmra.mxu3 %v5319_v47  ;;  %v3681_v12 = vor.u32 %v4125_v4, %v3678_v59  ;;  %v4212_v47 = vld [vmem:[%s6577_s1 + $0x464] sm:$0xf0] }
 0x10f   : > { %1846 = vmatmul.bf16.vlgmr.msra.gmra.mxu1 %v5322_v51  ;;  %v3831_v51 = vor.u32 %v4212_v47, %v3830_v7  ;;  %v3662_v47 = vld [vmem:[%s6577_s1 + $0x198] sm:$0xf0] }
 0x110   : > { %v1189_v16 = vpop.f32.mrf.mxu2  ;;  %1871 = vmatpush.bf16.msrb.mxu2 %v3681_v12  ;;  %v4121_v12 = vld [vmem:[%s6577_s1 + $0x194] sm:$0xf] }
 0x111   : > { %v1190_v53 = vadd.f32 %v1189_v16, %v5335_v26  ;;  %v1218_v38 = vpop.f32.mrf.mxu3  ;;  %2444 = vmatpush.bf16.msrb.mxu0 %v3831_v51  ;;  %v3895_v26 = vor.u32 %v4228_v23, %v3894_v1  ;;  %v3814_v16 = vld [vmem:[%s6577_s1 + $0x440] sm:$0xf]  ;;  %v3665_v51 = vor.u32 %v4121_v12, %v3662_v47 }
 0x112   : > { %v1249_v33 = vpop.f32.mrf.mxu0 }
 0x113   : > { %v1219_v8 = vadd.f32 %v1218_v38, %v1190_v53  ;;  %2473 = vmatpush.bf16.msrb.mxu1 %v3895_v26  ;;  %v4208_v53 = vld [vmem:[%s6577_s1 + $0x444] sm:$0xf0] }
 0x114   : > { %v1278_v28 = vpop.f32.mrf.mxu1  ;;  %1872 = vmatpush.bf16.msrb.mxu2 %v3673_v31  ;;  %v4224_v26 = vld [vmem:[%s6577_s1 + $0x4c4] sm:$0xf0]  ;;  %v3654_v31 = vld [vmem:[%s6577_s1 + $0x188] sm:$0xf0] }
 0x115   : > { %v1248_v29 = vadd.f32 %v1247_v58, %v1219_v8  ;;  %2445 = vmatpush.bf16.msrb.mxu0 %v3823_v52  ;;  %v3815_v8 = vor.u32 %v4208_v53, %v3814_v16  ;;  %v3879_v45 = vor.u32 %v4224_v26, %v3878_v3  ;;  %v3806_v52 = vld [vmem:[%s6577_s1 + $0x430] sm:$0xf]  ;;  %v3798_v16 = vld [vmem:[%s6577_s1 + $0x420] sm:$0xf]  ;;  %v4250_v26 = vld [vmem:[%s6577_s1 + $0x594] sm:$0xf0] }
 0x116   : > { %v3982_v3 = vld [vmem:[%s6577_s1 + $0x590] sm:$0xf] }
 0x117   : > { %v5590_v5 = vadd.f32 %v1276_v50, %v1248_v29  ;;  %v3886_v50 = vld [vmem:[%s6577_s1 + $0x4d0] sm:$0xf] }
 0x118   : > { %v1191_v58 = vpop.f32.mrf.mxu2  ;;  %1873 = vmatpush.bf16.msrb.mxu2 %v3665_v51  ;;  %v4204_v51 = vld [vmem:[%s6577_s1 + $0x424] sm:$0xf0] }
 0x119   : > { %v1192_v55 = vadd.f32 %v1191_v58, %v5360_v21  ;;  %v1220_v41 = vpop.f32.mrf.mxu3  ;;  %v4226_v21 = vld [vmem:[%s6577_s1 + $0x4d4] sm:$0xf0]  ;;  %2446 = vmatpush.bf16.msrb.mxu0 %v3815_v8  ;;  %v3799_v8 = vor.u32 %v4204_v51, %v3798_v16 }
 0x11a   : > { %v1252_v60 = vpop.f32.mrf.mxu0  ;;  %v3887_v7 = vor.u32 %v4226_v21, %v3886_v50 }
 0x11b   : > { %v1221_v0 = vadd.f32 %v1220_v41, %v1192_v55  ;;  %v4206_v55 = vld [vmem:[%s6577_s1 + $0x434] sm:$0xf0]  ;;  %v3870_v41 = vld [vmem:[%s6577_s1 + $0x4b0] sm:$0xf] }
 0x11c   : > { %v1281_v4 = vpop.f32.mrf.mxu1  ;;  %2474 = vmatpush.bf16.msrb.mxu1 %v3887_v7 }
 0x11d   : > { %v1250_v59 = vadd.f32 %v1249_v33, %v1221_v0  ;;  %3723 = vmatmul.msk.bf16.gmra.mxu2 %vm993_vm1, %v4729_v30  ;;  %1822 = vmatmul.bf16.gmra.mxu0 %v4492_v6  ;;  %v3807_v0 = vor.u32 %v4206_v55, %v3806_v52 }
 0x11e   : > { %1793 = vmatmul.bf16.gmra.mxu3 %v4482_v62 }
 0x11f   : > { %1851 = vmatmul.bf16.gmra.mxu1 %v4718_v24  ;;  %v5616_v38 = vadd.f32 %v1278_v28, %v1250_v59  ;;  %2447 = vmatpush.bf16.msrb.mxu0 %v3807_v0 }
 0x120   : > { %v1194_v33 = vpop.f32.mrf.mxu2  ;;  %2475 = vmatpush.bf16.msrb.mxu1 %v3879_v45  ;;  %v4266_v45 = vld [vmem:[%s6577_s1 + $0x614] sm:$0xf0] }
 0x121   : > { %v1195_v29 = vadd.f32 %v1194_v33, %v5383_v2  ;;  %v1223_v1 = vpop.f32.mrf.mxu3  ;;  %v4119_v2 = vld [vmem:[%s6577_s1 + $0x184] sm:$0xf] }
 0x122   : > { %v1254_v23 = vpop.f32.mrf.mxu0  ;;  %v3657_v58 = vor.u32 %v4119_v2, %v3654_v31 }
 0x123   : > { %v1224_v15 = vadd.f32 %v1223_v1, %v1195_v29  ;;  %2448 = vmatpush.bf16.msrb.mxu0 %v3799_v8 }
 0x124   : > { %v1283_v28 = vpop.f32.mrf.mxu1  ;;  %1874 = vmatpush.bf16.msrb.mxu2 %v3657_v58 }
 0x125   : > { %v1253_v13 = vadd.f32 %v1252_v60, %v1224_v15  ;;  %v4222_v60 = vld [vmem:[%s6577_s1 + $0x4b4] sm:$0xf0]  ;;  %v4046_v15 = vld [vmem:[%s6577_s1 + $0x610] sm:$0xf] }
 0x126   : > { %v3871_v59 = vor.u32 %v4222_v60, %v3870_v41  ;;  %v4047_v31 = vor.u32 %v4266_v45, %v4046_v15  ;;  %v3966_v45 = vld [vmem:[%s6577_s1 + $0x570] sm:$0xf] }
 0x127   : > { %v5643_v50 = vadd.f32 %v1281_v4, %v1253_v13  ;;  %v3862_v4 = vld [vmem:[%s6577_s1 + $0x4a0] sm:$0xf] }
 0x128   : > { %v1196_v21 = vpop.f32.mrf.mxu2  ;;  %2476 = vmatpush.bf16.msrb.mxu1 %v3871_v59  ;;  %2528 = vmatpush.bf16.msra.mxu3 %v4047_v31  ;;  %v3974_v59 = vld [vmem:[%s6577_s1 + $0x580] sm:$0xf]  ;;  %v4030_v31 = vld [vmem:[%s6577_s1 + $0x5f0] sm:$0xf] }
 0x129   : > { %v1197_v7 = vadd.f32 %v1196_v21, %v5416_v27  ;;  %v1225_v12 = vpop.f32.mrf.mxu3  ;;  %v4220_v27 = vld [vmem:[%s6577_s1 + $0x4a4] sm:$0xf0]  ;;  %v4038_v21 = vld [vmem:[%s6577_s1 + $0x600] sm:$0xf] }
 0x12a   : > { %v1257_v47 = vpop.f32.mrf.mxu0  ;;  %v3863_v29 = vor.u32 %v4220_v27, %v3862_v4 }
 0x12b   : > { %v1226_v53 = vadd.f32 %v1225_v12, %v1197_v7  ;;  %v4264_v7 = vld [vmem:[%s6577_s1 + $0x604] sm:$0xf0]  ;;  %v4054_v12 = vld [vmem:[%s6577_s1 + $0x620] sm:$0xf] }
 0x12c   : > { %v1286_v33 = vpop.f32.mrf.mxu1  ;;  %2477 = vmatpush.bf16.msrb.mxu1 %v3863_v29  ;;  %v4039_v16 = vor.u32 %v4264_v7, %v4038_v21 }
 0x12d   : > { %v1255_v1 = vadd.f32 %v1254_v23, %v1226_v53  ;;  %3724 = vmatmul.msk.bf16.gmra.mxu2 %vm993_vm1, %v4844_v61  ;;  %1827 = vmatmul.bf16.gmra.mxu0 %v4466_v49  ;;  %v3983_v23 = vor.u32 %v4250_v26, %v3982_v3 }
 0x12e   : > { %1798 = vmatmul.bf16.gmra.mxu3 %v4458_v42 }
 0x12f   : > { %1856 = vmatmul.bf16.gmra.mxu1 %v4842_v32  ;;  %v5675_v13 = vadd.f32 %v1283_v28, %v1255_v1  ;;  %2499 = vmatpush.bf16.msra.mxu2 %v3983_v23  ;;  %v4248_v28 = vld [vmem:[%s6577_s1 + $0x584] sm:$0xf0]  ;;  %v1925_v23 = vld [vmem:[%s4452_s14] sm:$0xfc] }
 0x130   : > { %v1199_v2 = vpop.f32.mrf.mxu2  ;;  %2529 = vmatpush.bf16.msra.mxu3 %v4039_v16 }
 0x131   : > { %v1200_v52 = vadd.f32 %v1199_v2, %v5448_v56  ;;  %v1228_v58 = vpop.f32.mrf.mxu3  ;;  %v3975_v56 = vor.u32 %v4248_v28, %v3974_v59  ;;  %v4246_v2 = vld [vmem:[%s6577_s1 + $0x574] sm:$0xf0]  ;;  %v1926_v59 = vld [vmem:[%s4452_s14 + $0x8] sm:$0xfc] }
 0x132   : > { %v1259_v55 = vpop.f32.mrf.mxu0  ;;  %v1936_v16 = vpack.c.bf16 %v5327_v57, %v1926_v59 }
 0x133   : > { %v1229_v41 = vadd.f32 %v1228_v58, %v1200_v52  ;;  %2500 = vmatpush.bf16.msra.mxu2 %v3975_v56  ;;  %v3967_v52 = vor.u32 %v4246_v2, %v3966_v45  ;;  %v4262_v58 = vld [vmem:[%s6577_s1 + $0x5f4] sm:$0xf0] }
 0x134   : > { %v1288_v60 = vpop.f32.mrf.mxu1  ;;  %v4031_v28 = vor.u32 %v4262_v58, %v4030_v31 }
 0x135   : > { %v1258_v0 = vadd.f32 %v1257_v47, %v1229_v41  ;;  %v4268_v47 = vld [vmem:[%s6577_s1 + $0x624] sm:$0xf0] }
 0x136   : > { %v4055_v51 = vor.u32 %v4268_v47, %v4054_v12  ;;  %2530 = vmatpush.bf16.msra.mxu3 %v4031_v28  ;;  %v3840_v28 = vld [vmem:[%s6577_s1 + $0x478] sm:$0xf0] }
 0x137   : > { %v5696_v4 = vadd.f32 %v1286_v33, %v1258_v0  ;;  %v4217_v33 = vld [vmem:[%s6577_s1 + $0x494] sm:$0xf]  ;;  %v1935_v0 = vpack.c.bf16 %v5316_v44, %v1925_v23  ;;  %2501 = vmatpush.bf16.msra.mxu2 %v3967_v52  ;;  %v2041_v23 = vrot.slane %v1936_v16, 1 }
 0x138   : > { %v1201_v53 = vpop.f32.mrf.mxu2  ;;  %2564 = vmatpush.bf16.msra.mxu0 %v4055_v51 }
 0x139   : > { %v1202_v8 = vadd.f32 %v1201_v53, %v5472_v40  ;;  %v1230_v27 = vpop.f32.mrf.mxu3  ;;  %v3856_v40 = vld [vmem:[%s6577_s1 + $0x498] sm:$0xf0]  ;;  %v2038_v51 = vrot.slane %v1935_v0, 1  ;;  %v2042_v53 = vrot.slane %v4492_v6, 1 }
 0x13a   : > { %v1262_v29 = vpop.f32.mrf.mxu0  ;;  %v3859_v15 = vor.u32 %v4217_v33, %v3856_v40 }
 0x13b   : > { %v1231_v1 = vadd.f32 %v1230_v27, %v1202_v8  ;;  %v4215_v8 = vld [vmem:[%s6577_s1 + $0x484] sm:$0xf]  ;;  %v3958_v27 = vld [vmem:[%s6577_s1 + $0x560] sm:$0xf] }
 0x13c   : > { %v1291_v3 = vpop.f32.mrf.mxu1  ;;  %2586 = vmatpush.bf16.msra.mxu1 %v3859_v15 }
 0x13d   : > { %v1260_v26 = vadd.f32 %v1259_v55, %v1231_v1  ;;  %3725 = vmatmul.msk.bf16.gmra.mxu2 %vm993_vm1, %v4937_v14  ;;  %1832 = vmatmul.bf16.gmra.mxu0 %v4470_v54  ;;  %v4244_v1 = vld [vmem:[%s6577_s1 + $0x564] sm:$0xf0] }
 0x13e   : > { %1803 = vmatmul.bf16.gmra.mxu3 %v4462_v46  ;;  %v3959_v33 = vor.u32 %v4244_v1, %v3958_v27 }
 0x13f   : > { %1861 = vmatmul.bf16.gmra.mxu1 %v4935_v11  ;;  %v5723_v55 = vadd.f32 %v1288_v60, %v1260_v26  ;;  %v2039_v60 = vrot.slane %v4482_v62, 1  ;;  %v4260_v26 = vld [vmem:[%s6577_s1 + $0x5e4] sm:$0xf0]  ;;  %v4209_v62 = vld [vmem:[%s6577_s1 + $0x454] sm:$0xf] }
 0x140   : > { %v1204_v41 = vpop.f32.mrf.mxu2  ;;  %2502 = vmatpush.bf16.msra.mxu2 %v3959_v33 }
 0x141   : > { %v1205_v21 = vadd.f32 %v1204_v41, %v5489_v37  ;;  %v1233_v56 = vpop.f32.mrf.mxu3  ;;  %v3848_v37 = vld [vmem:[%s6577_s1 + $0x488] sm:$0xf0]  ;;  %v5755_v58 = vsel %vm2037_vm2, %v2038_v51, %v2039_v60 }
 0x142   : > { %v1264_v7 = vpop.f32.mrf.mxu0  ;;  %v3851_v57 = vor.u32 %v4215_v8, %v3848_v37 }
 0x143   : > { %v1234_v12 = vadd.f32 %v1233_v56, %v1205_v21  ;;  %v4242_v56 = vld [vmem:[%s6577_s1 + $0x554] sm:$0xf0] }
 0x144   : > { %v1293_v47 = vpop.f32.mrf.mxu1  ;;  %2587 = vmatpush.bf16.msra.mxu1 %v3851_v57 }
 0x145   : > { %v1263_v44 = vadd.f32 %v1262_v29, %v1234_v12  ;;  %v4022_v29 = vld [vmem:[%s6577_s1 + $0x5e0] sm:$0xf] }
 0x146   : > { %v4023_v40 = vor.u32 %v4260_v26, %v4022_v29  ;;  %v2053_v29 = vrot.slane %v4458_v42, 1  ;;  %v3800_v42 = vld [vmem:[%s6577_s1 + $0x428] sm:$0xf0] }
 0x147   : > { %v5749_v15 = vadd.f32 %v1291_v3, %v1263_v44  ;;  %v5760_v3 = vsel %vm2037_vm2, %v2041_v23, %v2042_v53  ;;  %v4211_v23 = vld [vmem:[%s6577_s1 + $0x464] sm:$0xf] }
 0x148   : > { %v1206_v45 = vpop.f32.mrf.mxu2  ;;  %2531 = vmatpush.bf16.msra.mxu3 %v4023_v40  ;;  %v4240_v40 = vld [vmem:[%s6577_s1 + $0x544] sm:$0xf0] }
 0x149   : > { %v1207_v2 = vadd.f32 %v1206_v45, %v5516_v10  ;;  %v1235_v31 = vpop.f32.mrf.mxu3  ;;  %v4213_v10 = vld [vmem:[%s6577_s1 + $0x474] sm:$0xf]  ;;  %v4006_v45 = vld [vmem:[%s6577_s1 + $0x5c0] sm:$0xf] }
 0x14a   : > { %v1702_v52 = vpop.f32.mrf.mxu0  ;;  %v3843_v21 = vor.u32 %v4213_v10, %v3840_v28 }
 0x14b   : > { %v1236_v41 = vadd.f32 %v1235_v31, %v1207_v2  ;;  %v4256_v2 = vld [vmem:[%s6577_s1 + $0x5c4] sm:$0xf0]  ;;  %v2055_v31 = vrot.slane %v4466_v49, 1  ;;  %v4233_v49 = vld [vmem:[%s6577_s1 + $0x514] sm:$0xf] }
 0x14c   : > { %v1731_v0 = vpop.f32.mrf.mxu1  ;;  %2588 = vmatpush.bf16.msra.mxu1 %v3843_v21 }
 0x14d   : > { %v1265_v59 = vadd.f32 %v1264_v7, %v1236_v41  ;;  %1875 = vmatmul.bf16.vlgmr.msrb.gmra.mxu2 %v5333_v22  ;;  %2449 = vmatmul.bf16.vlgmr.msrb.gmra.mxu0 %v5755_v58  ;;  %v3950_v22 = vld [vmem:[%s6577_s1 + $0x550] sm:$0xf]  ;;  %v4007_v41 = vor.u32 %v4256_v2, %v4006_v45 }
 0x14e   : > { %3726 = vmatmul.msk.bf16.vlgmr.msrb.gmra.mxu3 %vm993_vm1, %v5543_v35  ;;  %v4014_v7 = vld [vmem:[%s6577_s1 + $0x5d0] sm:$0xf]  ;;  %v3951_v12 = vor.u32 %v4242_v56, %v3950_v22  ;;  %v4258_v35 = vld [vmem:[%s6577_s1 + $0x5d4] sm:$0xf0]  ;;  %v5816_v56 = vsel %vm2037_vm2, %v2039_v60, %v2053_v29  ;;  %v3824_v60 = vld [vmem:[%s6577_s1 + $0x458] sm:$0xf0] }
 0x14f   : > { %2478 = vmatmul.bf16.vlgmr.msrb.gmra.mxu1 %v5760_v3  ;;  %v5785_v16 = vadd.f32 %v1293_v47, %v1265_v59  ;;  %v4015_v44 = vor.u32 %v4258_v35, %v4014_v7  ;;  %v3832_v47 = vld [vmem:[%s6577_s1 + $0x468] sm:$0xf0]  ;;  %v3827_v6 = vor.u32 %v4209_v62, %v3824_v60  ;;  %v4238_v35 = vld [vmem:[%s6577_s1 + $0x534] sm:$0xf0]  ;;  %v4205_v60 = vld [vmem:[%s6577_s1 + $0x434] sm:$0xf] }
 0x150   : > { %v1644_v51 = vpop.f32.mrf.mxu2  ;;  %2503 = vmatpush.bf16.msra.mxu2 %v3951_v12  ;;  %v3835_v33 = vor.u32 %v4211_v23, %v3832_v47 }
 0x151   : > { %v1645_v8 = vadd.f32 %v1644_v51, %v5380_v19  ;;  %v1673_v37 = vpop.f32.mrf.mxu3  ;;  %2532 = vmatpush.bf16.msra.mxu3 %v4015_v44  ;;  %v3942_v19 = vld [vmem:[%s6577_s1 + $0x540] sm:$0xf]  ;;  %v3998_v51 = vld [vmem:[%s6577_s1 + $0x5b0] sm:$0xf] }
 0x152   : > { %v1704_v27 = vpop.f32.mrf.mxu0  ;;  %2589 = vmatpush.bf16.msra.mxu1 %v3835_v33 }
 0x153   : > { %v1674_v57 = vadd.f32 %v1673_v37, %v1645_v8  ;;  %v4254_v8 = vld [vmem:[%s6577_s1 + $0x5b4] sm:$0xf0] }
 0x154   : > { %v1733_v1 = vpop.f32.mrf.mxu1 }
 0x155   : > { %v1703_v26 = vadd.f32 %v1702_v52, %v1674_v57  ;;  %v3943_v52 = vor.u32 %v4240_v40, %v3942_v19  ;;  %2533 = vmatpush.bf16.msra.mxu3 %v4007_v41  ;;  %v3999_v57 = vor.u32 %v4254_v8, %v3998_v51  ;;  %v4207_v40 = vld [vmem:[%s6577_s1 + $0x444] sm:$0xf]  ;;  %v3990_v41 = vld [vmem:[%s6577_s1 + $0x5a0] sm:$0xf] }
 0x156   : > { %2590 = vmatpush.bf16.msra.mxu1 %v3827_v6  ;;  %v3808_v6 = vld [vmem:[%s6577_s1 + $0x438] sm:$0xf0] }
 0x157   : > { %v5808_v59 = vadd.f32 %v1731_v0, %v1703_v26  ;;  %2504 = vmatpush.bf16.msra.mxu2 %v3943_v52  ;;  %v5823_v0 = vsel %vm2037_vm2, %v2042_v53, %v2055_v31  ;;  %v3934_v53 = vld [vmem:[%s6577_s1 + $0x530] sm:$0xf]  ;;  %v4236_v52 = vld [vmem:[%s6577_s1 + $0x524] sm:$0xf0]  ;;  %v3811_v51 = vor.u32 %v4205_v60, %v3808_v6  ;;  %v4231_v6 = vld [vmem:[%s6577_s1 + $0x504] sm:$0xf] }
 0x158   : > { %v1646_v10 = vpop.f32.mrf.mxu2  ;;  %v3935_v44 = vor.u32 %v4238_v35, %v3934_v53 }
 0x159   : > { %v1647_v28 = vadd.f32 %v1646_v10, %v5393_v9  ;;  %v1675_v21 = vpop.f32.mrf.mxu3  ;;  %2534 = vmatpush.bf16.msra.mxu3 %v3999_v57  ;;  %v2063_v10 = vrot.slane %v4462_v46, 1  ;;  %v4203_v57 = vld [vmem:[%s6577_s1 + $0x424] sm:$0xf]  ;;  %v4056_v46 = vld [vmem:[%s6577_s1 + $0x628] sm:$0xf0] }
 0x15a   : > { %v1707_v22 = vpop.f32.mrf.mxu0 }
 0x15b   : > { %v1676_v7 = vadd.f32 %v1675_v21, %v1647_v28  ;;  %2505 = vmatpush.bf16.msra.mxu2 %v3935_v44  ;;  %v4252_v21 = vld [vmem:[%s6577_s1 + $0x5a4] sm:$0xf0] }
 0x15c   : > { %v1736_v12 = vpop.f32.mrf.mxu1 }
 0x15d   : > { %v1705_v9 = vadd.f32 %v1704_v27, %v1676_v7  ;;  %1880 = vmatmul.bf16.gmra.mxu2 %v4744_v39  ;;  %2454 = vmatmul.bf16.gmra.mxu0 %v5816_v56  ;;  %v3991_v7 = vor.u32 %v4252_v21, %v3990_v41 }
 0x15e   : > { %3727 = vmatmul.msk.bf16.gmra.mxu3 %vm993_vm1, %v4729_v30 }
 0x15f   : > { %2483 = vmatmul.bf16.gmra.mxu1 %v5823_v0  ;;  %v5848_v37 = vadd.f32 %v1733_v1, %v1705_v9  ;;  %v3816_v1 = vld [vmem:[%s6577_s1 + $0x448] sm:$0xf0]  ;;  %2535 = vmatpush.bf16.msra.mxu3 %v3991_v7 }
 0x160   : > { %v1649_v27 = vpop.f32.mrf.mxu2  ;;  %v3819_v2 = vor.u32 %v4207_v40, %v3816_v1  ;;  %v3984_v40 = vld [vmem:[%s6577_s1 + $0x598] sm:$0xf0] }
 0x161   : > { %v1650_v26 = vadd.f32 %v1649_v27, %v5430_v25  ;;  %v1678_v23 = vpop.f32.mrf.mxu3  ;;  %v3926_v25 = vld [vmem:[%s6577_s1 + $0x520] sm:$0xf] }
 0x162   : > { %v1709_v47 = vpop.f32.mrf.mxu0  ;;  %v3927_v28 = vor.u32 %v4236_v52, %v3926_v25  ;;  %2591 = vmatpush.bf16.msra.mxu1 %v3819_v2  ;;  %v1931_v2 = vld [vmem:[%s4452_s14 + $0x148] sm:$0x3] }
 0x163   : > { %v1679_v19 = vadd.f32 %v1678_v23, %v1650_v26  ;;  %v3803_v26 = vor.u32 %v4203_v57, %v3800_v42  ;;  %v1930_v23 = vld [vmem:[%s4452_s14 + $0x140] sm:$0x3]  ;;  %v1941_v60 = vpack.c.bf16 %v1931_v2, %v1931_v2  ;;  %v4048_v57 = vld [vmem:[%s6577_s1 + $0x618] sm:$0xf0] }
 0x164   : > { %v1738_v33 = vpop.f32.mrf.mxu1  ;;  %2506 = vmatpush.bf16.msra.mxu2 %v3927_v28  ;;  %v1940_v21 = vpack.c.bf16 %v1930_v23, %v1930_v23 }
 0x165   : > { %v1708_v45 = vadd.f32 %v1707_v22, %v1679_v19  ;;  %v2065_v22 = vrot.slane %v4470_v54, 1  ;;  %v4249_v19 = vld [vmem:[%s6577_s1 + $0x594] sm:$0xf] }
 0x166   : > { %2592 = vmatpush.bf16.msra.mxu1 %v3811_v51  ;;  %v3987_v25 = vor.u32 %v4249_v19, %v3984_v40  ;;  %v3976_v51 = vld [vmem:[%s6577_s1 + $0x588] sm:$0xf0]  ;;  %v2073_v42 = vrot.slane %v1940_v21, 1  ;;  %v4303_v21 = vld [vmem:[%s4452_s14 + $0x38] sm:$0xff] }
 0x167   : > { %v5871_v9 = vadd.f32 %v1736_v12, %v1708_v45  ;;  %v5885_v12 = vsel %vm2037_vm2, %v2053_v29, %v2063_v10 }
 0x168   : > { %v1651_v62 = vpop.f32.mrf.mxu2  ;;  %2644 = vmatpush.bf16.msrb.mxu3 %v3987_v25  ;;  %v5946_v40 = vsel %vm2037_vm2, %v2063_v10, %v2073_v42  ;;  %v1927_v25 = vld [vmem:[%s4452_s14 + $0x10] sm:$0xfc]  ;;  %v1929_v10 = vld [vmem:[%s4452_s14 + $0x20] sm:$0xfc] }
 0x169   : > { %v1652_v53 = vadd.f32 %v1651_v62, %v5455_v63  ;;  %v1680_v35 = vpop.f32.mrf.mxu3  ;;  %v5892_v63 = vsel %vm2037_vm2, %v2055_v31, %v2065_v22  ;;  %v3920_v31 = vld [vmem:[%s6577_s1 + $0x518] sm:$0xf0] }
 0x16a   : > { %v1712_v44 = vpop.f32.mrf.mxu0  ;;  %2593 = vmatpush.bf16.msra.mxu1 %v3803_v26 }
 0x16b   : > { %v1681_v8 = vadd.f32 %v1680_v35, %v1652_v53 }
 0x16c   : > { %v1741_v27 = vpop.f32.mrf.mxu1 }
 0x16d   : > { %v1710_v29 = vadd.f32 %v1709_v47, %v1681_v8  ;;  %1885 = vmatmul.bf16.gmra.mxu2 %v4846_v34  ;;  %2459 = vmatmul.bf16.gmra.mxu0 %v5885_v12  ;;  %v3923_v47 = vor.u32 %v4233_v49, %v3920_v31  ;;  %v4265_v8 = vld [vmem:[%s6577_s1 + $0x614] sm:$0xf]  ;;  %v2075_v49 = vrot.slane %v1941_v60, 1 }
 0x16e   : > { %3728 = vmatmul.msk.bf16.gmra.mxu3 %vm993_vm1, %v4844_v61  ;;  %v4051_v26 = vor.u32 %v4265_v8, %v4048_v57 }
 0x16f   : > { %2488 = vmatmul.bf16.gmra.mxu1 %v5892_v63  ;;  %v5918_v1 = vadd.f32 %v1738_v33, %v1710_v29  ;;  %2615 = vmatpush.bf16.msrb.mxu2 %v3923_v47  ;;  %v3912_v33 = vld [vmem:[%s6577_s1 + $0x508] sm:$0xf0] }
 0x170   : > { %v1654_v45 = vpop.f32.mrf.mxu2  ;;  %v3915_v35 = vor.u32 %v4231_v6, %v3912_v33  ;;  %2673 = vmatpush.bf16.msrb.mxu0 %v4051_v26  ;;  %v3968_v6 = vld [vmem:[%s6577_s1 + $0x578] sm:$0xf0]  ;;  %v4263_v33 = vld [vmem:[%s6577_s1 + $0x604] sm:$0xf] }
 0x171   : > { %v1655_v52 = vadd.f32 %v1654_v45, %v5483_v43  ;;  %v1683_v41 = vpop.f32.mrf.mxu3  ;;  %v4247_v43 = vld [vmem:[%s6577_s1 + $0x584] sm:$0xf] }
 0x172   : > { %v1714_v28 = vpop.f32.mrf.mxu0  ;;  %v3979_v29 = vor.u32 %v4247_v43, %v3976_v51  ;;  %v4040_v43 = vld [vmem:[%s6577_s1 + $0x608] sm:$0xf0]  ;;  %v1928_v51 = vld [vmem:[%s4452_s14 + $0x18] sm:$0xfc] }
 0x173   : > { %v1684_v7 = vadd.f32 %v1683_v41, %v1655_v52  ;;  %2616 = vmatpush.bf16.msrb.mxu2 %v3915_v35  ;;  %v3904_v41 = vld [vmem:[%s6577_s1 + $0x4f8] sm:$0xf0]  ;;  %v4043_v57 = vor.u32 %v4263_v33, %v4040_v43 }
 0x174   : > { %v1743_v62 = vpop.f32.mrf.mxu1  ;;  %2645 = vmatpush.bf16.msrb.mxu3 %v3979_v29 }
 0x175   : > { %v1713_v53 = vadd.f32 %v1712_v44, %v1684_v7  ;;  %v1937_v7 = vpack.c.bf16 %v4303_v21, %v1927_v25  ;;  %2674 = vmatpush.bf16.msrb.mxu0 %v4043_v57 }
 0x177   : > { %v5940_v44 = vadd.f32 %v1741_v27, %v1713_v53  ;;  %v5951_v27 = vsel %vm2037_vm2, %v2065_v22, %v2075_v49  ;;  %v4229_v22 = vld [vmem:[%s6577_s1 + $0x4f4] sm:$0xf]  ;;  %v1939_v49 = vpack.c.bf16 %v5540_v48, %v1929_v10  ;;  %v4243_v48 = vld [vmem:[%s6577_s1 + $0x564] sm:$0xf]  ;;  %v3960_v10 = vld [vmem:[%s6577_s1 + $0x568] sm:$0xf0] }
 0x178   : > { %v1656_v31 = vpop.f32.mrf.mxu2  ;;  %v3907_v60 = vor.u32 %v4229_v22, %v3904_v41  ;;  %v4032_v22 = vld [vmem:[%s6577_s1 + $0x5f8] sm:$0xf0]  ;;  %v3963_v21 = vor.u32 %v4243_v48, %v3960_v10 }
 0x179   : > { %v1657_v23 = vadd.f32 %v1656_v31, %v5499_v36  ;;  %v1685_v47 = vpop.f32.mrf.mxu3  ;;  %v4267_v36 = vld [vmem:[%s6577_s1 + $0x624] sm:$0xf]  ;;  %v2050_v41 = vrot.slane %v1939_v49, 1  ;;  %v4225_v49 = vld [vmem:[%s6577_s1 + $0x4d4] sm:$0xf] }
 0x17a   : > { %v1717_v19 = vpop.f32.mrf.mxu0  ;;  %v4059_v54 = vor.u32 %v4267_v36, %v4056_v46  ;;  %2617 = vmatpush.bf16.msrb.mxu2 %v3907_v60  ;;  %v4227_v36 = vld [vmem:[%s6577_s1 + $0x4e4] sm:$0xf] }
 0x17b   : > { %v1686_v45 = vadd.f32 %v1685_v47, %v1657_v23  ;;  %v2044_v47 = vrot.slane %v1937_v7, 1 }
 0x17c   : > { %v1746_v2 = vpop.f32.mrf.mxu1  ;;  %2709 = vmatpush.bf16.msrb.mxu1 %v4059_v54  ;;  %v4261_v54 = vld [vmem:[%s6577_s1 + $0x5f4] sm:$0xf] }
 0x17d   : > { %v1715_v52 = vadd.f32 %v1714_v28, %v1686_v45  ;;  %1890 = vmatmul.bf16.gmra.mxu2 %v4948_v17  ;;  %2464 = vmatmul.bf16.gmra.mxu0 %v5946_v40  ;;  %v4245_v28 = vld [vmem:[%s6577_s1 + $0x574] sm:$0xf]  ;;  %v4304_v45 = vld [vmem:[%s4452_s14 + $0x40] sm:$0xff]  ;;  %v4035_v7 = vor.u32 %v4261_v54, %v4032_v22 }
 0x17e   : > { %3729 = vmatmul.msk.bf16.gmra.mxu3 %vm993_vm1, %v4937_v14  ;;  %v3971_v8 = vor.u32 %v4245_v28, %v3968_v6  ;;  %v1938_v25 = vpack.c.bf16 %v4304_v45, %v1928_v51  ;;  %v2051_v28 = vrot.slane %v4729_v30, 1  ;;  %v3952_v45 = vld [vmem:[%s6577_s1 + $0x558] sm:$0xf0] }
 0x17f   : > { %2493 = vmatmul.bf16.gmra.mxu1 %v5951_v27  ;;  %v5985_v53 = vadd.f32 %v1743_v62, %v1715_v52  ;;  %v2045_v62 = vrot.slane %v4718_v24, 1  ;;  %2675 = vmatpush.bf16.msrb.mxu0 %v4035_v7  ;;  %v4221_v24 = vld [vmem:[%s6577_s1 + $0x4b4] sm:$0xf]  ;;  %v3872_v30 = vld [vmem:[%s6577_s1 + $0x4b8] sm:$0xf0] }
 0x180   : > { %v1659_v35 = vpop.f32.mrf.mxu2  ;;  %2646 = vmatpush.bf16.msrb.mxu3 %v3971_v8  ;;  %v2047_v60 = vrot.slane %v1938_v25, 1  ;;  %v6023_v57 = vsel %vm2037_vm2, %v2050_v41, %v2051_v28  ;;  %v4024_v25 = vld [vmem:[%s6577_s1 + $0x5e8] sm:$0xf0] }
 0x181   : > { %v1660_v42 = vadd.f32 %v1659_v35, %v5528_v18  ;;  %v1688_v29 = vpop.f32.mrf.mxu3  ;;  %v3896_v18 = vld [vmem:[%s6577_s1 + $0x4e8] sm:$0xf0]  ;;  %v6018_v8 = vsel %vm2037_vm2, %v2044_v47, %v2045_v62 }
 0x182   : > { %v1719_v26 = vpop.f32.mrf.mxu0  ;;  %v3899_v52 = vor.u32 %v4227_v36, %v3896_v18 }
 0x183   : > { %v1689_v31 = vadd.f32 %v1688_v29, %v1660_v42 }
 0x184   : > { %v1748_v23 = vpop.f32.mrf.mxu1  ;;  %2618 = vmatpush.bf16.msrb.mxu2 %v3899_v52  ;;  %2647 = vmatpush.bf16.msrb.mxu3 %v3963_v21  ;;  %v2057_v21 = vrot.slane %v4842_v32, 1 }
 0x185   : > { %v1718_v46 = vadd.f32 %v1717_v19, %v1689_v31  ;;  %v2048_v19 = vrot.slane %v4744_v39, 1  ;;  %v3888_v31 = vld [vmem:[%s6577_s1 + $0x4d8] sm:$0xf0]  ;;  %v4237_v39 = vld [vmem:[%s6577_s1 + $0x534] sm:$0xf] }
 0x186   : > { %v3891_v47 = vor.u32 %v4225_v49, %v3888_v31  ;;  %v2059_v31 = vrot.slane %v4846_v34, 1 }
 0x187   : > { %v6012_v6 = vadd.f32 %v1746_v2, %v1718_v46  ;;  %v6028_v29 = vsel %vm2037_vm2, %v2047_v60, %v2048_v19  ;;  %v4239_v60 = vld [vmem:[%s6577_s1 + $0x544] sm:$0xf] }
 0x188   : > { %v1661_v33 = vpop.f32.mrf.mxu2  ;;  %2619 = vmatpush.bf16.msrb.mxu2 %v3891_v47 }
 0x189   : > { %v1662_v43 = vadd.f32 %v1661_v33, %v5555_v20  ;;  %v1690_v35 = vpop.f32.mrf.mxu3  ;;  %v3944_v33 = vld [vmem:[%s6577_s1 + $0x548] sm:$0xf0] }
 0x18a   : > { %v1818_v51 = vpop.f32.mrf.mxu0 }
 0x18b   : > { %v1691_v42 = vadd.f32 %v1690_v35, %v1662_v43  ;;  %v4257_v43 = vld [vmem:[%s6577_s1 + $0x5d4] sm:$0xf]  ;;  %v4016_v35 = vld [vmem:[%s6577_s1 + $0x5d8] sm:$0xf0] }
 0x18c   : > { %v1847_v2 = vpop.f32.mrf.mxu1 }
 0x18d   : > { %v1720_v20 = vadd.f32 %v1719_v26, %v1691_v42  ;;  %2507 = vmatmul.bf16.vlgmr.msra.gmra.mxu2 %v6018_v8  ;;  %4060 = vmatmul.msk.bf16.vlgmr.msra.gmra.mxu0 %vm993_vm1, %v6023_v57  ;;  %v4241_v26 = vld [vmem:[%s6577_s1 + $0x554] sm:$0xf]  ;;  %v3947_v42 = vor.u32 %v4239_v60, %v3944_v33 }
 0x18e   : > { %2536 = vmatmul.bf16.vlgmr.msra.gmra.mxu3 %v6028_v29  ;;  %v3955_v48 = vor.u32 %v4241_v26, %v3952_v45 }
 0x18f   : > { %2594 = vmatmul.bf16.vlgmr.msra.gmra.mxu1 %v5755_v58  ;;  %v4259_v58 = vld [vmem:[%s6577_s1 + $0x5e4] sm:$0xf]  ;;  %v6053_v36 = vadd.f32 %v1748_v23, %v1720_v20  ;;  %v4019_v20 = vor.u32 %v4257_v43, %v4016_v35 }
 0x190   : > { %v1760_v18 = vpop.f32.mrf.mxu2  ;;  %v4027_v46 = vor.u32 %v4259_v58, %v4024_v25  ;;  %2648 = vmatpush.bf16.msrb.mxu3 %v3955_v48  ;;  %v4223_v23 = vld [vmem:[%s6577_s1 + $0x4c4] sm:$0xf] }
 0x191   : > { %v6056_v52 = vadd.f32 %v1760_v18, %v5808_v59  ;;  %v1789_v10 = vpop.f32.mrf.mxu3  ;;  %v3880_v59 = vld [vmem:[%s6577_s1 + $0x4c8] sm:$0xf0]  ;;  %v4219_v43 = vld [vmem:[%s6577_s1 + $0x4a4] sm:$0xf] }
 0x192   : > { %v1790_v54 = vadd.f32 %v1789_v10, %v5590_v5  ;;  %v1820_v22 = vpop.f32.mrf.mxu0  ;;  %2676 = vmatpush.bf16.msrb.mxu0 %v4027_v46  ;;  %v3883_v5 = vor.u32 %v4223_v23, %v3880_v59  ;;  %v4008_v46 = vld [vmem:[%s6577_s1 + $0x5c8] sm:$0xf0]  ;;  %v4235_v35 = vld [vmem:[%s6577_s1 + $0x524] sm:$0xf] }
 0x194   : > { %v1849_v41 = vpop.f32.mrf.mxu1  ;;  %v1819_v7 = vadd.f32 %v1818_v51, %v1790_v54  ;;  %v2061_v51 = vrot.slane %v4844_v61, 1  ;;  %2620 = vmatpush.bf16.msrb.mxu2 %v3883_v5  ;;  %2649 = vmatpush.bf16.msrb.mxu3 %v3947_v42  ;;  %v2067_v5 = vrot.slane %v4935_v11, 1  ;;  %v3928_v42 = vld [vmem:[%s6577_s1 + $0x528] sm:$0xf0]  ;;  %v4253_v11 = vld [vmem:[%s6577_s1 + $0x5b4] sm:$0xf] }
 0x196   : > { %v6079_v49 = vadd.f32 %v1847_v2, %v1819_v7  ;;  %2677 = vmatpush.bf16.msrb.mxu0 %v4019_v20  ;;  %v6091_v2 = vsel %vm2037_vm2, %v2045_v62, %v2057_v21  ;;  %v6098_v18 = vsel %vm2037_vm2, %v2051_v28, %v2061_v51  ;;  %v3875_v28 = vor.u32 %v4221_v24, %v3872_v30  ;;  %v4000_v20 = vld [vmem:[%s6577_s1 + $0x5b8] sm:$0xf0] }
 0x198   : > { %v1762_v26 = vpop.f32.mrf.mxu2  ;;  %2621 = vmatpush.bf16.msrb.mxu2 %v3875_v28 }
 0x199   : > { %v6083_v47 = vadd.f32 %v1762_v26, %v5848_v37  ;;  %v1791_v45 = vpop.f32.mrf.mxu3  ;;  %v2071_v26 = vrot.slane %v4937_v14, 1  ;;  %v6166_v14 = vsel %vm2037_vm2, %v2057_v21, %v2067_v5 }
 0x19a   : > { %v1792_v58 = vadd.f32 %v1791_v45, %v5616_v38  ;;  %v1823_v25 = vpop.f32.mrf.mxu0  ;;  %v6105_v38 = vsel %vm2037_vm2, %v2048_v19, %v2059_v31  ;;  %v3936_v19 = vld [vmem:[%s6577_s1 + $0x538] sm:$0xf0]  ;;  %v3931_v45 = vor.u32 %v4235_v35, %v3928_v42 }
 0x19b   : > { %v3939_v54 = vor.u32 %v4237_v39, %v3936_v19 }
 0x19c   : > { %v1852_v37 = vpop.f32.mrf.mxu1  ;;  %v1821_v48 = vadd.f32 %v1820_v22, %v1792_v58  ;;  %v4003_v58 = vor.u32 %v4253_v11, %v4000_v20 }
 0x19d   : > { %2512 = vmatmul.bf16.gmra.mxu2 %v6091_v2  ;;  %4061 = vmatmul.msk.bf16.gmra.mxu0 %vm993_vm1, %v6098_v18 }
 0x19e   : > { %2541 = vmatmul.bf16.gmra.mxu3 %v6105_v38  ;;  %v6121_v62 = vadd.f32 %v1849_v41, %v1821_v48  ;;  %v2069_v48 = vrot.slane %v4948_v17, 1  ;;  %v6171_v17 = vsel %vm2037_vm2, %v2061_v51, %v2071_v26 }
 0x19f   : > { %2599 = vmatmul.bf16.gmra.mxu1 %v5816_v56  ;;  %v4255_v56 = vld [vmem:[%s6577_s1 + $0x5c4] sm:$0xf]  ;;  %2650 = vmatpush.bf16.msrb.mxu3 %v3939_v54 }
 0x1a0   : > { %v1765_v10 = vpop.f32.mrf.mxu2  ;;  %v4011_v22 = vor.u32 %v4255_v56, %v4008_v46  ;;  %v6182_v32 = vsel %vm2037_vm2, %v2059_v31, %v2069_v48  ;;  %v1932_v56 = vld [vmem:[%s4452_s14 + $0x150] sm:$0x3]  ;;  %v1934_v46 = vld [vmem:[%s4452_s14 + $0x160] sm:$0x3] }
 0x1a1   : > { %v6133_v7 = vadd.f32 %v1765_v10, %v5871_v9  ;;  %v1794_v41 = vpop.f32.mrf.mxu3  ;;  %v3864_v9 = vld [vmem:[%s6577_s1 + $0x4a8] sm:$0xf0]  ;;  %v1933_v10 = vld [vmem:[%s4452_s14 + $0x158] sm:$0x3] }
 0x1a2   : > { %v1795_v23 = vadd.f32 %v1794_v41, %v5643_v50  ;;  %v1825_v59 = vpop.f32.mrf.mxu0  ;;  %2678 = vmatpush.bf16.msrb.mxu0 %v4011_v22  ;;  %v3867_v50 = vor.u32 %v4219_v43, %v3864_v9  ;;  %v1943_v43 = vpack.c.bf16 %v1933_v10, %v1933_v10 }
 0x1a3   : > { %2651 = vmatpush.bf16.msrb.mxu3 %v3931_v45 }
 0x1a4   : > { %v1854_v60 = vpop.f32.mrf.mxu1  ;;  %v1824_v33 = vadd.f32 %v1823_v25, %v1795_v23  ;;  %2622 = vmatpush.bf16.msrb.mxu2 %v3867_v50  ;;  %v1942_v23 = vpack.c.bf16 %v1932_v56, %v1932_v56  ;;  %v2079_v50 = vrot.slane %v1943_v43, 1 }
 0x1a6   : > { %v6156_v25 = vadd.f32 %v1852_v37, %v1824_v33  ;;  %2679 = vmatpush.bf16.msrb.mxu0 %v4003_v58 }
 0x1a8   : > { %v1767_v24 = vpop.f32.mrf.mxu2 }
 0x1a9   : > { %v6160_v30 = vadd.f32 %v1767_v24, %v5918_v1  ;;  %v1796_v39 = vpop.f32.mrf.mxu3  ;;  %v4251_v1 = vld [vmem:[%s6577_s1 + $0x5a4] sm:$0xf] }
 0x1aa   : > { %v1797_v28 = vadd.f32 %v1796_v39, %v5675_v13  ;;  %v1828_v19 = vpop.f32.mrf.mxu0  ;;  %v3992_v13 = vld [vmem:[%s6577_s1 + $0x5a8] sm:$0xf0]  ;;  %v6211_v39 = vsel %vm2037_vm2, %v2069_v48, %v2079_v50 }
 0x1ab   : > { %v3995_v21 = vor.u32 %v4251_v1, %v3992_v13 }
 0x1ac   : > { %v1857_v37 = vpop.f32.mrf.mxu1  ;;  %v1826_v61 = vadd.f32 %v1825_v59, %v1797_v28  ;;  %v1944_v59 = vpack.c.bf16 %v1934_v46, %v1934_v46 }
 0x1ad   : > { %2517 = vmatmul.bf16.gmra.mxu2 %v6166_v14  ;;  %4062 = vmatmul.msk.bf16.gmra.mxu0 %vm993_vm1, %v6171_v17 }
 0x1ae   : > { %2546 = vmatmul.bf16.gmra.mxu3 %v6182_v32  ;;  %v6189_v51 = vadd.f32 %v1854_v60, %v1826_v61  ;;  %2680 = vmatpush.bf16.msrb.mxu0 %v3995_v21  ;;  %v2081_v60 = vrot.slane %v1944_v59, 1 }
 0x1af   : > { %2604 = vmatmul.bf16.gmra.mxu1 %v5885_v12  ;;  %v2077_v12 = vrot.slane %v1942_v23, 1 }
 0x1b0   : > { %v1770_v34 = vpop.f32.mrf.mxu2  ;;  %v6208_v58 = vsel %vm2037_vm2, %v2071_v26, %v2081_v60 }
 0x1b1   : > { %v6195_v31 = vadd.f32 %v1770_v34, %v5940_v44  ;;  %v1799_v54 = vpop.f32.mrf.mxu3 }
 0x1b2   : > { %v1800_v22 = vadd.f32 %v1799_v54, %v5696_v4  ;;  %v1830_v41 = vpop.f32.mrf.mxu0  ;;  %v6205_v4 = vsel %vm2037_vm2, %v2067_v5, %v2077_v12 }
 0x1b4   : > { %v1859_v33 = vpop.f32.mrf.mxu1  ;;  %v1829_v9 = vadd.f32 %v1828_v19, %v1800_v22 }
 0x1b6   : > { %v6198_v35 = vadd.f32 %v1857_v37, %v1829_v9 }
 0x1b8   : > { %v1772_v42 = vpop.f32.mrf.mxu2 }
 0x1b9   : > { %v6201_v11 = vadd.f32 %v1772_v42, %v5985_v53  ;;  %v1801_v44 = vpop.f32.mrf.mxu3 }
 0x1ba   : > { %v1802_v20 = vadd.f32 %v1801_v44, %v5723_v55  ;;  %v1833_v45 = vpop.f32.mrf.mxu0 }
 0x1bc   : > { %v1862_v24 = vpop.f32.mrf.mxu1  ;;  %v1831_v28 = vadd.f32 %v1830_v41, %v1802_v20 }
 0x1bd   : > { %2522 = vmatmul.bf16.gmra.mxu2 %v6205_v4  ;;  %4063 = vmatmul.msk.bf16.gmra.mxu0 %vm993_vm1, %v6208_v58 }
 0x1be   : > { %2551 = vmatmul.bf16.gmra.mxu3 %v6211_v39  ;;  %v6218_v55 = vadd.f32 %v1859_v33, %v1831_v28 }
 0x1bf   : > { %2609 = vmatmul.bf16.gmra.mxu1 %v5946_v40 }
 0x1c0   : > { %v1775_v53 = vpop.f32.mrf.mxu2 }
 0x1c1   : > { %v6221_v5 = vadd.f32 %v1775_v53, %v6012_v6  ;;  %v1804_v26 = vpop.f32.mrf.mxu3 }
 0x1c2   : > { %v1805_v48 = vadd.f32 %v1804_v26, %v5749_v15  ;;  %v1835_v19 = vpop.f32.mrf.mxu0 }
 0x1c4   : > { %v1864_v1 = vpop.f32.mrf.mxu1  ;;  %v1834_v13 = vadd.f32 %v1833_v45, %v1805_v48 }
 0x1c6   : > { %v6224_v37 = vadd.f32 %v1862_v24, %v1834_v13 }
 0x1c8   : > { %v1777_v21 = vpop.f32.mrf.mxu2 }
 0x1c9   : > { %v6227_v61 = vadd.f32 %v1777_v21, %v6053_v36  ;;  %v1806_v56 = vpop.f32.mrf.mxu3 }
 0x1ca   : > { %v1807_v40 = vadd.f32 %v1806_v56, %v5785_v16  ;;  %v2450_v46 = vpop.f32.mrf.mxu0 }
 0x1cc   : > { %v2479_v34 = vpop.f32.mrf.mxu1  ;;  %v1836_v10 = vadd.f32 %v1835_v19, %v1807_v40 }
 0x1cd   : > { %v6230_v6 = vadd.f32 %v2479_v34, %v2450_v46  ;;  %2623 = vmatmul.bf16.vlgmr.msrb.gmra.mxu2 %v5760_v3  ;;  %2681 = vmatmul.bf16.vlgmr.msrb.gmra.mxu0 %v6028_v29 }
 0x1ce   : > { %2652 = vmatmul.bf16.vlgmr.msrb.gmra.mxu3 %v6018_v8  ;;  %v6237_v15 = vadd.f32 %v1864_v1, %v1836_v10 }
 0x1cf   : > { %4064 = vmatmul.msk.bf16.vlgmr.msrb.gmra.mxu1 %vm993_vm1, %v6023_v57 }
 0x1d0   : > { %v1876_v36 = vpop.f32.mrf.mxu2 }
 0x1d1   : > { %v1877_v54 = vadd.f32 %v1876_v36, %v6079_v49  ;;  %v1905_v16 = vpop.f32.mrf.mxu3 }
 0x1d2   : > { %v2452_v22 = vpop.f32.mrf.mxu0 }
 0x1d3   : > { %v6240_v41 = vadd.f32 %v1905_v16, %v1877_v54 }
 0x1d4   : > { %v2481_v23 = vpop.f32.mrf.mxu1 }
 0x1d5   : > { %v6242_v59 = vadd.f32 %v2481_v23, %v2452_v22 }
 0x1d8   : > { %v1878_v3 = vpop.f32.mrf.mxu2 }
 0x1d9   : > { %v1879_v29 = vadd.f32 %v1878_v3, %v6121_v62  ;;  %v1907_v33 = vpop.f32.mrf.mxu3 }
 0x1da   : > { %v2455_v8 = vpop.f32.mrf.mxu0 }
 0x1db   : > { %v6245_v43 = vadd.f32 %v1907_v33, %v1879_v29 }
 0x1dc   : > { %v2484_v57 = vpop.f32.mrf.mxu1 }
 0x1dd   : > { %v6247_v9 = vadd.f32 %v2484_v57, %v2455_v8  ;;  %2628 = vmatmul.bf16.gmra.mxu2 %v5823_v0  ;;  %2686 = vmatmul.bf16.gmra.mxu0 %v6105_v38 }
 0x1de   : > { %2657 = vmatmul.bf16.gmra.mxu3 %v6091_v2 }
 0x1df   : > { %4065 = vmatmul.msk.bf16.gmra.mxu1 %vm993_vm1, %v6098_v18 }
 0x1e0   : > { %v1881_v49 = vpop.f32.mrf.mxu2 }
 0x1e1   : > { %v1882_v12 = vadd.f32 %v1881_v49, %v6156_v25  ;;  %v1910_v62 = vpop.f32.mrf.mxu3 }
 0x1e2   : > { %v2457_v60 = vpop.f32.mrf.mxu0 }
 0x1e3   : > { %v6255_v50 = vadd.f32 %v1910_v62, %v1882_v12 }
 0x1e4   : > { %v2486_v42 = vpop.f32.mrf.mxu1 }
 0x1e5   : > { %v6257_v44 = vadd.f32 %v2486_v42, %v2457_v60 }
 0x1e8   : > { %v1883_v20 = vpop.f32.mrf.mxu2 }
 0x1e9   : > { %v1884_v0 = vadd.f32 %v1883_v20, %v6189_v51  ;;  %v1912_v45 = vpop.f32.mrf.mxu3 }
 0x1ea   : > { %v2460_v38 = vpop.f32.mrf.mxu0 }
 0x1eb   : > { %v6260_v24 = vadd.f32 %v1912_v45, %v1884_v0 }
 0x1ec   : > { %v2489_v2 = vpop.f32.mrf.mxu1 }
 0x1ed   : > { %v6262_v28 = vadd.f32 %v2489_v2, %v2460_v38  ;;  %2633 = vmatmul.bf16.gmra.mxu2 %v5892_v63  ;;  %2691 = vmatmul.bf16.gmra.mxu0 %v6182_v32 }
 0x1ee   : > { %2662 = vmatmul.bf16.gmra.mxu3 %v6166_v14 }
 0x1ef   : > { %4066 = vmatmul.msk.bf16.gmra.mxu1 %vm993_vm1, %v6171_v17 }
 0x1f0   : > { %v1886_v18 = vpop.f32.mrf.mxu2 }
 0x1f1   : > { %v1887_v25 = vadd.f32 %v1886_v18, %v6198_v35  ;;  %v1915_v51 = vpop.f32.mrf.mxu3 }
 0x1f2   : > { %v2462_v53 = vpop.f32.mrf.mxu0 }
 0x1f3   : > { %v6270_v26 = vadd.f32 %v1915_v51, %v1887_v25 }
 0x1f4   : > { %v2491_v48 = vpop.f32.mrf.mxu1 }
 0x1f5   : > { %v6272_v19 = vadd.f32 %v2491_v48, %v2462_v53 }
 0x1f8   : > { %v1888_v1 = vpop.f32.mrf.mxu2 }
 0x1f9   : > { %v1889_v63 = vadd.f32 %v1888_v1, %v6218_v55  ;;  %v1917_v13 = vpop.f32.mrf.mxu3 }
 0x1fa   : > { %v2465_v32 = vpop.f32.mrf.mxu0 }
 0x1fb   : > { %v6275_v21 = vadd.f32 %v1917_v13, %v1889_v63 }
 0x1fc   : > { %v2494_v14 = vpop.f32.mrf.mxu1 }
 0x1fd   : > { %v6277_v56 = vadd.f32 %v2494_v14, %v2465_v32  ;;  %2638 = vmatmul.bf16.gmra.mxu2 %v5951_v27  ;;  %2696 = vmatmul.bf16.gmra.mxu0 %v6211_v39 }
 0x1fe   : > { %2667 = vmatmul.bf16.gmra.mxu3 %v6205_v4 }
 0x1ff   : > { %4067 = vmatmul.msk.bf16.gmra.mxu1 %vm993_vm1, %v6208_v58 }
 0x200   : > { %v1891_v17 = vpop.f32.mrf.mxu2 }
 0x201   : > { %v1892_v35 = vadd.f32 %v1891_v17, %v6224_v37  ;;  %v1920_v55 = vpop.f32.mrf.mxu3 }
 0x202   : > { %v2467_v40 = vpop.f32.mrf.mxu0 }
 0x203   : > { %v6285_v46 = vadd.f32 %v1920_v55, %v1892_v35 }
 0x204   : > { %v2496_v34 = vpop.f32.mrf.mxu1 }
 0x205   : > { %v6287_v10 = vadd.f32 %v2496_v34, %v2467_v40 }
 0x208   : > { %v1893_v36 = vpop.f32.mrf.mxu2 }
 0x209   : > { %v1894_v27 = vadd.f32 %v1893_v36, %v6237_v15  ;;  %v1922_v54 = vpop.f32.mrf.mxu3 }
 0x20a   : > { %v2566_v39 = vpop.f32.mrf.mxu0 }
 0x20b   : > { %v6290_v16 = vadd.f32 %v1922_v54, %v1894_v27 }
 0x20c   : > { %v6292_v4 = vpop.f32.mrf.mxu1 }
 0x210   : > { %v2508_v58 = vpop.f32.mrf.mxu2 }
 0x211   : > { %v2509_v22 = vadd.f32 %v2508_v58, %v6230_v6  ;;  %v2537_v37 = vpop.f32.mrf.mxu3 }
 0x212   : > { %v2568_v23 = vpop.f32.mrf.mxu0 }
 0x213   : > { %v2538_v3 = vadd.f32 %v2537_v37, %v2509_v22 }
 0x214   : > { %v6295_v29 = vpop.f32.mrf.mxu1 }
 0x215   : > { %v2567_v33 = vadd.f32 %v2566_v39, %v2538_v3 }
 0x217   : > { %v6298_v8 = vadd.f32 %v2567_v33, %v6056_v52 }
 0x218   : > { %v2510_v57 = vpop.f32.mrf.mxu2 }
 0x219   : > { %v2511_v15 = vadd.f32 %v2510_v57, %v6242_v59  ;;  %v2539_v49 = vpop.f32.mrf.mxu3 }
 0x21a   : > { %v2571_v12 = vpop.f32.mrf.mxu0 }
 0x21b   : > { %v2540_v62 = vadd.f32 %v2539_v49, %v2511_v15 }
 0x21c   : > { %v6301_v60 = vpop.f32.mrf.mxu1 }
 0x21d   : > { %v2569_v42 = vadd.f32 %v2568_v23, %v2540_v62 }
 0x21f   : > { %v6304_v6 = vadd.f32 %v2569_v42, %v6083_v47 }
 0x220   : > { %v2513_v20 = vpop.f32.mrf.mxu2 }
 0x221   : > { %v2514_v0 = vadd.f32 %v2513_v20, %v6247_v9  ;;  %v2542_v45 = vpop.f32.mrf.mxu3 }
 0x222   : > { %v2573_v38 = vpop.f32.mrf.mxu0 }
 0x223   : > { %v2543_v2 = vadd.f32 %v2542_v45, %v2514_v0 }
 0x224   : > { %v6307_v52 = vpop.f32.mrf.mxu1 }
 0x225   : > { %v2572_v18 = vadd.f32 %v2571_v12, %v2543_v2 }
 0x227   : > { %v6310_v59 = vadd.f32 %v2572_v18, %v6133_v7 }
 0x228   : > { %v2515_v25 = vpop.f32.mrf.mxu2 }
 0x229   : > { %v2516_v51 = vadd.f32 %v2515_v25, %v6257_v44  ;;  %v2544_v53 = vpop.f32.mrf.mxu3 }
 0x22a   : > { %v2576_v48 = vpop.f32.mrf.mxu0 }
 0x22b   : > { %v2545_v1 = vadd.f32 %v2544_v53, %v2516_v51 }
 0x22c   : > { %v6313_v47 = vpop.f32.mrf.mxu1 }
 0x22d   : > { %v2574_v63 = vadd.f32 %v2573_v38, %v2545_v1 }
 0x22f   : > { %v6316_v9 = vadd.f32 %v2574_v63, %v6160_v30 }
 0x230   : > { %v2518_v13 = vpop.f32.mrf.mxu2 }
 0x231   : > { %v2519_v32 = vadd.f32 %v2518_v13, %v6262_v28  ;;  %v2547_v14 = vpop.f32.mrf.mxu3 }
 0x232   : > { %v2578_v17 = vpop.f32.mrf.mxu0 }
 0x233   : > { %v2548_v35 = vadd.f32 %v2547_v14, %v2519_v32 }
 0x234   : > { %v6319_v7 = vpop.f32.mrf.mxu1 }
 0x235   : > { %v2577_v55 = vadd.f32 %v2576_v48, %v2548_v35 }
 0x237   : > { %v6322_v44 = vadd.f32 %v2577_v55, %v6195_v31 }
 0x238   : > { %v2520_v40 = vpop.f32.mrf.mxu2 }
 0x239   : > { %v2521_v34 = vadd.f32 %v2520_v40, %v6272_v19  ;;  %v2549_v36 = vpop.f32.mrf.mxu3 }
 0x23a   : > { %v2581_v27 = vpop.f32.mrf.mxu0 }
 0x23b   : > { %v2550_v54 = vadd.f32 %v2549_v36, %v2521_v34 }
 0x23c   : > { %v6325_v30 = vpop.f32.mrf.mxu1 }
 0x23d   : > { %v2579_v39 = vadd.f32 %v2578_v17, %v2550_v54 }
 0x23f   : > { %v6328_v28 = vadd.f32 %v2579_v39, %v6201_v11 }
 0x240   : > { %v2523_v58 = vpop.f32.mrf.mxu2 }
 0x241   : > { %v2524_v22 = vadd.f32 %v2523_v58, %v6277_v56  ;;  %v2552_v37 = vpop.f32.mrf.mxu3 }
 0x242   : > { %v2583_v23 = vpop.f32.mrf.mxu0 }
 0x243   : > { %v2553_v3 = vadd.f32 %v2552_v37, %v2524_v22 }
 0x244   : > { %v6331_v31 = vpop.f32.mrf.mxu1 }
 0x245   : > { %v2582_v33 = vadd.f32 %v2581_v27, %v2553_v3 }
 0x247   : > { %v6334_v19 = vadd.f32 %v2582_v33, %v6221_v5 }
 0x248   : > { %v2525_v57 = vpop.f32.mrf.mxu2 }
 0x249   : > { %v2526_v15 = vadd.f32 %v2525_v57, %v6287_v10  ;;  %v2554_v49 = vpop.f32.mrf.mxu3 }
 0x24a   : > { %v2682_v12 = vpop.f32.mrf.mxu0 }
 0x24b   : > { %v2555_v62 = vadd.f32 %v2554_v49, %v2526_v15  ;;  %v2747_v49 = vld [vmem:[%s6578_s2] sm:$0x3] }
 0x24c   : > { %v2711_v11 = vpop.f32.mrf.mxu1 }
 0x24d   : > { %v2584_v42 = vadd.f32 %v2583_v23, %v2555_v62 }
 0x24f   : > { %v6338_v20 = vadd.f32 %v2584_v42, %v6227_v61 }
 0x250   : > { %v2624_v56 = vpop.f32.mrf.mxu2 }
 0x251   : > { %v2625_v0 = vadd.f32 %v2624_v56, %v6292_v4  ;;  %v2653_v45 = vpop.f32.mrf.mxu3 }
 0x252   : > { %v2684_v38 = vpop.f32.mrf.mxu0 }
 0x253   : > { %v2654_v2 = vadd.f32 %v2653_v45, %v2625_v0 }
 0x254   : > { %v2713_v18 = vpop.f32.mrf.mxu1 }
 0x255   : > { %v2683_v5 = vadd.f32 %v2682_v12, %v2654_v2 }
 0x257   : > { %v2712_v25 = vadd.f32 %v2711_v11, %v2683_v5 }
 0x258   : > { %v2626_v51 = vpop.f32.mrf.mxu2 }
 0x259   : > { %v6342_v10 = vadd.f32 %v2712_v25, %v6240_v41  ;;  %v2627_v53 = vadd.f32 %v2626_v51, %v6295_v29  ;;  %v2655_v48 = vpop.f32.mrf.mxu3 }
 0x25a   : > { %v2687_v1 = vpop.f32.mrf.mxu0 }
 0x25b   : > { %v2656_v63 = vadd.f32 %v2655_v48, %v2627_v53 }
 0x25c   : > { %v2716_v61 = vpop.f32.mrf.mxu1 }
 0x25d   : > { %v2685_v13 = vadd.f32 %v2684_v38, %v2656_v63 }
 0x25f   : > { %v2714_v32 = vadd.f32 %v2713_v18, %v2685_v13 }
 0x260   : > { %v2629_v14 = vpop.f32.mrf.mxu2 }
 0x261   : > { %v2734_v4 = vadd.f32 %v2714_v32, %v6245_v43  ;;  %v2630_v17 = vadd.f32 %v2629_v14, %v6301_v60  ;;  %v2658_v35 = vpop.f32.mrf.mxu3 }
 0x262   : > { %v2689_v40 = vpop.f32.mrf.mxu0 }
 0x263   : > { %v2659_v55 = vadd.f32 %v2658_v35, %v2630_v17 }
 0x264   : > { %v2718_v36 = vpop.f32.mrf.mxu1 }
 0x265   : > { %v2688_v34 = vadd.f32 %v2687_v1, %v2659_v55 }
 0x267   : > { %v2717_v41 = vadd.f32 %v2716_v61, %v2688_v34 }
 0x268   : > { %v2631_v27 = vpop.f32.mrf.mxu2 }
 0x269   : > { %v2736_v29 = vadd.f32 %v2717_v41, %v6255_v50  ;;  %v2632_v54 = vadd.f32 %v2631_v27, %v6307_v52  ;;  %v2660_v39 = vpop.f32.mrf.mxu3  ;;  %v2749_v52 = vperm.slane %v2747_v49, 0 }
 0x26a   : > { %v2692_v37 = vpop.f32.mrf.mxu0 }
 0x26b   : > { %v2661_v58 = vadd.f32 %v2660_v39, %v2632_v54  ;;  %v6360_v38 = vadd.f32 %v2749_v52, %v6298_v8  ;;  %v6363_v2 = vadd.f32 %v2749_v52, %v6310_v59  ;;  %v6374_v51 = vadd.f32 %v2749_v52, %v6322_v44 }
 0x26c   : > { %v2721_v3 = vpop.f32.mrf.mxu1  ;;  %v6376_v8 = vperm.slane %v2747_v49, 1  ;;  %v6386_v13 = vadd.f32 %v2749_v52, %v6328_v28  ;;  %v6408_v27 = vadd.f32 %v2749_v52, %v6338_v20 }
 0x26d   : > { %v2690_v22 = vadd.f32 %v2689_v40, %v2661_v58  ;;  %v2796_v53 = vmul.f32 %v6360_v38, %v6360_v38  ;;  %v2800_v48 = vmul.f32 %v6363_v2, %v6363_v2 }
 0x26e   : > { %v6389_v44 = vadd.f32 %v6376_v8, %v2734_v4  ;;  %v6402_v28 = vadd.f32 %v6376_v8, %v2736_v29  ;;  %v2806_v39 = vmul.f32 %v6386_v13, %v6386_v13 }
 0x26f   : > { %v2719_v23 = vadd.f32 %v2718_v36, %v2690_v22  ;;  %v2804_v36 = vmul.f32 %v6374_v51, %v6374_v51 }
 0x270   : > { %v2634_v43 = vpop.f32.mrf.mxu2  ;;  %v2801_v20 = vmul.f32 %v6402_v28, %v6402_v28 }
 0x271   : > { %v2738_v60 = vadd.f32 %v2719_v23, %v6260_v24  ;;  %v2635_v33 = vadd.f32 %v2634_v43, %v6313_v47  ;;  %v2663_v57 = vpop.f32.mrf.mxu3  ;;  %v6357_v24 = vadd.f32 %v2749_v52, %v6304_v6 }
 0x272   : > { %v2694_v62 = vpop.f32.mrf.mxu0 }
 0x273   : > { %v2664_v15 = vadd.f32 %v2663_v57, %v2635_v33  ;;  %v2770_v5 = vadd.f32 %v6357_v24, %v6360_v38 }
 0x274   : > { %v2723_v47 = vpop.f32.mrf.mxu1 }
 0x275   : > { %v2693_v50 = vadd.f32 %v2692_v37, %v2664_v15  ;;  %v2771_v25 = vadd.f32 %v2770_v5, %v6363_v2 }
 0x277   : > { %v2722_v12 = vadd.f32 %v2721_v3, %v2693_v50 }
 0x278   : > { %v2636_v11 = vpop.f32.mrf.mxu2 }
 0x279   : > { %v2740_v42 = vadd.f32 %v2722_v12, %v6270_v26  ;;  %v2637_v56 = vadd.f32 %v2636_v11, %v6319_v7  ;;  %v2665_v0 = vpop.f32.mrf.mxu3  ;;  %v6368_v26 = vadd.f32 %v2749_v52, %v6316_v9  ;;  %v2798_v7 = vmul.f32 %v6357_v24, %v6357_v24 }
 0x27a   : > { %v2697_v32 = vpop.f32.mrf.mxu0 }
 0x27b   : > { %v2666_v45 = vadd.f32 %v2665_v0, %v2637_v56  ;;  %v2772_v61 = vadd.f32 %v2771_v25, %v6368_v26  ;;  %v2812_v14 = vadd.f32 %v2798_v7, %v2796_v53  ;;  %v2802_v17 = vmul.f32 %v6368_v26, %v6368_v26 }
 0x27c   : > { %v2726_v4 = vpop.f32.mrf.mxu1  ;;  %v6425_v3 = vadd.f32 %v6376_v8, %v2740_v42 }
 0x27d   : > { %v2695_v18 = vadd.f32 %v2694_v62, %v2666_v45  ;;  %v2773_v55 = vadd.f32 %v2772_v61, %v6374_v51  ;;  %v2813_v40 = vadd.f32 %v2812_v14, %v2800_v48 }
 0x27f   : > { %v2724_v6 = vadd.f32 %v2723_v47, %v2695_v18  ;;  %v2774_v41 = vadd.f32 %v2773_v55, %v6386_v13  ;;  %v2814_v54 = vadd.f32 %v2813_v40, %v2802_v17  ;;  %v2805_v47 = vmul.f32 %v6425_v3, %v6425_v3 }
 0x280   : > { %v2639_v59 = vpop.f32.mrf.mxu2 }
 0x281   : > { %v2742_v9 = vadd.f32 %v2724_v6, %v6275_v21  ;;  %v2640_v1 = vadd.f32 %v2639_v59, %v6325_v30  ;;  %v2668_v63 = vpop.f32.mrf.mxu3  ;;  %v6395_v21 = vadd.f32 %v2749_v52, %v6334_v19  ;;  %v6399_v30 = vadd.f32 %v6376_v8, %v6342_v10 }
 0x282   : > { %v2799_v19 = vmul.f32 %v6389_v44, %v6389_v44  ;;  %v6413_v10 = vadd.f32 %v6376_v8, %v2738_v60  ;;  %v2815_v33 = vadd.f32 %v2814_v54, %v2804_v36  ;;  %v2699_v56 = vpop.f32.mrf.mxu0 }
 0x283   : > { %v2669_v35 = vadd.f32 %v2668_v63, %v2640_v1  ;;  %v2775_v58 = vadd.f32 %v2774_v41, %v6395_v21  ;;  %v2797_v22 = vmul.f32 %v6399_v30, %v6399_v30  ;;  %v2783_v23 = vadd.f32 %v6389_v44, %v6399_v30 }
 0x284   : > { %v2808_v57 = vmul.f32 %v6395_v21, %v6395_v21  ;;  %v2803_v52 = vmul.f32 %v6413_v10, %v6413_v10  ;;  %v6436_v62 = vadd.f32 %v6376_v8, %v2742_v9  ;;  %v2728_v6 = vpop.f32.mrf.mxu1 }
 0x285   : > { %v2698_v34 = vadd.f32 %v2697_v32, %v2669_v35  ;;  %v2776_v15 = vadd.f32 %v2775_v58, %v6408_v27  ;;  %v2825_v49 = vadd.f32 %v2799_v19, %v2797_v22  ;;  %v2784_v12 = vadd.f32 %v2783_v23, %v6402_v28 }
 0x286   : > { %v2807_v53 = vmul.f32 %v6436_v62, %v6436_v62 }
 0x287   : > { %v2727_v29 = vadd.f32 %v2726_v4, %v2698_v34  ;;  %v2826_v42 = vadd.f32 %v2825_v49, %v2801_v20  ;;  %v2785_v0 = vadd.f32 %v2784_v12, %v6413_v10  ;;  %v2777_v7 = vrot.slane %v2776_v15, 4 }
 0x288   : > { %v2641_v37 = vpop.f32.mrf.mxu2 }
 0x289   : > { %v2744_v43 = vadd.f32 %v2727_v29, %v6285_v46  ;;  %v2642_v60 = vadd.f32 %v2641_v37, %v6331_v31  ;;  %v2670_v50 = vpop.f32.mrf.mxu3  ;;  %v2816_v46 = vadd.f32 %v2815_v33, %v2806_v39  ;;  %v2810_v31 = vmul.f32 %v6408_v27, %v6408_v27 }
 0x28a   : > { %v2827_v25 = vadd.f32 %v2826_v42, %v2803_v52  ;;  %v2786_v59 = vadd.f32 %v2785_v0, %v6425_v3  ;;  %v2778_v14 = vadd.f32 %v2777_v7, %v2776_v15  ;;  %v6463_v52 = vld [vmem:[%s6581_s5] sm:$0xf] }
 0x28b   : > { %v2671_v11 = vadd.f32 %v2670_v50, %v2642_v60  ;;  %v6444_v45 = vadd.f32 %v6376_v8, %v2744_v43  ;;  %v2817_v5 = vadd.f32 %v2816_v46, %v2808_v57 }
 0x28c   : > { %v2828_v1 = vadd.f32 %v2827_v25, %v2805_v47  ;;  %v2787_v63 = vadd.f32 %v2786_v59, %v6436_v62  ;;  %v2779_v41 = vrot.slane %v2778_v14, 2 }
 0x28d   : > { %v2700_v18 = vadd.f32 %v2699_v56, %v2671_v11  ;;  %v2818_v9 = vadd.f32 %v2817_v5, %v2810_v31  ;;  %v2809_v61 = vmul.f32 %v6444_v45, %v6444_v45 }
 0x28e   : > { %v2829_v17 = vadd.f32 %v2828_v1, %v2807_v53  ;;  %v2788_v35 = vadd.f32 %v2787_v63, %v6444_v45  ;;  %v2780_v58 = vadd.f32 %v2779_v41, %v2778_v14 }
 0x28f   : > { %v2729_v48 = vadd.f32 %v2728_v6, %v2700_v18  ;;  %v2819_v4 = vrot.slane %v2818_v9, 4 }
 0x290   : > { %v2830_v40 = vadd.f32 %v2829_v17, %v2809_v61  ;;  %v2781_v43 = vrot.slane %v2780_v58, 1  ;;  %v4313_v61 = vmov 8192.0  }
 0x291   : > { %v2746_v32 = vadd.f32 %v2729_v48, %v6290_v16  ;;  %v2820_v29 = vadd.f32 %v2819_v4, %v2818_v9  ;;  %4296 = vrcp.f32 %v4313_v61 }
 0x292   : > { %v2782_v50 = vadd.f32 %v2781_v43, %v2780_v58 }
 0x293   : > { %v6455_v55 = vadd.f32 %v6376_v8, %v2746_v32  ;;  %v2821_v37 = vrot.slane %v2820_v29, 2 }
 0x295   : > { %v2789_v34 = vadd.f32 %v2788_v35, %v6455_v55  ;;  %v2811_v36 = vmul.f32 %v6455_v55, %v6455_v55  ;;  %v2822_v57 = vadd.f32 %v2821_v37, %v2820_v29 }
 0x297   : > { %v2790_v19 = vrot.slane %v2789_v34, 4  ;;  %v2831_v54 = vadd.f32 %v2830_v40, %v2811_v36  ;;  %v2823_v46 = vrot.slane %v2822_v57, 1  ;;  %v4297_v32 = vpop.eup %4296  ;;  %v4314_v40 = vmov 269488144  }
 0x298   : > { %v2874_v14 = vmul.f32 8192.0, %v4297_v32  ;;  %vm2878_vm4 = vweird.f32 %v4297_v32 }
 0x299   : > { %v2791_v39 = vadd.f32 %v2790_v19, %v2789_v34  ;;  %v2832_v16 = vrot.slane %v2831_v54, 4  ;;  %v2824_v0 = vadd.f32 %v2823_v46, %v2822_v57  ;;  %v2897_v34 = vunpack.c.l.s4 %v4314_v40 }
 0x29a   : > { %v2875_v17 = vsub.f32 1.0, %v2874_v14 }
 0x29b   : > { %v2792_v22 = vrot.slane %v2791_v39, 2  ;;  %v2833_v20 = vadd.f32 %v2832_v16, %v2831_v54  ;;  %v2898_v41 = vunpack.c.0.s8 %v2897_v34 }
 0x29c   : > { %v2876_v35 = vmul.f32 %v4297_v32, %v2875_v17 }
 0x29d   : > { %v2793_v23 = vadd.f32 %v2792_v22, %v2791_v39  ;;  %v2834_v8 = vrot.slane %v2833_v20, 2 }
 0x29e   : > { %v2877_v4 = vadd.f32 %v4297_v32, %v2876_v35 }
 0x29f   : > { %v2794_v60 = vrot.slane %v2793_v23, 1  ;;  %v2835_v33 = vadd.f32 %v2834_v8, %v2833_v20 }
 0x2a0   : > { %v2879_v36 = vsel %vm2878_vm4, %v4297_v32, %v2877_v4 }
 0x2a1   : > { %v2795_v15 = vadd.f32 %v2794_v60, %v2793_v23  ;;  %v2836_v49 = vrot.slane %v2835_v33, 1 }
 0x2a3   : > { %v2837_v12 = vadd.f32 %v2836_v49, %v2835_v33  ;;  %v2840_v11 = vrot.slane %v2795_v15, 6 }
 0x2a5   : > { %v2842_v31 = vsel %vm2841_vm3, %v2782_v50, %v2840_v11  ;;  %v2858_v56 = vrot.slane %v2837_v12, 6 }
 0x2a6   : > { %v2844_v42 = vmul.f32 %v2842_v31, %v6463_v52 }
 0x2a7   : > { %v2859_v47 = vsel %vm2841_vm3, %v2824_v0, %v2858_v56 }
 0x2a8   : > { %2846 = vst [vmem:[#allocation1] ss:$4 sm:$0xff] %v2844_v42  ;;  %v2861_v18 = vmul.f32 %v2859_v47, %v6463_v52 }
 0x2af   : > { %v2847_v5 = vld.sshfl [vmem:[#allocation1] sm:$0xff pattern:$0x73625140]  ;;  %v2848_v7 = vld.sshfl [vmem:[#allocation1 + $0x8] sm:$0xff pattern:$0x73625140] }
 0x2b0   : > { %v2851_v6 = vsel %vm2841_vm3, %v2847_v5, 0.0  ;;  %v2852_v25 = vsel %vm2841_vm3, %v2848_v7, 0.0  ;;  %2863 = vst [vmem:[#allocation1] ss:$4 sm:$0xff] %v2861_v18 }
 0x2b1   : > { %v2853_v59 = vadd.f32 %v2852_v25, %v2851_v6 }
 0x2b3   : > { %2854 = vadd.xlane.f32.xlu0 %v2853_v59 }
 0x2b7   : > { %v2864_v53 = vld.sshfl [vmem:[#allocation1] sm:$0xff pattern:$0x73625140]  ;;  %v2865_v48 = vld.sshfl [vmem:[#allocation1 + $0x8] sm:$0xff pattern:$0x73625140] }
 0x2b8   : > { %v2868_v9 = vsel %vm2841_vm3, %v2864_v53, 0.0  ;;  %v2869_v1 = vsel %vm2841_vm3, %v2865_v48, 0.0 }
 0x2b9   : > { %v2870_v63 = vadd.f32 %v2869_v1, %v2868_v9 }
 0x2bb   : > { %2871 = vadd.xlane.f32.xlu0 %v2870_v63 }
 0x326   : > { %v2855_v19 = vpop.xlane.xlu0 %2854 }
 0x327   : > { %v2880_v54 = vmul.f32 %v2879_v36, %v2855_v19 }
 0x329   : > { %v2899_v29 = vperm.slane %v2880_v54, %v2898_v41  ;;  %v2882_v58 = vmul.f32 %v2880_v54, %v2880_v54 }
 0x32b   : > { %v2901_v39 = vmul.f32 %v2899_v29, %v6463_v52 }
 0x32d   : > { %2903 = vst [vmem:[#allocation1] ss:$4 sm:$0xff] %v2901_v39 }
 0x32e   : > { %v2872_v16 = vpop.xlane.xlu0 %2871 }
 0x32f   : > { %v2881_v22 = vmul.f32 %v2879_v36, %v2872_v16  ;;  %v2981_v36 = vld [vmem:[%s6579_s3] sm:$0x3] }
 0x331   : > { %v2883_v20 = vsub.f32 %v2881_v22, %v2882_v58 }
 0x333   : > { %v2884_v37 = vadd.f32 1e-05, %v2883_v20  ;;  %v6490_v20 = vperm.slane %v2981_v36, 0 }
 0x334   : > { %v2904_v33 = vld.sshfl [vmem:[#allocation1] sm:$0xff pattern:$0x73625140]  ;;  %v2905_v57 = vld.sshfl [vmem:[#allocation1 + $0x8] sm:$0xff pattern:$0x73625140] }
 0x335   : > { %4298 = vrsqrt.f32 %v2884_v37  ;;  %v2908_v15 = vsel %vm2841_vm3, %v2904_v33, 0.0  ;;  %v2915_v50 = vsel %vm2841_vm3, %v2905_v57, 0.0  ;;  %vm2891_vm6 = vweird.f32 %v2884_v37 }
 0x336   : > { %v2909_v11 = vrot.slane %v2908_v15, 4  ;;  %v2916_v46 = vrot.slane %v2915_v50, 4 }
 0x338   : > { %v2910_v56 = vadd.f32 %v2909_v11, %v2908_v15  ;;  %v2917_v47 = vadd.f32 %v2916_v46, %v2915_v50 }
 0x33a   : > { %v2911_v18 = vrot.slane %v2910_v56, 2  ;;  %v2918_v5 = vrot.slane %v2917_v47, 2 }
 0x33b   : > { %v4299_v23 = vpop.eup %4298 }
 0x33c   : > { %v2886_v8 = vmul.f32 %v4299_v23, %v2884_v37  ;;  %vm2892_vm5 = vweird.f32 %v4299_v23  ;;  %v2912_v7 = vadd.f32 %v2911_v18, %v2910_v56  ;;  %v2919_v6 = vadd.f32 %v2918_v5, %v2917_v47 }
 0x33d   : > { %vm2893_vm7 = vmor %vm2891_vm6, %vm2892_vm5  ;;  %v6492_v37 = vperm.slane %v2981_v36, 1 }
 0x33e   : > { %v2887_v43 = vmul.f32 %v4299_v23, %v2886_v8  ;;  %v2913_v63 = vrot.slane %v2912_v7, 1  ;;  %v2920_v61 = vrot.slane %v2919_v6, 1 }
 0x340   : > { %v2888_v60 = vmul.f32 0.5, %v2887_v43  ;;  %v2914_v35 = vadd.f32 %v2913_v63, %v2912_v7  ;;  %v6479_v4 = vadd.f32 %v2920_v61, %v2919_v6 }
 0x342   : > { %v2889_v49 = vsub.f32 1.5, %v2888_v60  ;;  %v2949_v54 = vsub.f32 %v6360_v38, %v2914_v35  ;;  %v2950_v29 = vsub.f32 %v6399_v30, %v6479_v4  ;;  %v2951_v39 = vsub.f32 %v6357_v24, %v2914_v35 }
 0x343   : > { %v2952_v22 = vsub.f32 %v6389_v44, %v6479_v4  ;;  %v2953_v38 = vsub.f32 %v6363_v2, %v2914_v35  ;;  %v2954_v24 = vsub.f32 %v6402_v28, %v6479_v4  ;;  %v2955_v33 = vsub.f32 %v6368_v26, %v2914_v35 }
 0x344   : > { %v2890_v12 = vmul.f32 %v4299_v23, %v2889_v49  ;;  %v2956_v49 = vsub.f32 %v6413_v10, %v6479_v4  ;;  %v2957_v50 = vsub.f32 %v6374_v51, %v2914_v35  ;;  %v2958_v2 = vsub.f32 %v6425_v3, %v6479_v4 }
 0x345   : > { %v2961_v56 = vsub.f32 %v6395_v21, %v2914_v35  ;;  %v2962_v3 = vsub.f32 %v6444_v45, %v6479_v4  ;;  %v2963_v18 = vsub.f32 %v6408_v27, %v2914_v35  ;;  %v2964_v45 = vsub.f32 %v6455_v55, %v6479_v4 }
 0x346   : > { %v2894_v31 = vsel %vm2893_vm7, %v4299_v23, %v2890_v12  ;;  %v3003_v23 = vld [vmem:[%s6580_s4] sm:$0x3] }
 0x347   : > { %v2926_v42 = vperm.slane %v2894_v31, %v2898_v41  ;;  %v6501_v44 = vperm.slane %v3003_v23, 0  ;;  %v6503_v57 = vperm.slane %v3003_v23, 1  ;;  %v2959_v31 = vsub.f32 %v6386_v13, %v2914_v35 }
 0x349   : > { %v2928_v0 = vmul.f32 %v2926_v42, %v6463_v52  ;;  %v2960_v42 = vsub.f32 %v6436_v62, %v6479_v4 }
 0x34b   : > { %2930 = vst [vmem:[#allocation1] ss:$4 sm:$0xff] %v2928_v0 }
 0x352   : > { %v2931_v25 = vld.sshfl [vmem:[#allocation1] sm:$0xff pattern:$0x73625140]  ;;  %v2932_v59 = vld.sshfl [vmem:[#allocation1 + $0x8] sm:$0xff pattern:$0x73625140] }
 0x353   : > { %v2935_v53 = vsel %vm2841_vm3, %v2931_v25, 0.0  ;;  %v2942_v48 = vsel %vm2841_vm3, %v2932_v59, 0.0 }
 0x354   : > { %v2936_v9 = vrot.slane %v2935_v53, 4  ;;  %v2943_v1 = vrot.slane %v2942_v48, 4 }
 0x356   : > { %v2937_v32 = vadd.f32 %v2936_v9, %v2935_v53  ;;  %v2944_v14 = vadd.f32 %v2943_v1, %v2942_v48 }
 0x358   : > { %v2938_v17 = vrot.slane %v2937_v32, 2  ;;  %v2945_v52 = vrot.slane %v2944_v14, 2 }
 0x35a   : > { %v2939_v40 = vadd.f32 %v2938_v17, %v2937_v32  ;;  %v2946_v34 = vadd.f32 %v2945_v52, %v2944_v14 }
 0x35c   : > { %v2940_v41 = vrot.slane %v2939_v40, 1  ;;  %v2947_v19 = vrot.slane %v2946_v34, 1 }
 0x35e   : > { %v2941_v16 = vadd.f32 %v2940_v41, %v2939_v40  ;;  %v2948_v58 = vadd.f32 %v2947_v19, %v2946_v34 }
 0x360   : > { %v2965_v8 = vmul.f32 %v2949_v54, %v2941_v16  ;;  %v2966_v43 = vmul.f32 %v2950_v29, %v2948_v58  ;;  %v2967_v30 = vmul.f32 %v2951_v39, %v2941_v16  ;;  %v2968_v60 = vmul.f32 %v2952_v22, %v2948_v58 }
 0x361   : > { %v2969_v15 = vmul.f32 %v2953_v38, %v2941_v16  ;;  %v2970_v12 = vmul.f32 %v2954_v24, %v2948_v58  ;;  %v2971_v11 = vmul.f32 %v2955_v33, %v2941_v16  ;;  %v2972_v10 = vmul.f32 %v2956_v49, %v2948_v58 }
 0x362   : > { %v2987_v28 = vmul.f32 %v6490_v20, %v2965_v8  ;;  %v2988_v26 = vmul.f32 %v6492_v37, %v2966_v43  ;;  %v2989_v46 = vmul.f32 %v6490_v20, %v2967_v30  ;;  %v2990_v51 = vmul.f32 %v6492_v37, %v2968_v60 }
 0x363   : > { %v2973_v0 = vmul.f32 %v2957_v50, %v2941_v16  ;;  %v2991_v47 = vmul.f32 %v6490_v20, %v2969_v15  ;;  %v2974_v5 = vmul.f32 %v2958_v2, %v2948_v58  ;;  %v2975_v7 = vmul.f32 %v2959_v31, %v2941_v16 }
 0x364   : > { %v2992_v13 = vmul.f32 %v6492_v37, %v2970_v12  ;;  %v2993_v62 = vmul.f32 %v6490_v20, %v2971_v11  ;;  %v3009_v6 = vadd.f32 %v6501_v44, %v2987_v28  ;;  %v3010_v25 = vadd.f32 %v6503_v57, %v2988_v26 }
 0x365   : > { %v3011_v21 = vadd.f32 %v6501_v44, %v2989_v46  ;;  %v2976_v59 = vmul.f32 %v2960_v42, %v2948_v58  ;;  %v2994_v53 = vmul.f32 %v6492_v37, %v2972_v10  ;;  %v3012_v27 = vadd.f32 %v6503_v57, %v2990_v51 }
 0x366   : > { %v2977_v48 = vmul.f32 %v2961_v56, %v2941_v16  ;;  %v2978_v9 = vmul.f32 %v2962_v3, %v2948_v58  ;;  %v2995_v1 = vmul.f32 %v6490_v20, %v2973_v0  ;;  %v3013_v63 = vadd.f32 %v6501_v44, %v2991_v47 }
 0x367   : > { %v2979_v61 = vmul.f32 %v2963_v18, %v2941_v16  ;;  %v2996_v55 = vmul.f32 %v6492_v37, %v2974_v5  ;;  %v2997_v32 = vmul.f32 %v6490_v20, %v2975_v7  ;;  %v3014_v14 = vadd.f32 %v6503_v57, %v2992_v13 }
 0x368   : > { %v3015_v17 = vadd.f32 %v6501_v44, %v2993_v62  ;;  %v3025_v52 = vmax.f32 %v3009_v6, 0.0  ;;  %v3026_v35 = vmax.f32 %v3010_v25, 0.0  ;;  %v3027_v4 = vmax.f32 %v3011_v21, 0.0 }
 0x369   : > { %v2980_v40 = vmul.f32 %v2964_v45, %v2948_v58  ;;  %v2998_v34 = vmul.f32 %v6492_v37, %v2976_v59  ;;  %v3016_v36 = vadd.f32 %v6503_v57, %v2994_v53  ;;  %v3028_v41 = vmax.f32 %v3012_v27, 0.0 }
 0x36a   : > { %v2999_v19 = vmul.f32 %v6490_v20, %v2977_v48  ;;  %v3017_v54 = vadd.f32 %v6501_v44, %v2995_v1  ;;  %v3029_v29 = vmax.f32 %v3013_v63, 0.0  ;;  %3041 = vst [vmem:[%s6537_s27] sm:$0xff] %v3025_v52  ;;  %v3000_v39 = vmul.f32 %v6492_v37, %v2978_v9 }
 0x36b   : > { %v3018_v16 = vadd.f32 %v6503_v57, %v2996_v55  ;;  %v3030_v22 = vmax.f32 %v3014_v14, 0.0  ;;  %3042 = vst [vmem:[%s6537_s27 + $0x8] sm:$0xff] %v3026_v35  ;;  %v3001_v58 = vmul.f32 %v6490_v20, %v2979_v61  ;;  %v3019_v23 = vadd.f32 %v6501_v44, %v2997_v32 }
 0x36c   : > { %v3031_v38 = vmax.f32 %v3015_v17, 0.0  ;;  %3043 = vst [vmem:[%s6537_s27 + $0x10] sm:$0xff] %v3027_v4  ;;  %v3002_v8 = vmul.f32 %v6492_v37, %v2980_v40  ;;  %v3020_v43 = vadd.f32 %v6503_v57, %v2998_v34  ;;  %v3032_v30 = vmax.f32 %v3016_v36, 0.0 }
 0x36d   : > { %3044 = vst [vmem:[%s6537_s27 + $0x18] sm:$0xff] %v3028_v41  ;;  %v3021_v24 = vadd.f32 %v6501_v44, %v2999_v19  ;;  %v3033_v60 = vmax.f32 %v3017_v54, 0.0  ;;  %v3022_v20 = vadd.f32 %v6503_v57, %v3000_v39  ;;  %v3034_v33 = vmax.f32 %v3018_v16, 0.0 }
 0x36e   : > { %3045 = vst [vmem:[%s6537_s27 + $0x20] sm:$0xff] %v3029_v29  ;;  %v3023_v37 = vadd.f32 %v6501_v44, %v3001_v58  ;;  %v3035_v15 = vmax.f32 %v3019_v23, 0.0  ;;  %v3024_v49 = vadd.f32 %v6503_v57, %v3002_v8  ;;  %v3036_v50 = vmax.f32 %v3020_v43, 0.0 }
 0x36f   : > { %3046 = vst [vmem:[%s6537_s27 + $0x28] sm:$0xff] %v3030_v22  ;;  %v3037_v2 = vmax.f32 %v3021_v24, 0.0  ;;  %v3038_v12 = vmax.f32 %v3022_v20, 0.0 }
 0x370   : > { %3047 = vst [vmem:[%s6537_s27 + $0x30] sm:$0xff] %v3031_v38  ;;  %v3039_v11 = vmax.f32 %v3023_v37, 0.0  ;;  %v3040_v28 = vmax.f32 %v3024_v49, 0.0 }
 0x371   : > { %3048 = vst [vmem:[%s6537_s27 + $0x38] sm:$0xff] %v3032_v30 }
 0x372   : > { %3049 = vst [vmem:[%s6537_s27 + $0x40] sm:$0xff] %v3033_v60 }
 0x373   : > { %3050 = vst [vmem:[%s6537_s27 + $0x48] sm:$0xff] %v3034_v33 }
 0x374   : > { %3051 = vst [vmem:[%s6537_s27 + $0x50] sm:$0xff] %v3035_v15 }
 0x375   : > { %3052 = vst [vmem:[%s6537_s27 + $0x58] sm:$0xff] %v3036_v50 }
 0x376   : > { %3053 = vst [vmem:[%s6537_s27 + $0x60] sm:$0xff] %v3037_v2 }
 0x377   : > { %3054 = vst [vmem:[%s6537_s27 + $0x68] sm:$0xff] %v3038_v12 }
 0x378   : > { %3055 = vst [vmem:[%s6537_s27 + $0x70] sm:$0xff] %v3039_v11 }
 0x379   : > { %3056 = vst [vmem:[%s6537_s27 + $0x78] sm:$0xff] %v3040_v28 }
 0x37a PF: > { %s16_s21 = sadd.s32 1, %s4311_s21  }
 0x37b   : > { %p13_p4 = scmp.ge.s32.totalorder %s16_s21, 4  }
 0x37d   :  { %15 = sbr.rel (!%p13_p4) target bundleno = 1 (0x1), region = 76 }

// kernel: decoder_forward_pallas.13
= control target key start
LH: loop header
LB: loop body
LE: loop exit
PB: predicated region body
PF: predicated region fallthrough
CT: control target
= control target key end

     0   :  { %s1729_s12 = smov 0   ;;  %s3010_s0 = inlined_call_operand.vmem [shape: f32[2,66,264], index: 0, kind: input, shape index: {}]   ;;  %s3011_s1 = inlined_call_operand.vmem [shape: f32[3,264,192], index: 1, kind: input, shape index: {}]   ;;  %s3012_s2 = inlined_call_operand.vmem [shape: f32[1,192], index: 2, kind: input, shape index: {}]   ;;  %s3013_s3 = inlined_call_operand.vmem [shape: f32[2,64,192], index: 3, kind: output, shape index: {}]  }
   0x1 LB: > { %s1474_s13 = sadd.s32 4294967295, %s1707_s12   ;;  %p1478_p0 = scmp.ge.s32.totalorder %s1707_s12, 1  ;;  %s1707_s12 = sphi %s1729_s12, %s13_s12  }
   0x2   : > { %p137_p1 = scmp.lt.s32.totalorder %s1707_s12, 3 }
   0x4   : > { %p138_p2 = pnand %p1478_p0, %p137_p1 }
   0x6   : > { %141 = sbr.rel (%p138_p2) target bundleno = 453 (0x1c5), region = 32 }
   0xb   : > { %v1512_v0 = vld [vmem:[%s3011_s1 + $0x300] sm:$0xff]  ;;  %v1510_v2 = vld [vmem:[%s3011_s1 + $0x2f0] sm:$0xff]  ;;  %p161_p3 = scmp.lt.s32.totalorder %s1474_s13, 1  ;;  %v1513_v9 = vld [vmem:[%s3011_s1 + $0x308] sm:$0xff]  ;;  %vm361_vm0 = vcmask 1046528   ;;  %vm429_vm1 = vcmask 64512  }
   0xc   : > { %v1544_v1 = vld [vmem:[%s3011_s1 + $0x400] sm:$0xff]  ;;  %446 = vmatpush.msra.mxu0 %v1512_v0  ;;  %v1542_v3 = vld [vmem:[%s3011_s1 + $0x3f0] sm:$0xff]  ;;  %v1545_v10 = vld [vmem:[%s3011_s1 + $0x408] sm:$0xff]  ;;  %vm1034_vm2 = vcmask 1045504   ;;  %vm1403_vm3 = vcmask 523264  }
   0xd   : > { %487 = vmatpush.msra.mxu1 %v1544_v1  ;;  %v1508_v4 = vld [vmem:[%s3011_s1 + $0x2e0] sm:$0xff]  ;;  %s3036_s13 = smov (!%p161_p3, %s1474_s13), 1  ;;  %v1506_v6 = vld [vmem:[%s3011_s1 + $0x2d0] sm:$0xff]  ;;  %v1511_v13 = vld [vmem:[%s3011_s1 + $0x2f8] sm:$0xff] }
   0xe   : > { %v1540_v5 = vld [vmem:[%s3011_s1 + $0x3e0] sm:$0xff]  ;;  %447 = vmatpush.msra.mxu0 %v1510_v2  ;;  %v1546_v7 = vld [vmem:[%s3011_s1 + $0x410] sm:$0xff]  ;;  %s1684_s5 = smul.u32 216, %s3036_s13  ;;  %v1543_v16 = vld [vmem:[%s3011_s1 + $0x3f8] sm:$0xff]  ;;  %s1664_s30 = sshll.u32 %s3036_s13, 7 }
   0xf   : > { %488 = vmatpush.msra.mxu1 %v1542_v3  ;;  %v1538_v8 = vld [vmem:[%s3011_s1 + $0x3d0] sm:$0xff]  ;;  %543 = vmatpush.msra.mxu2 %v1546_v7  ;;  %v1504_v11 = vld [vmem:[%s3011_s1 + $0x2c0] sm:$0xff]  ;;  %v1509_v24 = vld [vmem:[%s3011_s1 + $0x2e8] sm:$0xff]  ;;  %s2938_s6 = scalar_lea.vmem %s3013_s3, %s1664_s30 }
  0x10   : > { %1665 = vmatpush.msra.mxu3 %v1546_v7  ;;  %448 = vmatpush.msra.mxu0 %v1508_v4  ;;  %v1536_v12 = vld [vmem:[%s3011_s1 + $0x3c0] sm:$0xff]  ;;  %v1502_v14 = vld [vmem:[%s3011_s1 + $0x2b0] sm:$0xff]  ;;  %s1791_s24 = scalar_lea.vmem %s3010_s0, %s1684_s5  ;;  %v1541_v25 = vld [vmem:[%s3011_s1 + $0x3e8] sm:$0xff] }
  0x11   : > { %489 = vmatpush.msra.mxu1 %v1540_v5  ;;  %v1534_v15 = vld [vmem:[%s3011_s1 + $0x3b0] sm:$0xff]  ;;  %610 = vmatpush.msrb.mxu2 %v1545_v10  ;;  %v1797_v17 = vld [vmem:[%s1791_s24 + $0x28] sm:$0xff]  ;;  %v1500_v28 = vld [vmem:[%s3011_s1 + $0x2a0] sm:$0xff] }
  0x12   : > { %569 = vmatpush.msrb.mxu3 %v1513_v9  ;;  %449 = vmatpush.msra.mxu0 %v1506_v6  ;;  %v263_v18 = vld [vmem:[%s1791_s24 + $0x10] sm:$0xfe]  ;;  %v369_v21 = vrot.slane %v1797_v17, 1  ;;  %v1805_v22 = vld [vmem:[%s1791_s24 + $0x88] sm:$0xff]  ;;  %v1532_v29 = vld [vmem:[%s3011_s1 + $0x3a0] sm:$0xff] }
  0x13   : > { %490 = vmatpush.msra.mxu1 %v1538_v8  ;;  %v1801_v19 = vld [vmem:[%s1791_s24 + $0x70] sm:$0xff]  ;;  %v368_v20 = vrot.slane %v263_v18, 1  ;;  %611 = vmatpush.msrb.mxu2 %v1543_v16  ;;  %v393_v26 = vrot.slane %v1805_v22, 1  ;;  %v1507_v30 = vld [vmem:[%s3011_s1 + $0x2d8] sm:$0xff]  ;;  %v1836_v33 = vld [vmem:[%s1791_s24 + $0x40] sm:$0xff] }
  0x14   : > { %v387_v23 = vrot.slane %v1801_v19, 1  ;;  %570 = vmatpush.msrb.mxu3 %v1511_v13  ;;  %450 = vmatpush.msra.mxu0 %v1504_v11  ;;  %v1539_v32 = vld [vmem:[%s3011_s1 + $0x3d8] sm:$0xff]  ;;  %v1839_v34 = vld [vmem:[%s1791_s24 + $0xa0] sm:$0xff]  ;;  %v1498_v35 = vld [vmem:[%s3011_s1 + $0x290] sm:$0xff]  ;;  %v375_v37 = vrot.slane %v1836_v33, 1 }
  0x15   : > { %491 = vmatpush.msra.mxu1 %v1536_v12  ;;  %v1816_v27 = vsel %vm361_vm0, %v368_v20, %v369_v21  ;;  %612 = vmatpush.msrb.mxu2 %v1541_v25  ;;  %v1530_v36 = vld [vmem:[%s3011_s1 + $0x390] sm:$0xff]  ;;  %v399_v38 = vrot.slane %v1839_v34, 1  ;;  %v1505_v39 = vld [vmem:[%s3011_s1 + $0x2c8] sm:$0xff]  ;;  %v1496_v41 = vld [vmem:[%s3011_s1 + $0x280] sm:$0xff] }
  0x16   : > { %571 = vmatpush.msrb.mxu3 %v1509_v24  ;;  %451 = vmatpush.msra.mxu0 %v1502_v14  ;;  %v1830_v31 = vsel %vm361_vm0, %v387_v23, %v393_v26  ;;  %v1537_v40 = vld [vmem:[%s3011_s1 + $0x3c8] sm:$0xff]  ;;  %v1528_v42 = vld [vmem:[%s3011_s1 + $0x380] sm:$0xff]  ;;  %v1503_v43 = vld [vmem:[%s3011_s1 + $0x2b8] sm:$0xff]  ;;  %v1878_v47 = vsel %vm361_vm0, %v369_v21, %v375_v37 }
  0x17   : > { %492 = vmatpush.msra.mxu1 %v1534_v15  ;;  %1548 = vmatmul.msk.f32.vlgmr.msra.gmra.mxu2 %vm429_vm1, %v1816_v27  ;;  %v1535_v44 = vld [vmem:[%s3011_s1 + $0x3b8] sm:$0xff]  ;;  %v1494_v45 = vld [vmem:[%s3011_s1 + $0x270] sm:$0xff]  ;;  %v1881_v48 = vsel %vm361_vm0, %v393_v26, %v399_v38  ;;  %v1492_v49 = vld [vmem:[%s3011_s1 + $0x260] sm:$0xff] }
  0x18   : > { %1552 = vmatmul.msk.f32.vlgmr.msra.gmra.mxu3 %vm429_vm1, %v1830_v31  ;;  %452 = vmatpush.msra.mxu0 %v1500_v28  ;;  %v1526_v46 = vld [vmem:[%s3011_s1 + $0x370] sm:$0xff]  ;;  %v1524_v50 = vld [vmem:[%s3011_s1 + $0x360] sm:$0xff]  ;;  %v1890_v51 = vld [vmem:[%s1791_s24 + $0x58] sm:$0xff] }
  0x19   : > { %493 = vmatpush.msra.mxu1 %v1532_v29  ;;  %572 = vmatpush.msrb.mxu3 %v1507_v30  ;;  %v1893_v52 = vld [vmem:[%s1791_s24 + $0xb8] sm:$0xff]  ;;  %v1501_v53 = vld [vmem:[%s3011_s1 + $0x2a8] sm:$0xff]  ;;  %v1490_v55 = vld [vmem:[%s3011_s1 + $0x250] sm:$0xff]  ;;  %v381_v61 = vrot.slane %v1890_v51, 1 }
  0x1a   : > { %613 = vmatpush.msrb.mxu2 %v1539_v32  ;;  %453 = vmatpush.msra.mxu0 %v1498_v35  ;;  %v1533_v54 = vld [vmem:[%s3011_s1 + $0x3a8] sm:$0xff]  ;;  %v1522_v56 = vld [vmem:[%s3011_s1 + $0x350] sm:$0xff]  ;;  %v1488_v57 = vld [vmem:[%s3011_s1 + $0x240] sm:$0xff]  ;;  %v405_v62 = vrot.slane %v1893_v52, 1 }
  0x1b   : > { %494 = vmatpush.msra.mxu1 %v1530_v36  ;;  %573 = vmatpush.msrb.mxu3 %v1505_v39  ;;  %v1520_v58 = vld [vmem:[%s3011_s1 + $0x340] sm:$0xff]  ;;  %v1499_v59 = vld [vmem:[%s3011_s1 + $0x298] sm:$0xff]  ;;  %v1497_v63 = vld [vmem:[%s3011_s1 + $0x288] sm:$0xff]  ;;  %v1946_v7 = vsel %vm361_vm0, %v375_v37, %v381_v61 }
  0x1c   : > { %614 = vmatpush.msrb.mxu2 %v1537_v40  ;;  %454 = vmatpush.msra.mxu0 %v1496_v41  ;;  %v1531_v60 = vld [vmem:[%s3011_s1 + $0x398] sm:$0xff]  ;;  %v261_v1 = vld [vmem:[%s1791_s24] sm:$0xfe]  ;;  %v1529_v2 = vld [vmem:[%s3011_s1 + $0x388] sm:$0xff]  ;;  %v1949_v8 = vsel %vm361_vm0, %v399_v38, %v405_v62  ;;  %v2002_v38 = vsel %vm361_vm0, %v381_v61, %v387_v23 }
  0x1d   : > { %495 = vmatpush.msra.mxu1 %v1528_v42  ;;  %574 = vmatpush.msrb.mxu3 %v1503_v43  ;;  %v1929_v0 = vld [vmem:[%s1791_s24 + $0x18] sm:$0xff]  ;;  %v1936_v3 = vld [vmem:[%s1791_s24 + $0x20] sm:$0xff]  ;;  %v262_v4 = vld [vmem:[%s1791_s24 + $0x8] sm:$0xfe]  ;;  %v362_v9 = vrot.slane %v261_v1, 1 }
  0x1e   : > { %615 = vmatpush.msrb.mxu2 %v1535_v44  ;;  %455 = vmatpush.msra.mxu0 %v1494_v45  ;;  %v1486_v5 = vld [vmem:[%s3011_s1 + $0x230] sm:$0xff]  ;;  %v363_v10 = vrot.slane %v1929_v0, 1  ;;  %v1484_v11 = vld [vmem:[%s3011_s1 + $0x220] sm:$0xff]  ;;  %v365_v13 = vrot.slane %v262_v4, 1  ;;  %v366_v14 = vrot.slane %v1936_v3, 1  ;;  %v1495_v16 = vld [vmem:[%s3011_s1 + $0x278] sm:$0xff] }
  0x1f   : > { %496 = vmatpush.msra.mxu1 %v1526_v46  ;;  %1549 = vmatmul.msk.f32.gmra.mxu2 %vm429_vm1, %v1878_v47  ;;  %v1518_v6 = vld [vmem:[%s3011_s1 + $0x330] sm:$0xff]  ;;  %v1516_v12 = vld [vmem:[%s3011_s1 + $0x320] sm:$0xff]  ;;  %v1527_v18 = vld [vmem:[%s3011_s1 + $0x378] sm:$0xff] }
  0x20   : > { %1553 = vmatmul.msk.f32.gmra.mxu3 %vm429_vm1, %v1881_v48  ;;  %456 = vmatpush.msra.mxu0 %v1492_v49  ;;  %v266_v15 = vld [vmem:[%s1791_s24 + $0xd0] sm:$0x1]  ;;  %v1493_v24 = vld [vmem:[%s3011_s1 + $0x268] sm:$0xff]  ;;  %v364_v25 = vsel %vm361_vm0, %v362_v9, %v363_v10  ;;  %v367_v28 = vsel %vm361_vm0, %v365_v13, %v366_v14  ;;  %v1491_v32 = vld [vmem:[%s3011_s1 + $0x258] sm:$0xff] }
  0x21   : > { %497 = vmatpush.msra.mxu1 %v1524_v50  ;;  %575 = vmatpush.msrb.mxu3 %v1501_v53  ;;  %v1482_v20 = vld [vmem:[%s3011_s1 + $0x210] sm:$0xff]  ;;  %v411_v26 = vrot.slane %v266_v15, 1  ;;  %v1525_v29 = vld [vmem:[%s3011_s1 + $0x368] sm:$0xff]  ;;  %v1547_v35 = vld [vmem:[%s3011_s1 + $0x418] sm:$0xff] }
  0x22   : > { %616 = vmatpush.msrb.mxu2 %v1533_v54  ;;  %457 = vmatpush.msra.mxu0 %v1490_v55  ;;  %v1514_v21 = vld [vmem:[%s3011_s1 + $0x310] sm:$0xff]  ;;  %v1994_v36 = vld [vmem:[%s1791_s24 + $0x38] sm:$0xff]  ;;  %v1489_v41 = vld [vmem:[%s3011_s1 + $0x248] sm:$0xff] }
  0x23   : > { %498 = vmatpush.msra.mxu1 %v1522_v56  ;;  %576 = vmatpush.msrb.mxu3 %v1499_v59  ;;  %v1985_v30 = vld [vmem:[%s1791_s24 + $0x30] sm:$0xff]  ;;  %v1523_v37 = vld [vmem:[%s3011_s1 + $0x358] sm:$0xff]  ;;  %v2005_v39 = vsel %vm361_vm0, %v405_v62, %v411_v26  ;;  %v1521_v42 = vld [vmem:[%s3011_s1 + $0x348] sm:$0xff]  ;;  %v373_v43 = vrot.slane %v1994_v36, 1 }
  0x24   : > { %617 = vmatpush.msrb.mxu2 %v1531_v60  ;;  %458 = vmatpush.msra.mxu0 %v1488_v57  ;;  %v371_v40 = vrot.slane %v1985_v30, 1  ;;  %v1487_v23 = vld [vmem:[%s3011_s1 + $0x238] sm:$0xff]  ;;  %v1485_v46 = vld [vmem:[%s3011_s1 + $0x228] sm:$0xff]  ;;  %v2037_v54 = vld [vmem:[%s1791_s24 + $0x50] sm:$0xff] }
  0x25   : > { %499 = vmatpush.msra.mxu1 %v1520_v58  ;;  %577 = vmatpush.msrb.mxu3 %v1497_v63  ;;  %v1519_v44 = vld [vmem:[%s3011_s1 + $0x338] sm:$0xff]  ;;  %v374_v49 = vsel %vm361_vm0, %v366_v14, %v373_v43  ;;  %v2031_v50 = vld [vmem:[%s1791_s24 + $0x48] sm:$0xff]  ;;  %v257_v58 = vld [vmem:[%s3011_s1 + $0x1f0] sm:$0xff]  ;;  %v379_v59 = vrot.slane %v2037_v54, 1 }
  0x26   : > { %618 = vmatpush.msrb.mxu2 %v1529_v2  ;;  %459 = vmatpush.msra.mxu0 %v1486_v5  ;;  %v372_v45 = vsel %vm361_vm0, %v363_v10, %v371_v40  ;;  %v1517_v53 = vld [vmem:[%s3011_s1 + $0x328] sm:$0xff]  ;;  %v1483_v55 = vld [vmem:[%s3011_s1 + $0x218] sm:$0xff]  ;;  %v377_v57 = vrot.slane %v2031_v50, 1  ;;  %v259_v60 = vld [vmem:[%s3011_s1 + $0x200] sm:$0xff] }
  0x27   : > { %500 = vmatpush.msra.mxu1 %v1518_v6  ;;  %1550 = vmatmul.msk.f32.gmra.mxu2 %vm429_vm1, %v1946_v7  ;;  %v1515_v56 = vld [vmem:[%s3011_s1 + $0x318] sm:$0xff]  ;;  %v255_v61 = vld [vmem:[%s3011_s1 + $0x1e0] sm:$0xff]  ;;  %v380_v63 = vsel %vm361_vm0, %v373_v43, %v379_v59  ;;  %v253_v1 = vld [vmem:[%s3011_s1 + $0x1d0] sm:$0xff] }
  0x28   : > { %1554 = vmatmul.msk.f32.gmra.mxu3 %vm429_vm1, %v1949_v8  ;;  %460 = vmatpush.msra.mxu0 %v1484_v11  ;;  %v378_v62 = vsel %vm361_vm0, %v371_v40, %v377_v57  ;;  %v2062_v2 = vld [vmem:[%s1791_s24 + $0x60] sm:$0xff]  ;;  %v2065_v4 = vld [vmem:[%s1791_s24 + $0x68] sm:$0xff]  ;;  %v249_v10 = vld [vmem:[%s3011_s1 + $0x1b0] sm:$0xff] }
  0x29   : > { %501 = vmatpush.msra.mxu1 %v1516_v12  ;;  %578 = vmatpush.msrb.mxu3 %v1495_v16  ;;  %v251_v5 = vld [vmem:[%s3011_s1 + $0x1c0] sm:$0xff]  ;;  %v383_v6 = vrot.slane %v2062_v2, 1  ;;  %v385_v9 = vrot.slane %v2065_v4, 1  ;;  %v2081_v14 = vld [vmem:[%s1791_s24 + $0x78] sm:$0xff]  ;;  %v245_v15 = vld [vmem:[%s3011_s1 + $0x190] sm:$0xff] }
  0x2a   : > { %619 = vmatpush.msrb.mxu2 %v1527_v18  ;;  %461 = vmatpush.msra.mxu0 %v1482_v20  ;;  %v247_v11 = vld [vmem:[%s3011_s1 + $0x1a0] sm:$0xff]  ;;  %v389_v20 = vrot.slane %v2081_v14, 1 }
  0x2b   : > { %502 = vmatpush.msra.mxu1 %v1514_v21  ;;  %579 = vmatpush.msrb.mxu3 %v1493_v24  ;;  %v384_v12 = vsel %vm361_vm0, %v377_v57, %v383_v6  ;;  %v386_v13 = vsel %vm361_vm0, %v379_v59, %v385_v9  ;;  %v2087_v16 = vld [vmem:[%s1791_s24 + $0x80] sm:$0xff]  ;;  %v241_v24 = vld [vmem:[%s3011_s1 + $0x170] sm:$0xff]  ;;  %v222_v59 = vld [vmem:[%s3011_s1 + $0xd8] sm:$0xff] }
  0x2c   : > { %462 = vmatmul.f32.vlgmr.msra.gmra.mxu0 %v364_v25  ;;  %503 = vmatmul.f32.vlgmr.msra.gmra.mxu1 %v367_v28  ;;  %v243_v18 = vld [vmem:[%s3011_s1 + $0x180] sm:$0xff]  ;;  %v391_v21 = vrot.slane %v2087_v16, 1  ;;  %v390_v26 = vsel %vm361_vm0, %v383_v6, %v389_v20  ;;  %v229_v57 = vld [vmem:[%s3011_s1 + $0x110] sm:$0xff]  ;;  %v218_v6 = vld [vmem:[%s3011_s1 + $0xb8] sm:$0xff] }
  0x2d   : > { %620 = vmatpush.msrb.mxu2 %v1525_v29  ;;  %580 = vmatpush.msrb.mxu3 %v1491_v32  ;;  %v2103_v29 = vld [vmem:[%s1791_s24 + $0x90] sm:$0xff] }
  0x2e   : > { %666 = vmatpush.msrb.mxu0 %v1547_v35  ;;  %1666 = vmatpush.msrb.mxu1 %v1547_v35  ;;  %v237_v32 = vld [vmem:[%s3011_s1 + $0x150] sm:$0xff]  ;;  %v2109_v35 = vld [vmem:[%s1791_s24 + $0x98] sm:$0xff]  ;;  %v395_v40 = vrot.slane %v2103_v29, 1 }
  0x2f   : > { %621 = vmatpush.msrb.mxu2 %v1523_v37  ;;  %581 = vmatpush.msrb.mxu3 %v1489_v41  ;;  %v235_v37 = vld [vmem:[%s3011_s1 + $0x140] sm:$0xff]  ;;  %v225_v41 = vld [vmem:[%s3011_s1 + $0xf0] sm:$0xff]  ;;  %v397_v43 = vrot.slane %v2109_v35, 1 }
  0x30   : > { %1551 = vmatmul.msk.f32.gmra.mxu2 %vm429_vm1, %v2002_v38  ;;  %1555 = vmatmul.msk.f32.gmra.mxu3 %vm429_vm1, %v2005_v39 }
  0x31   : > { %622 = vmatpush.msrb.mxu2 %v1521_v42  ;;  %582 = vmatpush.msrb.mxu3 %v1487_v23  ;;  %v226_v42 = vld [vmem:[%s3011_s1 + $0xf8] sm:$0xff]  ;;  %v233_v23 = vld [vmem:[%s3011_s1 + $0x130] sm:$0xff] }
  0x32   : > { %709 = vmatpush.msra.mxu1 %v225_v41  ;;  %832 = vmatpush.msra.mxu0 %v226_v42  ;;  %v209_v41 = vld [vmem:[%s3011_s1 + $0x70] sm:$0xff]  ;;  %v210_v42 = vld [vmem:[%s3011_s1 + $0x78] sm:$0xff] }
  0x33   : > { %623 = vmatpush.msrb.mxu2 %v1519_v44  ;;  %583 = vmatpush.msrb.mxu3 %v1485_v46  ;;  %v231_v44 = vld [vmem:[%s3011_s1 + $0x120] sm:$0xff]  ;;  %v224_v46 = vld [vmem:[%s3011_s1 + $0xe8] sm:$0xff] }
  0x34   : > { %465 = vmatmul.f32.gmra.mxu0 %v372_v45  ;;  %506 = vmatmul.f32.gmra.mxu1 %v374_v49 }
  0x35   : > { %624 = vmatpush.msrb.mxu2 %v1517_v53  ;;  %584 = vmatpush.msrb.mxu3 %v1483_v55  ;;  %v221_v53 = vld [vmem:[%s3011_s1 + $0xd0] sm:$0xff]  ;;  %v398_v55 = vsel %vm361_vm0, %v391_v21, %v397_v43 }
  0x36   : > { %833 = vmatpush.msra.mxu0 %v224_v46 }
  0x37   : > { %625 = vmatpush.msrb.mxu2 %v1515_v56  ;;  %750 = vmatpush.msra.mxu3 %v257_v58  ;;  %v2140_v56 = vld [vmem:[%s1791_s24 + $0xa8] sm:$0xff]  ;;  %v2146_v58 = vld [vmem:[%s1791_s24 + $0xb0] sm:$0xff] }
  0x38   : > { %585 = vmatmul.f32.vlgmr.msrb.gmra.mxu3 %v364_v25  ;;  %626 = vmatmul.f32.vlgmr.msrb.gmra.mxu2 %v367_v28  ;;  %v239_v25 = vld [vmem:[%s3011_s1 + $0x160] sm:$0xff]  ;;  %v392_v28 = vsel %vm361_vm0, %v385_v9, %v391_v21  ;;  %v265_v21 = vld [vmem:[%s1791_s24 + $0xc8] sm:$0x1] }
  0x39   : > { %806 = vmatpush.msra.mxu2 %v259_v60  ;;  %751 = vmatpush.msra.mxu3 %v255_v61  ;;  %v219_v60 = vld [vmem:[%s3011_s1 + $0xc0] sm:$0xff] }
  0x3a   : > { %v227_v61 = vld [vmem:[%s3011_s1 + $0x100] sm:$0xff]  ;;  %834 = vmatpush.msra.mxu0 %v222_v59 }
  0x3b   : > { %752 = vmatpush.msra.mxu3 %v253_v1  ;;  %v403_v1 = vrot.slane %v2146_v58, 1  ;;  %v215_v9 = vld [vmem:[%s3011_s1 + $0xa0] sm:$0xff] }
  0x3c   : > { %468 = vmatmul.f32.gmra.mxu0 %v378_v62  ;;  %509 = vmatmul.f32.gmra.mxu1 %v380_v63  ;;  %v203_v59 = vld [vmem:[%s3011_s1 + $0x40] sm:$0xff] }
  0x3d   : > { %753 = vmatpush.msra.mxu3 %v251_v5  ;;  %v217_v5 = vld [vmem:[%s3011_s1 + $0xb0] sm:$0xff] }
  0x3f   : > { %754 = vmatpush.msra.mxu3 %v249_v10  ;;  %v2174_v10 = vld [vmem:[%s3011_s1 + $0x1f8] sm:$0xff] }
  0x40   : > { %588 = vmatmul.f32.gmra.mxu3 %v372_v45  ;;  %629 = vmatmul.f32.gmra.mxu2 %v374_v49  ;;  %v223_v45 = vld [vmem:[%s3011_s1 + $0xe0] sm:$0xff]  ;;  %v396_v49 = vsel %vm361_vm0, %v389_v20, %v395_v40  ;;  %v2189_v20 = vld [vmem:[%s3011_s1 + $0x1e8] sm:$0xff] }
  0x41   : > { %755 = vmatpush.msra.mxu3 %v247_v11  ;;  %710 = vmatpush.msra.mxu1 %v223_v45  ;;  %v1606_v45 = vld [vmem:[%s3011_s1 + $0x4f0] sm:$0xff] }
  0x43   : > { %756 = vmatpush.msra.mxu3 %v245_v15  ;;  %711 = vmatpush.msra.mxu1 %v221_v53  ;;  %v264_v15 = vld [vmem:[%s1791_s24 + $0xc0] sm:$0x1]  ;;  %v205_v53 = vld [vmem:[%s3011_s1 + $0x50] sm:$0xff] }
  0x44   : > { %471 = vmatmul.f32.gmra.mxu0 %v384_v12  ;;  %512 = vmatmul.f32.gmra.mxu1 %v386_v13 }
  0x45   : > { %757 = vmatpush.msra.mxu3 %v243_v18  ;;  %712 = vmatpush.msra.mxu1 %v219_v60  ;;  %v216_v18 = vld [vmem:[%s3011_s1 + $0xa8] sm:$0xff]  ;;  %v1604_v60 = vld [vmem:[%s3011_s1 + $0x4e0] sm:$0xff] }
  0x47   : > { %758 = vmatpush.msra.mxu3 %v241_v24  ;;  %713 = vmatpush.msra.mxu1 %v217_v5  ;;  %v213_v24 = vld [vmem:[%s3011_s1 + $0x90] sm:$0xff]  ;;  %v199_v5 = vld [vmem:[%s3011_s1 + $0x20] sm:$0xff] }
  0x48   : > { %591 = vmatmul.f32.gmra.mxu3 %v378_v62  ;;  %632 = vmatmul.f32.gmra.mxu2 %v380_v63  ;;  %v401_v62 = vrot.slane %v2140_v56, 1  ;;  %v220_v63 = vld [vmem:[%s3011_s1 + $0xc8] sm:$0xff] }
  0x49   : > { %759 = vmatpush.msra.mxu3 %v239_v25  ;;  %835 = vmatpush.msra.mxu0 %v220_v63  ;;  %v214_v25 = vld [vmem:[%s3011_s1 + $0x98] sm:$0xff] }
  0x4a   : > { %v402_v11 = vsel %vm361_vm0, %v395_v40, %v401_v62  ;;  %714 = vmatpush.msra.mxu1 %v215_v9  ;;  %v212_v40 = vld [vmem:[%s3011_s1 + $0x88] sm:$0xff]  ;;  %v202_v63 = vld [vmem:[%s3011_s1 + $0x38] sm:$0xff] }
  0x4b   : > { %760 = vmatpush.msra.mxu3 %v237_v32  ;;  %836 = vmatpush.msra.mxu0 %v218_v6  ;;  %v1608_v32 = vld [vmem:[%s3011_s1 + $0x500] sm:$0xff]  ;;  %v1602_v6 = vld [vmem:[%s3011_s1 + $0x4d0] sm:$0xff]  ;;  %v200_v9 = vld [vmem:[%s3011_s1 + $0x28] sm:$0xff] }
  0x4c   : > { %474 = vmatmul.f32.gmra.mxu0 %v390_v26  ;;  %515 = vmatmul.f32.gmra.mxu1 %v392_v28 }
  0x4d   : > { %761 = vmatpush.msra.mxu3 %v235_v37  ;;  %837 = vmatpush.msra.mxu0 %v216_v18  ;;  %v409_v37 = vrot.slane %v265_v21, 1  ;;  %v1600_v18 = vld [vmem:[%s3011_s1 + $0x4c0] sm:$0xff]  ;;  %v1642_v21 = vld [vmem:[%s3011_s1 + $0x610] sm:$0xff] }
  0x4e   : > { %715 = vmatpush.msra.mxu1 %v213_v24  ;;  %v1598_v24 = vld [vmem:[%s3011_s1 + $0x4b0] sm:$0xff] }
  0x4f   : > { %762 = vmatpush.msra.mxu3 %v233_v23  ;;  %838 = vmatpush.msra.mxu0 %v214_v25  ;;  %v410_v46 = vsel %vm361_vm0, %v403_v1, %v409_v37  ;;  %v244_v25 = vld [vmem:[%s3011_s1 + $0x188] sm:$0xff] }
  0x50   : > { %594 = vmatmul.f32.gmra.mxu3 %v384_v12  ;;  %635 = vmatmul.f32.gmra.mxu2 %v386_v13  ;;  %v1610_v12 = vld [vmem:[%s3011_s1 + $0x510] sm:$0xff]  ;;  %v404_v13 = vsel %vm361_vm0, %v397_v43, %v403_v1  ;;  %v2217_v43 = vld [vmem:[%s3011_s1 + $0x1d8] sm:$0xff]  ;;  %v240_v37 = vld [vmem:[%s3011_s1 + $0x168] sm:$0xff] }
  0x51   : > { %763 = vmatpush.msra.mxu3 %v231_v44  ;;  %1118 = vmatpush.msrb.mxu2 %v1610_v12  ;;  %v207_v44 = vld [vmem:[%s3011_s1 + $0x60] sm:$0xff]  ;;  %v2261_v1 = vld [vmem:[%s3011_s1 + $0x1b8] sm:$0xff]  ;;  %v248_v12 = vld [vmem:[%s3011_s1 + $0x1a8] sm:$0xff] }
  0x52   : > { %839 = vmatpush.msra.mxu0 %v212_v40  ;;  %v1636_v40 = vld [vmem:[%s3011_s1 + $0x5e0] sm:$0xff] }
  0x53   : > { %764 = vmatpush.msra.mxu3 %v229_v57  ;;  %1119 = vmatpush.msrb.mxu2 %v1608_v32  ;;  %v206_v57 = vld [vmem:[%s3011_s1 + $0x58] sm:$0xff]  ;;  %v2323_v32 = vld [vmem:[%s1791_s24 + $0x10] sm:$0xff] }
  0x54   : > { %477 = vmatmul.f32.gmra.mxu0 %v396_v49  ;;  %518 = vmatmul.f32.gmra.mxu1 %v398_v55 }
  0x55   : > { %765 = vmatpush.msra.mxu3 %v227_v61  ;;  %840 = vmatpush.msra.mxu0 %v210_v42  ;;  %v204_v61 = vld [vmem:[%s3011_s1 + $0x48] sm:$0xff]  ;;  %v238_v42 = vld [vmem:[%s3011_s1 + $0x158] sm:$0xff] }
  0x56   : > { %1120 = vmatpush.msrb.mxu2 %v1606_v45  ;;  %v1586_v45 = vld [vmem:[%s3011_s1 + $0x450] sm:$0xff] }
  0x57   : > { %1667 = vmatpush.msrb.mxu3 %v2174_v10 }
  0x58   : > { %597 = vmatmul.f32.gmra.mxu3 %v390_v26  ;;  %638 = vmatmul.f32.gmra.mxu2 %v392_v28  ;;  %v407_v26 = vrot.slane %v264_v15, 1  ;;  %v211_v28 = vld [vmem:[%s3011_s1 + $0x80] sm:$0xff] }
  0x59   : > { %1668 = vmatpush.msrb.mxu3 %v2189_v20  ;;  %716 = vmatpush.msra.mxu1 %v211_v28  ;;  %v195_v15 = vld [vmem:[%s3011_s1] sm:$0xff] }
  0x5a   : > { %v408_v23 = vsel %vm361_vm0, %v401_v62, %v407_v26  ;;  %v201_v62 = vld [vmem:[%s3011_s1 + $0x30] sm:$0xff]  ;;  %1121 = vmatpush.msrb.mxu2 %v1604_v60  ;;  %v1640_v26 = vld [vmem:[%s3011_s1 + $0x600] sm:$0xff] }
  0x5b   : > { %717 = vmatpush.msra.mxu1 %v209_v41  ;;  %1669 = vmatpush.msrb.mxu3 %v2217_v43  ;;  %v1596_v28 = vld [vmem:[%s3011_s1 + $0x4a0] sm:$0xff] }
  0x5c   : > { %480 = vmatmul.f32.gmra.mxu0 %v402_v11  ;;  %521 = vmatmul.f32.gmra.mxu1 %v404_v13  ;;  %v1592_v41 = vld [vmem:[%s3011_s1 + $0x480] sm:$0xff] }
  0x5d   : > { %718 = vmatpush.msra.mxu1 %v207_v44  ;;  %1122 = vmatpush.msrb.mxu2 %v1602_v6  ;;  %v234_v44 = vld [vmem:[%s3011_s1 + $0x138] sm:$0xff]  ;;  %v1624_v60 = vld [vmem:[%s3011_s1 + $0x580] sm:$0xff]  ;;  %v1641_v6 = vld [vmem:[%s3011_s1 + $0x608] sm:$0xff] }
  0x5f   : > { %719 = vmatpush.msra.mxu1 %v205_v53  ;;  %1123 = vmatpush.msrb.mxu2 %v1600_v18  ;;  %v230_v53 = vld [vmem:[%s3011_s1 + $0x118] sm:$0xff]  ;;  %v1614_v18 = vld [vmem:[%s3011_s1 + $0x530] sm:$0xff] }
  0x60   : > { %600 = vmatmul.f32.gmra.mxu3 %v396_v49  ;;  %641 = vmatmul.f32.gmra.mxu2 %v398_v55  ;;  %v208_v49 = vld [vmem:[%s3011_s1 + $0x68] sm:$0xff] }
  0x61   : > { %v2237_v55 = vld [vmem:[%s3011_s1 + $0x1c8] sm:$0xff]  ;;  %841 = vmatpush.msra.mxu0 %v208_v49  ;;  %720 = vmatpush.msra.mxu1 %v203_v59  ;;  %v1628_v49 = vld [vmem:[%s3011_s1 + $0x5a0] sm:$0xff] }
  0x62   : > { %1670 = vmatpush.msrb.mxu3 %v2237_v55  ;;  %1124 = vmatpush.msrb.mxu2 %v1598_v24  ;;  %v228_v59 = vld [vmem:[%s3011_s1 + $0x108] sm:$0xff] }
  0x63   : > { %842 = vmatpush.msra.mxu0 %v206_v57  ;;  %721 = vmatpush.msra.mxu1 %v201_v62  ;;  %v1582_v57 = vld [vmem:[%s3011_s1 + $0x430] sm:$0xff] }
  0x64   : > { %483 = vmatmul.f32.gmra.mxu0 %v408_v23  ;;  %524 = vmatmul.f32.gmra.mxu1 %v410_v46  ;;  %v1622_v62 = vld [vmem:[%s3011_s1 + $0x570] sm:$0xff] }
  0x65   : > { %843 = vmatpush.msra.mxu0 %v204_v61  ;;  %1671 = vmatpush.msrb.mxu3 %v2261_v1  ;;  %v260_v61 = vld [vmem:[%s3011_s1 + $0x208] sm:$0xff] }
  0x66   : > { %722 = vmatpush.msra.mxu1 %v199_v5  ;;  %1125 = vmatpush.msrb.mxu2 %v1596_v28  ;;  %v1643_v5 = vld [vmem:[%s3011_s1 + $0x618] sm:$0xff]  ;;  %v955_v28 = vld [vmem:[%s1791_s24] sm:$0xfc] }
  0x67   : > { %844 = vmatpush.msra.mxu0 %v202_v63  ;;  %1672 = vmatpush.msrb.mxu3 %v248_v12 }
  0x68   : > { %603 = vmatmul.f32.gmra.mxu3 %v402_v11  ;;  %644 = vmatmul.f32.gmra.mxu2 %v404_v13  ;;  %v197_v11 = vld [vmem:[%s3011_s1 + $0x10] sm:$0xff]  ;;  %v198_v13 = vld [vmem:[%s3011_s1 + $0x18] sm:$0xff] }
  0x69   : > { %845 = vmatpush.msra.mxu0 %v200_v9  ;;  %723 = vmatpush.msra.mxu1 %v197_v11  ;;  %v1618_v9 = vld [vmem:[%s3011_s1 + $0x550] sm:$0xff] }
  0x6b   : > { %846 = vmatpush.msra.mxu0 %v198_v13  ;;  %724 = vmatpush.msra.mxu1 %v195_v15  ;;  %v1639_v13 = vld [vmem:[%s3011_s1 + $0x5f8] sm:$0xff]  ;;  %v1616_v15 = vld [vmem:[%s3011_s1 + $0x540] sm:$0xff] }
  0x6c   : > { %1556 = vmatmul.msk.f32.vlgmr.msrb.gmra.mxu0 %vm429_vm1, %v1816_v27  ;;  %1560 = vmatmul.msk.f32.vlgmr.msrb.gmra.mxu1 %vm429_vm1, %v1830_v31  ;;  %v196_v27 = vld [vmem:[%s3011_s1 + $0x8] sm:$0xff]  ;;  %v246_v31 = vld [vmem:[%s3011_s1 + $0x198] sm:$0xff] }
  0x6d   : > { %847 = vmatpush.msra.mxu0 %v196_v27  ;;  %873 = vmatpush.msrb.mxu1 %v2174_v10  ;;  %v2317_v10 = vld [vmem:[%s1791_s24 + $0x8] sm:$0xff] }
  0x6e   : > { %1673 = vmatpush.msrb.mxu3 %v246_v31 }
  0x6f   : > { %1159 = vmatpush.msrb.mxu0 %v1642_v21  ;;  %874 = vmatpush.msrb.mxu1 %v2189_v20  ;;  %v1594_v20 = vld [vmem:[%s3011_s1 + $0x490] sm:$0xff] }
  0x70   : > { %606 = vmatmul.f32.gmra.mxu3 %v408_v23  ;;  %647 = vmatmul.f32.gmra.mxu2 %v410_v46  ;;  %v1632_v23 = vld [vmem:[%s3011_s1 + $0x5c0] sm:$0xff]  ;;  %v232_v46 = vld [vmem:[%s3011_s1 + $0x128] sm:$0xff] }
  0x71   : > { %1674 = vmatpush.msrb.mxu3 %v244_v25  ;;  %1160 = vmatpush.msrb.mxu0 %v1640_v26  ;;  %v1612_v26 = vld [vmem:[%s3011_s1 + $0x520] sm:$0xff] }
  0x72   : > { %875 = vmatpush.msrb.mxu1 %v2217_v43  ;;  %1126 = vmatpush.msrb.mxu2 %v1594_v20  ;;  %v236_v43 = vld [vmem:[%s3011_s1 + $0x148] sm:$0xff] }
  0x74   : > { %1557 = vmatmul.msk.f32.gmra.mxu0 %vm429_vm1, %v1878_v47  ;;  %1561 = vmatmul.msk.f32.gmra.mxu1 %vm429_vm1, %v1881_v48  ;;  %v242_v47 = vld [vmem:[%s3011_s1 + $0x178] sm:$0xff]  ;;  %v1638_v48 = vld [vmem:[%s3011_s1 + $0x5f0] sm:$0xff] }
  0x75   : > { %1675 = vmatpush.msrb.mxu3 %v242_v47  ;;  %1161 = vmatpush.msrb.mxu0 %v1638_v48  ;;  %v2501_v48 = vld [vmem:[%s3011_s1 + $0x628] sm:$0xff] }
  0x76   : > { %876 = vmatpush.msrb.mxu1 %v2237_v55  ;;  %1127 = vmatpush.msrb.mxu2 %v1592_v41  ;;  %v1626_v55 = vld [vmem:[%s3011_s1 + $0x590] sm:$0xff]  ;;  %v1036_v41 = vrot.slane %v1929_v0, 2 }
  0x77   : > { %1676 = vmatpush.msrb.mxu3 %v240_v37  ;;  %1162 = vmatpush.msrb.mxu0 %v1636_v40  ;;  %v1035_v40 = vrot.slane %v955_v28, 2 }
  0x78   : > { %766 = vmatmul.f32.vlgmr.msra.gmra.mxu3 %v2317_v10  ;;  %1564 = vmatmul.msk.f32.vlgmr.msra.gmra.mxu2 %vm429_vm1, %v2323_v32 }
  0x79   : > { %877 = vmatpush.msrb.mxu1 %v2261_v1  ;;  %1677 = vmatpush.msrb.mxu3 %v238_v42 }
  0x7b   : > { %878 = vmatpush.msrb.mxu1 %v248_v12  ;;  %1678 = vmatpush.msrb.mxu3 %v236_v43 }
  0x7c   : > { %1558 = vmatmul.msk.f32.gmra.mxu0 %vm429_vm1, %v1946_v7  ;;  %1562 = vmatmul.msk.f32.gmra.mxu1 %vm429_vm1, %v1949_v8  ;;  %v1634_v7 = vld [vmem:[%s3011_s1 + $0x5d0] sm:$0xff] }
  0x7d   : > { %v1590_v8 = vld [vmem:[%s3011_s1 + $0x470] sm:$0xff]  ;;  %1163 = vmatpush.msrb.mxu0 %v1634_v7  ;;  %879 = vmatpush.msrb.mxu1 %v246_v31 }
  0x7e   : > { %1128 = vmatpush.msrb.mxu2 %v1590_v8  ;;  %1679 = vmatpush.msrb.mxu3 %v234_v44  ;;  %v1631_v8 = vld [vmem:[%s3011_s1 + $0x5b8] sm:$0xff] }
  0x7f   : > { %1164 = vmatpush.msrb.mxu0 %v1632_v23  ;;  %880 = vmatpush.msrb.mxu1 %v244_v25  ;;  %v1635_v25 = vld [vmem:[%s3011_s1 + $0x5d8] sm:$0xff]  ;;  %v1609_v23 = vld [vmem:[%s3011_s1 + $0x508] sm:$0xff] }
  0x80   : > { %769 = vmatmul.f32.gmra.mxu3 %v1936_v3  ;;  %1565 = vmatmul.msk.f32.gmra.mxu2 %vm429_vm1, %v1797_v17  ;;  %v1588_v17 = vld [vmem:[%s3011_s1 + $0x460] sm:$0xff] }
  0x81   : > { %1129 = vmatpush.msrb.mxu2 %v1588_v17  ;;  %881 = vmatpush.msrb.mxu1 %v242_v47  ;;  %v1644_v47 = vld [vmem:[%s3011_s1 + $0x620] sm:$0xff] }
  0x82   : > { %1680 = vmatpush.msrb.mxu3 %v232_v46 }
  0x83   : > { %882 = vmatpush.msrb.mxu1 %v240_v37  ;;  %1130 = vmatpush.msrb.mxu2 %v1586_v45 }
  0x84   : > { %1559 = vmatmul.msk.f32.gmra.mxu0 %vm429_vm1, %v2002_v38  ;;  %1563 = vmatmul.msk.f32.gmra.mxu1 %vm429_vm1, %v2005_v39  ;;  %v1630_v38 = vld [vmem:[%s3011_s1 + $0x5b0] sm:$0xff]  ;;  %v171_v39 = vld [vmem:[%s1791_s24] sm:$0xff] }
  0x85   : > { %1165 = vmatpush.msrb.mxu0 %v1630_v38  ;;  %883 = vmatpush.msrb.mxu1 %v238_v42  ;;  %v1044_v38 = vrot.slane %v1985_v30, 2 }
  0x86   : > { %1681 = vmatpush.msrb.mxu3 %v230_v53 }
  0x87   : > { %1166 = vmatpush.msrb.mxu0 %v1628_v49  ;;  %884 = vmatpush.msrb.mxu1 %v236_v43  ;;  %v1611_v43 = vld [vmem:[%s3011_s1 + $0x518] sm:$0xff] }
  0x88   : > { %772 = vmatmul.f32.gmra.mxu3 %v1994_v36  ;;  %1566 = vmatmul.msk.f32.gmra.mxu2 %vm429_vm1, %v1836_v33  ;;  %v1584_v33 = vld [vmem:[%s3011_s1 + $0x440] sm:$0xff] }
  0x89   : > { %1131 = vmatpush.msrb.mxu2 %v1584_v33  ;;  %1167 = vmatpush.msrb.mxu0 %v1626_v55  ;;  %v1605_v33 = vld [vmem:[%s3011_s1 + $0x4e8] sm:$0xff]  ;;  %v2556_v55 = vsel %vm1034_vm2, %v1036_v41, %v1044_v38 }
  0x8a   : > { %1682 = vmatpush.msrb.mxu3 %v228_v59  ;;  %885 = vmatpush.msrb.mxu1 %v234_v44 }
  0x8b   : > { %1132 = vmatpush.msrb.mxu2 %v1582_v57  ;;  %1168 = vmatpush.msrb.mxu0 %v1624_v60  ;;  %v1603_v57 = vld [vmem:[%s3011_s1 + $0x4d8] sm:$0xff] }
  0x8c   : > { %848 = vmatmul.f32.vlgmr.msra.gmra.mxu0 %v171_v39  ;;  %725 = vmatmul.f32.vlgmr.msra.gmra.mxu1 %v171_v39  ;;  %v1607_v39 = vld [vmem:[%s3011_s1 + $0x4f8] sm:$0xff] }
  0x8d   : > { %929 = vmatpush.msra.mxu3 %v260_v61  ;;  %1169 = vmatpush.msrb.mxu0 %v1622_v62  ;;  %v1050_v61 = vrot.slane %v2031_v50, 2  ;;  %v956_v62 = vld [vmem:[%s1791_s24 + $0x8] sm:$0xfc] }
  0x8e   : > { %886 = vmatpush.msrb.mxu1 %v232_v46  ;;  %v1627_v46 = vld [vmem:[%s3011_s1 + $0x598] sm:$0xff] }
  0x90   : > { %775 = vmatmul.f32.gmra.mxu3 %v2037_v54  ;;  %1567 = vmatmul.msk.f32.gmra.mxu2 %vm429_vm1, %v1890_v51  ;;  %v1580_v51 = vld [vmem:[%s3011_s1 + $0x420] sm:$0xff] }
  0x91   : > { %1133 = vmatpush.msrb.mxu2 %v1580_v51  ;;  %887 = vmatpush.msrb.mxu1 %v230_v53  ;;  %v1625_v53 = vld [vmem:[%s3011_s1 + $0x588] sm:$0xff] }
  0x93   : > { %1282 = vmatpush.msra.mxu2 %v1643_v5  ;;  %888 = vmatpush.msrb.mxu1 %v228_v59  ;;  %v1601_v59 = vld [vmem:[%s3011_s1 + $0x4c8] sm:$0xff]  ;;  %v1599_v5 = vld [vmem:[%s3011_s1 + $0x4b8] sm:$0xff] }
  0x94   : > { %851 = vmatmul.f32.gmra.mxu0 %v1929_v0  ;;  %728 = vmatmul.f32.gmra.mxu1 %v1929_v0  ;;  %v2524_v0 = vsel %vm1034_vm2, %v1035_v40, %v1036_v41  ;;  %v1056_v40 = vrot.slane %v2062_v2, 2  ;;  %v1591_v41 = vld [vmem:[%s3011_s1 + $0x478] sm:$0xff] }
  0x95   : > { %1283 = vmatpush.msra.mxu2 %v1641_v6  ;;  %1215 = vmatpush.msra.mxu1 %v1644_v47 }
  0x97   : > { %1284 = vmatpush.msra.mxu2 %v1639_v13  ;;  %v1038_v13 = vrot.slane %v956_v62, 2 }
  0x98   : > { %778 = vmatmul.f32.gmra.mxu3 %v2065_v4  ;;  %1568 = vmatmul.msk.f32.gmra.mxu2 %vm429_vm1, %v1801_v19  ;;  %v1620_v19 = vld [vmem:[%s3011_s1 + $0x560] sm:$0xff] }
  0x99   : > { %1170 = vmatpush.msrb.mxu0 %v1620_v19 }
  0x9a   : > { %v2432_v63 = vpop.f32.mrf.mxu2 }
  0x9b   : > { %v2434_v1 = vpop.f32.mrf.mxu3  ;;  %1171 = vmatpush.msrb.mxu0 %v1618_v9  ;;  %v1597_v9 = vld [vmem:[%s3011_s1 + $0x4a8] sm:$0xff] }
  0x9c   : > { %854 = vmatmul.f32.gmra.mxu0 %v1985_v30  ;;  %731 = vmatmul.f32.gmra.mxu1 %v1985_v30 }
  0x9d   : > { %1172 = vmatpush.msrb.mxu0 %v1616_v15  ;;  %v1039_v15 = vrot.slane %v1936_v3, 2  ;;  %v1593_v3 = vld [vmem:[%s3011_s1 + $0x488] sm:$0xff] }
  0x9f   : > { %1173 = vmatpush.msrb.mxu0 %v1614_v18  ;;  %v2591_v18 = vsel %vm1034_vm2, %v1044_v38, %v1050_v61  ;;  %v2608_v28 = vsel %vm1034_vm2, %v1038_v13, %v1039_v15  ;;  %v1589_v38 = vld [vmem:[%s3011_s1 + $0x468] sm:$0xff]  ;;  %v2669_v13 = vld [vmem:[%s1791_s24 + $0x58] sm:$0xff] }
  0xa0   : > { %781 = vmatmul.f32.gmra.mxu3 %v2087_v16  ;;  %1569 = vmatmul.msk.f32.gmra.mxu2 %vm429_vm1, %v1805_v22  ;;  %v1637_v22 = vld [vmem:[%s3011_s1 + $0x5e8] sm:$0xff] }
  0xa1   : > { %1285 = vmatpush.msra.mxu2 %v1637_v22  ;;  %1174 = vmatpush.msrb.mxu0 %v1612_v26  ;;  %v1621_v22 = vld [vmem:[%s3011_s1 + $0x568] sm:$0xff] }
  0xa2   : > { %v2453_v11 = vpop.f32.mrf.mxu2  ;;  %v2597_v26 = vld [vmem:[%s1791_s24 + $0x28] sm:$0xff] }
  0xa3   : > { %v2455_v12 = vpop.f32.mrf.mxu3  ;;  %1286 = vmatpush.msra.mxu2 %v1635_v25  ;;  %1338 = vmatpush.msra.mxu0 %v2501_v48  ;;  %v1595_v25 = vld [vmem:[%s3011_s1 + $0x498] sm:$0xff] }
  0xa4   : > { %3015 = vst [vmem:[#allocation2_spill] sm:$0xff] %v2455_v12  ;;  %857 = vmatmul.f32.gmra.mxu0 %v2031_v50  ;;  %734 = vmatmul.f32.gmra.mxu1 %v2031_v50 }
  0xa8   : > { %784 = vmatmul.f32.gmra.mxu3 %v2109_v35  ;;  %1570 = vmatmul.msk.f32.gmra.mxu2 %vm429_vm1, %v1839_v34  ;;  %v1633_v34 = vld [vmem:[%s3011_s1 + $0x5c8] sm:$0xff] }
  0xa9   : > { %v2472_v27 = vpop.f32.mrf.mxu0  ;;  %v2476_v31 = vpop.f32.mrf.mxu1  ;;  %1287 = vmatpush.msra.mxu2 %v1633_v34 }
  0xaa   : > { %v2478_v21 = vpop.f32.mrf.mxu2 }
  0xab   : > { %v2480_v24 = vpop.f32.mrf.mxu3  ;;  %1288 = vmatpush.msra.mxu2 %v1631_v8 }
  0xac   : > { %3016 = vst [vmem:[#allocation3_spill] sm:$0xff] %v2480_v24  ;;  %860 = vmatmul.f32.gmra.mxu0 %v2062_v2  ;;  %737 = vmatmul.f32.gmra.mxu1 %v2062_v2  ;;  %v1046_v2 = vrot.slane %v1994_v36, 2  ;;  %v959_v24 = vld [vmem:[%s1791_s24 + $0xc8] sm:$0x3] }
  0xb0   : > { %787 = vmatmul.f32.gmra.mxu3 %v2146_v58  ;;  %1571 = vmatmul.msk.f32.gmra.mxu2 %vm429_vm1, %v1893_v52  ;;  %v1629_v52 = vld [vmem:[%s3011_s1 + $0x5a8] sm:$0xff] }
  0xb1   : > { %v2503_v20 = vpop.f32.mrf.mxu0  ;;  %v2507_v37 = vpop.f32.mrf.mxu1  ;;  %1289 = vmatpush.msra.mxu2 %v1629_v52  ;;  %v1619_v52 = vld [vmem:[%s3011_s1 + $0x558] sm:$0xff] }
  0xb3   : > { %v2511_v42 = vpop.f32.mrf.mxu2  ;;  %v2513_v7 = vpop.f32.mrf.mxu3  ;;  %1290 = vmatpush.msra.mxu2 %v1627_v46  ;;  %v2634_v46 = vld [vmem:[%s1791_s24 + $0x40] sm:$0xff] }
  0xb4   : > { %3017 = vst [vmem:[#allocation4_spill] sm:$0xff] %v2513_v7  ;;  %863 = vmatmul.f32.gmra.mxu0 %v2081_v14  ;;  %740 = vmatmul.f32.gmra.mxu1 %v2081_v14  ;;  %v2753_v7 = vld [vmem:[%s1791_s24 + $0xb8] sm:$0xff] }
  0xb5   : > { %1291 = vmatpush.msra.mxu2 %v1625_v53 }
  0xb8   : > { %910 = vmatmul.f32.vlgmr.msrb.gmra.mxu3 %v2146_v58  ;;  %1134 = vmatmul.f32.vlgmr.msrb.gmra.mxu2 %v2524_v0 }
  0xb9   : > { %v2533_v17 = vpop.f32.mrf.mxu0  ;;  %1241 = vmatpush.msrb.mxu3 %v1611_v43  ;;  %v2536_v44 = vpop.f32.mrf.mxu1 }
  0xbb   : > { %v586_v45 = vpop.f32.mrf.mxu3  ;;  %1242 = vmatpush.msrb.mxu3 %v1609_v23  ;;  %v627_v49 = vpop.f32.mrf.mxu2 }
  0xbc   : > { %866 = vmatmul.f32.gmra.mxu0 %v2103_v29  ;;  %v2549_v30 = vadd.f32 %v627_v49, %v586_v45  ;;  %743 = vmatmul.f32.gmra.mxu1 %v2103_v29  ;;  %v2631_v45 = vsel %vm1034_vm2, %v1050_v61, %v1056_v40  ;;  %v1615_v61 = vld [vmem:[%s3011_s1 + $0x538] sm:$0xff] }
  0xbd   : > { %1243 = vmatpush.msrb.mxu3 %v1607_v39  ;;  %v1617_v39 = vld [vmem:[%s3011_s1 + $0x548] sm:$0xff] }
  0xbf   : > { %1244 = vmatpush.msrb.mxu3 %v1605_v33  ;;  %v2645_v33 = vsel %vm1034_vm2, %v1039_v15, %v1046_v2  ;;  %v1583_v15 = vld [vmem:[%s3011_s1 + $0x438] sm:$0xff] }
  0xc0   : > { %1572 = vmatmul.msk.f32.vlgmr.msra.gmra.mxu3 %vm429_vm1, %v2323_v32  ;;  %1137 = vmatmul.f32.gmra.mxu2 %v2556_v55  ;;  %v1623_v32 = vld [vmem:[%s3011_s1 + $0x578] sm:$0xff] }
  0xc1   : > { %v2566_v60 = vpop.f32.mrf.mxu0  ;;  %1245 = vmatpush.msrb.mxu3 %v1603_v57  ;;  %v2569_v51 = vpop.f32.mrf.mxu1  ;;  %1292 = vmatpush.msra.mxu2 %v1623_v32  ;;  %v1062_v57 = vrot.slane %v2081_v14, 2  ;;  %v1052_v32 = vrot.slane %v2037_v54, 2  ;;  %v1585_v14 = vld [vmem:[%s3011_s1 + $0x448] sm:$0xff] }
  0xc3   : > { %v589_v19 = vpop.f32.mrf.mxu3  ;;  %1246 = vmatpush.msrb.mxu3 %v1601_v59  ;;  %v630_v6 = vpop.f32.mrf.mxu2  ;;  %1293 = vmatpush.msra.mxu2 %v1621_v22 }
  0xc4   : > { %869 = vmatmul.f32.gmra.mxu0 %v2140_v56  ;;  %v2583_v50 = vadd.f32 %v630_v6, %v589_v19  ;;  %746 = vmatmul.f32.gmra.mxu1 %v2140_v56  ;;  %v1695_v19 = vld [vmem:[%s1791_s24 + $0x20] sm:$0xff]  ;;  %v1613_v6 = vld [vmem:[%s3011_s1 + $0x528] sm:$0xff] }
  0xc5   : > { %1247 = vmatpush.msrb.mxu3 %v1599_v5  ;;  %1294 = vmatpush.msra.mxu2 %v1619_v52 }
  0xc7   : > { %1248 = vmatpush.msrb.mxu3 %v1597_v9  ;;  %1295 = vmatpush.msra.mxu2 %v1617_v39  ;;  %v2665_v9 = vsel %vm1034_vm2, %v1056_v40, %v1062_v57 }
  0xc8   : > { %1573 = vmatmul.msk.f32.gmra.mxu3 %vm429_vm1, %v2597_v26  ;;  %1140 = vmatmul.f32.gmra.mxu2 %v2591_v18 }
  0xc9   : > { %v2604_v34 = vpop.f32.mrf.mxu0  ;;  %1249 = vmatpush.msrb.mxu3 %v1595_v25  ;;  %v2610_v47 = vpop.f32.mrf.mxu1  ;;  %1296 = vmatpush.msra.mxu2 %v1615_v61  ;;  %v2680_v25 = vsel %vm1034_vm2, %v1046_v2, %v1052_v32 }
  0xcb   : > { %v592_v8 = vpop.f32.mrf.mxu3  ;;  %1250 = vmatpush.msrb.mxu3 %v1593_v3  ;;  %v633_v43 = vpop.f32.mrf.mxu2  ;;  %1297 = vmatpush.msra.mxu2 %v1613_v6 }
  0xcc   : > { %1175 = vmatmul.f32.vlgmr.msrb.gmra.mxu0 %v2608_v28  ;;  %v2620_v23 = vadd.f32 %v633_v43, %v592_v8  ;;  %889 = vmatmul.f32.vlgmr.msrb.gmra.mxu1 %v2317_v10  ;;  %v1587_v10 = vld [vmem:[%s3011_s1 + $0x458] sm:$0xff]  ;;  %v1058_v43 = vrot.slane %v2065_v4, 2 }
  0xcd   : > { %1251 = vmatpush.msrb.mxu3 %v1591_v41  ;;  %1683 = vmatpush.msrb.mxu2 %v2501_v48  ;;  %v1068_v48 = vrot.slane %v2103_v29, 2  ;;  %v1581_v41 = vld [vmem:[%s3011_s1 + $0x428] sm:$0xff]  ;;  %v2697_v29 = vld [vmem:[%s1791_s24 + $0x70] sm:$0xff] }
  0xce   : > { %v2705_v39 = vsel %vm1034_vm2, %v1052_v32, %v1058_v43  ;;  %v958_v32 = vld [vmem:[%s1791_s24 + $0xc0] sm:$0x3] }
  0xcf   : > { %1252 = vmatpush.msrb.mxu3 %v1589_v38  ;;  %v2694_v2 = vsel %vm1034_vm2, %v1062_v57, %v1068_v48 }
  0xd0   : > { %1574 = vmatmul.msk.f32.gmra.mxu3 %vm429_vm1, %v2634_v46  ;;  %1143 = vmatmul.f32.gmra.mxu2 %v2631_v45 }
  0xd1   : > { %v2641_v49 = vpop.f32.mrf.mxu0  ;;  %1253 = vmatpush.msrb.mxu3 %v1587_v10  ;;  %v2647_v53 = vpop.f32.mrf.mxu1  ;;  %v1074_v10 = vrot.slane %v2140_v56, 2 }
  0xd3   : > { %v595_v59 = vpop.f32.mrf.mxu3  ;;  %v636_v62 = vpop.f32.mrf.mxu2  ;;  %1254 = vmatpush.msrb.mxu3 %v1585_v14  ;;  %v2720_v14 = vld [vmem:[%s1791_s24 + $0x88] sm:$0xff] }
  0xd4   : > { %1178 = vmatmul.f32.gmra.mxu0 %v2645_v33  ;;  %v2654_v5 = vadd.f32 %v636_v62, %v595_v59  ;;  %892 = vmatmul.f32.gmra.mxu1 %v1695_v19  ;;  %v1064_v62 = vrot.slane %v2087_v16, 2  ;;  %v2716_v19 = vsel %vm1034_vm2, %v1068_v48, %v1074_v10 }
  0xd5   : > { %1255 = vmatpush.msrb.mxu3 %v1583_v15 }
  0xd6   : > { %v2726_v6 = vsel %vm1034_vm2, %v1058_v43, %v1064_v62 }
  0xd7   : > { %1256 = vmatpush.msrb.mxu3 %v1581_v41 }
  0xd8   : > { %1575 = vmatmul.msk.f32.gmra.mxu3 %vm429_vm1, %v2669_v13  ;;  %1146 = vmatmul.f32.gmra.mxu2 %v2665_v9 }
  0xd9   : > { %v2676_v22 = vpop.f32.mrf.mxu0  ;;  %v2682_v3 = vpop.f32.mrf.mxu1 }
  0xda   : > { %3018 = vst [vmem:[#allocation5_spill] sm:$0xff] %v2676_v22 }
  0xdb   : > { %3019 = vst [vmem:[#allocation6_spill] sm:$0xff] %v2682_v3  ;;  %v598_v40 = vpop.f32.mrf.mxu3  ;;  %v639_v8 = vpop.f32.mrf.mxu2 }
  0xdc   : > { %1181 = vmatmul.f32.gmra.mxu0 %v2680_v25  ;;  %v2689_v52 = vadd.f32 %v639_v8, %v598_v40  ;;  %895 = vmatmul.f32.gmra.mxu1 %v1994_v36  ;;  %v1070_v8 = vrot.slane %v2109_v35, 2 }
  0xe0   : > { %1576 = vmatmul.msk.f32.gmra.mxu3 %vm429_vm1, %v2697_v29  ;;  %1149 = vmatmul.f32.gmra.mxu2 %v2694_v2 }
  0xe1   : > { %v2701_v38 = vpop.f32.mrf.mxu0  ;;  %v2707_v36 = vpop.f32.mrf.mxu1 }
  0xe2   : > { %3020 = vst [vmem:[#allocation7_spill] sm:$0xff] %v2701_v38 }
  0xe3   : > { %3021 = vst [vmem:[#allocation8_spill] sm:$0xff] %v2707_v36  ;;  %v601_v59 = vpop.f32.mrf.mxu3  ;;  %v642_v57 = vpop.f32.mrf.mxu2 }
  0xe4   : > { %1184 = vmatmul.f32.gmra.mxu0 %v2705_v39  ;;  %v2711_v61 = vadd.f32 %v642_v57, %v601_v59  ;;  %898 = vmatmul.f32.gmra.mxu1 %v2037_v54  ;;  %v1080_v54 = vrot.slane %v958_v32, 2  ;;  %v2739_v57 = vld [vmem:[%s1791_s24 + $0xa0] sm:$0xff]  ;;  %v2745_v32 = vsel %vm1034_vm2, %v1064_v62, %v1070_v8 }
  0xe6   : > { %v2736_v59 = vsel %vm1034_vm2, %v1074_v10, %v1080_v54  ;;  %v1076_v54 = vrot.slane %v2146_v58, 2 }
  0xe7   : > { %3023 = vst [vmem:[#allocation10_spill] sm:$0xff] %v2736_v59 }
  0xe8   : > { %1577 = vmatmul.msk.f32.gmra.mxu3 %vm429_vm1, %v2720_v14  ;;  %1152 = vmatmul.f32.gmra.mxu2 %v2716_v19  ;;  %v2759_v62 = vsel %vm1034_vm2, %v1070_v8, %v1076_v54 }
  0xe9   : > { %v668_v56 = vpop.f32.mrf.mxu0  ;;  %v2728_v15 = vpop.f32.mrf.mxu1 }
  0xeb   : > { %v604_v40 = vpop.f32.mrf.mxu3  ;;  %v645_v41 = vpop.f32.mrf.mxu2 }
  0xec   : > { %1187 = vmatmul.f32.gmra.mxu0 %v2726_v6  ;;  %v2731_v48 = vadd.f32 %v645_v41, %v604_v40  ;;  %901 = vmatmul.f32.gmra.mxu1 %v2065_v4 }
  0xee   : > { %3022 = vst [vmem:[#allocation9_spill] sm:$0xff] %v2731_v48  ;;  %v1042_v48 = vrot.slane %v2597_v26, 2  ;;  %v1048_v26 = vrot.slane %v2634_v46, 2 }
  0xf0   : > { %1578 = vmatmul.msk.f32.gmra.mxu3 %vm429_vm1, %v2739_v57  ;;  %1155 = vmatmul.f32.gmra.mxu2 %v2736_v59 }
  0xf1   : > { %v671_v43 = vpop.f32.mrf.mxu0  ;;  %v2747_v40 = vpop.f32.mrf.mxu1 }
  0xf3   : > { %v607_v4 = vpop.f32.mrf.mxu3  ;;  %v648_v41 = vpop.f32.mrf.mxu2 }
  0xf4   : > { %1190 = vmatmul.f32.gmra.mxu0 %v2745_v32  ;;  %v649_v10 = vadd.f32 %v648_v41, %v607_v4  ;;  %904 = vmatmul.f32.gmra.mxu1 %v2087_v16  ;;  %v957_v4 = vld [vmem:[%s1791_s24 + $0x10] sm:$0xfc]  ;;  %v1082_v16 = vrot.slane %v959_v24, 2 }
  0xf5   : > { %v1041_v58 = vrot.slane %v957_v4, 2  ;;  %v1049_v4 = vsel %vm1034_vm2, %v1042_v48, %v1048_v26 }
  0xf6   : > { %v2771_v8 = vsel %vm1034_vm2, %v1076_v54, %v1082_v16 }
  0xf7   : > { %v1043_v22 = vsel %vm1034_vm2, %v1041_v58, %v1042_v48 }
  0xf8   : > { %1579 = vmatmul.msk.f32.gmra.mxu3 %vm429_vm1, %v2753_v7  ;;  %1298 = vmatmul.f32.vlgmr.msra.gmra.mxu2 %v2608_v28 }
  0xf9   : > { %v674_v36 = vpop.f32.mrf.mxu0  ;;  %v2761_v38 = vpop.f32.mrf.mxu1 }
  0xfa   : > { %3024 = vst [vmem:[#allocation11_spill] sm:$0xff] %v2761_v38 }
  0xfb   : > { %v767_v59 = vpop.f32.mrf.mxu3  ;;  %v808_v41 = vpop.f32.mrf.mxu2 }
  0xfc   : > { %1193 = vmatmul.f32.gmra.mxu0 %v2759_v62  ;;  %907 = vmatmul.f32.gmra.mxu1 %v2109_v35 }
 0x100   : > { %1257 = vmatmul.f32.vlgmr.msrb.gmra.mxu3 %v2524_v0  ;;  %1301 = vmatmul.f32.gmra.mxu2 %v2645_v33  ;;  %v505_v0 = vadd.f32 %v2476_v31, %v2472_v27  ;;  %v669_v33 = vadd.f32 %v668_v56, %v2549_v30  ;;  %v508_v30 = vadd.f32 %v2507_v37, %v2503_v20 }
 0x101   : > { %v677_v28 = vpop.f32.mrf.mxu0  ;;  %v689_v3 = vpop.f32.mrf.mxu1 }
 0x102   : > { %v2774_v38 = vadd.f32 %v677_v28, %v2654_v5  ;;  %v2777_v12 = vadd.f32 %v689_v3, %v649_v10  ;;  %v546_v5 = vadd.f32 %v2432_v63, %v505_v0  ;;  %v1054_v63 = vrot.slane %v2669_v13, 2 }
 0x103   : > { %v770_v35 = vpop.f32.mrf.mxu3  ;;  %v811_v24 = vpop.f32.mrf.mxu2  ;;  %v549_v56 = vadd.f32 %v2453_v11, %v508_v30  ;;  %v1060_v11 = vrot.slane %v2697_v29, 2 }
 0x104   : > { %1196 = vmatmul.f32.gmra.mxu0 %v2771_v8  ;;  %1646 = vmatmul.msk.f32.vlgmr.msra.gmra.mxu1 %vm429_vm1, %v1043_v22  ;;  %v1055_v20 = vsel %vm1034_vm2, %v1048_v26, %v1054_v63 }
 0x108   : > { %1260 = vmatmul.f32.gmra.mxu3 %v2556_v55  ;;  %1304 = vmatmul.f32.gmra.mxu2 %v2680_v25  ;;  %v672_v25 = vadd.f32 %v671_v43, %v2583_v50  ;;  %v511_v50 = vadd.f32 %v2536_v44, %v2533_v17  ;;  %v1061_v17 = vsel %vm1034_vm2, %v1054_v63, %v1060_v11  ;;  %v3025_v63 = vld [vmem:[#allocation2_spill] sm:$0xff] }
 0x109   : > { %v849_v54 = vpop.f32.mrf.mxu0  ;;  %v726_v3 = vpop.f32.mrf.mxu1 }
 0x10a   : > { %v2788_v10 = vadd.f32 %v849_v54, %v669_v33  ;;  %v727_v16 = vadd.f32 %v726_v3, %v546_v5  ;;  %v552_v43 = vadd.f32 %v2478_v21, %v511_v50  ;;  %v1066_v21 = vrot.slane %v2720_v14, 2  ;;  %v3028_v50 = vld [vmem:[#allocation9_spill] sm:$0xff] }
 0x10b   : > { %v773_v27 = vpop.f32.mrf.mxu3  ;;  %v814_v31 = vpop.f32.mrf.mxu2  ;;  %v517_v14 = vadd.f32 %v2610_v47, %v2604_v34 }
 0x10c   : > { %1654 = vmatmul.msk.f32.vlgmr.msra.gmra.mxu0 %vm429_vm1, %v1043_v22  ;;  %v768_v46 = vadd.f32 %v767_v59, %v727_v16  ;;  %1647 = vmatmul.msk.f32.gmra.mxu1 %vm429_vm1, %v1049_v4 }
 0x10e   : > { %v2796_v55 = vadd.f32 %v808_v41, %v768_v46  ;;  %v684_v46 = vadd.f32 %v2747_v40, %v2711_v61  ;;  %v3027_v61 = vld [vmem:[#allocation6_spill] sm:$0xff] }
 0x110   : > { %1263 = vmatmul.f32.gmra.mxu3 %v2591_v18  ;;  %1307 = vmatmul.f32.gmra.mxu2 %v2705_v39  ;;  %v675_v39 = vadd.f32 %v674_v36, %v2620_v23  ;;  %v514_v23 = vadd.f32 %v2569_v51, %v2566_v60  ;;  %v1067_v60 = vsel %vm1034_vm2, %v1060_v11, %v1066_v21 }
 0x111   : > { %v852_v48 = vpop.f32.mrf.mxu0  ;;  %v729_v22 = vpop.f32.mrf.mxu1 }
 0x112   : > { %v2802_v58 = vadd.f32 %v852_v48, %v672_v25  ;;  %v730_v37 = vadd.f32 %v729_v22, %v549_v56  ;;  %v555_v36 = vadd.f32 %v2511_v42, %v514_v23  ;;  %v1072_v42 = vrot.slane %v2739_v57, 2 }
 0x113   : > { %v776_v59 = vpop.f32.mrf.mxu3  ;;  %v817_v28 = vpop.f32.mrf.mxu2 }
 0x114   : > { %1655 = vmatmul.msk.f32.gmra.mxu0 %vm429_vm1, %v1049_v4  ;;  %v771_v13 = vadd.f32 %v770_v35, %v730_v37  ;;  %1648 = vmatmul.msk.f32.gmra.mxu1 %vm429_vm1, %v1055_v20  ;;  %v558_v4 = vadd.f32 %v2434_v1, %v517_v14  ;;  %v1073_v47 = vsel %vm1034_vm2, %v1066_v21, %v1072_v42  ;;  %v1078_v1 = vrot.slane %v2753_v7, 2  ;;  %v3033_v21 = vld [vmem:[#allocation8_spill] sm:$0xff] }
 0x116   : > { %v2810_v18 = vadd.f32 %v811_v24, %v771_v13  ;;  %v3029_v13 = vld [vmem:[#allocation11_spill] sm:$0xff] }
 0x117   : > { %v687_v11 = vadd.f32 %v3029_v13, %v3028_v50 }
 0x118   : > { %1266 = vmatmul.f32.gmra.mxu3 %v2631_v45  ;;  %1310 = vmatmul.f32.gmra.mxu2 %v2726_v6 }
 0x119   : > { %v855_v41 = vpop.f32.mrf.mxu0  ;;  %v732_v0 = vpop.f32.mrf.mxu1 }
 0x11a   : > { %v2816_v26 = vadd.f32 %v855_v41, %v675_v39  ;;  %v733_v44 = vadd.f32 %v732_v0, %v552_v43  ;;  %v3030_v39 = vld [vmem:[#allocation10_spill] sm:$0xff]  ;;  %v3031_v43 = vld [vmem:[#allocation3_spill] sm:$0xff] }
 0x11b   : > { %v779_v35 = vpop.f32.mrf.mxu3  ;;  %v820_v33 = vpop.f32.mrf.mxu2 }
 0x11c   : > { %1656 = vmatmul.msk.f32.gmra.mxu0 %vm429_vm1, %v1055_v20  ;;  %v774_v29 = vadd.f32 %v773_v27, %v733_v44  ;;  %1649 = vmatmul.msk.f32.gmra.mxu1 %vm429_vm1, %v1061_v17 }
 0x11e   : > { %v2824_v45 = vadd.f32 %v814_v31, %v774_v29  ;;  %v3032_v29 = vld [vmem:[#allocation7_spill] sm:$0xff] }
 0x120   : > { %1269 = vmatmul.f32.gmra.mxu3 %v2665_v9  ;;  %1313 = vmatmul.f32.gmra.mxu2 %v2745_v32 }
 0x121   : > { %v858_v6 = vpop.f32.mrf.mxu0  ;;  %v735_v24 = vpop.f32.mrf.mxu1 }
 0x122   : > { %v2830_v5 = vadd.f32 %v858_v6, %v2774_v38  ;;  %v736_v51 = vadd.f32 %v735_v24, %v555_v36  ;;  %v681_v38 = vadd.f32 %v2728_v15, %v2689_v52  ;;  %v520_v52 = vadd.f32 %v2647_v53, %v2641_v49 }
 0x123   : > { %v782_v54 = vpop.f32.mrf.mxu3  ;;  %v823_v3 = vpop.f32.mrf.mxu2  ;;  %v1079_v53 = vsel %vm1034_vm2, %v1072_v42, %v1078_v1  ;;  %v526_v36 = vadd.f32 %v3033_v21, %v3032_v29 }
 0x124   : > { %1657 = vmatmul.msk.f32.gmra.mxu0 %vm429_vm1, %v1061_v17  ;;  %v777_v9 = vadd.f32 %v776_v59, %v736_v51  ;;  %1650 = vmatmul.msk.f32.gmra.mxu1 %vm429_vm1, %v1067_v60  ;;  %v561_v25 = vadd.f32 %v3025_v63, %v520_v52  ;;  %v3026_v59 = vld [vmem:[#allocation5_spill] sm:$0xff] }
 0x125   : > { %v523_v40 = vadd.f32 %v3027_v61, %v3026_v59 }
 0x126   : > { %v2838_v32 = vadd.f32 %v817_v28, %v777_v9 }
 0x127   : > { %v564_v41 = vadd.f32 %v3031_v43, %v523_v40 }
 0x128   : > { %1272 = vmatmul.f32.gmra.mxu3 %v2694_v2  ;;  %1316 = vmatmul.f32.gmra.mxu2 %v2759_v62  ;;  %v960_v2 = vld [vmem:[%s1791_s24 + $0xd0] sm:$0x3] }
 0x129   : > { %v861_v16 = vpop.f32.mrf.mxu0  ;;  %v738_v27 = vpop.f32.mrf.mxu1  ;;  %v1084_v22 = vrot.slane %v960_v2, 2 }
 0x12a   : > { %v2845_v34 = vadd.f32 %v861_v16, %v681_v38  ;;  %v739_v31 = vadd.f32 %v738_v27, %v558_v4 }
 0x12b   : > { %v785_v57 = vpop.f32.mrf.mxu3  ;;  %v826_v30 = vpop.f32.mrf.mxu2  ;;  %v1085_v28 = vsel %vm1034_vm2, %v1078_v1, %v1084_v22 }
 0x12c   : > { %1658 = vmatmul.msk.f32.gmra.mxu0 %vm429_vm1, %v1067_v60  ;;  %v780_v15 = vadd.f32 %v779_v35, %v739_v31  ;;  %1651 = vmatmul.msk.f32.gmra.mxu1 %vm429_vm1, %v1073_v47  ;;  %v3034_v60 = vld [vmem:[#allocation4_spill] sm:$0xff] }
 0x12d   : > { %v567_v51 = vadd.f32 %v3034_v60, %v526_v36  ;;  %v1380_v60 = vld [vmem:[%s3012_s2] sm:$0x3] }
 0x12e   : > { %v2854_v62 = vadd.f32 %v820_v33, %v780_v15 }
 0x130   : > { %1275 = vmatmul.f32.gmra.mxu3 %v2716_v19  ;;  %1319 = vmatmul.f32.gmra.mxu2 %v2771_v8 }
 0x131   : > { %v864_v56 = vpop.f32.mrf.mxu0  ;;  %v741_v48 = vpop.f32.mrf.mxu1 }
 0x132   : > { %v2861_v49 = vadd.f32 %v864_v56, %v684_v46  ;;  %v742_v7 = vadd.f32 %v741_v48, %v561_v25 }
 0x133   : > { %v788_v20 = vpop.f32.mrf.mxu3  ;;  %v829_v37 = vpop.f32.mrf.mxu2 }
 0x134   : > { %1659 = vmatmul.msk.f32.gmra.mxu0 %vm429_vm1, %v1073_v47  ;;  %v783_v19 = vadd.f32 %v782_v54, %v742_v7  ;;  %1652 = vmatmul.msk.f32.gmra.mxu1 %vm429_vm1, %v1079_v53 }
 0x136   : > { %v2869_v8 = vadd.f32 %v823_v3, %v783_v19 }
 0x138   : > { %1278 = vmatmul.f32.gmra.mxu3 %v3030_v39  ;;  %1661 = vmatmul.msk.f32.vlgmr.msrb.gmra.mxu2 %vm429_vm1, %v1085_v28 }
 0x139   : > { %v867_v0 = vpop.f32.mrf.mxu0  ;;  %v744_v17 = vpop.f32.mrf.mxu1 }
 0x13a   : > { %v868_v44 = vadd.f32 %v867_v0, %v687_v11  ;;  %v745_v35 = vadd.f32 %v744_v17, %v564_v41 }
 0x13b   : > { %v911_v33 = vpop.f32.mrf.mxu3  ;;  %v1135_v23 = vpop.f32.mrf.mxu2 }
 0x13c   : > { %1660 = vmatmul.msk.f32.gmra.mxu0 %vm429_vm1, %v1079_v53  ;;  %v786_v6 = vadd.f32 %v785_v57, %v745_v35  ;;  %1653 = vmatmul.msk.f32.gmra.mxu1 %vm429_vm1, %v1085_v28 }
 0x13e   : > { %v2880_v24 = vadd.f32 %v826_v30, %v786_v6 }
 0x141   : > { %v870_v54 = vpop.f32.mrf.mxu0  ;;  %v747_v3 = vpop.f32.mrf.mxu1 }
 0x142   : > { %v871_v14 = vadd.f32 %v870_v54, %v2777_v12  ;;  %v748_v9 = vadd.f32 %v747_v3, %v567_v51 }
 0x143   : > { %v931_v42 = vpop.f32.mrf.mxu3  ;;  %v1138_v38 = vpop.f32.mrf.mxu2 }
 0x144   : > { %v912_v4 = vadd.f32 %v911_v33, %v871_v14  ;;  %v789_v16 = vadd.f32 %v788_v20, %v748_v9  ;;  %v2932_v14 = vperm.slane %v1380_v60, 0 }
 0x146   : > { %v2884_v27 = vadd.f32 %v829_v37, %v789_v16 }
 0x149   : > { %v1176_v47 = vpop.f32.mrf.mxu0  ;;  %v890_v31 = vpop.f32.mrf.mxu1 }
 0x14a   : > { %v891_v57 = vadd.f32 %v890_v31, %v2788_v10 }
 0x14b   : > { %v934_v52 = vpop.f32.mrf.mxu3  ;;  %v2887_v30 = vpop.f32.mrf.mxu2 }
 0x14c   : > { %v932_v15 = vadd.f32 %v931_v42, %v891_v57 }
 0x151   : > { %v1179_v1 = vpop.f32.mrf.mxu0  ;;  %v893_v2 = vpop.f32.mrf.mxu1 }
 0x152   : > { %v894_v46 = vadd.f32 %v893_v2, %v2802_v58  ;;  %v1180_v16 = vadd.f32 %v1179_v1, %v1138_v38 }
 0x153   : > { %v937_v12 = vpop.f32.mrf.mxu3  ;;  %v2890_v63 = vpop.f32.mrf.mxu2 }
 0x154   : > { %v2892_v25 = vadd.f32 %v934_v52, %v894_v46  ;;  %v2942_v52 = vperm.slane %v1380_v60, 1 }
 0x159   : > { %v1182_v56 = vpop.f32.mrf.mxu0  ;;  %v896_v48 = vpop.f32.mrf.mxu1 }
 0x15a   : > { %v897_v53 = vadd.f32 %v896_v48, %v2816_v26  ;;  %v1183_v1 = vadd.f32 %v1182_v56, %v2887_v30 }
 0x15b   : > { %v940_v22 = vpop.f32.mrf.mxu3  ;;  %v2895_v7 = vpop.f32.mrf.mxu2 }
 0x15c   : > { %v2897_v10 = vadd.f32 %v937_v12, %v897_v53 }
 0x161   : > { %v2899_v20 = vpop.f32.mrf.mxu0  ;;  %v899_v37 = vpop.f32.mrf.mxu1 }
 0x162   : > { %v900_v59 = vadd.f32 %v899_v37, %v2830_v5  ;;  %v1186_v30 = vadd.f32 %v2899_v20, %v2890_v63 }
 0x163   : > { %v943_v58 = vpop.f32.mrf.mxu3  ;;  %v2902_v61 = vpop.f32.mrf.mxu2 }
 0x164   : > { %v2904_v40 = vadd.f32 %v940_v22, %v900_v59 }
 0x169   : > { %v2906_v19 = vpop.f32.mrf.mxu0  ;;  %v902_v28 = vpop.f32.mrf.mxu1 }
 0x16a   : > { %v903_v26 = vadd.f32 %v902_v28, %v2845_v34  ;;  %v1189_v63 = vadd.f32 %v2906_v19, %v2895_v7 }
 0x16b   : > { %v946_v50 = vpop.f32.mrf.mxu3  ;;  %v2909_v13 = vpop.f32.mrf.mxu2 }
 0x16c   : > { %v2911_v11 = vadd.f32 %v943_v58, %v903_v26 }
 0x171   : > { %v2913_v39 = vpop.f32.mrf.mxu0  ;;  %v905_v43 = vpop.f32.mrf.mxu1 }
 0x172   : > { %v906_v5 = vadd.f32 %v905_v43, %v2861_v49  ;;  %v1177_v49 = vadd.f32 %v1176_v47, %v1135_v23  ;;  %v1192_v7 = vadd.f32 %v2913_v39, %v2902_v61 }
 0x173   : > { %v949_v41 = vpop.f32.mrf.mxu3  ;;  %v2916_v0 = vpop.f32.mrf.mxu2 }
 0x174   : > { %v2918_v17 = vadd.f32 %v946_v50, %v906_v5 }
 0x179   : > { %v2920_v35 = vpop.f32.mrf.mxu0  ;;  %v908_v33 = vpop.f32.mrf.mxu1 }
 0x17a   : > { %v909_v34 = vadd.f32 %v908_v33, %v868_v44  ;;  %v1195_v61 = vadd.f32 %v2920_v35, %v2909_v13 }
 0x17b   : > { %v952_v29 = vpop.f32.mrf.mxu3  ;;  %v1299_v36 = vpop.f32.mrf.mxu2 }
 0x17c   : > { %v2922_v21 = vadd.f32 %v952_v29, %v912_v4  ;;  %v2924_v6 = vadd.f32 %v949_v41, %v909_v34 }
 0x181   : > { %v2929_v51 = vpop.f32.mrf.mxu0  ;;  %v1217_v54 = vpop.f32.mrf.mxu1 }
 0x182   : > { %v1218_v3 = vadd.f32 %v1217_v54, %v1177_v49  ;;  %v1198_v13 = vadd.f32 %v2929_v51, %v2916_v0 }
 0x183   : > { %v1258_v9 = vpop.f32.mrf.mxu3  ;;  %v1302_v44 = vpop.f32.mrf.mxu2 }
 0x184   : > { %v1364_v42 = vadd.f32 %v1218_v3, %v2796_v55  ;;  %v1300_v23 = vadd.f32 %v1299_v36, %v1258_v9 }
 0x186   : > { %v1386_v4 = vadd.f32 %v2932_v14, %v1364_v42 }
 0x188   : > { %1402 = vst [vmem:[%s2938_s6] sm:$0xff] %v1386_v4 }
 0x189   : > { %v1340_v47 = vpop.f32.mrf.mxu0  ;;  %v1220_v31 = vpop.f32.mrf.mxu1 }
 0x18a   : > { %v1341_v57 = vadd.f32 %v1340_v47, %v1300_v23  ;;  %v1221_v2 = vadd.f32 %v1220_v31, %v1180_v16 }
 0x18b   : > { %v1261_v55 = vpop.f32.mrf.mxu3  ;;  %v1305_v12 = vpop.f32.mrf.mxu2 }
 0x18c   : > { %v1365_v46 = vadd.f32 %v1341_v57, %v932_v15  ;;  %v1366_v48 = vadd.f32 %v1221_v2, %v2810_v18  ;;  %v1303_v38 = vadd.f32 %v1302_v44, %v1261_v55 }
 0x18e   : > { %v1387_v53 = vadd.f32 %v2942_v52, %v1365_v46  ;;  %v1388_v22 = vadd.f32 %v2932_v14, %v1366_v48 }
 0x190   : > { %1404 = vst.msk [vmem:[%s2938_s6 + $0x8] sm:$0xff] %vm1403_vm3, %v1387_v53 }
 0x191   : > { %1405 = vst [vmem:[%s2938_s6 + $0x10] sm:$0xff] %v1388_v22  ;;  %v1343_v37 = vpop.f32.mrf.mxu0  ;;  %v1223_v59 = vpop.f32.mrf.mxu1 }
 0x192   : > { %v1344_v58 = vadd.f32 %v1343_v37, %v1303_v38  ;;  %v1224_v15 = vadd.f32 %v1223_v59, %v1183_v1 }
 0x193   : > { %v1264_v28 = vpop.f32.mrf.mxu3  ;;  %v1308_v26 = vpop.f32.mrf.mxu2 }
 0x194   : > { %v1367_v18 = vadd.f32 %v1344_v58, %v2892_v25  ;;  %v1368_v50 = vadd.f32 %v1224_v15, %v2824_v45  ;;  %v1306_v41 = vadd.f32 %v1305_v12, %v1264_v28 }
 0x196   : > { %v1389_v43 = vadd.f32 %v2942_v52, %v1367_v18  ;;  %v1390_v5 = vadd.f32 %v2932_v14, %v1368_v50 }
 0x198   : > { %1406 = vst.msk [vmem:[%s2938_s6 + $0x18] sm:$0xff] %vm1403_vm3, %v1389_v43 }
 0x199   : > { %1407 = vst [vmem:[%s2938_s6 + $0x20] sm:$0xff] %v1390_v5  ;;  %v1346_v56 = vpop.f32.mrf.mxu0  ;;  %v1226_v33 = vpop.f32.mrf.mxu1 }
 0x19a   : > { %v1347_v34 = vadd.f32 %v1346_v56, %v1306_v41  ;;  %v1227_v25 = vadd.f32 %v1226_v33, %v1186_v30 }
 0x19b   : > { %v1267_v29 = vpop.f32.mrf.mxu3  ;;  %v1311_v36 = vpop.f32.mrf.mxu2 }
 0x19c   : > { %v1369_v45 = vadd.f32 %v1347_v34, %v2897_v10  ;;  %v1370_v60 = vadd.f32 %v1227_v25, %v2838_v32  ;;  %v1309_v3 = vadd.f32 %v1308_v26, %v1267_v29 }
 0x19e   : > { %v1391_v49 = vadd.f32 %v2942_v52, %v1369_v45  ;;  %v1392_v54 = vadd.f32 %v2932_v14, %v1370_v60 }
 0x1a0   : > { %1408 = vst.msk [vmem:[%s2938_s6 + $0x28] sm:$0xff] %vm1403_vm3, %v1391_v49 }
 0x1a1   : > { %1409 = vst [vmem:[%s2938_s6 + $0x30] sm:$0xff] %v1392_v54  ;;  %v1349_v20 = vpop.f32.mrf.mxu0  ;;  %v1229_v9 = vpop.f32.mrf.mxu1 }
 0x1a2   : > { %v1350_v44 = vadd.f32 %v1349_v20, %v1309_v3  ;;  %v1230_v10 = vadd.f32 %v1229_v9, %v1189_v63 }
 0x1a3   : > { %v1270_v42 = vpop.f32.mrf.mxu3  ;;  %v1314_v4 = vpop.f32.mrf.mxu2 }
 0x1a4   : > { %v1371_v32 = vadd.f32 %v1350_v44, %v2904_v40  ;;  %v1372_v23 = vadd.f32 %v1230_v10, %v2854_v62  ;;  %v1312_v31 = vadd.f32 %v1311_v36, %v1270_v42 }
 0x1a6   : > { %v1393_v16 = vadd.f32 %v2942_v52, %v1371_v32  ;;  %v1394_v47 = vadd.f32 %v2932_v14, %v1372_v23 }
 0x1a8   : > { %1410 = vst.msk [vmem:[%s2938_s6 + $0x38] sm:$0xff] %vm1403_vm3, %v1393_v16 }
 0x1a9   : > { %1411 = vst [vmem:[%s2938_s6 + $0x40] sm:$0xff] %v1394_v47  ;;  %v1352_v19 = vpop.f32.mrf.mxu0  ;;  %v1232_v57 = vpop.f32.mrf.mxu1 }
 0x1aa   : > { %v1353_v2 = vadd.f32 %v1352_v19, %v1312_v31  ;;  %v1233_v40 = vadd.f32 %v1232_v57, %v1192_v7 }
 0x1ab   : > { %v1273_v55 = vpop.f32.mrf.mxu3  ;;  %v1317_v46 = vpop.f32.mrf.mxu2 }
 0x1ac   : > { %v1373_v62 = vadd.f32 %v1353_v2, %v2911_v11  ;;  %v1374_v12 = vadd.f32 %v1233_v40, %v2869_v8  ;;  %v1315_v22 = vadd.f32 %v1314_v4, %v1273_v55 }
 0x1ae   : > { %v1395_v48 = vadd.f32 %v2942_v52, %v1373_v62  ;;  %v1396_v53 = vadd.f32 %v2932_v14, %v1374_v12 }
 0x1b0   : > { %1412 = vst.msk [vmem:[%s2938_s6 + $0x48] sm:$0xff] %vm1403_vm3, %v1395_v48 }
 0x1b1   : > { %1413 = vst [vmem:[%s2938_s6 + $0x50] sm:$0xff] %v1396_v53  ;;  %v1355_v39 = vpop.f32.mrf.mxu0  ;;  %v1235_v38 = vpop.f32.mrf.mxu1 }
 0x1b2   : > { %v1356_v1 = vadd.f32 %v1355_v39, %v1315_v22  ;;  %v1236_v11 = vadd.f32 %v1235_v38, %v1195_v61 }
 0x1b3   : > { %v1276_v37 = vpop.f32.mrf.mxu3  ;;  %v1320_v59 = vpop.f32.mrf.mxu2 }
 0x1b4   : > { %v1375_v8 = vadd.f32 %v1356_v1, %v2918_v17  ;;  %v1376_v58 = vadd.f32 %v1236_v11, %v2880_v24  ;;  %v1318_v18 = vadd.f32 %v1317_v46, %v1276_v37 }
 0x1b6   : > { %v1397_v15 = vadd.f32 %v2942_v52, %v1375_v8  ;;  %v1398_v28 = vadd.f32 %v2932_v14, %v1376_v58 }
 0x1b8   : > { %1414 = vst.msk [vmem:[%s2938_s6 + $0x58] sm:$0xff] %vm1403_vm3, %v1397_v15 }
 0x1b9   : > { %1415 = vst [vmem:[%s2938_s6 + $0x60] sm:$0xff] %v1398_v28  ;;  %v1358_v35 = vpop.f32.mrf.mxu0  ;;  %v1238_v26 = vpop.f32.mrf.mxu1 }
 0x1ba   : > { %v1359_v17 = vadd.f32 %v1358_v35, %v1318_v18  ;;  %v1239_v50 = vadd.f32 %v1238_v26, %v1198_v13 }
 0x1bb   : > { %v1279_v43 = vpop.f32.mrf.mxu3  ;;  %v1361_v41 = vpop.f32.mrf.mxu2 }
 0x1bc   : > { %v1377_v24 = vadd.f32 %v1359_v17, %v2924_v6  ;;  %v1321_v5 = vadd.f32 %v1320_v59, %v1279_v43  ;;  %v1378_v30 = vadd.f32 %v1239_v50, %v2884_v27 }
 0x1be   : > { %v1399_v56 = vadd.f32 %v2942_v52, %v1377_v24  ;;  %v1362_v33 = vadd.f32 %v1361_v41, %v1321_v5  ;;  %v1400_v34 = vadd.f32 %v2932_v14, %v1378_v30 }
 0x1c0   : > { %1416 = vst.msk [vmem:[%s2938_s6 + $0x68] sm:$0xff] %vm1403_vm3, %v1399_v56  ;;  %v1379_v0 = vadd.f32 %v1362_v33, %v2922_v21 }
 0x1c1   : > { %1417 = vst [vmem:[%s2938_s6 + $0x70] sm:$0xff] %v1400_v34 }
 0x1c2   : > { %v1401_v51 = vadd.f32 %v2942_v52, %v1379_v0 }
 0x1c4   : > { %1418 = vst.msk [vmem:[%s2938_s6 + $0x78] sm:$0xff] %vm1403_vm3, %v1401_v51 }
 0x1c5 PF: > { %s13_s12 = sadd.s32 1, %s1707_s12  }
 0x1c6   : > { %p10_p4 = scmp.ge.s32.totalorder %s13_s12, 4  }
 0x1c8   :  { %12 = sbr.rel (!%p10_p4) target bundleno = 1 (0x1), region = 64 }

</bundles_post_ra>
